<compile_context>
chip_gen: v5e
topology: v5e:2x2
jax: 0.10.0
libtpu: 0.0.40
codegen_flags: <defaults>
</compile_context>

<pallas_src>
import functools

import jax
import jax.numpy as jnp
from jax import lax
from jax.experimental import pallas as pl
from jax.experimental.pallas import tpu as pltpu

_EPS = 1e-5
_SLOPE = 0.2
_TARGET_ROWS = 2048                     # target output rows (M) per conv block
_VMEM_LIMIT = 48 * 1024 * 1024          # per-block footprints stay ~<20 MiB

# conv configs matching the nn.Sequential: (Cout, Cin, K), stride, pad
_CONV_CFGS = [(64, 3, 4), (64, 64, 3), (128, 64, 4), (256, 128, 4), (1, 256, 4)]
_STRIDES = [2, 1, 2, 2, 1]
_PADS = [1, 1, 1, 1, 0]
_BN_CHANNELS = [64, 64, 128, 256]


# ----------------------------- Pallas kernels ------------------------------ #

def _conv_group_kernel(x_ref, w_ref, o_ref, st_ref, acc_ref, *,
                       offsets, ho, wo, chunk):
    """K-packed direct convolution for one batch block.

    x_ref  : (bn, Hq, Wq, Kg)    bf16  staged (channel-merged, padded) input
    w_ref  : (G, Kg, Cout)       bf16  per-group weights
    o_ref  : (bn*ho*wo, Cout)    bf16  raw conv output (pre-BatchNorm)
    st_ref : (1, 2, Cout)        f32   per-block [sum, sum_of_squares]
    acc_ref: (bn*ho*wo, Cout)    f32   VMEM scratch accumulator
    """
    bn = x_ref.shape[0]
    kg = x_ref.shape[3]
    cout = w_ref.shape[2]
    m = bn * ho * wo

    for g, (dh, dw) in enumerate(offsets):          # static, fully unrolled
        xt = x_ref[:, dh:dh + ho, dw:dw + wo, :].reshape(m, kg)
        part = jnp.dot(xt, w_ref[g], preferred_element_type=jnp.float32)
        if g == 0:
            acc_ref[...] = part
        else:
            acc_ref[...] += part

    # Epilogue: bf16 writeback + exact f32 BN statistics, in row strips so no
    # full-size acc*acc temporary is materialized.
    s1 = jnp.zeros((1, cout), jnp.float32)
    s2 = jnp.zeros((1, cout), jnp.float32)
    for i in range(m // chunk):
        a = acc_ref[i * chunk:(i + 1) * chunk, :]
        o_ref[i * chunk:(i + 1) * chunk, :] = a.astype(o_ref.dtype)
        s1 = s1 + jnp.sum(a, axis=0, keepdims=True)
        s2 = s2 + jnp.sum(a * a, axis=0, keepdims=True)
    st_ref[...] = jnp.concatenate([s1, s2], axis=0)[None]


def _head_kernel(x_ref, sc_ref, sh_ref, w_ref, o_ref, *, slope):
    """Final Conv2d(256, 1, 4, valid) as a VPU multiply-reduce with the last
    BatchNorm affine + LeakyReLU fused in.

    x_ref : (bn, 4096) bf16 flattened raw conv-3 output (h, w, c order)
    sc/sh : (1, 4096)  f32  BN scale / shift (tiled per spatial position)
    w_ref : (1, 4096)  f32  final conv weight, flattened (h, w, c)
    o_ref : (bn, 1)    f32
    """
    y = x_ref[...].astype(jnp.float32) * sc_ref[...] + sh_ref[...]
    y = jnp.where(y >= 0, y, slope * y)
    o_ref[...] = jnp.sum(y * w_ref[...], axis=1, keepdims=True)


# ------------------------------- block sizing ------------------------------ #

def _largest_divisor_leq(n, cap):
    cap = max(1, min(n, cap))
    for d in range(cap, 0, -1):
        if n % d == 0:
            return d
    return 1


def _pick_batch_block(n, rows_per_sample):
    cap = max(1, _TARGET_ROWS // rows_per_sample)
    if n > 1:
        # Keep at least 2 grid steps so the "parallel" axis can shard across
        # the two v7x TensorCores and the pipeline has something to overlap.
        cap = min(cap, max(1, n // 2))
    # TODO(synk): prime/odd batch sizes fall back to 1-sample blocks; a cdiv
    # grid with a masked stats tail would be needed to avoid that without
    # perturbing the BatchNorm statistics.
    return _largest_divisor_leq(n, cap)


def _head_batch_block(n):
    if n <= 1024:
        return n
    for d in range(1024, 7, -1):                    # keep stores 8-aligned
        if d % 8 == 0 and n % d == 0:
            return d
    return n


# ------------------------------ layer staging ------------------------------ #

def _pad_hw(x, pad):
    if pad:
        x = jnp.pad(x, ((0, 0), (pad, pad), (pad, pad), (0, 0)))
    return x


def _stage_layer0(act, w):
    """Cin=3 first layer: full 4x4 patch packing -> one (M,48)@(48,64) matmul."""
    cout, cin, kh, kw = w.shape
    xp = _pad_hw(act.astype(jnp.bfloat16), 1)
    n, hp, wp, c = xp.shape
    ho = (hp - kh) // 2 + 1
    wo = (wp - kw) // 2 + 1
    slabs = [xp[:, dh:dh + 2 * ho:2, dw:dw + 2 * wo:2, :]
             for dh in range(kh) for dw in range(kw)]
    x_st = jnp.concatenate(slabs, axis=-1)                  # (n, ho, wo, 48)
    w_g = jnp.transpose(w, (2, 3, 1, 0)).reshape(1, kh * kw * cin, cout)
    return x_st, w_g.astype(jnp.bfloat16), ((0, 0),)


def _stage_stride2(act, w, pad):
    """Stride-2 4x4 conv: merge 2x2 input pixels into channels so the 16 taps
    collapse into 4 groups, each a K = 4*Cin matmul on contiguous channels."""
    cout, cin, kh, kw = w.shape
    xp = _pad_hw(act.astype(jnp.bfloat16), pad)
    n, hp, wp, c = xp.shape
    if hp % 2 or wp % 2:                                    # keep pair merge valid
        xp = jnp.pad(xp, ((0, 0), (0, hp % 2), (0, wp % 2), (0, 0)))
        n, hp, wp, c = xp.shape
    hq, wq = hp // 2, wp // 2
    xm = xp.reshape(n, hq, 2, wq, 2, c)
    xm = jnp.transpose(xm, (0, 1, 3, 2, 4, 5)).reshape(n, hq, wq, 4 * c)
    groups, offsets = [], []
    for hoff in (0, 1):
        for woff in (0, 1):
            wg = w[:, :, 2 * hoff:2 * hoff + 2, 2 * woff:2 * woff + 2]
            wg = jnp.transpose(wg, (2, 3, 1, 0)).reshape(4 * cin, cout)
            groups.append(wg)
            offsets.append((hoff, woff))
    w_g = jnp.stack(groups, axis=0).astype(jnp.bfloat16)    # (4, 4*cin, cout)
    return xm, w_g, tuple(offsets)


def _stage_stride1(act, w, pad):
    """Stride-1 3x3 conv: 9 taps, K = Cin each (taps overlap, no channel merge)."""
    cout, cin, kh, kw = w.shape
    xp = _pad_hw(act.astype(jnp.bfloat16), pad)
    groups, offsets = [], []
    for dh in range(kh):
        for dw in range(kw):
            groups.append(jnp.transpose(w[:, :, dh, dw]))   # (cin, cout)
            offsets.append((dh, dw))
    w_g = jnp.stack(groups, axis=0).astype(jnp.bfloat16)    # (9, cin, cout)
    return xp, w_g, tuple(offsets)


# ------------------------------ call wrappers ------------------------------ #

def _conv_call(x_st, w_g, offsets, ho, wo, bn_blk):
    n, hq, wq, cm = x_st.shape
    g, kg, cout = w_g.shape
    nblk = n // bn_blk
    m_blk = bn_blk * ho * wo
    m_tot = n * ho * wo
    chunk = _largest_divisor_leq(m_blk, 512)

    kern = functools.partial(_conv_group_kernel, offsets=offsets,
                             ho=ho, wo=wo, chunk=chunk)
    return pl.pallas_call(
        kern,
        out_shape=(jax.ShapeDtypeStruct((m_tot, cout), jnp.bfloat16),
                   jax.ShapeDtypeStruct((nblk, 2, cout), jnp.float32)),
        grid=(nblk,),
        in_specs=[
            pl.BlockSpec((bn_blk, hq, wq, cm), lambda b: (b, 0, 0, 0)),
            pl.BlockSpec((g, kg, cout), lambda b: (0, 0, 0)),
        ],
        out_specs=(
            pl.BlockSpec((m_blk, cout), lambda b: (b, 0)),
            pl.BlockSpec((1, 2, cout), lambda b: (b, 0, 0)),
        ),
        scratch_shapes=[pltpu.VMEM((m_blk, cout), jnp.float32)],
        compiler_params=pltpu.CompilerParams(
            dimension_semantics=("parallel",),
            vmem_limit_bytes=_VMEM_LIMIT),
    )(x_st, w_g)


def _head_call(x_flat, sc, sh, w_flat, bn_blk):
    n, d = x_flat.shape
    nblk = n // bn_blk
    return pl.pallas_call(
        functools.partial(_head_kernel, slope=_SLOPE),
        out_shape=jax.ShapeDtypeStruct((n, 1), jnp.float32),
        grid=(nblk,),
        in_specs=[
            pl.BlockSpec((bn_blk, d), lambda b: (b, 0)),
            pl.BlockSpec((1, d), lambda b: (0, 0)),
            pl.BlockSpec((1, d), lambda b: (0, 0)),
            pl.BlockSpec((1, d), lambda b: (0, 0)),
        ],
        out_specs=pl.BlockSpec((bn_blk, 1), lambda b: (b, 0)),
        compiler_params=pltpu.CompilerParams(
            dimension_semantics=("parallel",),
            vmem_limit_bytes=_VMEM_LIMIT),
    )(x_flat, sc, sh, w_flat)


# -------------------------------- forward ---------------------------------- #

def init_params(key):
    params = {"conv": [], "gamma": [], "beta": []}
    for co, ci, k in _CONV_CFGS:
        key, sub = jax.random.split(key)
        fan_in = ci * k * k
        w = jax.random.normal(sub, (co, ci, k, k), jnp.float32) / jnp.sqrt(
            jnp.float32(fan_in))
        params["conv"].append(w)
    for c in _BN_CHANNELS:
        # PyTorch BatchNorm2d init: weight=1, bias=0.
        params["gamma"].append(jnp.ones((c,), jnp.float32))
        params["beta"].append(jnp.zeros((c,), jnp.float32))
    return params


def discriminator_32_forward(x_nchw, params):
    # All convs are bias=False in the reference module.  BatchNorm is
    # training-mode (batch statistics, biased variance), matching nn.Module
    # default behavior when called in train().
    x = jnp.transpose(x_nchw, (0, 2, 3, 1)).astype(jnp.float32)  # NCHW -> NHWC
    n = x.shape[0]

    act = x
    out2d = None
    scale = shift = None
    ho = wo = cout = None
    for li in range(4):
        w = params["conv"][li]                       # (Cout, Cin, KH, KW)
        cout, cin, kh, kw = w.shape
        s, p = _STRIDES[li], _PADS[li]
        hin, win = act.shape[1], act.shape[2]
        ho = (hin + 2 * p - kh) // s + 1
        wo = (win + 2 * p - kw) // s + 1

        if li == 0:
            x_st, w_g, offsets = _stage_layer0(act, w)
        elif s == 2:
            x_st, w_g, offsets = _stage_stride2(act, w, p)
        else:
            x_st, w_g, offsets = _stage_stride1(act, w, p)

        bn_blk = _pick_batch_block(n, ho * wo)
        out2d, stats = _conv_call(x_st, w_g, offsets, ho, wo, bn_blk)

        # BatchNorm2d, training mode: batch statistics, biased variance.
        ssum = jnp.sum(stats, axis=0)                # (2, Cout)
        cnt = jnp.float32(n * ho * wo)
        mean = ssum[0] / cnt
        var = jnp.maximum(ssum[1] / cnt - mean * mean, 0.0)
        scale = params["gamma"][li] * lax.rsqrt(var + _EPS)
        shift = params["beta"][li] - mean * scale

        if li < 3:
            # Apply BN affine + LeakyReLU in f32; XLA fuses this elementwise op
            # into the next layer's pad / channel-merge staging (single pass).
            y = out2d.reshape(n, ho, wo, cout).astype(jnp.float32) * scale + shift
            act = jnp.where(y >= 0, y, _SLOPE * y)
        # For li == 3 the affine + LeakyReLU is fused into the head kernel.

    # Final Conv2d(256, 1, 4, stride=1, pad=0, bias=False): VPU reduce kernel.
    w5 = params["conv"][4]                                   # (1, 256, 4, 4)
    assert (ho, wo) == (w5.shape[2], w5.shape[3]), "expects 4x4 feature map"
    d = ho * wo * cout
    x_flat = out2d.reshape(n, d)                             # (n, 4096) bf16
    sc = jnp.tile(scale, ho * wo).reshape(1, d).astype(jnp.float32)
    sh = jnp.tile(shift, ho * wo).reshape(1, d).astype(jnp.float32)
    w_flat = jnp.transpose(w5, (0, 2, 3, 1)).reshape(1, d).astype(jnp.float32)
    logits = _head_call(x_flat, sc, sh, w_flat, _head_batch_block(n))
    return logits.reshape(-1)                                # == .view(-1)


if __name__ == "__main__":
    key = jax.random.PRNGKey(0)
    pkey, xkey = jax.random.split(key)
    params = init_params(pkey)
    # Discriminator_32 expects 3-channel 32x32 images (the final 4x4 valid
    # conv requires a 4x4 feature map).
    x = jax.random.normal(xkey, (2, 3, 32, 32), jnp.float32)

    fwd = jax.jit(discriminator_32_forward)
    y = fwd(x, params)
    jax.block_until_ready(y)
    assert y.shape == (2,), y.shape
    assert bool(jnp.all(jnp.isfinite(y)))
    print("KERNEL_OK")
</pallas_src>

<mosaic_0001>
module attributes {stable_mosaic.version = 11 : i64} {
  func.func @_conv_group_kernel(%arg0: i32, %arg1: memref<1x16x16x48xbf16, #tpu.memory_space<vmem>>, %arg2: memref<1x48x64xbf16, #tpu.memory_space<vmem>>, %arg3: memref<256x64xbf16, #tpu.memory_space<vmem>>, %arg4: memref<1x2x64xf32, #tpu.memory_space<vmem>>, %arg5: memref<256x64xf32, #tpu.memory_space<vmem>>) attributes {dimension_semantics = [#tpu.dimension_semantics<parallel>], iteration_bounds = array<i64: 2>, scalar_prefetch = 0 : i64, scratch_operands = 1 : i64, tpu.core_type = #tpu.core_type<tc>, window_params = [{transform_indices = @transform_0, window_bounds = array<i64: 1, 16, 16, 48>}, {pipeline_mode = #tpu.pipeline_mode<synchronous>, transform_indices = @transform_1, window_bounds = array<i64: 1, 48, 64>}, {transform_indices = @transform_2, window_bounds = array<i64: 256, 64>}, {transform_indices = @transform_3, window_bounds = array<i64: 1, 2, 64>}]} {
    %c0 = arith.constant 0 : index
    %c0_0 = arith.constant 0 : index
    %c0_1 = arith.constant 0 : index
    %c0_2 = arith.constant 0 : index
    %0 = vector.load %arg1[%c0, %c0_0, %c0_1, %c0_2] : memref<1x16x16x48xbf16, #tpu.memory_space<vmem>>, vector<1x16x16x48xbf16>
    %1 = vector.shape_cast %0 : vector<1x16x16x48xbf16> to vector<256x48xbf16>
    %c0_3 = arith.constant 0 : index
    %c0_4 = arith.constant 0 : index
    %c0_5 = arith.constant 0 : index
    %2 = vector.load %arg2[%c0_3, %c0_4, %c0_5] : memref<1x48x64xbf16, #tpu.memory_space<vmem>>, vector<1x48x64xbf16>
    %3 = vector.shape_cast %2 : vector<1x48x64xbf16> to vector<48x64xbf16>
    %cst = arith.constant dense<0.000000e+00> : vector<256x64xf32>
    %4 = tpu.matmul %1, %3, %cst {dimension_numbers = #tpu.dot_dimension_numbers<[1], [0], [0], [1], [0, 0, 1, 1], [], []>} : vector<256x48xbf16>, vector<48x64xbf16>, vector<256x64xf32> -> vector<256x64xf32>
    %c0_6 = arith.constant 0 : index
    %c0_7 = arith.constant 0 : index
    %5 = vector.load %arg5[%c0_6, %c0_7] : memref<256x64xf32, #tpu.memory_space<vmem>>, vector<256x64xf32>
    tpu.vector_store %arg5[%c0_6, %c0_7], %4 {strides = array<i32>} : memref<256x64xf32, #tpu.memory_space<vmem>>, vector<256x64xf32>,
    %cst_8 = arith.constant 0.000000e+00 : f32
    %6 = vector.broadcast %cst_8 : f32 to vector<1x64xf32>
    %cst_9 = arith.constant 0.000000e+00 : f32
    %7 = vector.broadcast %cst_9 : f32 to vector<1x64xf32>
    %c0_10 = arith.constant 0 : index
    %c0_11 = arith.constant 0 : index
    %8 = vector.load %arg5[%c0_10, %c0_11] : memref<256x64xf32, #tpu.memory_space<vmem>>, vector<256x64xf32>
    %9 = arith.truncf %8 : vector<256x64xf32> to vector<256x64xbf16>
    %c0_12 = arith.constant 0 : index
    %c0_13 = arith.constant 0 : index
    %10 = vector.load %arg3[%c0_12, %c0_13] : memref<256x64xbf16, #tpu.memory_space<vmem>>, vector<256x64xbf16>
    tpu.vector_store %arg3[%c0_12, %c0_13], %9 {strides = array<i32>} : memref<256x64xbf16, #tpu.memory_space<vmem>>, vector<256x64xbf16>,
    %cst_14 = arith.constant dense<0.000000e+00> : vector<64xf32>
    %11 = vector.multi_reduction <add>, %8, %cst_14 [0] : vector<256x64xf32> to vector<64xf32>
    %12 = vector.shape_cast %11 : vector<64xf32> to vector<1x64xf32>
    %13 = arith.addf %6, %12 : vector<1x64xf32>
    %14 = arith.mulf %8, %8 : vector<256x64xf32>
    %cst_15 = arith.constant dense<0.000000e+00> : vector<64xf32>
    %15 = vector.multi_reduction <add>, %14, %cst_15 [0] : vector<256x64xf32> to vector<64xf32>
    %16 = vector.shape_cast %15 : vector<64xf32> to vector<1x64xf32>
    %17 = arith.addf %7, %16 : vector<1x64xf32>
    %18 = tpu.concatenate %13, %17 in 0 : vector<1x64xf32>, vector<1x64xf32> -> vector<2x64xf32>
    %19 = vector.shape_cast %18 : vector<2x64xf32> to vector<1x2x64xf32>
    %c0_16 = arith.constant 0 : index
    %c0_17 = arith.constant 0 : index
    %c0_18 = arith.constant 0 : index
    %20 = vector.load %arg4[%c0_16, %c0_17, %c0_18] : memref<1x2x64xf32, #tpu.memory_space<vmem>>, vector<1x2x64xf32>
    tpu.vector_store %arg4[%c0_16, %c0_17, %c0_18], %19 {strides = array<i32>} : memref<1x2x64xf32, #tpu.memory_space<vmem>>, vector<1x2x64xf32>,
    return
  }
  func.func @transform_0(%arg0: i32) -> (i32, i32, i32, i32) {
    %c0_i32 = arith.constant 0 : i32
    %c0_i32_0 = arith.constant 0 : i32
    %c0_i32_1 = arith.constant 0 : i32
    %c0_i32_2 = arith.constant 0 : i32
    return %arg0, %c0_i32, %c0_i32_0, %c0_i32_1 : i32, i32, i32, i32
  }
  func.func @transform_1(%arg0: i32) -> (i32, i32, i32) {
    %c0_i32 = arith.constant 0 : i32
    %c0_i32_0 = arith.constant 0 : i32
    %c0_i32_1 = arith.constant 0 : i32
    %c0_i32_2 = arith.constant 0 : i32
    return %c0_i32, %c0_i32_0, %c0_i32_1 : i32, i32, i32
  }
  func.func @transform_2(%arg0: i32) -> (i32, i32) {
    %c0_i32 = arith.constant 0 : i32
    %c0_i32_0 = arith.constant 0 : i32
    return %arg0, %c0_i32 : i32, i32
  }
  func.func @transform_3(%arg0: i32) -> (i32, i32, i32) {
    %c0_i32 = arith.constant 0 : i32
    %c0_i32_0 = arith.constant 0 : i32
    %c0_i32_1 = arith.constant 0 : i32
    return %arg0, %c0_i32, %c0_i32_0 : i32, i32, i32
  }
}

module attributes {stable_mosaic.version = 11 : i64} {
  func.func @_conv_group_kernel(%arg0: i32, %arg1: memref<1x18x18x64xbf16, #tpu.memory_space<vmem>>, %arg2: memref<9x64x64xbf16, #tpu.memory_space<vmem>>, %arg3: memref<256x64xbf16, #tpu.memory_space<vmem>>, %arg4: memref<1x2x64xf32, #tpu.memory_space<vmem>>, %arg5: memref<256x64xf32, #tpu.memory_space<vmem>>) attributes {dimension_semantics = [#tpu.dimension_semantics<parallel>], iteration_bounds = array<i64: 2>, scalar_prefetch = 0 : i64, scratch_operands = 1 : i64, tpu.core_type = #tpu.core_type<tc>, window_params = [{transform_indices = @transform_0, window_bounds = array<i64: 1, 18, 18, 64>}, {pipeline_mode = #tpu.pipeline_mode<synchronous>, transform_indices = @transform_1, window_bounds = array<i64: 9, 64, 64>}, {transform_indices = @transform_2, window_bounds = array<i64: 256, 64>}, {transform_indices = @transform_3, window_bounds = array<i64: 1, 2, 64>}]} {
    %c0 = arith.constant 0 : index
    %c0_0 = arith.constant 0 : index
    %c0_1 = arith.constant 0 : index
    %c0_2 = arith.constant 0 : index
    %0 = vector.load %arg1[%c0, %c0_0, %c0_1, %c0_2] : memref<1x18x18x64xbf16, #tpu.memory_space<vmem>>, vector<1x16x16x64xbf16>
    %1 = vector.shape_cast %0 : vector<1x16x16x64xbf16> to vector<256x64xbf16>
    %c0_3 = arith.constant 0 : index
    %c0_4 = arith.constant 0 : index
    %c0_5 = arith.constant 0 : index
    %2 = vector.load %arg2[%c0_3, %c0_4, %c0_5] : memref<9x64x64xbf16, #tpu.memory_space<vmem>>, vector<1x64x64xbf16>
    %3 = vector.shape_cast %2 : vector<1x64x64xbf16> to vector<64x64xbf16>
    %cst = arith.constant dense<0.000000e+00> : vector<256x64xf32>
    %4 = tpu.matmul %1, %3, %cst {dimension_numbers = #tpu.dot_dimension_numbers<[1], [0], [0], [1], [0, 0, 1, 1], [], []>} : vector<256x64xbf16>, vector<64x64xbf16>, vector<256x64xf32> -> vector<256x64xf32>
    %c0_6 = arith.constant 0 : index
    %c0_7 = arith.constant 0 : index
    %5 = vector.load %arg5[%c0_6, %c0_7] : memref<256x64xf32, #tpu.memory_space<vmem>>, vector<256x64xf32>
    tpu.vector_store %arg5[%c0_6, %c0_7], %4 {strides = array<i32>} : memref<256x64xf32, #tpu.memory_space<vmem>>, vector<256x64xf32>,
    %c0_8 = arith.constant 0 : index
    %c0_9 = arith.constant 0 : index
    %c1 = arith.constant 1 : index
    %c0_10 = arith.constant 0 : index
    %6 = vector.load %arg1[%c0_8, %c0_9, %c1, %c0_10] : memref<1x18x18x64xbf16, #tpu.memory_space<vmem>>, vector<1x16x16x64xbf16>
    %7 = vector.shape_cast %6 : vector<1x16x16x64xbf16> to vector<256x64xbf16>
    %c1_11 = arith.constant 1 : index
    %c0_12 = arith.constant 0 : index
    %c0_13 = arith.constant 0 : index
    %8 = vector.load %arg2[%c1_11, %c0_12, %c0_13] : memref<9x64x64xbf16, #tpu.memory_space<vmem>>, vector<1x64x64xbf16>
    %9 = vector.shape_cast %8 : vector<1x64x64xbf16> to vector<64x64xbf16>
    %cst_14 = arith.constant dense<0.000000e+00> : vector<256x64xf32>
    %10 = tpu.matmul %7, %9, %cst_14 {dimension_numbers = #tpu.dot_dimension_numbers<[1], [0], [0], [1], [0, 0, 1, 1], [], []>} : vector<256x64xbf16>, vector<64x64xbf16>, vector<256x64xf32> -> vector<256x64xf32>
    %c0_15 = arith.constant 0 : index
    %c0_16 = arith.constant 0 : index
    %11 = vector.load %arg5[%c0_15, %c0_16] : memref<256x64xf32, #tpu.memory_space<vmem>>, vector<256x64xf32>
    %12 = arith.addf %11, %10 : vector<256x64xf32>
    %c0_17 = arith.constant 0 : index
    %c0_18 = arith.constant 0 : index
    %13 = vector.load %arg5[%c0_17, %c0_18] : memref<256x64xf32, #tpu.memory_space<vmem>>, vector<256x64xf32>
    tpu.vector_store %arg5[%c0_17, %c0_18], %12 {strides = array<i32>} : memref<256x64xf32, #tpu.memory_space<vmem>>, vector<256x64xf32>,
    %c0_19 = arith.constant 0 : index
    %c0_20 = arith.constant 0 : index
    %c2 = arith.constant 2 : index
    %c0_21 = arith.constant 0 : index
    %14 = vector.load %arg1[%c0_19, %c0_20, %c2, %c0_21] : memref<1x18x18x64xbf16, #tpu.memory_space<vmem>>, vector<1x16x16x64xbf16>
    %15 = vector.shape_cast %14 : vector<1x16x16x64xbf16> to vector<256x64xbf16>
    %c2_22 = arith.constant 2 : index
    %c0_23 = arith.constant 0 : index
    %c0_24 = arith.constant 0 : index
    %16 = vector.load %arg2[%c2_22, %c0_23, %c0_24] : memref<9x64x64xbf16, #tpu.memory_space<vmem>>, vector<1x64x64xbf16>
    %17 = vector.shape_cast %16 : vector<1x64x64xbf16> to vector<64x64xbf16>
    %cst_25 = arith.constant dense<0.000000e+00> : vector<256x64xf32>
    %18 = tpu.matmul %15, %17, %cst_25 {dimension_numbers = #tpu.dot_dimension_numbers<[1], [0], [0], [1], [0, 0, 1, 1], [], []>} : vector<256x64xbf16>, vector<64x64xbf16>, vector<256x64xf32> -> vector<256x64xf32>
    %c0_26 = arith.constant 0 : index
    %c0_27 = arith.constant 0 : index
    %19 = vector.load %arg5[%c0_26, %c0_27] : memref<256x64xf32, #tpu.memory_space<vmem>>, vector<256x64xf32>
    %20 = arith.addf %19, %18 : vector<256x64xf32>
    %c0_28 = arith.constant 0 : index
    %c0_29 = arith.constant 0 : index
    %21 = vector.load %arg5[%c0_28, %c0_29] : memref<256x64xf32, #tpu.memory_space<vmem>>, vector<256x64xf32>
    tpu.vector_store %arg5[%c0_28, %c0_29], %20 {strides = array<i32>} : memref<256x64xf32, #tpu.memory_space<vmem>>, vector<256x64xf32>,
    %c0_30 = arith.constant 0 : index
    %c1_31 = arith.constant 1 : index
    %c0_32 = arith.constant 0 : index
    %c0_33 = arith.constant 0 : index
    %22 = vector.load %arg1[%c0_30, %c1_31, %c0_32, %c0_33] : memref<1x18x18x64xbf16, #tpu.memory_space<vmem>>, vector<1x16x16x64xbf16>
    %23 = vector.shape_cast %22 : vector<1x16x16x64xbf16> to vector<256x64xbf16>
    %c3 = arith.constant 3 : index
    %c0_34 = arith.constant 0 : index
    %c0_35 = arith.constant 0 : index
    %24 = vector.load %arg2[%c3, %c0_34, %c0_35] : memref<9x64x64xbf16, #tpu.memory_space<vmem>>, vector<1x64x64xbf16>
    %25 = vector.shape_cast %24 : vector<1x64x64xbf16> to vector<64x64xbf16>
    %cst_36 = arith.constant dense<0.000000e+00> : vector<256x64xf32>
    %26 = tpu.matmul %23, %25, %cst_36 {dimension_numbers = #tpu.dot_dimension_numbers<[1], [0], [0], [1], [0, 0, 1, 1], [], []>} : vector<256x64xbf16>, vector<64x64xbf16>, vector<256x64xf32> -> vector<256x64xf32>
    %c0_37 = arith.constant 0 : index
    %c0_38 = arith.constant 0 : index
    %27 = vector.load %arg5[%c0_37, %c0_38] : memref<256x64xf32, #tpu.memory_space<vmem>>, vector<256x64xf32>
    %28 = arith.addf %27, %26 : vector<256x64xf32>
    %c0_39 = arith.constant 0 : index
    %c0_40 = arith.constant 0 : index
    %29 = vector.load %arg5[%c0_39, %c0_40] : memref<256x64xf32, #tpu.memory_space<vmem>>, vector<256x64xf32>
    tpu.vector_store %arg5[%c0_39, %c0_40], %28 {strides = array<i32>} : memref<256x64xf32, #tpu.memory_space<vmem>>, vector<256x64xf32>,
    %c0_41 = arith.constant 0 : index
    %c1_42 = arith.constant 1 : index
    %c1_43 = arith.constant 1 : index
    %c0_44 = arith.constant 0 : index
    %30 = vector.load %arg1[%c0_41, %c1_42, %c1_43, %c0_44] : memref<1x18x18x64xbf16, #tpu.memory_space<vmem>>, vector<1x16x16x64xbf16>
    %31 = vector.shape_cast %30 : vector<1x16x16x64xbf16> to vector<256x64xbf16>
    %c4 = arith.constant 4 : index
    %c0_45 = arith.constant 0 : index
    %c0_46 = arith.constant 0 : index
    %32 = vector.load %arg2[%c4, %c0_45, %c0_46] : memref<9x64x64xbf16, #tpu.memory_space<vmem>>, vector<1x64x64xbf16>
    %33 = vector.shape_cast %32 : vector<1x64x64xbf16> to vector<64x64xbf16>
    %cst_47 = arith.constant dense<0.000000e+00> : vector<256x64xf32>
    %34 = tpu.matmul %31, %33, %cst_47 {dimension_numbers = #tpu.dot_dimension_numbers<[1], [0], [0], [1], [0, 0, 1, 1], [], []>} : vector<256x64xbf16>, vector<64x64xbf16>, vector<256x64xf32> -> vector<256x64xf32>
    %c0_48 = arith.constant 0 : index
    %c0_49 = arith.constant 0 : index
    %35 = vector.load %arg5[%c0_48, %c0_49] : memref<256x64xf32, #tpu.memory_space<vmem>>, vector<256x64xf32>
    %36 = arith.addf %35, %34 : vector<256x64xf32>
    %c0_50 = arith.constant 0 : index
    %c0_51 = arith.constant 0 : index
    %37 = vector.load %arg5[%c0_50, %c0_51] : memref<256x64xf32, #tpu.memory_space<vmem>>, vector<256x64xf32>
    tpu.vector_store %arg5[%c0_50, %c0_51], %36 {strides = array<i32>} : memref<256x64xf32, #tpu.memory_space<vmem>>, vector<256x64xf32>,
    %c0_52 = arith.constant 0 : index
    %c1_53 = arith.constant 1 : index
    %c2_54 = arith.constant 2 : index
    %c0_55 = arith.constant 0 : index
    %38 = vector.load %arg1[%c0_52, %c1_53, %c2_54, %c0_55] : memref<1x18x18x64xbf16, #tpu.memory_space<vmem>>, vector<1x16x16x64xbf16>
    %39 = vector.shape_cast %38 : vector<1x16x16x64xbf16> to vector<256x64xbf16>
    %c5 = arith.constant 5 : index
    %c0_56 = arith.constant 0 : index
    %c0_57 = arith.constant 0 : index
    %40 = vector.load %arg2[%c5, %c0_56, %c0_57] : memref<9x64x64xbf16, #tpu.memory_space<vmem>>, vector<1x64x64xbf16>
    %41 = vector.shape_cast %40 : vector<1x64x64xbf16> to vector<64x64xbf16>
    %cst_58 = arith.constant dense<0.000000e+00> : vector<256x64xf32>
    %42 = tpu.matmul %39, %41, %cst_58 {dimension_numbers = #tpu.dot_dimension_numbers<[1], [0], [0], [1], [0, 0, 1, 1], [], []>} : vector<256x64xbf16>, vector<64x64xbf16>, vector<256x64xf32> -> vector<256x64xf32>
    %c0_59 = arith.constant 0 : index
    %c0_60 = arith.constant 0 : index
    %43 = vector.load %arg5[%c0_59, %c0_60] : memref<256x64xf32, #tpu.memory_space<vmem>>, vector<256x64xf32>
    %44 = arith.addf %43, %42 : vector<256x64xf32>
    %c0_61 = arith.constant 0 : index
    %c0_62 = arith.constant 0 : index
    %45 = vector.load %arg5[%c0_61, %c0_62] : memref<256x64xf32, #tpu.memory_space<vmem>>, vector<256x64xf32>
    tpu.vector_store %arg5[%c0_61, %c0_62], %44 {strides = array<i32>} : memref<256x64xf32, #tpu.memory_space<vmem>>, vector<256x64xf32>,
    %c0_63 = arith.constant 0 : index
    %c2_64 = arith.constant 2 : index
    %c0_65 = arith.constant 0 : index
    %c0_66 = arith.constant 0 : index
    %46 = vector.load %arg1[%c0_63, %c2_64, %c0_65, %c0_66] : memref<1x18x18x64xbf16, #tpu.memory_space<vmem>>, vector<1x16x16x64xbf16>
    %47 = vector.shape_cast %46 : vector<1x16x16x64xbf16> to vector<256x64xbf16>
    %c6 = arith.constant 6 : index
    %c0_67 = arith.constant 0 : index
    %c0_68 = arith.constant 0 : index
    %48 = vector.load %arg2[%c6, %c0_67, %c0_68] : memref<9x64x64xbf16, #tpu.memory_space<vmem>>, vector<1x64x64xbf16>
    %49 = vector.shape_cast %48 : vector<1x64x64xbf16> to vector<64x64xbf16>
    %cst_69 = arith.constant dense<0.000000e+00> : vector<256x64xf32>
    %50 = tpu.matmul %47, %49, %cst_69 {dimension_numbers = #tpu.dot_dimension_numbers<[1], [0], [0], [1], [0, 0, 1, 1], [], []>} : vector<256x64xbf16>, vector<64x64xbf16>, vector<256x64xf32> -> vector<256x64xf32>
    %c0_70 = arith.constant 0 : index
    %c0_71 = arith.constant 0 : index
    %51 = vector.load %arg5[%c0_70, %c0_71] : memref<256x64xf32, #tpu.memory_space<vmem>>, vector<256x64xf32>
    %52 = arith.addf %51, %50 : vector<256x64xf32>
    %c0_72 = arith.constant 0 : index
    %c0_73 = arith.constant 0 : index
    %53 = vector.load %arg5[%c0_72, %c0_73] : memref<256x64xf32, #tpu.memory_space<vmem>>, vector<256x64xf32>
    tpu.vector_store %arg5[%c0_72, %c0_73], %52 {strides = array<i32>} : memref<256x64xf32, #tpu.memory_space<vmem>>, vector<256x64xf32>,
    %c0_74 = arith.constant 0 : index
    %c2_75 = arith.constant 2 : index
    %c1_76 = arith.constant 1 : index
    %c0_77 = arith.constant 0 : index
    %54 = vector.load %arg1[%c0_74, %c2_75, %c1_76, %c0_77] : memref<1x18x18x64xbf16, #tpu.memory_space<vmem>>, vector<1x16x16x64xbf16>
    %55 = vector.shape_cast %54 : vector<1x16x16x64xbf16> to vector<256x64xbf16>
    %c7 = arith.constant 7 : index
    %c0_78 = arith.constant 0 : index
    %c0_79 = arith.constant 0 : index
    %56 = vector.load %arg2[%c7, %c0_78, %c0_79] : memref<9x64x64xbf16, #tpu.memory_space<vmem>>, vector<1x64x64xbf16>
    %57 = vector.shape_cast %56 : vector<1x64x64xbf16> to vector<64x64xbf16>
    %cst_80 = arith.constant dense<0.000000e+00> : vector<256x64xf32>
    %58 = tpu.matmul %55, %57, %cst_80 {dimension_numbers = #tpu.dot_dimension_numbers<[1], [0], [0], [1], [0, 0, 1, 1], [], []>} : vector<256x64xbf16>, vector<64x64xbf16>, vector<256x64xf32> -> vector<256x64xf32>
    %c0_81 = arith.constant 0 : index
    %c0_82 = arith.constant 0 : index
    %59 = vector.load %arg5[%c0_81, %c0_82] : memref<256x64xf32, #tpu.memory_space<vmem>>, vector<256x64xf32>
    %60 = arith.addf %59, %58 : vector<256x64xf32>
    %c0_83 = arith.constant 0 : index
    %c0_84 = arith.constant 0 : index
    %61 = vector.load %arg5[%c0_83, %c0_84] : memref<256x64xf32, #tpu.memory_space<vmem>>, vector<256x64xf32>
    tpu.vector_store %arg5[%c0_83, %c0_84], %60 {strides = array<i32>} : memref<256x64xf32, #tpu.memory_space<vmem>>, vector<256x64xf32>,
    %c0_85 = arith.constant 0 : index
    %c2_86 = arith.constant 2 : index
    %c2_87 = arith.constant 2 : index
    %c0_88 = arith.constant 0 : index
    %62 = vector.load %arg1[%c0_85, %c2_86, %c2_87, %c0_88] : memref<1x18x18x64xbf16, #tpu.memory_space<vmem>>, vector<1x16x16x64xbf16>
    %63 = vector.shape_cast %62 : vector<1x16x16x64xbf16> to vector<256x64xbf16>
    %c8 = arith.constant 8 : index
    %c0_89 = arith.constant 0 : index
    %c0_90 = arith.constant 0 : index
    %64 = vector.load %arg2[%c8, %c0_89, %c0_90] : memref<9x64x64xbf16, #tpu.memory_space<vmem>>, vector<1x64x64xbf16>
    %65 = vector.shape_cast %64 : vector<1x64x64xbf16> to vector<64x64xbf16>
    %cst_91 = arith.constant dense<0.000000e+00> : vector<256x64xf32>
    %66 = tpu.matmul %63, %65, %cst_91 {dimension_numbers = #tpu.dot_dimension_numbers<[1], [0], [0], [1], [0, 0, 1, 1], [], []>} : vector<256x64xbf16>, vector<64x64xbf16>, vector<256x64xf32> -> vector<256x64xf32>
    %c0_92 = arith.constant 0 : index
    %c0_93 = arith.constant 0 : index
    %67 = vector.load %arg5[%c0_92, %c0_93] : memref<256x64xf32, #tpu.memory_space<vmem>>, vector<256x64xf32>
    %68 = arith.addf %67, %66 : vector<256x64xf32>
    %c0_94 = arith.constant 0 : index
    %c0_95 = arith.constant 0 : index
    %69 = vector.load %arg5[%c0_94, %c0_95] : memref<256x64xf32, #tpu.memory_space<vmem>>, vector<256x64xf32>
    tpu.vector_store %arg5[%c0_94, %c0_95], %68 {strides = array<i32>} : memref<256x64xf32, #tpu.memory_space<vmem>>, vector<256x64xf32>,
    %cst_96 = arith.constant 0.000000e+00 : f32
    %70 = vector.broadcast %cst_96 : f32 to vector<1x64xf32>
    %cst_97 = arith.constant 0.000000e+00 : f32
    %71 = vector.broadcast %cst_97 : f32 to vector<1x64xf32>
    %c0_98 = arith.constant 0 : index
    %c0_99 = arith.constant 0 : index
    %72 = vector.load %arg5[%c0_98, %c0_99] : memref<256x64xf32, #tpu.memory_space<vmem>>, vector<256x64xf32>
    %73 = arith.truncf %72 : vector<256x64xf32> to vector<256x64xbf16>
    %c0_100 = arith.constant 0 : index
    %c0_101 = arith.constant 0 : index
    %74 = vector.load %arg3[%c0_100, %c0_101] : memref<256x64xbf16, #tpu.memory_space<vmem>>, vector<256x64xbf16>
    tpu.vector_store %arg3[%c0_100, %c0_101], %73 {strides = array<i32>} : memref<256x64xbf16, #tpu.memory_space<vmem>>, vector<256x64xbf16>,
    %cst_102 = arith.constant dense<0.000000e+00> : vector<64xf32>
    %75 = vector.multi_reduction <add>, %72, %cst_102 [0] : vector<256x64xf32> to vector<64xf32>
    %76 = vector.shape_cast %75 : vector<64xf32> to vector<1x64xf32>
    %77 = arith.addf %70, %76 : vector<1x64xf32>
    %78 = arith.mulf %72, %72 : vector<256x64xf32>
    %cst_103 = arith.constant dense<0.000000e+00> : vector<64xf32>
    %79 = vector.multi_reduction <add>, %78, %cst_103 [0] : vector<256x64xf32> to vector<64xf32>
    %80 = vector.shape_cast %79 : vector<64xf32> to vector<1x64xf32>
    %81 = arith.addf %71, %80 : vector<1x64xf32>
    %82 = tpu.concatenate %77, %81 in 0 : vector<1x64xf32>, vector<1x64xf32> -> vector<2x64xf32>
    %83 = vector.shape_cast %82 : vector<2x64xf32> to vector<1x2x64xf32>
    %c0_104 = arith.constant 0 : index
    %c0_105 = arith.constant 0 : index
    %c0_106 = arith.constant 0 : index
    %84 = vector.load %arg4[%c0_104, %c0_105, %c0_106] : memref<1x2x64xf32, #tpu.memory_space<vmem>>, vector<1x2x64xf32>
    tpu.vector_store %arg4[%c0_104, %c0_105, %c0_106], %83 {strides = array<i32>} : memref<1x2x64xf32, #tpu.memory_space<vmem>>, vector<1x2x64xf32>,
    return
  }
  func.func @transform_0(%arg0: i32) -> (i32, i32, i32, i32) {
    %c0_i32 = arith.constant 0 : i32
    %c0_i32_0 = arith.constant 0 : i32
    %c0_i32_1 = arith.constant 0 : i32
    %c0_i32_2 = arith.constant 0 : i32
    return %arg0, %c0_i32, %c0_i32_0, %c0_i32_1 : i32, i32, i32, i32
  }
  func.func @transform_1(%arg0: i32) -> (i32, i32, i32) {
    %c0_i32 = arith.constant 0 : i32
    %c0_i32_0 = arith.constant 0 : i32
    %c0_i32_1 = arith.constant 0 : i32
    %c0_i32_2 = arith.constant 0 : i32
    return %c0_i32, %c0_i32_0, %c0_i32_1 : i32, i32, i32
  }
  func.func @transform_2(%arg0: i32) -> (i32, i32) {
    %c0_i32 = arith.constant 0 : i32
    %c0_i32_0 = arith.constant 0 : i32
    return %arg0, %c0_i32 : i32, i32
  }
  func.func @transform_3(%arg0: i32) -> (i32, i32, i32) {
    %c0_i32 = arith.constant 0 : i32
    %c0_i32_0 = arith.constant 0 : i32
    %c0_i32_1 = arith.constant 0 : i32
    return %arg0, %c0_i32, %c0_i32_0 : i32, i32, i32
  }
}

module attributes {stable_mosaic.version = 11 : i64} {
  func.func @_conv_group_kernel(%arg0: i32, %arg1: memref<1x9x9x256xbf16, #tpu.memory_space<vmem>>, %arg2: memref<4x256x128xbf16, #tpu.memory_space<vmem>>, %arg3: memref<64x128xbf16, #tpu.memory_space<vmem>>, %arg4: memref<1x2x128xf32, #tpu.memory_space<vmem>>, %arg5: memref<64x128xf32, #tpu.memory_space<vmem>>) attributes {dimension_semantics = [#tpu.dimension_semantics<parallel>], iteration_bounds = array<i64: 2>, scalar_prefetch = 0 : i64, scratch_operands = 1 : i64, tpu.core_type = #tpu.core_type<tc>, window_params = [{transform_indices = @transform_0, window_bounds = array<i64: 1, 9, 9, 256>}, {pipeline_mode = #tpu.pipeline_mode<synchronous>, transform_indices = @transform_1, window_bounds = array<i64: 4, 256, 128>}, {transform_indices = @transform_2, window_bounds = array<i64: 64, 128>}, {transform_indices = @transform_3, window_bounds = array<i64: 1, 2, 128>}]} {
    %c0 = arith.constant 0 : index
    %c0_0 = arith.constant 0 : index
    %c0_1 = arith.constant 0 : index
    %c0_2 = arith.constant 0 : index
    %0 = vector.load %arg1[%c0, %c0_0, %c0_1, %c0_2] : memref<1x9x9x256xbf16, #tpu.memory_space<vmem>>, vector<1x8x8x256xbf16>
    %1 = vector.shape_cast %0 : vector<1x8x8x256xbf16> to vector<64x256xbf16>
    %c0_3 = arith.constant 0 : index
    %c0_4 = arith.constant 0 : index
    %c0_5 = arith.constant 0 : index
    %2 = vector.load %arg2[%c0_3, %c0_4, %c0_5] : memref<4x256x128xbf16, #tpu.memory_space<vmem>>, vector<1x256x128xbf16>
    %3 = vector.shape_cast %2 : vector<1x256x128xbf16> to vector<256x128xbf16>
    %cst = arith.constant dense<0.000000e+00> : vector<64x128xf32>
    %4 = tpu.matmul %1, %3, %cst {dimension_numbers = #tpu.dot_dimension_numbers<[1], [0], [0], [1], [0, 0, 1, 1], [], []>} : vector<64x256xbf16>, vector<256x128xbf16>, vector<64x128xf32> -> vector<64x128xf32>
    %c0_6 = arith.constant 0 : index
    %c0_7 = arith.constant 0 : index
    %5 = vector.load %arg5[%c0_6, %c0_7] : memref<64x128xf32, #tpu.memory_space<vmem>>, vector<64x128xf32>
    tpu.vector_store %arg5[%c0_6, %c0_7], %4 {strides = array<i32>} : memref<64x128xf32, #tpu.memory_space<vmem>>, vector<64x128xf32>,
    %c0_8 = arith.constant 0 : index
    %c0_9 = arith.constant 0 : index
    %c1 = arith.constant 1 : index
    %c0_10 = arith.constant 0 : index
    %6 = vector.load %arg1[%c0_8, %c0_9, %c1, %c0_10] : memref<1x9x9x256xbf16, #tpu.memory_space<vmem>>, vector<1x8x8x256xbf16>
    %7 = vector.shape_cast %6 : vector<1x8x8x256xbf16> to vector<64x256xbf16>
    %c1_11 = arith.constant 1 : index
    %c0_12 = arith.constant 0 : index
    %c0_13 = arith.constant 0 : index
    %8 = vector.load %arg2[%c1_11, %c0_12, %c0_13] : memref<4x256x128xbf16, #tpu.memory_space<vmem>>, vector<1x256x128xbf16>
    %9 = vector.shape_cast %8 : vector<1x256x128xbf16> to vector<256x128xbf16>
    %cst_14 = arith.constant dense<0.000000e+00> : vector<64x128xf32>
    %10 = tpu.matmul %7, %9, %cst_14 {dimension_numbers = #tpu.dot_dimension_numbers<[1], [0], [0], [1], [0, 0, 1, 1], [], []>} : vector<64x256xbf16>, vector<256x128xbf16>, vector<64x128xf32> -> vector<64x128xf32>
    %c0_15 = arith.constant 0 : index
    %c0_16 = arith.constant 0 : index
    %11 = vector.load %arg5[%c0_15, %c0_16] : memref<64x128xf32, #tpu.memory_space<vmem>>, vector<64x128xf32>
    %12 = arith.addf %11, %10 : vector<64x128xf32>
    %c0_17 = arith.constant 0 : index
    %c0_18 = arith.constant 0 : index
    %13 = vector.load %arg5[%c0_17, %c0_18] : memref<64x128xf32, #tpu.memory_space<vmem>>, vector<64x128xf32>
    tpu.vector_store %arg5[%c0_17, %c0_18], %12 {strides = array<i32>} : memref<64x128xf32, #tpu.memory_space<vmem>>, vector<64x128xf32>,
    %c0_19 = arith.constant 0 : index
    %c1_20 = arith.constant 1 : index
    %c0_21 = arith.constant 0 : index
    %c0_22 = arith.constant 0 : index
    %14 = vector.load %arg1[%c0_19, %c1_20, %c0_21, %c0_22] : memref<1x9x9x256xbf16, #tpu.memory_space<vmem>>, vector<1x8x8x256xbf16>
    %15 = vector.shape_cast %14 : vector<1x8x8x256xbf16> to vector<64x256xbf16>
    %c2 = arith.constant 2 : index
    %c0_23 = arith.constant 0 : index
    %c0_24 = arith.constant 0 : index
    %16 = vector.load %arg2[%c2, %c0_23, %c0_24] : memref<4x256x128xbf16, #tpu.memory_space<vmem>>, vector<1x256x128xbf16>
    %17 = vector.shape_cast %16 : vector<1x256x128xbf16> to vector<256x128xbf16>
    %cst_25 = arith.constant dense<0.000000e+00> : vector<64x128xf32>
    %18 = tpu.matmul %15, %17, %cst_25 {dimension_numbers = #tpu.dot_dimension_numbers<[1], [0], [0], [1], [0, 0, 1, 1], [], []>} : vector<64x256xbf16>, vector<256x128xbf16>, vector<64x128xf32> -> vector<64x128xf32>
    %c0_26 = arith.constant 0 : index
    %c0_27 = arith.constant 0 : index
    %19 = vector.load %arg5[%c0_26, %c0_27] : memref<64x128xf32, #tpu.memory_space<vmem>>, vector<64x128xf32>
    %20 = arith.addf %19, %18 : vector<64x128xf32>
    %c0_28 = arith.constant 0 : index
    %c0_29 = arith.constant 0 : index
    %21 = vector.load %arg5[%c0_28, %c0_29] : memref<64x128xf32, #tpu.memory_space<vmem>>, vector<64x128xf32>
    tpu.vector_store %arg5[%c0_28, %c0_29], %20 {strides = array<i32>} : memref<64x128xf32, #tpu.memory_space<vmem>>, vector<64x128xf32>,
    %c0_30 = arith.constant 0 : index
    %c1_31 = arith.constant 1 : index
    %c1_32 = arith.constant 1 : index
    %c0_33 = arith.constant 0 : index
    %22 = vector.load %arg1[%c0_30, %c1_31, %c1_32, %c0_33] : memref<1x9x9x256xbf16, #tpu.memory_space<vmem>>, vector<1x8x8x256xbf16>
    %23 = vector.shape_cast %22 : vector<1x8x8x256xbf16> to vector<64x256xbf16>
    %c3 = arith.constant 3 : index
    %c0_34 = arith.constant 0 : index
    %c0_35 = arith.constant 0 : index
    %24 = vector.load %arg2[%c3, %c0_34, %c0_35] : memref<4x256x128xbf16, #tpu.memory_space<vmem>>, vector<1x256x128xbf16>
    %25 = vector.shape_cast %24 : vector<1x256x128xbf16> to vector<256x128xbf16>
    %cst_36 = arith.constant dense<0.000000e+00> : vector<64x128xf32>
    %26 = tpu.matmul %23, %25, %cst_36 {dimension_numbers = #tpu.dot_dimension_numbers<[1], [0], [0], [1], [0, 0, 1, 1], [], []>} : vector<64x256xbf16>, vector<256x128xbf16>, vector<64x128xf32> -> vector<64x128xf32>
    %c0_37 = arith.constant 0 : index
    %c0_38 = arith.constant 0 : index
    %27 = vector.load %arg5[%c0_37, %c0_38] : memref<64x128xf32, #tpu.memory_space<vmem>>, vector<64x128xf32>
    %28 = arith.addf %27, %26 : vector<64x128xf32>
    %c0_39 = arith.constant 0 : index
    %c0_40 = arith.constant 0 : index
    %29 = vector.load %arg5[%c0_39, %c0_40] : memref<64x128xf32, #tpu.memory_space<vmem>>, vector<64x128xf32>
    tpu.vector_store %arg5[%c0_39, %c0_40], %28 {strides = array<i32>} : memref<64x128xf32, #tpu.memory_space<vmem>>, vector<64x128xf32>,
    %cst_41 = arith.constant 0.000000e+00 : f32
    %30 = vector.broadcast %cst_41 : f32 to vector<1x128xf32>
    %cst_42 = arith.constant 0.000000e+00 : f32
    %31 = vector.broadcast %cst_42 : f32 to vector<1x128xf32>
    %c0_43 = arith.constant 0 : index
    %c0_44 = arith.constant 0 : index
    %32 = vector.load %arg5[%c0_43, %c0_44] : memref<64x128xf32, #tpu.memory_space<vmem>>, vector<64x128xf32>
    %33 = arith.truncf %32 : vector<64x128xf32> to vector<64x128xbf16>
    %c0_45 = arith.constant 0 : index
    %c0_46 = arith.constant 0 : index
    %34 = vector.load %arg3[%c0_45, %c0_46] : memref<64x128xbf16, #tpu.memory_space<vmem>>, vector<64x128xbf16>
    tpu.vector_store %arg3[%c0_45, %c0_46], %33 {strides = array<i32>} : memref<64x128xbf16, #tpu.memory_space<vmem>>, vector<64x128xbf16>,
    %cst_47 = arith.constant dense<0.000000e+00> : vector<128xf32>
    %35 = vector.multi_reduction <add>, %32, %cst_47 [0] : vector<64x128xf32> to vector<128xf32>
    %36 = vector.shape_cast %35 : vector<128xf32> to vector<1x128xf32>
    %37 = arith.addf %30, %36 : vector<1x128xf32>
    %38 = arith.mulf %32, %32 : vector<64x128xf32>
    %cst_48 = arith.constant dense<0.000000e+00> : vector<128xf32>
    %39 = vector.multi_reduction <add>, %38, %cst_48 [0] : vector<64x128xf32> to vector<128xf32>
    %40 = vector.shape_cast %39 : vector<128xf32> to vector<1x128xf32>
    %41 = arith.addf %31, %40 : vector<1x128xf32>
    %42 = tpu.concatenate %37, %41 in 0 : vector<1x128xf32>, vector<1x128xf32> -> vector<2x128xf32>
    %43 = vector.shape_cast %42 : vector<2x128xf32> to vector<1x2x128xf32>
    %c0_49 = arith.constant 0 : index
    %c0_50 = arith.constant 0 : index
    %c0_51 = arith.constant 0 : index
    %44 = vector.load %arg4[%c0_49, %c0_50, %c0_51] : memref<1x2x128xf32, #tpu.memory_space<vmem>>, vector<1x2x128xf32>
    tpu.vector_store %arg4[%c0_49, %c0_50, %c0_51], %43 {strides = array<i32>} : memref<1x2x128xf32, #tpu.memory_space<vmem>>, vector<1x2x128xf32>,
    return
  }
  func.func @transform_0(%arg0: i32) -> (i32, i32, i32, i32) {
    %c0_i32 = arith.constant 0 : i32
    %c0_i32_0 = arith.constant 0 : i32
    %c0_i32_1 = arith.constant 0 : i32
    %c0_i32_2 = arith.constant 0 : i32
    return %arg0, %c0_i32, %c0_i32_0, %c0_i32_1 : i32, i32, i32, i32
  }
  func.func @transform_1(%arg0: i32) -> (i32, i32, i32) {
    %c0_i32 = arith.constant 0 : i32
    %c0_i32_0 = arith.constant 0 : i32
    %c0_i32_1 = arith.constant 0 : i32
    %c0_i32_2 = arith.constant 0 : i32
    return %c0_i32, %c0_i32_0, %c0_i32_1 : i32, i32, i32
  }
  func.func @transform_2(%arg0: i32) -> (i32, i32) {
    %c0_i32 = arith.constant 0 : i32
    %c0_i32_0 = arith.constant 0 : i32
    return %arg0, %c0_i32 : i32, i32
  }
  func.func @transform_3(%arg0: i32) -> (i32, i32, i32) {
    %c0_i32 = arith.constant 0 : i32
    %c0_i32_0 = arith.constant 0 : i32
    %c0_i32_1 = arith.constant 0 : i32
    return %arg0, %c0_i32, %c0_i32_0 : i32, i32, i32
  }
}

module attributes {stable_mosaic.version = 11 : i64} {
  func.func @_conv_group_kernel(%arg0: i32, %arg1: memref<1x5x5x512xbf16, #tpu.memory_space<vmem>>, %arg2: memref<4x512x256xbf16, #tpu.memory_space<vmem>>, %arg3: memref<16x256xbf16, #tpu.memory_space<vmem>>, %arg4: memref<1x2x256xf32, #tpu.memory_space<vmem>>, %arg5: memref<16x256xf32, #tpu.memory_space<vmem>>) attributes {dimension_semantics = [#tpu.dimension_semantics<parallel>], iteration_bounds = array<i64: 2>, scalar_prefetch = 0 : i64, scratch_operands = 1 : i64, tpu.core_type = #tpu.core_type<tc>, window_params = [{transform_indices = @transform_0, window_bounds = array<i64: 1, 5, 5, 512>}, {pipeline_mode = #tpu.pipeline_mode<synchronous>, transform_indices = @transform_1, window_bounds = array<i64: 4, 512, 256>}, {transform_indices = @transform_2, window_bounds = array<i64: 16, 256>}, {transform_indices = @transform_3, window_bounds = array<i64: 1, 2, 256>}]} {
    %c0 = arith.constant 0 : index
    %c0_0 = arith.constant 0 : index
    %c0_1 = arith.constant 0 : index
    %c0_2 = arith.constant 0 : index
    %0 = vector.load %arg1[%c0, %c0_0, %c0_1, %c0_2] : memref<1x5x5x512xbf16, #tpu.memory_space<vmem>>, vector<1x4x4x512xbf16>
    %1 = vector.shape_cast %0 : vector<1x4x4x512xbf16> to vector<16x512xbf16>
    %c0_3 = arith.constant 0 : index
    %c0_4 = arith.constant 0 : index
    %c0_5 = arith.constant 0 : index
    %2 = vector.load %arg2[%c0_3, %c0_4, %c0_5] : memref<4x512x256xbf16, #tpu.memory_space<vmem>>, vector<1x512x256xbf16>
    %3 = vector.shape_cast %2 : vector<1x512x256xbf16> to vector<512x256xbf16>
    %cst = arith.constant dense<0.000000e+00> : vector<16x256xf32>
    %4 = tpu.matmul %1, %3, %cst {dimension_numbers = #tpu.dot_dimension_numbers<[1], [0], [0], [1], [0, 0, 1, 1], [], []>} : vector<16x512xbf16>, vector<512x256xbf16>, vector<16x256xf32> -> vector<16x256xf32>
    %c0_6 = arith.constant 0 : index
    %c0_7 = arith.constant 0 : index
    %5 = vector.load %arg5[%c0_6, %c0_7] : memref<16x256xf32, #tpu.memory_space<vmem>>, vector<16x256xf32>
    tpu.vector_store %arg5[%c0_6, %c0_7], %4 {strides = array<i32>} : memref<16x256xf32, #tpu.memory_space<vmem>>, vector<16x256xf32>,
    %c0_8 = arith.constant 0 : index
    %c0_9 = arith.constant 0 : index
    %c1 = arith.constant 1 : index
    %c0_10 = arith.constant 0 : index
    %6 = vector.load %arg1[%c0_8, %c0_9, %c1, %c0_10] : memref<1x5x5x512xbf16, #tpu.memory_space<vmem>>, vector<1x4x4x512xbf16>
    %7 = vector.shape_cast %6 : vector<1x4x4x512xbf16> to vector<16x512xbf16>
    %c1_11 = arith.constant 1 : index
    %c0_12 = arith.constant 0 : index
    %c0_13 = arith.constant 0 : index
    %8 = vector.load %arg2[%c1_11, %c0_12, %c0_13] : memref<4x512x256xbf16, #tpu.memory_space<vmem>>, vector<1x512x256xbf16>
    %9 = vector.shape_cast %8 : vector<1x512x256xbf16> to vector<512x256xbf16>
    %cst_14 = arith.constant dense<0.000000e+00> : vector<16x256xf32>
    %10 = tpu.matmul %7, %9, %cst_14 {dimension_numbers = #tpu.dot_dimension_numbers<[1], [0], [0], [1], [0, 0, 1, 1], [], []>} : vector<16x512xbf16>, vector<512x256xbf16>, vector<16x256xf32> -> vector<16x256xf32>
    %c0_15 = arith.constant 0 : index
    %c0_16 = arith.constant 0 : index
    %11 = vector.load %arg5[%c0_15, %c0_16] : memref<16x256xf32, #tpu.memory_space<vmem>>, vector<16x256xf32>
    %12 = arith.addf %11, %10 : vector<16x256xf32>
    %c0_17 = arith.constant 0 : index
    %c0_18 = arith.constant 0 : index
    %13 = vector.load %arg5[%c0_17, %c0_18] : memref<16x256xf32, #tpu.memory_space<vmem>>, vector<16x256xf32>
    tpu.vector_store %arg5[%c0_17, %c0_18], %12 {strides = array<i32>} : memref<16x256xf32, #tpu.memory_space<vmem>>, vector<16x256xf32>,
    %c0_19 = arith.constant 0 : index
    %c1_20 = arith.constant 1 : index
    %c0_21 = arith.constant 0 : index
    %c0_22 = arith.constant 0 : index
    %14 = vector.load %arg1[%c0_19, %c1_20, %c0_21, %c0_22] : memref<1x5x5x512xbf16, #tpu.memory_space<vmem>>, vector<1x4x4x512xbf16>
    %15 = vector.shape_cast %14 : vector<1x4x4x512xbf16> to vector<16x512xbf16>
    %c2 = arith.constant 2 : index
    %c0_23 = arith.constant 0 : index
    %c0_24 = arith.constant 0 : index
    %16 = vector.load %arg2[%c2, %c0_23, %c0_24] : memref<4x512x256xbf16, #tpu.memory_space<vmem>>, vector<1x512x256xbf16>
    %17 = vector.shape_cast %16 : vector<1x512x256xbf16> to vector<512x256xbf16>
    %cst_25 = arith.constant dense<0.000000e+00> : vector<16x256xf32>
    %18 = tpu.matmul %15, %17, %cst_25 {dimension_numbers = #tpu.dot_dimension_numbers<[1], [0], [0], [1], [0, 0, 1, 1], [], []>} : vector<16x512xbf16>, vector<512x256xbf16>, vector<16x256xf32> -> vector<16x256xf32>
    %c0_26 = arith.constant 0 : index
    %c0_27 = arith.constant 0 : index
    %19 = vector.load %arg5[%c0_26, %c0_27] : memref<16x256xf32, #tpu.memory_space<vmem>>, vector<16x256xf32>
    %20 = arith.addf %19, %18 : vector<16x256xf32>
    %c0_28 = arith.constant 0 : index
    %c0_29 = arith.constant 0 : index
    %21 = vector.load %arg5[%c0_28, %c0_29] : memref<16x256xf32, #tpu.memory_space<vmem>>, vector<16x256xf32>
    tpu.vector_store %arg5[%c0_28, %c0_29], %20 {strides = array<i32>} : memref<16x256xf32, #tpu.memory_space<vmem>>, vector<16x256xf32>,
    %c0_30 = arith.constant 0 : index
    %c1_31 = arith.constant 1 : index
    %c1_32 = arith.constant 1 : index
    %c0_33 = arith.constant 0 : index
    %22 = vector.load %arg1[%c0_30, %c1_31, %c1_32, %c0_33] : memref<1x5x5x512xbf16, #tpu.memory_space<vmem>>, vector<1x4x4x512xbf16>
    %23 = vector.shape_cast %22 : vector<1x4x4x512xbf16> to vector<16x512xbf16>
    %c3 = arith.constant 3 : index
    %c0_34 = arith.constant 0 : index
    %c0_35 = arith.constant 0 : index
    %24 = vector.load %arg2[%c3, %c0_34, %c0_35] : memref<4x512x256xbf16, #tpu.memory_space<vmem>>, vector<1x512x256xbf16>
    %25 = vector.shape_cast %24 : vector<1x512x256xbf16> to vector<512x256xbf16>
    %cst_36 = arith.constant dense<0.000000e+00> : vector<16x256xf32>
    %26 = tpu.matmul %23, %25, %cst_36 {dimension_numbers = #tpu.dot_dimension_numbers<[1], [0], [0], [1], [0, 0, 1, 1], [], []>} : vector<16x512xbf16>, vector<512x256xbf16>, vector<16x256xf32> -> vector<16x256xf32>
    %c0_37 = arith.constant 0 : index
    %c0_38 = arith.constant 0 : index
    %27 = vector.load %arg5[%c0_37, %c0_38] : memref<16x256xf32, #tpu.memory_space<vmem>>, vector<16x256xf32>
    %28 = arith.addf %27, %26 : vector<16x256xf32>
    %c0_39 = arith.constant 0 : index
    %c0_40 = arith.constant 0 : index
    %29 = vector.load %arg5[%c0_39, %c0_40] : memref<16x256xf32, #tpu.memory_space<vmem>>, vector<16x256xf32>
    tpu.vector_store %arg5[%c0_39, %c0_40], %28 {strides = array<i32>} : memref<16x256xf32, #tpu.memory_space<vmem>>, vector<16x256xf32>,
    %cst_41 = arith.constant 0.000000e+00 : f32
    %30 = vector.broadcast %cst_41 : f32 to vector<1x256xf32>
    %cst_42 = arith.constant 0.000000e+00 : f32
    %31 = vector.broadcast %cst_42 : f32 to vector<1x256xf32>
    %c0_43 = arith.constant 0 : index
    %c0_44 = arith.constant 0 : index
    %32 = vector.load %arg5[%c0_43, %c0_44] : memref<16x256xf32, #tpu.memory_space<vmem>>, vector<16x256xf32>
    %33 = arith.truncf %32 : vector<16x256xf32> to vector<16x256xbf16>
    %c0_45 = arith.constant 0 : index
    %c0_46 = arith.constant 0 : index
    %34 = vector.load %arg3[%c0_45, %c0_46] : memref<16x256xbf16, #tpu.memory_space<vmem>>, vector<16x256xbf16>
    tpu.vector_store %arg3[%c0_45, %c0_46], %33 {strides = array<i32>} : memref<16x256xbf16, #tpu.memory_space<vmem>>, vector<16x256xbf16>,
    %cst_47 = arith.constant dense<0.000000e+00> : vector<256xf32>
    %35 = vector.multi_reduction <add>, %32, %cst_47 [0] : vector<16x256xf32> to vector<256xf32>
    %36 = vector.shape_cast %35 : vector<256xf32> to vector<1x256xf32>
    %37 = arith.addf %30, %36 : vector<1x256xf32>
    %38 = arith.mulf %32, %32 : vector<16x256xf32>
    %cst_48 = arith.constant dense<0.000000e+00> : vector<256xf32>
    %39 = vector.multi_reduction <add>, %38, %cst_48 [0] : vector<16x256xf32> to vector<256xf32>
    %40 = vector.shape_cast %39 : vector<256xf32> to vector<1x256xf32>
    %41 = arith.addf %31, %40 : vector<1x256xf32>
    %42 = tpu.concatenate %37, %41 in 0 : vector<1x256xf32>, vector<1x256xf32> -> vector<2x256xf32>
    %43 = vector.shape_cast %42 : vector<2x256xf32> to vector<1x2x256xf32>
    %c0_49 = arith.constant 0 : index
    %c0_50 = arith.constant 0 : index
    %c0_51 = arith.constant 0 : index
    %44 = vector.load %arg4[%c0_49, %c0_50, %c0_51] : memref<1x2x256xf32, #tpu.memory_space<vmem>>, vector<1x2x256xf32>
    tpu.vector_store %arg4[%c0_49, %c0_50, %c0_51], %43 {strides = array<i32>} : memref<1x2x256xf32, #tpu.memory_space<vmem>>, vector<1x2x256xf32>,
    return
  }
  func.func @transform_0(%arg0: i32) -> (i32, i32, i32, i32) {
    %c0_i32 = arith.constant 0 : i32
    %c0_i32_0 = arith.constant 0 : i32
    %c0_i32_1 = arith.constant 0 : i32
    %c0_i32_2 = arith.constant 0 : i32
    return %arg0, %c0_i32, %c0_i32_0, %c0_i32_1 : i32, i32, i32, i32
  }
  func.func @transform_1(%arg0: i32) -> (i32, i32, i32) {
    %c0_i32 = arith.constant 0 : i32
    %c0_i32_0 = arith.constant 0 : i32
    %c0_i32_1 = arith.constant 0 : i32
    %c0_i32_2 = arith.constant 0 : i32
    return %c0_i32, %c0_i32_0, %c0_i32_1 : i32, i32, i32
  }
  func.func @transform_2(%arg0: i32) -> (i32, i32) {
    %c0_i32 = arith.constant 0 : i32
    %c0_i32_0 = arith.constant 0 : i32
    return %arg0, %c0_i32 : i32, i32
  }
  func.func @transform_3(%arg0: i32) -> (i32, i32, i32) {
    %c0_i32 = arith.constant 0 : i32
    %c0_i32_0 = arith.constant 0 : i32
    %c0_i32_1 = arith.constant 0 : i32
    return %arg0, %c0_i32, %c0_i32_0 : i32, i32, i32
  }
}

module attributes {stable_mosaic.version = 11 : i64} {
  func.func @_head_kernel(%arg0: i32, %arg1: memref<2x4096xbf16, #tpu.memory_space<vmem>>, %arg2: memref<1x4096xf32, #tpu.memory_space<vmem>>, %arg3: memref<1x4096xf32, #tpu.memory_space<vmem>>, %arg4: memref<1x4096xf32, #tpu.memory_space<vmem>>, %arg5: memref<2x1xf32, #tpu.memory_space<vmem>>) attributes {dimension_semantics = [#tpu.dimension_semantics<parallel>], iteration_bounds = array<i64: 1>, scalar_prefetch = 0 : i64, scratch_operands = 0 : i64, tpu.core_type = #tpu.core_type<tc>, window_params = [{transform_indices = @transform_0, window_bounds = array<i64: 2, 4096>}, {pipeline_mode = #tpu.pipeline_mode<synchronous>, transform_indices = @transform_1, window_bounds = array<i64: 1, 4096>}, {pipeline_mode = #tpu.pipeline_mode<synchronous>, transform_indices = @transform_2, window_bounds = array<i64: 1, 4096>}, {pipeline_mode = #tpu.pipeline_mode<synchronous>, transform_indices = @transform_3, window_bounds = array<i64: 1, 4096>}, {transform_indices = @transform_4, window_bounds = array<i64: 2, 1>}]} {
    %c0 = arith.constant 0 : index
    %c0_0 = arith.constant 0 : index
    %0 = vector.load %arg1[%c0, %c0_0] : memref<2x4096xbf16, #tpu.memory_space<vmem>>, vector<2x4096xbf16>
    %1 = arith.extf %0 : vector<2x4096xbf16> to vector<2x4096xf32>
    %c0_1 = arith.constant 0 : index
    %c0_2 = arith.constant 0 : index
    %2 = vector.load %arg2[%c0_1, %c0_2] : memref<1x4096xf32, #tpu.memory_space<vmem>>, vector<1x4096xf32>
    %3 = vector.broadcast %2 : vector<1x4096xf32> to vector<2x4096xf32>
    %4 = arith.mulf %1, %3 : vector<2x4096xf32>
    %c0_3 = arith.constant 0 : index
    %c0_4 = arith.constant 0 : index
    %5 = vector.load %arg3[%c0_3, %c0_4] : memref<1x4096xf32, #tpu.memory_space<vmem>>, vector<1x4096xf32>
    %6 = vector.broadcast %5 : vector<1x4096xf32> to vector<2x4096xf32>
    %7 = arith.addf %4, %6 : vector<2x4096xf32>
    %cst = arith.constant 0.000000e+00 : f32
    %8 = vector.broadcast %cst : f32 to vector<2x4096xf32>
    %9 = arith.cmpf oge, %7, %8 : vector<2x4096xf32>
    %cst_5 = arith.constant 2.000000e-01 : f32
    %10 = vector.broadcast %cst_5 : f32 to vector<2x4096xf32>
    %11 = arith.mulf %10, %7 : vector<2x4096xf32>
    %12 = arith.select %9, %7, %11 : vector<2x4096xi1>, vector<2x4096xf32>
    %c0_6 = arith.constant 0 : index
    %c0_7 = arith.constant 0 : index
    %13 = vector.load %arg4[%c0_6, %c0_7] : memref<1x4096xf32, #tpu.memory_space<vmem>>, vector<1x4096xf32>
    %14 = vector.broadcast %13 : vector<1x4096xf32> to vector<2x4096xf32>
    %15 = arith.mulf %12, %14 : vector<2x4096xf32>
    %cst_8 = arith.constant dense<0.000000e+00> : vector<2xf32>
    %16 = vector.multi_reduction <add>, %15, %cst_8 [1] : vector<2x4096xf32> to vector<2xf32>
    %17 = vector.shape_cast %16 : vector<2xf32> to vector<2x1xf32>
    %c0_9 = arith.constant 0 : index
    %c0_10 = arith.constant 0 : index
    %18 = vector.load %arg5[%c0_9, %c0_10] : memref<2x1xf32, #tpu.memory_space<vmem>>, vector<2x1xf32>
    tpu.vector_store %arg5[%c0_9, %c0_10], %17 {strides = array<i32>} : memref<2x1xf32, #tpu.memory_space<vmem>>, vector<2x1xf32>,
    return
  }
  func.func @transform_0(%arg0: i32) -> (i32, i32) {
    %c0_i32 = arith.constant 0 : i32
    %c0_i32_0 = arith.constant 0 : i32
    return %arg0, %c0_i32 : i32, i32
  }
  func.func @transform_1(%arg0: i32) -> (i32, i32) {
    %c0_i32 = arith.constant 0 : i32
    %c0_i32_0 = arith.constant 0 : i32
    %c0_i32_1 = arith.constant 0 : i32
    return %c0_i32, %c0_i32_0 : i32, i32
  }
  func.func @transform_2(%arg0: i32) -> (i32, i32) {
    %c0_i32 = arith.constant 0 : i32
    %c0_i32_0 = arith.constant 0 : i32
    %c0_i32_1 = arith.constant 0 : i32
    return %c0_i32, %c0_i32_0 : i32, i32
  }
  func.func @transform_3(%arg0: i32) -> (i32, i32) {
    %c0_i32 = arith.constant 0 : i32
    %c0_i32_0 = arith.constant 0 : i32
    %c0_i32_1 = arith.constant 0 : i32
    return %c0_i32, %c0_i32_0 : i32, i32
  }
  func.func @transform_4(%arg0: i32) -> (i32, i32) {
    %c0_i32 = arith.constant 0 : i32
    %c0_i32_0 = arith.constant 0 : i32
    return %arg0, %c0_i32 : i32, i32
  }
}

</mosaic_0001>

<bundles_post_ra>
// kernel: discriminator_32_forward.5
= control target key start
LH: loop header
LB: loop body
LE: loop exit
PB: predicated region body
PF: predicated region fallthrough
CT: control target
= control target key end

     0   :  { %s1020_s12 = smov 0   ;;  %s1443_s0 = inlined_call_operand.vmem [shape: bf16[2,16,16,48], index: 0, kind: input, shape index: {}]   ;;  %s1444_s1 = inlined_call_operand.vmem [shape: bf16[1,48,64], index: 1, kind: input, shape index: {}]   ;;  %s1445_s2 = inlined_call_operand.vmem [shape: bf16[512,64], index: 2, kind: output, shape index: {0}]   ;;  %s1446_s3 = inlined_call_operand.vmem [shape: f32[2,2,64], index: 3, kind: output, shape index: {1}]  }
   0x1 LB: > { %s1026_s13 = sadd.s32 4294967295, %s998_s12   ;;  %p855_p0 = scmp.ge.s32.totalorder %s998_s12, 1  ;;  %s998_s12 = sphi %s1020_s12, %s14_s12  }
   0x2   : > { %p140_p1 = scmp.lt.s32.totalorder %s998_s12, 3 }
   0x4   : > { %p141_p2 = pnand %p855_p0, %p140_p1 }
   0x5   : > { %p168_p3 = scmp.lt.s32.totalorder (!%p141_p2), %s1026_s13, 1  ;;  %s858_s25 = sshll.u32 (!%p141_p2), %s1026_s13, 5 }
   0x6   : > { %144 = sbr.rel (%p141_p2) target bundleno = 280 (0x118), region = 28  ;;  %p174_p4 = scmp.lt.s32.totalorder (!%p141_p2), %s858_s25, 63 }
   0xb   : > { %v974_v0 = vld [vmem:[%s1444_s1 + $0x10] sm:$0xff]  ;;  %v973_v1 = vld [vmem:[%s1444_s1 + $0x8] sm:$0xff]  ;;  %s1038_s18 = scalar_select %p168_p3, %s1026_s13, 1  ;;  %v972_v2 = vld [vmem:[%s1444_s1] sm:$0xff]  ;;  %vm320_vm0 = vcmask 392192   ;;  %vm458_vm1 = vcmask 523264  }
   0xc   : > { %374 = vmatpush.bf16.msra.mxu0 %v974_v0  ;;  %975 = vmatpush.bf16.msra.mxu1 %v974_v0  ;;  %s1448_s25 = smov (!%p174_p4, %s858_s25), 63  ;;  %vm555_vm2 = vcmask 519168   ;;  %vm760_vm3 = vcmask 1040384   ;;  %vm762_vm4 = vcmask 517120  }
   0xd   : > { %976 = vmatpush.bf16.msra.mxu2 %v974_v0  ;;  %977 = vmatpush.bf16.msra.mxu3 %v974_v0  ;;  %s955_s19 = sshll.u32 %s1038_s18, 7  ;;  %s859_s26 = sshll.u32 %s1448_s25, 2 }
   0xe   : > { %s1047_s24 = scalar_lea.vmem %s1443_s0, %s955_s19  ;;  %s1087_s29 = scalar_lea.vmem %s1445_s2, %s859_s26 }
   0xf   : > { %v956_v3 = vld [vmem:[%s1047_s24] sm:$0xff]  ;;  %v957_v7 = vld [vmem:[%s1047_s24 + $0x8] sm:$0xff]  ;;  %v958_v11 = vld [vmem:[%s1047_s24 + $0x10] sm:$0xff]  ;;  %s860_s30 = sshll.u32 %s1038_s18, 1 }
  0x10   : > { %375 = vmatpush.bf16.msra.mxu0 %v973_v1  ;;  %978 = vmatpush.bf16.msra.mxu1 %v973_v1  ;;  %v960_v4 = vld [vmem:[%s1047_s24 + $0x20] sm:$0xff]  ;;  %v961_v8 = vld [vmem:[%s1047_s24 + $0x28] sm:$0xff]  ;;  %v962_v12 = vld [vmem:[%s1047_s24 + $0x30] sm:$0xff]  ;;  %s182_s6 = scalar_lea.vmem %s1446_s3, %s860_s30 }
  0x11   : > { %979 = vmatpush.bf16.msra.mxu2 %v973_v1  ;;  %980 = vmatpush.bf16.msra.mxu3 %v973_v1  ;;  %v964_v5 = vld [vmem:[%s1047_s24 + $0x40] sm:$0xff]  ;;  %v965_v9 = vld [vmem:[%s1047_s24 + $0x48] sm:$0xff]  ;;  %v966_v13 = vld [vmem:[%s1047_s24 + $0x50] sm:$0xff] }
  0x12   : > { %v968_v6 = vld [vmem:[%s1047_s24 + $0x60] sm:$0xff]  ;;  %v969_v10 = vld [vmem:[%s1047_s24 + $0x68] sm:$0xff]  ;;  %v970_v14 = vld [vmem:[%s1047_s24 + $0x70] sm:$0xff] }
  0x13   : > { %v959_v15 = vld [vmem:[%s1047_s24 + $0x18] sm:$0xff] }
  0x14   : > { %376 = vmatpush.bf16.msra.mxu0 %v972_v2  ;;  %981 = vmatpush.bf16.msra.mxu1 %v972_v2  ;;  %v963_v16 = vld [vmem:[%s1047_s24 + $0x38] sm:$0xff] }
  0x15   : > { %982 = vmatpush.bf16.msra.mxu2 %v972_v2  ;;  %983 = vmatpush.bf16.msra.mxu3 %v972_v2  ;;  %v967_v17 = vld [vmem:[%s1047_s24 + $0x58] sm:$0xff] }
  0x16   : > { %v971_v18 = vld [vmem:[%s1047_s24 + $0x78] sm:$0xff] }
  0x17   : > { %937 = vmatmul.msk.bf16.vlgmr.msra.gmra.mxu0 %vm320_vm0, %v956_v3  ;;  %941 = vmatmul.msk.bf16.vlgmr.msra.gmra.mxu1 %vm320_vm0, %v960_v4 }
  0x18   : > { %945 = vmatmul.msk.bf16.vlgmr.msra.gmra.mxu2 %vm320_vm0, %v964_v5  ;;  %949 = vmatmul.msk.bf16.vlgmr.msra.gmra.mxu3 %vm320_vm0, %v968_v6 }
  0x27   : > { %938 = vmatmul.msk.bf16.gmra.mxu0 %vm320_vm0, %v957_v7  ;;  %942 = vmatmul.msk.bf16.gmra.mxu1 %vm320_vm0, %v961_v8 }
  0x28   : > { %946 = vmatmul.msk.bf16.gmra.mxu2 %vm320_vm0, %v965_v9  ;;  %950 = vmatmul.msk.bf16.gmra.mxu3 %vm320_vm0, %v969_v10 }
  0x37   : > { %939 = vmatmul.msk.bf16.gmra.mxu0 %vm320_vm0, %v958_v11  ;;  %943 = vmatmul.msk.bf16.gmra.mxu1 %vm320_vm0, %v962_v12 }
  0x38   : > { %947 = vmatmul.msk.bf16.gmra.mxu2 %vm320_vm0, %v966_v13  ;;  %951 = vmatmul.msk.bf16.gmra.mxu3 %vm320_vm0, %v970_v14 }
  0x47   : > { %940 = vmatmul.msk.bf16.gmra.mxu0 %vm320_vm0, %v959_v15  ;;  %944 = vmatmul.msk.bf16.gmra.mxu1 %vm320_vm0, %v963_v16 }
  0x48   : > { %948 = vmatmul.msk.bf16.gmra.mxu2 %vm320_vm0, %v967_v17  ;;  %952 = vmatmul.msk.bf16.gmra.mxu3 %vm320_vm0, %v971_v18 }
  0x94   : > { %v378_v19 = vpop.f32.mrf.mxu0  ;;  %v398_v20 = vpop.f32.mrf.mxu1 }
  0x95   : > { %459 = vst.msk [vmem:[#allocation2] sm:$0xff] %vm458_vm1, %v378_v19 }
  0x96   : > { %467 = vst.msk [vmem:[#allocation2 + $0x40] sm:$0xff] %vm458_vm1, %v398_v20 }
  0x9b   : > { %v418_v21 = vpop.f32.mrf.mxu2  ;;  %v438_v27 = vpop.f32.mrf.mxu3 }
  0x9c   : > { %v1089_v22 = vld [vmem:[#allocation2] sm:$0xff]  ;;  %v380_v23 = vpop.f32.mrf.mxu0  ;;  %v400_v24 = vpop.f32.mrf.mxu1  ;;  %475 = vst.msk [vmem:[#allocation2 + $0x80] sm:$0xff] %vm458_vm1, %v418_v21 }
  0x9d   : > { %v523_v25 = vpack.c.bf16 %v1089_v22, %v1089_v22  ;;  %460 = vst.msk [vmem:[#allocation2 + $0x8] sm:$0xff] %vm458_vm1, %v380_v23  ;;  %v1095_v26 = vld [vmem:[#allocation2 + $0x40] sm:$0xff] }
  0x9e   : > { %v531_v28 = vpack.c.bf16 %v1095_v26, %v1095_v26  ;;  %468 = vst.msk [vmem:[#allocation2 + $0x48] sm:$0xff] %vm458_vm1, %v400_v24 }
  0x9f   : > { %556 = vst.msk [vmem:[%s1087_s29] sm:$0xf] %vm555_vm2, %v523_v25  ;;  %v658_v25 = vmul.f32 %v1089_v22, %v1089_v22 }
  0xa0   : > { %564 = vst.msk [vmem:[%s1087_s29 + $0x20] sm:$0xf] %vm555_vm2, %v531_v28 }
  0xa1   : > { %483 = vst.msk [vmem:[#allocation2 + $0xc0] sm:$0xff] %vm458_vm1, %v438_v27 }
  0xa3   : > { %v1105_v29 = vld [vmem:[#allocation2 + $0x80] sm:$0xff]  ;;  %v420_v30 = vpop.f32.mrf.mxu2  ;;  %v440_v37 = vpop.f32.mrf.mxu3 }
  0xa4   : > { %v1107_v31 = vld [vmem:[#allocation2 + $0x8] sm:$0xff]  ;;  %v383_v32 = vpop.f32.mrf.mxu0  ;;  %v403_v33 = vpop.f32.mrf.mxu1  ;;  %476 = vst.msk [vmem:[#allocation2 + $0x88] sm:$0xff] %vm458_vm1, %v420_v30  ;;  %v539_v36 = vpack.c.bf16 %v1105_v29, %v1105_v29 }
  0xa5   : > { %v524_v34 = vpack.c.bf16 %v1107_v31, %v1107_v31  ;;  %461 = vst.msk [vmem:[#allocation2 + $0x10] sm:$0xff] %vm458_vm1, %v383_v32  ;;  %v1113_v35 = vld [vmem:[#allocation2 + $0x48] sm:$0xff]  ;;  %v659_v17 = vmul.f32 %v1107_v31, %v1107_v31  ;;  %v589_v27 = vsel %vm458_vm1, %v1107_v31, 0.0  ;;  %v588_v32 = vsel %vm458_vm1, %v1089_v22, 0.0 }
  0xa6   : > { %v532_v38 = vpack.c.bf16 %v1113_v35, %v1113_v35  ;;  %469 = vst.msk [vmem:[#allocation2 + $0x50] sm:$0xff] %vm458_vm1, %v403_v33  ;;  %v590_v31 = vadd.f32 %v589_v27, %v588_v32 }
  0xa7   : > { %557 = vst.msk [vmem:[%s1087_s29 + $0x4] sm:$0xf] %vm555_vm2, %v524_v34  ;;  %v691_v33 = vsel %vm458_vm1, %v659_v17, 0.0 }
  0xa8   : > { %565 = vst.msk [vmem:[%s1087_s29 + $0x24] sm:$0xf] %vm555_vm2, %v532_v38  ;;  %v1124_v39 = vld [vmem:[#allocation2 + $0xc0] sm:$0xff] }
  0xa9   : > { %572 = vst.msk [vmem:[%s1087_s29 + $0x40] sm:$0xf] %vm555_vm2, %v539_v36  ;;  %v547_v40 = vpack.c.bf16 %v1124_v39, %v1124_v39  ;;  %v690_v36 = vsel %vm458_vm1, %v658_v25, 0.0  ;;  %v666_v25 = vmul.f32 %v1095_v26, %v1095_v26 }
  0xaa   : > { %484 = vst.msk [vmem:[#allocation2 + $0xc8] sm:$0xff] %vm458_vm1, %v440_v37 }
  0xab   : > { %v1131_v41 = vld [vmem:[#allocation2 + $0x88] sm:$0xff]  ;;  %v423_v42 = vpop.f32.mrf.mxu2  ;;  %580 = vst.msk [vmem:[%s1087_s29 + $0x60] sm:$0xf] %vm555_vm2, %v547_v40  ;;  %v443_v49 = vpop.f32.mrf.mxu3 }
  0xac   : > { %v1135_v43 = vld [vmem:[#allocation2 + $0x10] sm:$0xff]  ;;  %v385_v44 = vpop.f32.mrf.mxu0  ;;  %v405_v45 = vpop.f32.mrf.mxu1  ;;  %477 = vst.msk [vmem:[#allocation2 + $0x90] sm:$0xff] %vm458_vm1, %v423_v42  ;;  %v540_v48 = vpack.c.bf16 %v1131_v41, %v1131_v41 }
  0xad   : > { %v525_v46 = vpack.c.bf16 %v1135_v43, %v1135_v43  ;;  %462 = vst.msk [vmem:[#allocation2 + $0x18] sm:$0xff] %vm458_vm1, %v385_v44  ;;  %v1141_v47 = vld [vmem:[#allocation2 + $0x50] sm:$0xff]  ;;  %v660_v28 = vmul.f32 %v1135_v43, %v1135_v43  ;;  %v591_v34 = vsel %vm458_vm1, %v1135_v43, 0.0  ;;  %v692_v44 = vadd.f32 %v691_v33, %v690_v36 }
  0xae   : > { %v533_v50 = vpack.c.bf16 %v1141_v47, %v1141_v47  ;;  %470 = vst.msk [vmem:[#allocation2 + $0x58] sm:$0xff] %vm458_vm1, %v405_v45  ;;  %v592_v43 = vadd.f32 %v591_v34, %v590_v31 }
  0xaf   : > { %558 = vst.msk [vmem:[%s1087_s29 + $0x8] sm:$0xf] %vm555_vm2, %v525_v46  ;;  %v693_v37 = vsel %vm458_vm1, %v660_v28, 0.0 }
  0xb0   : > { %566 = vst.msk [vmem:[%s1087_s29 + $0x28] sm:$0xf] %vm555_vm2, %v533_v50 }
  0xb1   : > { %573 = vst.msk [vmem:[%s1087_s29 + $0x44] sm:$0xf] %vm555_vm2, %v540_v48  ;;  %v1157_v53 = vld [vmem:[#allocation2 + $0xc8] sm:$0xff] }
  0xb2   : > { %485 = vst.msk [vmem:[#allocation2 + $0xd0] sm:$0xff] %vm458_vm1, %v443_v49  ;;  %v548_v62 = vpack.c.bf16 %v1157_v53, %v1157_v53 }
  0xb3   : > { %v1155_v51 = vld [vmem:[#allocation2 + $0x90] sm:$0xff]  ;;  %v425_v52 = vpop.f32.mrf.mxu2  ;;  %v445_v60 = vpop.f32.mrf.mxu3 }
  0xb4   : > { %v1159_v54 = vld [vmem:[#allocation2 + $0x18] sm:$0xff]  ;;  %v388_v55 = vpop.f32.mrf.mxu0  ;;  %v408_v56 = vpop.f32.mrf.mxu1  ;;  %478 = vst.msk [vmem:[#allocation2 + $0x98] sm:$0xff] %vm458_vm1, %v425_v52  ;;  %v541_v59 = vpack.c.bf16 %v1155_v51, %v1155_v51 }
  0xb5   : > { %v526_v57 = vpack.c.bf16 %v1159_v54, %v1159_v54  ;;  %463 = vst.msk [vmem:[#allocation2 + $0x20] sm:$0xff] %vm458_vm1, %v388_v55  ;;  %v1165_v58 = vld [vmem:[#allocation2 + $0x58] sm:$0xff]  ;;  %v661_v30 = vmul.f32 %v1159_v54, %v1159_v54  ;;  %v593_v38 = vsel %vm458_vm1, %v1159_v54, 0.0 }
  0xb6   : > { %v534_v61 = vpack.c.bf16 %v1165_v58, %v1165_v58  ;;  %471 = vst.msk [vmem:[#allocation2 + $0x60] sm:$0xff] %vm458_vm1, %v408_v56 }
  0xb7   : > { %559 = vst.msk [vmem:[%s1087_s29 + $0xc] sm:$0xf] %vm555_vm2, %v526_v57  ;;  %v695_v45 = vsel %vm458_vm1, %v661_v30, 0.0 }
  0xb8   : > { %567 = vst.msk [vmem:[%s1087_s29 + $0x2c] sm:$0xf] %vm555_vm2, %v534_v61  ;;  %v594_v61 = vadd.f32 %v593_v38, %v592_v43  ;;  %v667_v38 = vmul.f32 %v1113_v35, %v1113_v35  ;;  %v705_v43 = vsel %vm458_vm1, %v666_v25, 0.0 }
  0xb9   : > { %574 = vst.msk [vmem:[%s1087_s29 + $0x48] sm:$0xf] %vm555_vm2, %v541_v59  ;;  %v1186_v4 = vld [vmem:[#allocation2 + $0xd0] sm:$0xff] }
  0xba   : > { %581 = vst.msk [vmem:[%s1087_s29 + $0x64] sm:$0xf] %vm555_vm2, %v548_v62  ;;  %v549_v10 = vpack.c.bf16 %v1186_v4, %v1186_v4 }
  0xbb   : > { %v1182_v63 = vld [vmem:[#allocation2 + $0x98] sm:$0xff]  ;;  %v428_v0 = vpop.f32.mrf.mxu2  ;;  %486 = vst.msk [vmem:[#allocation2 + $0xd8] sm:$0xff] %vm458_vm1, %v445_v60  ;;  %v448_v8 = vpop.f32.mrf.mxu3  ;;  %v694_v60 = vadd.f32 %v693_v37, %v692_v44  ;;  %v603_v37 = vsel %vm458_vm1, %v1095_v26, 0.0 }
  0xbc   : > { %v495_v1 = vld [vmem:[#allocation2 + $0x20] sm:$0xff]  ;;  %v390_v2 = vpop.f32.mrf.mxu0  ;;  %v410_v3 = vpop.f32.mrf.mxu1  ;;  %479 = vst.msk [vmem:[#allocation2 + $0xa0] sm:$0xff] %vm458_vm1, %v428_v0  ;;  %v542_v7 = vpack.c.bf16 %v1182_v63, %v1182_v63 }
  0xbd   : > { %v527_v5 = vpack.c.bf16 %v495_v1, %v495_v1  ;;  %464 = vst.msk [vmem:[#allocation2 + $0x28] sm:$0xff] %vm458_vm1, %v390_v2  ;;  %v1189_v6 = vld [vmem:[#allocation2 + $0x60] sm:$0xff]  ;;  %v662_v40 = vmul.f32 %v495_v1, %v495_v1  ;;  %v595_v52 = vsel %vm458_vm1, %v495_v1, 0.0 }
  0xbe   : > { %v535_v9 = vpack.c.bf16 %v1189_v6, %v1189_v6  ;;  %472 = vst.msk [vmem:[#allocation2 + $0x68] sm:$0xff] %vm458_vm1, %v410_v3 }
  0xbf   : > { %560 = vst.msk [vmem:[%s1087_s29 + $0x10] sm:$0xf] %vm555_vm2, %v527_v5  ;;  %v697_v1 = vsel %vm458_vm1, %v662_v40, 0.0  ;;  %v696_v5 = vadd.f32 %v695_v45, %v694_v60  ;;  %v605_v45 = vsel %vm458_vm1, %v1113_v35, 0.0 }
  0xc0   : > { %568 = vst.msk [vmem:[%s1087_s29 + $0x30] sm:$0xf] %vm555_vm2, %v535_v9 }
  0xc1   : > { %575 = vst.msk [vmem:[%s1087_s29 + $0x4c] sm:$0xf] %vm555_vm2, %v542_v7  ;;  %v596_v7 = vadd.f32 %v595_v52, %v594_v61  ;;  %v607_v52 = vsel %vm458_vm1, %v1141_v47, 0.0 }
  0xc2   : > { %582 = vst.msk [vmem:[%s1087_s29 + $0x68] sm:$0xf] %vm555_vm2, %v549_v10  ;;  %v1208_v13 = vld [vmem:[#allocation2 + $0xd8] sm:$0xff]  ;;  %v698_v10 = vadd.f32 %v697_v1, %v696_v5  ;;  %v611_v5 = vsel %vm458_vm1, %v1189_v6, 0.0 }
  0xc3   : > { %v1206_v11 = vld [vmem:[#allocation2 + $0xa0] sm:$0xff]  ;;  %v430_v12 = vpop.f32.mrf.mxu2  ;;  %487 = vst.msk [vmem:[#allocation2 + $0xe0] sm:$0xff] %vm458_vm1, %v448_v8  ;;  %v450_v21 = vpop.f32.mrf.mxu3  ;;  %v550_v24 = vpack.c.bf16 %v1208_v13, %v1208_v13 }
  0xc4   : > { %v496_v14 = vld [vmem:[#allocation2 + $0x28] sm:$0xff]  ;;  %v393_v15 = vpop.f32.mrf.mxu0  ;;  %v413_v16 = vpop.f32.mrf.mxu1  ;;  %480 = vst.msk [vmem:[#allocation2 + $0xa8] sm:$0xff] %vm458_vm1, %v430_v12  ;;  %v543_v20 = vpack.c.bf16 %v1206_v11, %v1206_v11 }
  0xc5   : > { %v528_v18 = vpack.c.bf16 %v496_v14, %v496_v14  ;;  %465 = vst.msk [vmem:[#allocation2 + $0x30] sm:$0xff] %vm458_vm1, %v393_v15  ;;  %v1215_v19 = vld [vmem:[#allocation2 + $0x68] sm:$0xff]  ;;  %v663_v54 = vmul.f32 %v496_v14, %v496_v14  ;;  %v597_v2 = vsel %vm458_vm1, %v496_v14, 0.0 }
  0xc6   : > { %v536_v23 = vpack.c.bf16 %v1215_v19, %v1215_v19  ;;  %473 = vst.msk [vmem:[#allocation2 + $0x70] sm:$0xff] %vm458_vm1, %v413_v16  ;;  %v598_v12 = vadd.f32 %v597_v2, %v596_v7  ;;  %v671_v7 = vmul.f32 %v1215_v19, %v1215_v19 }
  0xc7   : > { %561 = vst.msk [vmem:[%s1087_s29 + $0x14] sm:$0xf] %vm555_vm2, %v528_v18  ;;  %v699_v8 = vsel %vm458_vm1, %v663_v54, 0.0  ;;  %v669_v54 = vmul.f32 %v1165_v58, %v1165_v58 }
  0xc8   : > { %569 = vst.msk [vmem:[%s1087_s29 + $0x34] sm:$0xf] %vm555_vm2, %v536_v23 }
  0xc9   : > { %576 = vst.msk [vmem:[%s1087_s29 + $0x50] sm:$0xf] %vm555_vm2, %v543_v20  ;;  %v700_v20 = vadd.f32 %v699_v8, %v698_v10 }
  0xca   : > { %583 = vst.msk [vmem:[%s1087_s29 + $0x6c] sm:$0xf] %vm555_vm2, %v550_v24  ;;  %v1254_v50 = vld [vmem:[#allocation2 + $0xe0] sm:$0xff] }
  0xcb   : > { %v1249_v42 = vld [vmem:[#allocation2 + $0xa8] sm:$0xff]  ;;  %v433_v22 = vpop.f32.mrf.mxu2  ;;  %488 = vst.msk [vmem:[#allocation2 + $0xe8] sm:$0xff] %vm458_vm1, %v450_v21  ;;  %v453_v59 = vpop.f32.mrf.mxu3  ;;  %v551_v0 = vpack.c.bf16 %v1254_v50, %v1254_v50 }
  0xcc   : > { %v497_v46 = vld [vmem:[#allocation2 + $0x30] sm:$0xff]  ;;  %v395_v48 = vpop.f32.mrf.mxu0  ;;  %v415_v49 = vpop.f32.mrf.mxu1  ;;  %481 = vst.msk [vmem:[#allocation2 + $0xb0] sm:$0xff] %vm458_vm1, %v433_v22  ;;  %v544_v57 = vpack.c.bf16 %v1249_v42, %v1249_v42 }
  0xcd   : > { %v529_v55 = vpack.c.bf16 %v497_v46, %v497_v46  ;;  %466 = vst.msk [vmem:[#allocation2 + $0x38] sm:$0xff] %vm458_vm1, %v395_v48  ;;  %v1258_v56 = vld [vmem:[#allocation2 + $0x70] sm:$0xff]  ;;  %v664_v3 = vmul.f32 %v497_v46, %v497_v46  ;;  %v599_v9 = vsel %vm458_vm1, %v497_v46, 0.0  ;;  %v668_v46 = vmul.f32 %v1141_v47, %v1141_v47 }
  0xce   : > { %v537_v62 = vpack.c.bf16 %v1258_v56, %v1258_v56  ;;  %474 = vst.msk [vmem:[#allocation2 + $0x78] sm:$0xff] %vm458_vm1, %v415_v49  ;;  %v600_v21 = vadd.f32 %v599_v9, %v598_v12  ;;  %v707_v49 = vsel %vm458_vm1, %v667_v38, 0.0  ;;  %v670_v47 = vmul.f32 %v1189_v6, %v1189_v6 }
  0xcf   : > { %562 = vst.msk [vmem:[%s1087_s29 + $0x18] sm:$0xf] %vm555_vm2, %v529_v55  ;;  %v701_v14 = vsel %vm458_vm1, %v664_v3, 0.0  ;;  %v709_v61 = vsel %vm458_vm1, %v668_v46, 0.0  ;;  %v711_v3 = vsel %vm458_vm1, %v669_v54, 0.0  ;;  %v613_v12 = vsel %vm458_vm1, %v1215_v19, 0.0 }
  0xd0   : > { %570 = vst.msk [vmem:[%s1087_s29 + $0x38] sm:$0xf] %vm555_vm2, %v537_v62  ;;  %v702_v33 = vadd.f32 %v701_v14, %v700_v20  ;;  %v609_v62 = vsel %vm458_vm1, %v1165_v58, 0.0  ;;  %v713_v10 = vsel %vm458_vm1, %v670_v47, 0.0  ;;  %v672_v14 = vmul.f32 %v1258_v56, %v1258_v56 }
  0xd1   : > { %577 = vst.msk [vmem:[%s1087_s29 + $0x54] sm:$0xf] %vm555_vm2, %v544_v57  ;;  %v715_v20 = vsel %vm458_vm1, %v671_v7, 0.0  ;;  %v674_v19 = vmul.f32 %v1105_v29, %v1105_v29 }
  0xd2   : > { %584 = vst.msk [vmem:[%s1087_s29 + $0x70] sm:$0xf] %vm555_vm2, %v551_v0  ;;  %v1279_v15 = vld [vmem:[#allocation2 + $0xe8] sm:$0xff] }
  0xd3   : > { %v1282_v16 = vld [vmem:[#allocation2 + $0xb0] sm:$0xff]  ;;  %v435_v17 = vpop.f32.mrf.mxu2  ;;  %v552_v18 = vpack.c.bf16 %v1279_v15, %v1279_v15  ;;  %489 = vst.msk [vmem:[#allocation2 + $0xf0] sm:$0xff] %vm458_vm1, %v453_v59  ;;  %v455_v36 = vpop.f32.mrf.mxu3  ;;  %v721_v38 = vsel %vm458_vm1, %v674_v19, 0.0  ;;  %v685_v19 = vmul.f32 %v1208_v13, %v1208_v13 }
  0xd4   : > { %v498_v23 = vld [vmem:[#allocation2 + $0x38] sm:$0xff]  ;;  %v545_v24 = vpack.c.bf16 %v1282_v16, %v1282_v16  ;;  %482 = vst.msk [vmem:[#allocation2 + $0xb8] sm:$0xff] %vm458_vm1, %v435_v17  ;;  %v680_v47 = vmul.f32 %v1282_v16, %v1282_v16 }
  0xd5   : > { %v530_v27 = vpack.c.bf16 %v498_v23, %v498_v23  ;;  %v601_v28 = vsel %vm458_vm1, %v498_v23, 0.0  ;;  %v665_v30 = vmul.f32 %v498_v23, %v498_v23  ;;  %v506_v32 = vld [vmem:[#allocation2 + $0x78] sm:$0xff]  ;;  %585 = vst.msk [vmem:[%s1087_s29 + $0x74] sm:$0xf] %vm555_vm2, %v552_v18 }
  0xd6   : > { %v602_v34 = vadd.f32 %v601_v28, %v600_v21  ;;  %v538_v31 = vpack.c.bf16 %v506_v32, %v506_v32  ;;  %578 = vst.msk [vmem:[%s1087_s29 + $0x58] sm:$0xf] %vm555_vm2, %v545_v24  ;;  %v615_v21 = vsel %vm458_vm1, %v1258_v56, 0.0  ;;  %v673_v23 = vmul.f32 %v506_v32, %v506_v32 }
  0xd7   : > { %563 = vst.msk [vmem:[%s1087_s29 + $0x1c] sm:$0xf] %vm555_vm2, %v530_v27  ;;  %v703_v40 = vsel %vm458_vm1, %v665_v30, 0.0  ;;  %v717_v27 = vsel %vm458_vm1, %v672_v14, 0.0  ;;  %v617_v28 = vsel %vm458_vm1, %v506_v32, 0.0  ;;  %v675_v56 = vmul.f32 %v1131_v41, %v1131_v41 }
  0xd8   : > { %v604_v22 = vadd.f32 %v603_v37, %v602_v34  ;;  %v704_v44 = vadd.f32 %v703_v40, %v702_v33  ;;  %571 = vst.msk [vmem:[%s1087_s29 + $0x3c] sm:$0xf] %vm555_vm2, %v538_v31  ;;  %v619_v34 = vsel %vm458_vm1, %v1105_v29, 0.0  ;;  %v719_v31 = vsel %vm458_vm1, %v673_v23, 0.0 }
  0xd9   : > { %490 = vst.msk [vmem:[#allocation2 + $0xf8] sm:$0xff] %vm458_vm1, %v455_v36  ;;  %v621_v40 = vsel %vm458_vm1, %v1131_v41, 0.0  ;;  %v676_v32 = vmul.f32 %v1155_v51, %v1155_v51  ;;  %v623_v29 = vsel %vm458_vm1, %v1155_v51, 0.0  ;;  %v625_v41 = vsel %vm458_vm1, %v1182_v63, 0.0 }
  0xda   : > { %v606_v26 = vadd.f32 %v605_v45, %v604_v22  ;;  %v706_v48 = vadd.f32 %v705_v43, %v704_v44  ;;  %v1321_v60 = vld [vmem:[#allocation2 + $0xf0] sm:$0xff]  ;;  %v723_v43 = vsel %vm458_vm1, %v675_v56, 0.0  ;;  %v677_v45 = vmul.f32 %v1182_v63, %v1182_v63 }
  0xdb   : > { %v1317_v55 = vld [vmem:[#allocation2 + $0xb8] sm:$0xff]  ;;  %v553_v0 = vpack.c.bf16 %v1321_v60, %v1321_v60  ;;  %v627_v51 = vsel %vm458_vm1, %v1206_v11, 0.0  ;;  %v629_v63 = vsel %vm458_vm1, %v1249_v42, 0.0  ;;  %v635_v14 = vsel %vm458_vm1, %v1124_v39, 0.0 }
  0xdc   : > { %v608_v35 = vadd.f32 %v607_v52, %v606_v26  ;;  %v708_v57 = vadd.f32 %v707_v49, %v706_v48  ;;  %v546_v59 = vpack.c.bf16 %v1317_v55, %v1317_v55  ;;  %v725_v48 = vsel %vm458_vm1, %v676_v32, 0.0 }
  0xdd   : > { %586 = vst.msk [vmem:[%s1087_s29 + $0x78] sm:$0xf] %vm555_vm2, %v553_v0  ;;  %v678_v49 = vmul.f32 %v1206_v11, %v1206_v11  ;;  %v631_v11 = vsel %vm458_vm1, %v1282_v16, 0.0  ;;  %v683_v16 = vmul.f32 %v1157_v53, %v1157_v53  ;;  %v688_v32 = vmul.f32 %v1321_v60, %v1321_v60 }
  0xde   : > { %v710_v1 = vadd.f32 %v709_v61, %v708_v57  ;;  %v610_v2 = vadd.f32 %v609_v62, %v608_v35  ;;  %579 = vst.msk [vmem:[%s1087_s29 + $0x5c] sm:$0xf] %vm555_vm2, %v546_v59  ;;  %v727_v35 = vsel %vm458_vm1, %v677_v45, 0.0  ;;  %v679_v57 = vmul.f32 %v1249_v42, %v1249_v42 }
  0xdf   : > { %v729_v62 = vsel %vm458_vm1, %v678_v49, 0.0  ;;  %v733_v42 = vsel %vm458_vm1, %v680_v47, 0.0 }
  0xe0   : > { %v612_v58 = vadd.f32 %v611_v5, %v610_v2  ;;  %v712_v8 = vadd.f32 %v711_v3, %v710_v1  ;;  %v1339_v9 = vld [vmem:[#allocation2 + $0xf8] sm:$0xff]  ;;  %v731_v2 = vsel %vm458_vm1, %v679_v57, 0.0  ;;  %v681_v3 = vmul.f32 %v1317_v55, %v1317_v55 }
  0xe1   : > { %v554_v6 = vpack.c.bf16 %v1339_v9, %v1339_v9 }
  0xe2   : > { %v614_v17 = vadd.f32 %v613_v12, %v612_v58  ;;  %v714_v18 = vadd.f32 %v713_v10, %v712_v8  ;;  %v682_v58 = vmul.f32 %v1124_v39, %v1124_v39  ;;  %v633_v8 = vsel %vm458_vm1, %v1317_v55, 0.0 }
  0xe3   : > { %587 = vst.msk [vmem:[%s1087_s29 + $0x7c] sm:$0xf] %vm555_vm2, %v554_v6  ;;  %v735_v6 = vsel %vm458_vm1, %v681_v3, 0.0  ;;  %v684_v55 = vmul.f32 %v1186_v4, %v1186_v4  ;;  %v639_v39 = vsel %vm458_vm1, %v1186_v4, 0.0  ;;  %v643_v4 = vsel %vm458_vm1, %v1254_v50, 0.0 }
  0xe4   : > { %v616_v24 = vadd.f32 %v615_v21, %v614_v17  ;;  %v716_v25 = vadd.f32 %v715_v20, %v714_v18  ;;  %v737_v20 = vsel %vm458_vm1, %v682_v58, 0.0  ;;  %v637_v21 = vsel %vm458_vm1, %v1157_v53, 0.0 }
  0xe5   : > { %v641_v53 = vsel %vm458_vm1, %v1208_v13, 0.0  ;;  %v645_v13 = vsel %vm458_vm1, %v1279_v15, 0.0 }
  0xe6   : > { %v718_v30 = vadd.f32 %v717_v27, %v716_v25  ;;  %v618_v33 = vadd.f32 %v617_v28, %v616_v24  ;;  %v739_v25 = vsel %vm458_vm1, %v683_v16, 0.0 }
  0xe8   : > { %v620_v36 = vadd.f32 %v619_v34, %v618_v33  ;;  %v720_v37 = vadd.f32 %v719_v31, %v718_v30  ;;  %v741_v30 = vsel %vm458_vm1, %v684_v55, 0.0  ;;  %v686_v33 = vmul.f32 %v1254_v50, %v1254_v50 }
  0xe9   : > { %v743_v31 = vsel %vm458_vm1, %v685_v19, 0.0  ;;  %v647_v50 = vsel %vm458_vm1, %v1321_v60, 0.0 }
  0xea   : > { %v622_v22 = vadd.f32 %v621_v40, %v620_v36  ;;  %v722_v44 = vadd.f32 %v721_v38, %v720_v37  ;;  %v687_v36 = vmul.f32 %v1279_v15, %v1279_v15  ;;  %v745_v40 = vsel %vm458_vm1, %v686_v33, 0.0 }
  0xeb   : > { %v649_v15 = vsel %vm458_vm1, %v1339_v9, 0.0 }
  0xec   : > { %v724_v46 = vadd.f32 %v723_v43, %v722_v44  ;;  %v624_v26 = vadd.f32 %v623_v29, %v622_v22  ;;  %v747_v43 = vsel %vm458_vm1, %v687_v36, 0.0  ;;  %v689_v29 = vmul.f32 %v1339_v9, %v1339_v9 }
  0xee   : > { %v626_v52 = vadd.f32 %v625_v41, %v624_v26  ;;  %v726_v54 = vadd.f32 %v725_v48, %v724_v46  ;;  %v749_v26 = vsel %vm458_vm1, %v688_v32, 0.0  ;;  %v751_v49 = vsel %vm458_vm1, %v689_v29, 0.0 }
  0xf0   : > { %v628_v59 = vadd.f32 %v627_v51, %v626_v52  ;;  %v728_v61 = vadd.f32 %v727_v35, %v726_v54 }
  0xf2   : > { %v630_v0 = vadd.f32 %v629_v63, %v628_v59  ;;  %v730_v1 = vadd.f32 %v729_v62, %v728_v61 }
  0xf4   : > { %v732_v5 = vadd.f32 %v731_v2, %v730_v1  ;;  %v632_v7 = vadd.f32 %v631_v11, %v630_v0 }
  0xf6   : > { %v734_v10 = vadd.f32 %v733_v42, %v732_v5  ;;  %v634_v12 = vadd.f32 %v633_v8, %v632_v7 }
  0xf8   : > { %v636_v17 = vadd.f32 %v635_v14, %v634_v12  ;;  %v736_v18 = vadd.f32 %v735_v6, %v734_v10 }
  0xfa   : > { %v638_v23 = vadd.f32 %v637_v21, %v636_v17  ;;  %v738_v24 = vadd.f32 %v737_v20, %v736_v18 }
  0xfc   : > { %v740_v27 = vadd.f32 %v739_v25, %v738_v24  ;;  %v640_v28 = vadd.f32 %v639_v39, %v638_v23 }
  0xfe   : > { %v642_v34 = vadd.f32 %v641_v53, %v640_v28  ;;  %v742_v56 = vadd.f32 %v741_v30, %v740_v27 }
 0x100   : > { %v644_v37 = vadd.f32 %v643_v4, %v642_v34  ;;  %v744_v38 = vadd.f32 %v743_v31, %v742_v56 }
 0x102   : > { %v646_v22 = vadd.f32 %v645_v13, %v644_v37  ;;  %v746_v44 = vadd.f32 %v745_v40, %v744_v38 }
 0x104   : > { %v748_v45 = vadd.f32 %v747_v43, %v746_v44  ;;  %v648_v46 = vadd.f32 %v647_v50, %v646_v22 }
 0x106   : > { %v750_v48 = vadd.f32 %v749_v26, %v748_v45  ;;  %v650_v41 = vadd.f32 %v649_v15, %v648_v46 }
 0x108   : > { %v651_v52 = vrot.slane %v650_v41, 4  ;;  %v752_v54 = vadd.f32 %v751_v49, %v750_v48 }
 0x10a   : > { %v652_v35 = vadd.f32 %v651_v52, %v650_v41  ;;  %v753_v51 = vrot.slane %v752_v54, 4 }
 0x10c   : > { %v653_v60 = vrot.slane %v652_v35, 2  ;;  %v754_v57 = vadd.f32 %v753_v51, %v752_v54 }
 0x10e   : > { %v654_v59 = vadd.f32 %v653_v60, %v652_v35  ;;  %v755_v61 = vrot.slane %v754_v57, 2 }
 0x110   : > { %v655_v62 = vrot.slane %v654_v59, 1  ;;  %v756_v63 = vadd.f32 %v755_v61, %v754_v57 }
 0x112   : > { %v757_v47 = vrot.slane %v756_v63, 1  ;;  %v656_v9 = vadd.f32 %v655_v62, %v654_v59 }
 0x114   : > { %v758_v0 = vadd.f32 %v757_v47, %v756_v63 }
 0x116   : > { %v761_v1 = vsel %vm760_vm3, %v656_v9, %v758_v0 }
 0x117   : > { %763 = vst.msk [vmem:[%s182_s6] sm:$0x3] %vm762_vm4, %v761_v1 }
 0x118 PF: > { %s14_s12 = sadd.s32 1, %s998_s12  }
 0x119   : > { %p11_p5 = scmp.ge.s32.totalorder %s14_s12, 4  }
 0x11b   :  { %13 = sbr.rel (!%p11_p5) target bundleno = 1 (0x1), region = 70 }

// kernel: discriminator_32_forward.6
= control target key start
LH: loop header
LB: loop body
LE: loop exit
PB: predicated region body
PF: predicated region fallthrough
CT: control target
= control target key end

     0   :  { %s6418_s12 = smov 0   ;;  %s8462_s0 = inlined_call_operand.vmem [shape: bf16[2,18,18,64], index: 0, kind: input, shape index: {}]   ;;  %s8463_s1 = inlined_call_operand.vmem [shape: bf16[9,64,64], index: 1, kind: input, shape index: {}]   ;;  %s8464_s2 = inlined_call_operand.vmem [shape: bf16[512,64], index: 2, kind: output, shape index: {0}]   ;;  %s8465_s3 = inlined_call_operand.vmem [shape: f32[2,2,64], index: 3, kind: output, shape index: {1}]  }
   0x1 LB: > { %s6424_s13 = sadd.s32 4294967295, %s6396_s12   ;;  %p5430_p0 = scmp.ge.s32.totalorder %s6396_s12, 1  ;;  %s6396_s12 = sphi %s6418_s12, %s14_s12  }
   0x2   : > { %p140_p1 = scmp.lt.s32.totalorder %s6396_s12, 3 }
   0x4   : > { %p141_p2 = pnand %p5430_p0, %p140_p1 }
   0x5   : > { %p168_p3 = scmp.lt.s32.totalorder (!%p141_p2), %s6424_s13, 1 }
   0x6   : > { %144 = sbr.rel (%p141_p2) target bundleno = 780 (0x30c), region = 28 }
   0xb   : > { %v6304_v0 = vld [vmem:[%s8463_s1 + $0x18] sm:$0xff]  ;;  %v6303_v1 = vld [vmem:[%s8463_s1 + $0x10] sm:$0xff]  ;;  %s6436_s18 = scalar_select %p168_p3, %s6424_s13, 1  ;;  %v6302_v2 = vld [vmem:[%s8463_s1 + $0x8] sm:$0xff]  ;;  %vm328_vm0 = vcmask 523264   ;;  %vm1343_vm3 = vcmask 1042432  }
   0xc   : > { %6369 = vmatpush.bf16.msra.mxu1 %v6304_v0  ;;  %6370 = vmatpush.bf16.msra.mxu2 %v6304_v0  ;;  %v6301_v3 = vld [vmem:[%s8463_s1] sm:$0xff]  ;;  %v6308_v4 = vld [vmem:[%s8463_s1 + $0x38] sm:$0xff]  ;;  %v6307_v10 = vld [vmem:[%s8463_s1 + $0x30] sm:$0xff]  ;;  %vm546_vm1 = vsmask.f32 3328  ;;  %vm1344_vm4 = vcmask 1046532  }
   0xd   : > { %6371 = vmatpush.bf16.msra.mxu3 %v6304_v0  ;;  %381 = vmatpush.bf16.msra.mxu0 %v6304_v0  ;;  %s6381_s21 = smul.u32 216, %s6436_s18  ;;  %v6312_v5 = vld [vmem:[%s8463_s1 + $0x58] sm:$0xff]  ;;  %v6311_v12 = vld [vmem:[%s8463_s1 + $0x50] sm:$0xff]  ;;  %v6306_v15 = vld [vmem:[%s8463_s1 + $0x28] sm:$0xff]  ;;  %vm547_vm2 = vsmask.f32 7440 }
   0xe   : > { %v6332_v6 = vld [vmem:[%s8463_s1 + $0x78] sm:$0xff]  ;;  %v6331_v13 = vld [vmem:[%s8463_s1 + $0x70] sm:$0xff]  ;;  %v6310_v17 = vld [vmem:[%s8463_s1 + $0x48] sm:$0xff]  ;;  %vm5130_vm7 = vcmask 519168   ;;  %vm5335_vm8 = vcmask 1040384   ;;  %vm5337_vm9 = vcmask 517120  }
   0xf   : > { %s6448_s26 = scalar_lea.vmem %s8462_s0, %s6381_s21  ;;  %v6336_v11 = vld [vmem:[%s8463_s1 + $0x98] sm:$0xff]  ;;  %v6335_v16 = vld [vmem:[%s8463_s1 + $0x90] sm:$0xff]  ;;  %v6330_v18 = vld [vmem:[%s8463_s1 + $0x68] sm:$0xff]  ;;  %s5432_s21 = sshll.u32 %s6424_s13, 5 }
  0x10   : > { %6372 = vmatpush.bf16.msra.mxu1 %v6303_v1  ;;  %6373 = vmatpush.bf16.msra.mxu2 %v6303_v1  ;;  %v6289_v7 = vld [vmem:[%s6448_s26 + $0x30] sm:$0xff]  ;;  %v6293_v8 = vld [vmem:[%s6448_s26 + $0x60] sm:$0xff]  ;;  %v6334_v26 = vld [vmem:[%s8463_s1 + $0x88] sm:$0xff]  ;;  %p7851_p4 = scmp.lt.s32.totalorder %s5432_s21, 63 }
  0x11   : > { %6374 = vmatpush.bf16.msra.mxu3 %v6303_v1  ;;  %382 = vmatpush.bf16.msra.mxu0 %v6303_v1  ;;  %v6297_v9 = vld [vmem:[%s6448_s26 + $0x90] sm:$0xff]  ;;  %v6285_v14 = vld [vmem:[%s6448_s26] sm:$0xff]  ;;  %v6291_v27 = vld [vmem:[%s6448_s26 + $0x48] sm:$0xff] }
  0x12   : > { %v6290_v19 = vld [vmem:[%s6448_s26 + $0x3c] sm:$0xff]  ;;  %v6294_v20 = vld [vmem:[%s6448_s26 + $0x6c] sm:$0xff]  ;;  %v499_v34 = vld [vmem:[%s6448_s26 + $0x4] sm:$0xf]  ;;  %s8472_s21 = smov (!%p7851_p4, %s5432_s21), 63 }
  0x13   : > { %v6298_v21 = vld [vmem:[%s6448_s26 + $0x9c] sm:$0xff]  ;;  %v6286_v22 = vld [vmem:[%s6448_s26 + $0xc] sm:$0xff]  ;;  %v559_v39 = vshll.u32 %v499_v34, 16  ;;  %v563_v40 = vshrl.u32 %v499_v34, 16  ;;  %v500_v41 = vld [vmem:[%s6448_s26 + $0x8] sm:$0x1] }
  0x14   : > { %6375 = vmatpush.bf16.msra.mxu1 %v6302_v2  ;;  %6376 = vmatpush.bf16.msra.mxu2 %v6302_v2  ;;  %v6305_v23 = vld [vmem:[%s8463_s1 + $0x20] sm:$0xff]  ;;  %v6295_v28 = vld [vmem:[%s6448_s26 + $0x78] sm:$0xff]  ;;  %v6299_v29 = vld [vmem:[%s6448_s26 + $0xa8] sm:$0xff]  ;;  %v569_v53 = vshll.u32 %v500_v41, 16  ;;  %s5433_s13 = sshll.u32 %s8472_s21, 2 }
  0x15   : > { %6377 = vmatpush.bf16.msra.mxu3 %v6302_v2  ;;  %383 = vmatpush.bf16.msra.mxu0 %v6302_v2  ;;  %v6309_v24 = vld [vmem:[%s8463_s1 + $0x40] sm:$0xff]  ;;  %v6287_v30 = vld [vmem:[%s6448_s26 + $0x18] sm:$0xff]  ;;  %v6534_v44 = vrot.slane %v559_v39, 5  ;;  %v565_v45 = vrot.slane %v563_v40, 4  ;;  %v5763_v46 = vld [vmem:[%s6448_s26 + $0xc] sm:$0xf]  ;;  %s7915_s25 = scalar_lea.vmem %s8464_s2, %s5433_s13 }
  0x16   : > { %v6329_v25 = vld [vmem:[%s8463_s1 + $0x60] sm:$0xff]  ;;  %v6340_v32 = vld [vmem:[%s8463_s1 + $0xb8] sm:$0xff]  ;;  %v5764_v48 = vld [vmem:[%s6448_s26 + $0x10] sm:$0xf]  ;;  %v2200_v49 = vshrl.u32 %v5763_v46, 16  ;;  %v2203_v50 = vshll.u32 %v5763_v46, 16 }
  0x17   : > { %v498_v31 = vld [vmem:[%s6448_s26] sm:$0xf]  ;;  %v6360_v33 = vld [vmem:[%s8463_s1 + $0xd8] sm:$0xff]  ;;  %v1248_v47 = vld [vmem:[%s6448_s26 + $0x4] sm:$0xf]  ;;  %v2209_v51 = vshll.u32 %v5764_v48, 16  ;;  %v566_v57 = vor.u32 %v565_v45, %v6534_v44 }
  0x18   : > { %6378 = vmatpush.bf16.msra.mxu1 %v6301_v3  ;;  %6379 = vmatpush.bf16.msra.mxu2 %v6301_v3  ;;  %v6333_v35 = vld [vmem:[%s8463_s1 + $0x80] sm:$0xff]  ;;  %v6364_v36 = vld [vmem:[%s8463_s1 + $0xf8] sm:$0xff]  ;;  %v550_v37 = vshrl.u32 %v498_v31, 16  ;;  %v553_v38 = vshll.u32 %v498_v31, 16  ;;  %v2213_v54 = vshrl.u32 %v5764_v48, 16  ;;  %v1348_v59 = vrot.slane %v1248_v47, 5  ;;  %vm6552_vm5 = vmor %vm546_vm1, %vm547_vm2 }
  0x19   : > { %6380 = vmatpush.bf16.msra.mxu3 %v6301_v3  ;;  %384 = vmatpush.bf16.msra.mxu0 %v6301_v3  ;;  %v6292_v52 = vld [vmem:[%s6448_s26 + $0x54] sm:$0xff]  ;;  %v6296_v55 = vld [vmem:[%s6448_s26 + $0x84] sm:$0xff]  ;;  %v1247_v58 = vld [vmem:[%s6448_s26] sm:$0xe]  ;;  %v2202_v62 = vrot.slane %v2200_v49, 4  ;;  %v2205_v63 = vrot.slane %v2203_v50, 5 }
  0x1a   : > { %v552_v42 = vrot.slane %v550_v37, 4  ;;  %v555_v43 = vrot.slane %v553_v38, 5  ;;  %v6300_v60 = vld [vmem:[%s6448_s26 + $0xb4] sm:$0xff]  ;;  %v1249_v61 = vld [vmem:[%s6448_s26 + $0x8] sm:$0x1]  ;;  %v2211_v0 = vrot.slane %v2209_v51, 5  ;;  %vm6560_vm6 = vmor %vm1343_vm3, %vm1344_vm4 }
  0x1b   : > { %5519 = vmatmul.msk.bf16.vlgmr.msra.gmra.mxu1 %vm328_vm0, %v6289_v7  ;;  %5523 = vmatmul.msk.bf16.vlgmr.msra.gmra.mxu2 %vm328_vm0, %v6293_v8  ;;  %v5765_v1 = vld [vmem:[%s6448_s26 + $0x14] sm:$0x1]  ;;  %v2215_v2 = vrot.slane %v2213_v54, 4  ;;  %v571_v3 = vrot.slane %v569_v53, 5  ;;  %v567_v8 = vrot.slane %v566_v57, 4  ;;  %v6313_v50 = vld [vmem:[%s6448_s26 + $0xc] sm:$0xff] }
  0x1c   : > { %1066 = vmatpush.bf16.msrb.mxu1 %v6308_v4  ;;  %1591 = vmatpush.bf16.msrb.mxu2 %v6312_v5  ;;  %v556_v56 = vor.u32 %v555_v43, %v552_v42  ;;  %v501_v4 = vld [vmem:[%s6448_s26 + $0xc] sm:$0xf]  ;;  %v502_v5 = vld [vmem:[%s6448_s26 + $0x10] sm:$0xf]  ;;  %v5766_v42 = vld [vmem:[%s6448_s26 + $0x18] sm:$0xf] }
  0x1d   : > { %1970 = vmatpush.bf16.msrb.mxu3 %v6332_v6  ;;  %2716 = vmatpush.bf16.msrb.mxu0 %v6336_v11  ;;  %v6288_v11 = vld [vmem:[%s6448_s26 + $0x24] sm:$0xff]  ;;  %v1251_v39 = vld [vmem:[%s6448_s26 + $0x10] sm:$0xf]  ;;  %v5767_v45 = vld [vmem:[%s6448_s26 + $0x1c] sm:$0xf]  ;;  %v2224_v46 = vshrl.u32 %v5766_v42, 16 }
  0x1e   : > { %5527 = vmatmul.msk.bf16.vlgmr.msra.gmra.mxu3 %vm328_vm0, %v6297_v9  ;;  %5515 = vmatmul.msk.bf16.vlgmr.msra.gmra.mxu0 %vm328_vm0, %v6285_v14  ;;  %v557_v7 = vrot.slane %v556_v56, 4  ;;  %v5571_v9 = vrot.slane %v1247_v58, 9  ;;  %v2206_v14 = vor.u32 %v2205_v63, %v2202_v62  ;;  %v2227_v47 = vshll.u32 %v5766_v42, 16  ;;  %v1250_v51 = vld [vmem:[%s6448_s26 + $0xc] sm:$0xe] }
  0x1f   : > { %v2226_v56 = vrot.slane %v2224_v46, 4  ;;  %v2233_v58 = vshll.u32 %v5767_v45, 16  ;;  %v5768_v63 = vld [vmem:[%s6448_s26 + $0x20] sm:$0x1] }
  0x20   : > { %1067 = vmatpush.bf16.msrb.mxu1 %v6307_v10  ;;  %1592 = vmatpush.bf16.msrb.mxu2 %v6311_v12  ;;  %v1350_v10 = vrot.slane %v1348_v59, 4  ;;  %v2229_v57 = vrot.slane %v2227_v47, 5 }
  0x21   : > { %1971 = vmatpush.bf16.msrb.mxu3 %v6331_v13  ;;  %2717 = vmatpush.bf16.msrb.mxu0 %v6335_v16  ;;  %v1351_v13 = vrot.slane %v1249_v61, 5  ;;  %v2219_v16 = vshll.u32 %v5765_v1, 16  ;;  %v505_v1 = vld [vmem:[%s6448_s26 + $0x1c] sm:$0xf] }
  0x24   : > { %1068 = vmatpush.bf16.msrb.mxu1 %v6306_v15  ;;  %1593 = vmatpush.bf16.msrb.mxu2 %v6310_v17  ;;  %v2216_v15 = vor.u32 %v2215_v2, %v2211_v0  ;;  %v6368_v17 = vld [vmem:[%s8463_s1 + $0x118] sm:$0xff]  ;;  %v2235_v2 = vrot.slane %v2233_v58, 5  ;;  %v5771_v58 = vld [vmem:[%s6448_s26 + $0x2c] sm:$0x1] }
  0x25   : > { %1972 = vmatpush.bf16.msrb.mxu3 %v6330_v18  ;;  %2718 = vmatpush.bf16.msrb.mxu0 %v6334_v26  ;;  %v574_v18 = vshrl.u32 %v501_v4, 16  ;;  %v2207_v26 = vrot.slane %v2206_v14, 4 }
  0x27   : > { %v2212_v40 = vsel %vm6552_vm5, %v2207_v26, %v2211_v0  ;;  %v504_v0 = vld [vmem:[%s6448_s26 + $0x18] sm:$0xf] }
  0x28   : > { %1069 = vmatpush.bf16.msrb.mxu1 %v6305_v23  ;;  %1594 = vmatpush.bf16.msrb.mxu2 %v6309_v24  ;;  %v572_v23 = vsel %vm6552_vm5, %v567_v8, %v571_v3  ;;  %v1349_v24 = vsel %vm6560_vm6, %v5571_v9, %v1348_v59  ;;  %v2592_v53 = vunpack.c.l.b16 %v2212_v40  ;;  %v2237_v59 = vshrl.u32 %v5767_v45, 16  ;;  %v5770_v40 = vld [vmem:[%s6448_s26 + $0x28] sm:$0xf]  ;;  %v6314_v45 = vld [vmem:[%s6448_s26 + $0x18] sm:$0xff] }
  0x29   : > { %1973 = vmatpush.bf16.msrb.mxu3 %v6329_v25  ;;  %2719 = vmatpush.bf16.msrb.mxu0 %v6333_v35  ;;  %v1352_v25 = vsel %vm6560_vm6, %v1350_v10, %v1351_v13  ;;  %v943_v35 = vunpack.c.l.b16 %v572_v23  ;;  %v2230_v9 = vor.u32 %v2229_v57, %v2226_v56  ;;  %v598_v13 = vshrl.u32 %v504_v0, 16  ;;  %v1255_v57 = vld [vmem:[%s6448_s26 + $0x20] sm:$0x1] }
  0x2a   : > { %v1468_v37 = vunpack.c.l.b16 %v1352_v25  ;;  %v2239_v3 = vrot.slane %v2237_v59, 4  ;;  %v601_v14 = vshll.u32 %v504_v0, 16  ;;  %v507_v0 = vld [vmem:[%s6448_s26 + $0x24] sm:$0xf] }
  0x2b   : > { %5520 = vmatmul.msk.bf16.gmra.mxu1 %vm328_vm0, %v6290_v19  ;;  %5524 = vmatmul.msk.bf16.gmra.mxu2 %vm328_vm0, %v6294_v20  ;;  %v577_v19 = vshll.u32 %v501_v4, 16  ;;  %v583_v20 = vshll.u32 %v502_v5, 16  ;;  %v5572_v4 = vrot.slane %v1250_v51, 9  ;;  %v600_v25 = vrot.slane %v598_v13, 4 }
  0x2c   : > { %3238 = vmatpush.bf16.msra.mxu1 %v6340_v32  ;;  %3617 = vmatpush.bf16.msra.mxu2 %v6360_v33  ;;  %v2240_v10 = vor.u32 %v2239_v3, %v2235_v2  ;;  %v603_v26 = vrot.slane %v601_v14, 5 }
  0x2d   : > { %4363 = vmatpush.bf16.msra.mxu3 %v6364_v36  ;;  %4885 = vmatpush.bf16.msra.mxu0 %v6368_v17  ;;  %v579_v31 = vrot.slane %v577_v19, 5  ;;  %v6578_v32 = vrot.slane %v583_v20, 5  ;;  %v1467_v36 = vunpack.c.l.b16 %v1349_v24 }
  0x2e   : > { %5528 = vmatmul.msk.bf16.gmra.mxu3 %vm328_vm0, %v6298_v21  ;;  %5516 = vmatmul.msk.bf16.gmra.mxu0 %vm328_vm0, %v6286_v22  ;;  %v587_v21 = vshrl.u32 %v502_v5, 16  ;;  %v562_v22 = vsel %vm6552_vm5, %v557_v7, %v6534_v44  ;;  %v2241_v23 = vrot.slane %v2240_v10, 4  ;;  %v625_v10 = vshll.u32 %v507_v0, 16 }
  0x2f   : > { %v942_v34 = vunpack.c.l.b16 %v562_v22  ;;  %v1499_v49 = vpack.c.b16 %v1468_v37, %v1467_v36  ;;  %v2231_v22 = vrot.slane %v2230_v9, 4  ;;  %v5769_v37 = vld [vmem:[%s6448_s26 + $0x24] sm:$0xf]  ;;  %v622_v9 = vshrl.u32 %v507_v0, 16 }
  0x30   : > { %v589_v33 = vrot.slane %v587_v21, 4  ;;  %v506_v21 = vld [vmem:[%s6448_s26 + $0x20] sm:$0x1]  ;;  %v2251_v42 = vshll.u32 %v5769_v37, 16 }
  0x31   : > { %v974_v48 = vpack.c.b16 %v943_v35, %v942_v34  ;;  %v1254_v34 = vld [vmem:[%s6448_s26 + $0x1c] sm:$0xf]  ;;  %v2236_v35 = vsel %vm6552_vm5, %v2231_v22, %v2235_v2  ;;  %v1365_v2 = vrot.slane %v1255_v57, 5  ;;  %v624_v22 = vrot.slane %v622_v9, 4 }
  0x32   : > { %v590_v44 = vor.u32 %v589_v33, %v6578_v32  ;;  %v617_v33 = vshll.u32 %v506_v21, 16  ;;  %v1362_v47 = vrot.slane %v1254_v34, 5  ;;  %v509_v21 = vld [vmem:[%s6448_s26 + $0x2c] sm:$0x1] }
  0x33   : > { %v641_v34 = vshll.u32 %v509_v21, 16 }
  0x34   : > { %v591_v61 = vrot.slane %v590_v44, 4  ;;  %v619_v46 = vrot.slane %v617_v33, 5 }
  0x3b   : > { %5521 = vmatmul.msk.bf16.gmra.mxu1 %vm328_vm0, %v6291_v27  ;;  %5525 = vmatmul.msk.bf16.gmra.mxu2 %vm328_vm0, %v6295_v28  ;;  %v2217_v27 = vrot.slane %v2216_v15, 4  ;;  %v2221_v28 = vrot.slane %v2219_v16, 5  ;;  %v607_v15 = vshll.u32 %v505_v1, 16  ;;  %v611_v16 = vshrl.u32 %v505_v1, 16  ;;  %v508_v1 = vld [vmem:[%s6448_s26 + $0x28] sm:$0xf] }
  0x3c   : > { %v635_v13 = vshrl.u32 %v508_v1, 16 }
  0x3d   : > { %v2222_v41 = vsel %vm6552_vm5, %v2217_v27, %v2221_v28  ;;  %v609_v27 = vrot.slane %v607_v15, 5  ;;  %v613_v28 = vrot.slane %v611_v16, 4 }
  0x3e   : > { %5529 = vmatmul.msk.bf16.gmra.mxu3 %vm328_vm0, %v6299_v29  ;;  %5517 = vmatmul.msk.bf16.gmra.mxu0 %vm328_vm0, %v6287_v30  ;;  %v503_v29 = vld [vmem:[%s6448_s26 + $0x14] sm:$0x1]  ;;  %v576_v30 = vrot.slane %v574_v18, 4  ;;  %v2593_v54 = vunpack.c.l.b16 %v2222_v41  ;;  %v2248_v41 = vshrl.u32 %v5769_v37, 16 }
  0x3f   : > { %v593_v38 = vshll.u32 %v503_v29, 16 }
  0x40   : > { %v580_v43 = vor.u32 %v579_v31, %v576_v30  ;;  %v2624_v8 = vpack.c.b16 %v2593_v54, %v2592_v53  ;;  %v2250_v51 = vrot.slane %v2248_v41, 4  ;;  %v2257_v53 = vshll.u32 %v5770_v40, 16 }
  0x41   : > { %v595_v62 = vrot.slane %v593_v38, 5  ;;  %v604_v38 = vor.u32 %v603_v26, %v600_v25  ;;  %v2261_v54 = vshrl.u32 %v5770_v40, 16  ;;  %v637_v25 = vrot.slane %v635_v13, 4 }
  0x42   : > { %v2259_v59 = vrot.slane %v2257_v53, 5 }
  0x43   : > { %v596_v18 = vsel %vm6552_vm5, %v591_v61, %v595_v62  ;;  %v1364_v62 = vrot.slane %v1362_v47, 4 }
  0x44   : > { %v945_v30 = vunpack.c.l.b16 %v596_v18 }
  0x45   : > { %v1366_v15 = vsel %vm6560_vm6, %v1364_v62, %v1365_v2 }
  0x4b   : > { %5522 = vmatmul.msk.bf16.gmra.mxu1 %vm328_vm0, %v6292_v52  ;;  %5526 = vmatmul.msk.bf16.gmra.mxu2 %vm328_vm0, %v6296_v55  ;;  %v1355_v52 = vrot.slane %v1251_v39, 5  ;;  %v1252_v55 = vld [vmem:[%s6448_s26 + $0x14] sm:$0x1]  ;;  %v614_v39 = vor.u32 %v613_v28, %v609_v27  ;;  %v5772_v28 = vld [vmem:[%s6448_s26 + $0x30] sm:$0xf] }
  0x4c   : > { %v1358_v7 = vrot.slane %v1252_v55, 5  ;;  %v605_v55 = vrot.slane %v604_v38, 4 }
  0x4d   : > { %v1357_v5 = vrot.slane %v1355_v52, 4  ;;  %v1356_v19 = vsel %vm6560_vm6, %v5572_v4, %v1355_v52  ;;  %v2253_v52 = vrot.slane %v2251_v42, 5  ;;  %v615_v56 = vrot.slane %v614_v39, 4 }
  0x4e   : > { %5530 = vmatmul.msk.bf16.gmra.mxu3 %vm328_vm0, %v6300_v60  ;;  %5518 = vmatmul.msk.bf16.gmra.mxu0 %vm328_vm0, %v6288_v11  ;;  %v581_v60 = vrot.slane %v580_v43, 4  ;;  %v2243_v11 = vshll.u32 %v5768_v63, 16  ;;  %v1469_v31 = vunpack.c.l.b16 %v1356_v19 }
  0x4f   : > { %v1359_v20 = vsel %vm6560_vm6, %v1357_v5, %v1358_v7  ;;  %v2254_v3 = vor.u32 %v2253_v52, %v2250_v51  ;;  %v2267_v5 = vshll.u32 %v5771_v58, 16  ;;  %v610_v7 = vsel %vm6552_vm5, %v605_v55, %v609_v27 }
  0x50   : > { %v586_v17 = vsel %vm6552_vm5, %v581_v60, %v6578_v32  ;;  %v2245_v24 = vrot.slane %v2243_v11, 5  ;;  %v1470_v32 = vunpack.c.l.b16 %v1359_v20  ;;  %v2263_v60 = vrot.slane %v2261_v54, 4 }
  0x51   : > { %v944_v29 = vunpack.c.l.b16 %v586_v17  ;;  %v631_v11 = vshll.u32 %v508_v1, 16  ;;  %v2255_v16 = vrot.slane %v2254_v3, 4  ;;  %v2269_v18 = vrot.slane %v2267_v5, 5 }
  0x52   : > { %v2246_v36 = vsel %vm6552_vm5, %v2241_v23, %v2245_v24  ;;  %v1500_v44 = vpack.c.b16 %v1470_v32, %v1469_v31  ;;  %v2264_v4 = vor.u32 %v2263_v60, %v2259_v59  ;;  %v946_v19 = vunpack.c.l.b16 %v610_v7  ;;  %v5773_v32 = vld [vmem:[%s6448_s26 + $0x34] sm:$0xf] }
  0x53   : > { %v975_v43 = vpack.c.b16 %v945_v30, %v944_v29  ;;  %v627_v23 = vrot.slane %v625_v10, 5  ;;  %v633_v24 = vrot.slane %v631_v11, 5  ;;  %v1472_v27 = vunpack.c.l.b16 %v1366_v15  ;;  %v1257_v29 = vld [vmem:[%s6448_s26 + $0x28] sm:$0xf]  ;;  %v511_v60 = vld [vmem:[%s6448_s26 + $0x34] sm:$0xf] }
  0x54   : > { %v2265_v17 = vrot.slane %v2264_v4, 4  ;;  %v2260_v30 = vsel %vm6552_vm5, %v2255_v16, %v2259_v59  ;;  %v2281_v39 = vshll.u32 %v5773_v32, 16  ;;  %v2285_v40 = vshrl.u32 %v5773_v32, 16  ;;  %v6359_v10 = vld [vmem:[%s8463_s1 + $0xd0] sm:$0xff] }
  0x55   : > { %v628_v37 = vor.u32 %v627_v23, %v624_v22  ;;  %v638_v38 = vor.u32 %v637_v25, %v633_v24  ;;  %v1369_v42 = vrot.slane %v1257_v29, 5  ;;  %v643_v55 = vrot.slane %v641_v34, 5  ;;  %3618 = vmatpush.bf16.msra.mxu2 %v6359_v10  ;;  %v5775_v25 = vld [vmem:[%s6448_s26 + $0x3c] sm:$0xf]  ;;  %v5776_v29 = vld [vmem:[%s6448_s26 + $0x40] sm:$0xf] }
  0x56   : > { %v2270_v31 = vsel %vm6552_vm5, %v2265_v17, %v2269_v18  ;;  %v2283_v51 = vrot.slane %v2281_v39, 5  ;;  %v2287_v52 = vrot.slane %v2285_v40, 4  ;;  %v655_v7 = vshll.u32 %v511_v60, 16  ;;  %v6316_v39 = vld [vmem:[%s6448_s26 + $0x30] sm:$0xff] }
  0x57   : > { %v629_v53 = vrot.slane %v628_v37, 4  ;;  %v639_v54 = vrot.slane %v638_v38, 4  ;;  %v1371_v58 = vrot.slane %v1369_v42, 4  ;;  %v2296_v32 = vshrl.u32 %v5775_v25, 16 }
  0x58   : > { %v2288_v0 = vor.u32 %v2287_v52, %v2283_v51  ;;  %v2309_v37 = vshrl.u32 %v5776_v29, 16 }
  0x59   : > { %v634_v4 = vsel %vm6552_vm5, %v629_v53, %v633_v24  ;;  %v644_v5 = vsel %vm6552_vm5, %v639_v54, %v643_v55  ;;  %v512_v24 = vld [vmem:[%s6448_s26 + $0x38] sm:$0x1]  ;;  %v513_v54 = vld [vmem:[%s6448_s26 + $0x3c] sm:$0xf] }
  0x5a   : > { %v948_v16 = vunpack.c.l.b16 %v634_v4  ;;  %v949_v17 = vunpack.c.l.b16 %v644_v5 }
  0x5b   : > { %5555 = vmatmul.msk.bf16.vlgmr.msrb.gmra.mxu1 %vm328_vm0, %v974_v48  ;;  %5611 = vmatmul.msk.bf16.vlgmr.msrb.gmra.mxu2 %vm328_vm0, %v1499_v49  ;;  %v2594_v48 = vunpack.c.l.b16 %v2236_v35  ;;  %v2595_v49 = vunpack.c.l.b16 %v2246_v36  ;;  %v2272_v35 = vshrl.u32 %v5772_v28, 16  ;;  %v2275_v36 = vshll.u32 %v5772_v28, 16 }
  0x5d   : > { %v2625_v63 = vpack.c.b16 %v2595_v49, %v2594_v48  ;;  %v2277_v48 = vrot.slane %v2275_v36, 5  ;;  %v1258_v49 = vld [vmem:[%s6448_s26 + $0x2c] sm:$0x1]  ;;  %v2305_v36 = vshll.u32 %v5776_v29, 16 }
  0x5e   : > { %5747 = vmatmul.msk.bf16.vlgmr.msrb.gmra.mxu3 %vm328_vm0, %v6313_v50  ;;  %5835 = vmatmul.msk.bf16.vlgmr.msrb.gmra.mxu0 %vm328_vm0, %v2624_v8  ;;  %v1253_v50 = vld [vmem:[%s6448_s26 + $0x18] sm:$0xe]  ;;  %v620_v8 = vsel %vm6552_vm5, %v615_v56, %v619_v46  ;;  %v1256_v46 = vld [vmem:[%s6448_s26 + $0x24] sm:$0xe]  ;;  %v510_v56 = vld [vmem:[%s6448_s26 + $0x30] sm:$0xf] }
  0x5f   : > { %v5573_v61 = vrot.slane %v1253_v50, 9  ;;  %v947_v20 = vunpack.c.l.b16 %v620_v8  ;;  %v5774_v50 = vld [vmem:[%s6448_s26 + $0x38] sm:$0x1]  ;;  %v5574_v57 = vrot.slane %v1256_v46, 9  ;;  %v1372_v62 = vrot.slane %v1258_v49, 5 }
  0x60   : > { %v2291_v1 = vshll.u32 %v5774_v50, 16  ;;  %v646_v2 = vshrl.u32 %v510_v56, 16  ;;  %v649_v3 = vshll.u32 %v510_v56, 16  ;;  %v659_v8 = vshrl.u32 %v511_v60, 16 }
  0x61   : > { %v1363_v14 = vsel %vm6560_vm6, %v5573_v61, %v1362_v47  ;;  %v976_v33 = vpack.c.b16 %v947_v20, %v946_v19  ;;  %v2274_v47 = vrot.slane %v2272_v35, 4  ;;  %v6339_v61 = vld [vmem:[%s8463_s1 + $0xb0] sm:$0xff]  ;;  %v1370_v9 = vsel %vm6560_vm6, %v5574_v57, %v1369_v42 }
  0x62   : > { %v1471_v26 = vunpack.c.l.b16 %v1363_v14  ;;  %3239 = vmatpush.bf16.msra.mxu1 %v6339_v61  ;;  %v1373_v11 = vsel %vm6560_vm6, %v1371_v58, %v1372_v62  ;;  %v2289_v14 = vrot.slane %v2288_v0, 4  ;;  %v2293_v15 = vrot.slane %v2291_v1, 5  ;;  %v514_v58 = vld [vmem:[%s6448_s26 + $0x40] sm:$0xf] }
  0x63   : > { %v648_v18 = vrot.slane %v646_v2, 4  ;;  %v651_v19 = vrot.slane %v649_v3, 5  ;;  %v657_v20 = vrot.slane %v655_v7, 5  ;;  %v661_v21 = vrot.slane %v659_v8, 4 }
  0x64   : > { %v1501_v41 = vpack.c.b16 %v1472_v27, %v1471_v26  ;;  %v1473_v22 = vunpack.c.l.b16 %v1370_v9  ;;  %v1474_v23 = vunpack.c.l.b16 %v1373_v11  ;;  %v1260_v26 = vld [vmem:[%s6448_s26 + $0x34] sm:$0xf]  ;;  %v2294_v28 = vsel %vm6552_vm5, %v2289_v14, %v2293_v15 }
  0x65   : > { %v662_v34 = vor.u32 %v661_v21, %v657_v20  ;;  %v665_v35 = vshll.u32 %v512_v24, 16  ;;  %v1376_v40 = vrot.slane %v1260_v26, 5  ;;  %v2599_v42 = vunpack.c.l.b16 %v2294_v28  ;;  %v5778_v21 = vld [vmem:[%s6448_s26 + $0x48] sm:$0xf] }
  0x66   : > { %v1502_v38 = vpack.c.b16 %v1474_v23, %v1473_v22  ;;  %v2307_v49 = vrot.slane %v2305_v36, 5  ;;  %v2311_v50 = vrot.slane %v2309_v37, 4  ;;  %v673_v0 = vshll.u32 %v513_v54, 16  ;;  %v1263_v22 = vld [vmem:[%s6448_s26 + $0x40] sm:$0xf] }
  0x67   : > { %v663_v52 = vrot.slane %v662_v34, 4  ;;  %v667_v53 = vrot.slane %v665_v35, 5  ;;  %v1378_v56 = vrot.slane %v1376_v40, 4  ;;  %v679_v3 = vshll.u32 %v514_v58, 16  ;;  %v6317_v35 = vld [vmem:[%s6448_s26 + $0x3c] sm:$0xff] }
  0x68   : > { %v2312_v61 = vor.u32 %v2311_v50, %v2307_v49  ;;  %v683_v4 = vshrl.u32 %v514_v58, 16  ;;  %v675_v15 = vrot.slane %v673_v0, 5  ;;  %v2320_v28 = vshrl.u32 %v5778_v21, 16 }
  0x69   : > { %v668_v2 = vsel %vm6552_vm5, %v663_v52, %v667_v53  ;;  %v2323_v29 = vshll.u32 %v5778_v21, 16  ;;  %v1383_v36 = vrot.slane %v1263_v22, 5  ;;  %v518_v21 = vld [vmem:[%s6448_s26 + $0x50] sm:$0x1]  ;;  %v5781_v22 = vld [vmem:[%s6448_s26 + $0x54] sm:$0xf] }
  0x6a   : > { %v2313_v9 = vrot.slane %v2312_v61, 4 }
  0x6b   : > { %5556 = vmatmul.msk.bf16.gmra.mxu1 %vm328_vm0, %v975_v43  ;;  %5612 = vmatmul.msk.bf16.gmra.mxu2 %vm328_vm0, %v1500_v44  ;;  %v2596_v43 = vunpack.c.l.b16 %v2260_v30  ;;  %v2597_v44 = vunpack.c.l.b16 %v2270_v31  ;;  %v977_v30 = vpack.c.b16 %v949_v17, %v948_v16  ;;  %v652_v31 = vor.u32 %v651_v19, %v648_v18 }
  0x6c   : > { %v6694_v16 = vrot.slane %v679_v3, 5  ;;  %v685_v17 = vrot.slane %v683_v4, 4  ;;  %v1385_v53 = vrot.slane %v1383_v36, 4 }
  0x6d   : > { %v2626_v59 = vpack.c.b16 %v2597_v44, %v2596_v43  ;;  %v1259_v43 = vld [vmem:[%s6448_s26 + $0x30] sm:$0xe]  ;;  %v1261_v44 = vld [vmem:[%s6448_s26 + $0x38] sm:$0x1] }
  0x6e   : > { %5748 = vmatmul.msk.bf16.gmra.mxu3 %vm328_vm0, %v6314_v45  ;;  %5836 = vmatmul.msk.bf16.gmra.mxu0 %vm328_vm0, %v2625_v63  ;;  %v6315_v45 = vld [vmem:[%s6448_s26 + $0x24] sm:$0xff]  ;;  %v2278_v63 = vor.u32 %v2277_v48, %v2274_v47  ;;  %v6363_v47 = vld [vmem:[%s8463_s1 + $0xf0] sm:$0xff]  ;;  %v5575_v55 = vrot.slane %v1259_v43, 9  ;;  %v2325_v43 = vrot.slane %v2323_v29, 5 }
  0x6f   : > { %v5777_v48 = vld [vmem:[%s6448_s26 + $0x44] sm:$0x1]  ;;  %4364 = vmatpush.bf16.msra.mxu3 %v6363_v47 }
  0x70   : > { %v2279_v13 = vrot.slane %v2278_v63, 4  ;;  %v2315_v62 = vshll.u32 %v5777_v48, 16  ;;  %v670_v63 = vshrl.u32 %v513_v54, 16  ;;  %v1377_v5 = vsel %vm6560_vm6, %v5575_v55, %v1376_v40  ;;  %v1262_v40 = vld [vmem:[%s6448_s26 + $0x3c] sm:$0xe] }
  0x71   : > { %v1475_v18 = vunpack.c.l.b16 %v1377_v5  ;;  %v5576_v52 = vrot.slane %v1262_v40, 9  ;;  %v517_v55 = vld [vmem:[%s6448_s26 + $0x4c] sm:$0xf] }
  0x72   : > { %v2284_v27 = vsel %vm6552_vm5, %v2279_v13, %v2283_v51  ;;  %v653_v51 = vrot.slane %v652_v31, 4  ;;  %v2317_v10 = vrot.slane %v2315_v62, 5  ;;  %v951_v13 = vunpack.c.l.b16 %v668_v2 }
  0x73   : > { %v672_v14 = vrot.slane %v670_v63, 4  ;;  %v703_v2 = vshll.u32 %v517_v55, 16  ;;  %v707_v3 = vshrl.u32 %v517_v55, 16  ;;  %v1384_v5 = vsel %vm6560_vm6, %v5576_v52, %v1383_v36 }
  0x74   : > { %v658_v1 = vsel %vm6552_vm5, %v653_v51, %v657_v20  ;;  %v515_v20 = vld [vmem:[%s6448_s26 + $0x44] sm:$0x1]  ;;  %v2318_v24 = vsel %vm6552_vm5, %v2313_v9, %v2317_v10  ;;  %v516_v51 = vld [vmem:[%s6448_s26 + $0x48] sm:$0xf] }
  0x75   : > { %v950_v11 = vunpack.c.l.b16 %v658_v1  ;;  %v689_v31 = vshll.u32 %v515_v20, 16  ;;  %v694_v61 = vshrl.u32 %v516_v51, 16  ;;  %v697_v62 = vshll.u32 %v516_v51, 16 }
  0x77   : > { %v978_v26 = vpack.c.b16 %v951_v13, %v950_v11  ;;  %v691_v50 = vrot.slane %v689_v31, 5  ;;  %v2347_v31 = vshll.u32 %v5781_v22, 16 }
  0x7b   : > { %5557 = vmatmul.msk.bf16.gmra.mxu1 %vm328_vm0, %v976_v33  ;;  %5613 = vmatmul.msk.bf16.gmra.mxu2 %vm328_vm0, %v1501_v41  ;;  %v2299_v33 = vshll.u32 %v5775_v25, 16  ;;  %v2598_v41 = vunpack.c.l.b16 %v2284_v27  ;;  %v5779_v25 = vld [vmem:[%s6448_s26 + $0x4c] sm:$0xf]  ;;  %v676_v27 = vor.u32 %v675_v15, %v672_v14  ;;  %v696_v15 = vrot.slane %v694_v61, 4 }
  0x7d   : > { %v2301_v46 = vrot.slane %v2299_v33, 5  ;;  %v2627_v57 = vpack.c.b16 %v2599_v42, %v2598_v41  ;;  %v2333_v33 = vshrl.u32 %v5779_v25, 16  ;;  %v1264_v41 = vld [vmem:[%s6448_s26 + $0x44] sm:$0x1]  ;;  %v2322_v42 = vrot.slane %v2320_v28, 4 }
  0x7e   : > { %5749 = vmatmul.msk.bf16.gmra.mxu3 %vm328_vm0, %v6315_v45  ;;  %5837 = vmatmul.msk.bf16.gmra.mxu0 %vm328_vm0, %v2626_v59  ;;  %v2298_v45 = vrot.slane %v2296_v32, 4  ;;  %v1379_v59 = vrot.slane %v1261_v44, 5  ;;  %v2329_v32 = vshll.u32 %v5779_v25, 16  ;;  %v6367_v44 = vld [vmem:[%s8463_s1 + $0x110] sm:$0xff]  ;;  %v677_v48 = vrot.slane %v676_v27, 4 }
  0x7f   : > { %v2335_v47 = vrot.slane %v2333_v33, 4  ;;  %4886 = vmatpush.bf16.msra.mxu0 %v6367_v44  ;;  %v2326_v58 = vor.u32 %v2325_v43, %v2322_v42  ;;  %v5782_v27 = vld [vmem:[%s6448_s26 + $0x58] sm:$0xf]  ;;  %v6318_v44 = vld [vmem:[%s6448_s26 + $0x48] sm:$0xff] }
  0x80   : > { %v2302_v60 = vor.u32 %v2301_v46, %v2298_v45  ;;  %v1380_v7 = vsel %vm6560_vm6, %v1378_v56, %v1379_v59  ;;  %v5780_v45 = vld [vmem:[%s6448_s26 + $0x50] sm:$0x1]  ;;  %v6713_v46 = vrot.slane %v2329_v32, 5  ;;  %v1386_v56 = vrot.slane %v1264_v41, 5 }
  0x81   : > { %v1476_v19 = vunpack.c.l.b16 %v1380_v7  ;;  %v682_v0 = vsel %vm6552_vm5, %v677_v48, %v6694_v16  ;;  %v2327_v9 = vrot.slane %v2326_v58, 4  ;;  %v2357_v36 = vshrl.u32 %v5782_v27, 16  ;;  %v5783_v48 = vld [vmem:[%s6448_s26 + $0x5c] sm:$0x1]  ;;  %v520_v58 = vld [vmem:[%s6448_s26 + $0x58] sm:$0xf] }
  0x82   : > { %v2303_v8 = vrot.slane %v2302_v60, 4  ;;  %v2336_v59 = vor.u32 %v2335_v47, %v6713_v46  ;;  %v2339_v60 = vshll.u32 %v5780_v45, 16  ;;  %v952_v13 = vunpack.c.l.b16 %v682_v0  ;;  %v1267_v45 = vld [vmem:[%s6448_s26 + $0x50] sm:$0x1] }
  0x83   : > { %v1503_v34 = vpack.c.b16 %v1476_v19, %v1475_v18  ;;  %v709_v18 = vrot.slane %v707_v3, 4  ;;  %v1477_v19 = vunpack.c.l.b16 %v1384_v5  ;;  %v2332_v25 = vsel %vm6552_vm5, %v2327_v9, %v6713_v46 }
  0x84   : > { %v2308_v23 = vsel %vm6552_vm5, %v2303_v8, %v2307_v49  ;;  %v1387_v8 = vsel %vm6560_vm6, %v1385_v53, %v1386_v56  ;;  %v2337_v10 = vrot.slane %v2336_v59, 4  ;;  %v2341_v11 = vrot.slane %v2339_v60, 5 }
  0x85   : > { %v2600_v37 = vunpack.c.l.b16 %v2308_v23  ;;  %v1478_v20 = vunpack.c.l.b16 %v1387_v8  ;;  %v2602_v41 = vunpack.c.l.b16 %v2332_v25  ;;  %v2349_v47 = vrot.slane %v2347_v31, 5  ;;  %v5784_v25 = vld [vmem:[%s6448_s26 + $0x60] sm:$0xf] }
  0x86   : > { %v1393_v59 = vrot.slane %v1267_v45, 5  ;;  %v727_v5 = vshll.u32 %v520_v58, 16 }
  0x8b   : > { %5558 = vmatmul.msk.bf16.gmra.mxu1 %vm328_vm0, %v977_v30  ;;  %5614 = vmatmul.msk.bf16.gmra.mxu2 %vm328_vm0, %v1502_v38  ;;  %v686_v30 = vor.u32 %v685_v17, %v6694_v16  ;;  %v2601_v38 = vunpack.c.l.b16 %v2318_v24  ;;  %v699_v16 = vrot.slane %v697_v62, 5  ;;  %v6735_v17 = vrot.slane %v703_v2, 5  ;;  %v1266_v24 = vld [vmem:[%s6448_s26 + $0x4c] sm:$0xf] }
  0x8c   : > { %v1390_v40 = vrot.slane %v1266_v24, 5  ;;  %v521_v24 = vld [vmem:[%s6448_s26 + $0x5c] sm:$0x1] }
  0x8d   : > { %v687_v49 = vrot.slane %v686_v30, 4  ;;  %v2628_v54 = vpack.c.b16 %v2601_v38, %v2600_v37  ;;  %v700_v29 = vor.u32 %v699_v16, %v696_v15  ;;  %v2344_v30 = vshrl.u32 %v5781_v22, 16 }
  0x8e   : > { %5750 = vmatmul.msk.bf16.gmra.mxu3 %vm328_vm0, %v6316_v39  ;;  %5838 = vmatmul.msk.bf16.gmra.mxu0 %vm328_vm0, %v2627_v57  ;;  %v710_v33 = vor.u32 %v709_v18, %v6735_v17  ;;  %v1504_v37 = vpack.c.b16 %v1478_v20, %v1477_v19  ;;  %v1392_v56 = vrot.slane %v1390_v40, 4  ;;  %v6777_v20 = vrot.slane %v727_v5, 5 }
  0x8f   : > { %v692_v1 = vsel %vm6552_vm5, %v687_v49, %v691_v50  ;;  %v2346_v46 = vrot.slane %v2344_v30, 4  ;;  %v2359_v50 = vrot.slane %v2357_v36, 4  ;;  %v701_v51 = vrot.slane %v700_v29, 4  ;;  %v5785_v30 = vld [vmem:[%s6448_s26 + $0x64] sm:$0xf] }
  0x90   : > { %v953_v14 = vunpack.c.l.b16 %v692_v1  ;;  %v711_v52 = vrot.slane %v710_v33, 4  ;;  %v2368_v33 = vshrl.u32 %v5784_v25, 16 }
  0x91   : > { %v2350_v61 = vor.u32 %v2349_v47, %v2346_v46  ;;  %v706_v3 = vsel %vm6552_vm5, %v701_v51, %v6735_v17  ;;  %v6319_v47 = vld [vmem:[%s6448_s26 + $0x54] sm:$0xff]  ;;  %v5786_v51 = vld [vmem:[%s6448_s26 + $0x68] sm:$0x1] }
  0x92   : > { %v979_v28 = vpack.c.b16 %v953_v14, %v952_v13  ;;  %v954_v16 = vunpack.c.l.b16 %v706_v3  ;;  %v2387_v3 = vshll.u32 %v5786_v51, 16 }
  0x93   : > { %v2351_v13 = vrot.slane %v2350_v61, 4  ;;  %v6338_v61 = vld [vmem:[%s8463_s1 + $0xa8] sm:$0xff] }
  0x94   : > { %3240 = vmatpush.bf16.msra.mxu1 %v6338_v61 }
  0x98   : > { %v406_v39 = vpop.f32.mrf.mxu1 }
  0x99   : > { %474 = vst.msk [vmem:[#allocation2 + $0x40] sm:$0xff] %vm328_vm0, %v406_v39  ;;  %v1265_v39 = vld [vmem:[%s6448_s26 + $0x48] sm:$0xe] }
  0x9a   : > { %v5577_v55 = vrot.slane %v1265_v39, 9  ;;  %v2381_v39 = vshrl.u32 %v5785_v30, 16 }
  0x9b   : > { %5559 = vmatmul.msk.bf16.gmra.mxu1 %vm328_vm0, %v978_v26  ;;  %5615 = vmatmul.msk.bf16.gmra.mxu2 %vm328_vm0, %v1503_v34  ;;  %v386_v57 = vpop.f32.mrf.mxu0  ;;  %v2342_v26 = vsel %vm6552_vm5, %v2337_v10, %v2341_v11  ;;  %v713_v34 = vshll.u32 %v518_v21, 16  ;;  %v1394_v11 = vsel %vm6560_vm6, %v1392_v56, %v1393_v59 }
  0x9c   : > { %466 = vst.msk [vmem:[#allocation2] sm:$0xff] %vm328_vm0, %v386_v57  ;;  %v2603_v42 = vunpack.c.l.b16 %v2342_v26  ;;  %v1391_v9 = vsel %vm6560_vm6, %v5577_v55, %v1390_v40 }
  0x9d   : > { %v715_v53 = vrot.slane %v713_v34, 5  ;;  %v1479_v22 = vunpack.c.l.b16 %v1391_v9  ;;  %v2371_v34 = vshll.u32 %v5784_v25, 16 }
  0x9e   : > { %5751 = vmatmul.msk.bf16.gmra.mxu3 %vm328_vm0, %v6317_v35  ;;  %v426_v63 = vpop.f32.mrf.mxu2  ;;  %5839 = vmatmul.msk.bf16.gmra.mxu0 %vm328_vm0, %v2628_v54  ;;  %v2353_v35 = vshll.u32 %v5782_v27, 16  ;;  %v519_v54 = vld [vmem:[%s6448_s26 + $0x54] sm:$0xf]  ;;  %v2629_v57 = vpack.c.b16 %v2603_v42, %v2602_v41  ;;  %v1269_v27 = vld [vmem:[%s6448_s26 + $0x58] sm:$0xf] }
  0x9f   : > { %482 = vst.msk [vmem:[#allocation2 + $0x80] sm:$0xff] %vm328_vm0, %v426_v63  ;;  %v2363_v63 = vshll.u32 %v5783_v48, 16  ;;  %v718_v0 = vshrl.u32 %v519_v54, 16  ;;  %v721_v1 = vshll.u32 %v519_v54, 16  ;;  %v1268_v42 = vld [vmem:[%s6448_s26 + $0x54] sm:$0xe] }
  0xa0   : > { %v408_v7 = vpop.f32.mrf.mxu1  ;;  %v6755_v49 = vrot.slane %v2353_v35, 5  ;;  %v1270_v48 = vld [vmem:[%s6448_s26 + $0x5c] sm:$0x1] }
  0xa1   : > { %v446_v4 = vpop.f32.mrf.mxu3  ;;  %475 = vst.msk [vmem:[#allocation2 + $0x48] sm:$0xff] %vm328_vm0, %v408_v7  ;;  %v731_v7 = vshrl.u32 %v520_v58, 16  ;;  %v2365_v15 = vrot.slane %v2363_v63, 5  ;;  %v720_v18 = vrot.slane %v718_v0, 4  ;;  %v723_v19 = vrot.slane %v721_v1, 5 }
  0xa2   : > { %490 = vst.msk [vmem:[#allocation2 + $0xc0] sm:$0xff] %vm328_vm0, %v446_v4  ;;  %v2360_v62 = vor.u32 %v2359_v50, %v6755_v49  ;;  %v716_v4 = vsel %vm6552_vm5, %v711_v52, %v715_v53  ;;  %v2373_v50 = vrot.slane %v2371_v34, 5  ;;  %v2383_v53 = vrot.slane %v2381_v39, 4  ;;  %v523_v0 = vld [vmem:[%s6448_s26 + $0x64] sm:$0xf] }
  0xa3   : > { %v388_v23 = vpop.f32.mrf.mxu0  ;;  %v955_v17 = vunpack.c.l.b16 %v716_v4  ;;  %v733_v21 = vrot.slane %v731_v7, 4  ;;  %v5578_v58 = vrot.slane %v1268_v42, 9  ;;  %v5788_v34 = vld [vmem:[%s6448_s26 + $0x70] sm:$0xf] }
  0xa4   : > { %467 = vst.msk [vmem:[#allocation2 + $0x8] sm:$0xff] %vm328_vm0, %v388_v23  ;;  %v2361_v14 = vrot.slane %v2360_v62, 4  ;;  %v1480_v23 = vunpack.c.l.b16 %v1394_v11  ;;  %v1400_v62 = vrot.slane %v1270_v48, 5  ;;  %v1271_v48 = vld [vmem:[%s6448_s26 + $0x60] sm:$0xe] }
  0xa5   : > { %v980_v31 = vpack.c.b16 %v955_v17, %v954_v16  ;;  %v734_v36 = vor.u32 %v733_v21, %v6777_v20 }
  0xa6   : > { %v428_v32 = vpop.f32.mrf.mxu2  ;;  %v2366_v29 = vsel %vm6552_vm5, %v2361_v14, %v2365_v15  ;;  %v1505_v40 = vpack.c.b16 %v1480_v23, %v1479_v22  ;;  %v755_v14 = vshrl.u32 %v523_v0, 16 }
  0xa7   : > { %483 = vst.msk [vmem:[#allocation2 + $0x88] sm:$0xff] %vm328_vm0, %v428_v32  ;;  %v724_v32 = vor.u32 %v723_v19, %v720_v18  ;;  %v2605_v45 = vunpack.c.l.b16 %v2366_v29  ;;  %v735_v55 = vrot.slane %v734_v36, 4  ;;  %v2389_v19 = vrot.slane %v2387_v3, 5  ;;  %v6826_v29 = vld [vmem:[%s6448_s26 + $0x64] sm:$0xf] }
  0xa8   : > { %v411_v43 = vpop.f32.mrf.mxu1  ;;  %v1404_v42 = vrot.slane %v6826_v29, 5  ;;  %v526_v3 = vld [vmem:[%s6448_s26 + $0x70] sm:$0xf]  ;;  %v527_v29 = vld [vmem:[%s6448_s26 + $0x74] sm:$0x1] }
  0xa9   : > { %v448_v38 = vpop.f32.mrf.mxu3  ;;  %476 = vst.msk [vmem:[#allocation2 + $0x50] sm:$0xff] %vm328_vm0, %v411_v43  ;;  %v1397_v43 = vrot.slane %v1269_v27, 5  ;;  %v725_v54 = vrot.slane %v724_v32, 4 }
  0xaa   : > { %491 = vst.msk [vmem:[#allocation2 + $0xc8] sm:$0xff] %vm328_vm0, %v448_v38  ;;  %v2377_v38 = vshll.u32 %v5785_v30, 16  ;;  %v5787_v30 = vld [vmem:[%s6448_s26 + $0x6c] sm:$0xf] }
  0xab   : > { %5560 = vmatmul.msk.bf16.gmra.mxu1 %vm328_vm0, %v979_v28  ;;  %5616 = vmatmul.msk.bf16.gmra.mxu2 %vm328_vm0, %v1504_v37  ;;  %v391_v60 = vpop.f32.mrf.mxu0  ;;  %v2356_v28 = vsel %vm6552_vm5, %v2351_v13, %v6755_v49  ;;  %v737_v37 = vshll.u32 %v521_v24, 16  ;;  %v2370_v49 = vrot.slane %v2368_v33, 4  ;;  %v1399_v59 = vrot.slane %v1397_v43, 4  ;;  %v524_v24 = vld [vmem:[%s6448_s26 + $0x68] sm:$0x1] }
  0xac   : > { %468 = vst.msk [vmem:[#allocation2 + $0x10] sm:$0xff] %vm328_vm0, %v391_v60  ;;  %v6797_v52 = vrot.slane %v2377_v38, 5  ;;  %v1398_v11 = vsel %vm6560_vm6, %v5578_v58, %v1397_v43  ;;  %v751_v13 = vshll.u32 %v523_v0, 16  ;;  %v2392_v38 = vshrl.u32 %v5787_v30, 16 }
  0xad   : > { %v739_v56 = vrot.slane %v737_v37, 5  ;;  %v2374_v1 = vor.u32 %v2373_v50, %v2370_v49  ;;  %v1401_v16 = vsel %vm6560_vm6, %v1399_v59, %v1400_v62  ;;  %v1481_v25 = vunpack.c.l.b16 %v1398_v11  ;;  %v6358_v37 = vld [vmem:[%s8463_s1 + $0xc8] sm:$0xff] }
  0xae   : > { %5752 = vmatmul.msk.bf16.gmra.mxu3 %vm328_vm0, %v6318_v44  ;;  %v431_v2 = vpop.f32.mrf.mxu2  ;;  %5840 = vmatmul.msk.bf16.gmra.mxu0 %vm328_vm0, %v2629_v57  ;;  %v2604_v44 = vunpack.c.l.b16 %v2356_v28  ;;  %v522_v57 = vld [vmem:[%s6448_s26 + $0x60] sm:$0xf]  ;;  %v6823_v27 = vrot.slane %v751_v13, 5  ;;  %v757_v28 = vrot.slane %v755_v14, 4  ;;  %v2395_v39 = vshll.u32 %v5787_v30, 16 }
  0xaf   : > { %484 = vst.msk [vmem:[#allocation2 + $0x90] sm:$0xff] %vm328_vm0, %v431_v2  ;;  %v2384_v2 = vor.u32 %v2383_v53, %v6797_v52  ;;  %v742_v4 = vshrl.u32 %v522_v57, 16  ;;  %v745_v5 = vshll.u32 %v522_v57, 16  ;;  %v740_v9 = vsel %vm6552_vm5, %v735_v55, %v739_v56  ;;  %v1273_v49 = vld [vmem:[%s6448_s26 + $0x68] sm:$0x1]  ;;  %3619 = vmatpush.bf16.msra.mxu2 %v6358_v37  ;;  %v6320_v53 = vld [vmem:[%s6448_s26 + $0x60] sm:$0xff] }
  0xb0   : > { %v413_v10 = vpop.f32.mrf.mxu1  ;;  %v2630_v60 = vpack.c.b16 %v2605_v45, %v2604_v44  ;;  %v2375_v17 = vrot.slane %v2374_v1, 4  ;;  %v957_v21 = vunpack.c.l.b16 %v740_v9  ;;  %v2401_v43 = vshll.u32 %v5788_v34, 16  ;;  %v5789_v57 = vld [vmem:[%s6448_s26 + $0x74] sm:$0x1]  ;;  %v1275_v37 = vld [vmem:[%s6448_s26 + $0x70] sm:$0xf] }
  0xb1   : > { %v451_v8 = vpop.f32.mrf.mxu3  ;;  %477 = vst.msk [vmem:[#allocation2 + $0x58] sm:$0xff] %vm328_vm0, %v413_v10  ;;  %v2385_v18 = vrot.slane %v2384_v2, 4  ;;  %v744_v22 = vrot.slane %v742_v4, 4  ;;  %v747_v23 = vrot.slane %v745_v5, 5  ;;  %v2405_v44 = vshrl.u32 %v5788_v34, 16 }
  0xb2   : > { %492 = vst.msk [vmem:[#allocation2 + $0xd0] sm:$0xff] %vm328_vm0, %v451_v8  ;;  %v730_v8 = vsel %vm6552_vm5, %v725_v54, %v6777_v20  ;;  %v2380_v32 = vsel %vm6552_vm5, %v2375_v17, %v6797_v52  ;;  %v525_v54 = vld [vmem:[%s6448_s26 + $0x6c] sm:$0xf]  ;;  %v2394_v55 = vrot.slane %v2392_v38, 4  ;;  %v2397_v56 = vrot.slane %v2395_v39, 5 }
  0xb3   : > { %v393_v26 = vpop.f32.mrf.mxu0  ;;  %v956_v20 = vunpack.c.l.b16 %v730_v8  ;;  %v2390_v33 = vsel %vm6552_vm5, %v2385_v18, %v2389_v19  ;;  %v748_v36 = vor.u32 %v747_v23, %v744_v22  ;;  %v2606_v50 = vunpack.c.l.b16 %v2380_v32  ;;  %v5790_v34 = vld [vmem:[%s6448_s26 + $0x78] sm:$0xf] }
  0xb4   : > { %469 = vst.msk [vmem:[#allocation2 + $0x18] sm:$0xff] %vm328_vm0, %v393_v26  ;;  %v1482_v26 = vunpack.c.l.b16 %v1401_v16  ;;  %v2607_v51 = vunpack.c.l.b16 %v2390_v33  ;;  %v6849_v58 = vrot.slane %v2401_v43, 5  ;;  %v2407_v59 = vrot.slane %v2405_v44, 4 }
  0xb5   : > { %v5579_v62 = vrot.slane %v1271_v48, 9  ;;  %v1407_v1 = vrot.slane %v1273_v49, 5  ;;  %v766_v4 = vshrl.u32 %v525_v54, 16  ;;  %v2398_v8 = vor.u32 %v2397_v56, %v2394_v55  ;;  %v1274_v49 = vld [vmem:[%s6448_s26 + $0x6c] sm:$0xe] }
  0xb6   : > { %v433_v35 = vpop.f32.mrf.mxu2  ;;  %v1506_v45 = vpack.c.b16 %v1482_v26, %v1481_v25  ;;  %v2631_v2 = vpack.c.b16 %v2607_v51, %v2606_v50  ;;  %v2408_v9 = vor.u32 %v2407_v59, %v6849_v58  ;;  %v775_v14 = vshll.u32 %v526_v3, 16 }
  0xb7   : > { %485 = vst.msk [vmem:[#allocation2 + $0x98] sm:$0xff] %vm328_vm0, %v433_v35  ;;  %v981_v35 = vpack.c.b16 %v957_v21, %v956_v20  ;;  %v1405_v18 = vsel %vm6560_vm6, %v5579_v62, %v1404_v42  ;;  %v6362_v20 = vld [vmem:[%s8463_s1 + $0xe8] sm:$0xff]  ;;  %v768_v21 = vrot.slane %v766_v4, 4  ;;  %v2419_v43 = vshll.u32 %v5790_v34, 16 }
  0xb8   : > { %v416_v46 = vpop.f32.mrf.mxu1  ;;  %v2409_v25 = vrot.slane %v2408_v9, 4  ;;  %4365 = vmatpush.bf16.msra.mxu3 %v6362_v20  ;;  %v6874_v30 = vrot.slane %v775_v14, 5  ;;  %v1483_v32 = vunpack.c.l.b16 %v1405_v18  ;;  %v1411_v55 = vrot.slane %v1275_v37, 5 }
  0xb9   : > { %v453_v41 = vpop.f32.mrf.mxu3  ;;  %478 = vst.msk [vmem:[#allocation2 + $0x60] sm:$0xff] %vm328_vm0, %v416_v46 }
  0xba   : > { %493 = vst.msk [vmem:[#allocation2 + $0xd8] sm:$0xff] %vm328_vm0, %v453_v41  ;;  %v761_v41 = vshll.u32 %v524_v24, 16  ;;  %v2399_v24 = vrot.slane %v2398_v8, 4 }
  0xbb   : > { %5561 = vmatmul.msk.bf16.gmra.mxu1 %vm328_vm0, %v980_v31  ;;  %5617 = vmatmul.msk.bf16.gmra.mxu2 %vm328_vm0, %v1505_v40  ;;  %v396_v63 = vpop.f32.mrf.mxu0 }
  0xbc   : > { %470 = vst.msk [vmem:[#allocation2 + $0x20] sm:$0xff] %vm328_vm0, %v396_v63  ;;  %v763_v61 = vrot.slane %v761_v41, 5  ;;  %v1406_v63 = vrot.slane %v1404_v42, 4  ;;  %v2404_v38 = vsel %vm6552_vm5, %v2399_v24, %v6849_v58  ;;  %v785_v41 = vshll.u32 %v527_v29, 16  ;;  %v528_v58 = vld [vmem:[%s6448_s26 + $0x78] sm:$0xf] }
  0xbd   : > { %v2416_v42 = vshrl.u32 %v5790_v34, 16  ;;  %v2608_v56 = vunpack.c.l.b16 %v2404_v38  ;;  %v790_v8 = vshrl.u32 %v528_v58, 16  ;;  %v793_v9 = vshll.u32 %v528_v58, 16 }
  0xbe   : > { %5753 = vmatmul.msk.bf16.gmra.mxu3 %vm328_vm0, %v6319_v47  ;;  %v436_v7 = vpop.f32.mrf.mxu2  ;;  %5841 = vmatmul.msk.bf16.gmra.mxu0 %vm328_vm0, %v2630_v60  ;;  %v758_v47 = vor.u32 %v757_v28, %v6823_v27  ;;  %v749_v60 = vrot.slane %v748_v36, 4  ;;  %v1408_v19 = vsel %vm6560_vm6, %v1406_v63, %v1407_v1  ;;  %v2421_v63 = vrot.slane %v2419_v43, 5 }
  0xbf   : > { %486 = vst.msk [vmem:[#allocation2 + $0xa0] sm:$0xff] %vm328_vm0, %v436_v7  ;;  %v769_v7 = vshll.u32 %v525_v54, 16  ;;  %v1484_v33 = vunpack.c.l.b16 %v1408_v19  ;;  %v1276_v54 = vld [vmem:[%s6448_s26 + $0x74] sm:$0x1]  ;;  %v2418_v62 = vrot.slane %v2416_v42, 4  ;;  %v787_v1 = vrot.slane %v785_v41, 5 }
  0xc0   : > { %v418_v15 = vpop.f32.mrf.mxu1  ;;  %v759_v0 = vrot.slane %v758_v47, 4  ;;  %v754_v13 = vsel %vm6552_vm5, %v749_v60, %v6823_v27  ;;  %v6321_v47 = vld [vmem:[%s6448_s26 + $0x6c] sm:$0xff]  ;;  %v795_v24 = vrot.slane %v793_v9, 5 }
  0xc1   : > { %v456_v10 = vpop.f32.mrf.mxu3  ;;  %479 = vst.msk [vmem:[#allocation2 + $0x68] sm:$0xff] %vm328_vm0, %v418_v15  ;;  %v779_v15 = vshrl.u32 %v526_v3, 16  ;;  %v771_v23 = vrot.slane %v769_v7, 5  ;;  %v958_v27 = vunpack.c.l.b16 %v754_v13  ;;  %v5580_v7 = vrot.slane %v1274_v49, 9  ;;  %v1277_v49 = vld [vmem:[%s6448_s26 + $0x78] sm:$0xe] }
  0xc2   : > { %494 = vst.msk [vmem:[#allocation2 + $0xe0] sm:$0xff] %vm328_vm0, %v456_v10  ;;  %v2411_v10 = vshll.u32 %v5789_v57, 16  ;;  %v764_v17 = vsel %vm6552_vm5, %v759_v0, %v763_v61  ;;  %v529_v61 = vld [vmem:[%s6448_s26 + $0x7c] sm:$0xf] }
  0xc3   : > { %v398_v31 = vpop.f32.mrf.mxu0  ;;  %v959_v28 = vunpack.c.l.b16 %v764_v17  ;;  %v772_v36 = vor.u32 %v771_v23, %v768_v21  ;;  %v799_v14 = vshll.u32 %v529_v61, 16  ;;  %v2422_v17 = vor.u32 %v2421_v63, %v2418_v62 }
  0xc4   : > { %471 = vst.msk [vmem:[#allocation2 + $0x28] sm:$0xff] %vm328_vm0, %v398_v31  ;;  %v2413_v26 = vrot.slane %v2411_v10, 5  ;;  %v781_v31 = vrot.slane %v779_v15, 4  ;;  %v1413_v10 = vrot.slane %v1411_v55, 4  ;;  %v792_v23 = vrot.slane %v790_v8, 4  ;;  %v6322_v8 = vld [vmem:[%s6448_s26 + $0x78] sm:$0xff] }
  0xc5   : > { %v773_v60 = vrot.slane %v772_v36, 4  ;;  %v6915_v29 = vrot.slane %v799_v14, 5 }
  0xc6   : > { %v438_v40 = vpop.f32.mrf.mxu2  ;;  %v2414_v39 = vsel %vm6552_vm5, %v2409_v25, %v2413_v26  ;;  %v782_v48 = vor.u32 %v781_v31, %v6874_v30  ;;  %v1152_v25 = vld [vmem:[#allocation2 + $0x8] sm:$0xff]  ;;  %v530_v31 = vld [vmem:[%s6448_s26 + $0x80] sm:$0x1] }
  0xc7   : > { %487 = vst.msk [vmem:[#allocation2 + $0xa8] sm:$0xff] %vm328_vm0, %v438_v40  ;;  %v5791_v40 = vld [vmem:[%s6448_s26 + $0x7c] sm:$0xf]  ;;  %v2609_v57 = vunpack.c.l.b16 %v2414_v39  ;;  %v778_v21 = vsel %vm6552_vm5, %v773_v60, %v6874_v30  ;;  %v6366_v39 = vld [vmem:[%s8463_s1 + $0x108] sm:$0xff]  ;;  %v1279_v60 = vld [vmem:[%s6448_s26 + $0x80] sm:$0x1] }
  0xc8   : > { %v421_v52 = vpop.f32.mrf.mxu1  ;;  %v2425_v50 = vshll.u32 %v5791_v40, 16  ;;  %v2429_v51 = vshrl.u32 %v5791_v40, 16  ;;  %v960_v37 = vunpack.c.l.b16 %v778_v21  ;;  %v1278_v40 = vld [vmem:[%s6448_s26 + $0x7c] sm:$0xf]  ;;  %4887 = vmatpush.bf16.msra.mxu0 %v6366_v39 }
  0xc9   : > { %v458_v46 = vpop.f32.mrf.mxu3  ;;  %480 = vst.msk [vmem:[#allocation2 + $0x70] sm:$0xff] %vm328_vm0, %v421_v52  ;;  %v1507_v52 = vpack.c.b16 %v1484_v33, %v1483_v32  ;;  %v2632_v13 = vpack.c.b16 %v2609_v57, %v2608_v56  ;;  %v2423_v33 = vrot.slane %v2422_v17, 4  ;;  %v5795_v17 = vld [vmem:[%s6448_s26 + $0x8c] sm:$0x1] }
  0xca   : > { %495 = vst.msk [vmem:[#allocation2 + $0xe8] sm:$0xff] %vm328_vm0, %v458_v46  ;;  %v982_v46 = vpack.c.b16 %v959_v28, %v958_v27  ;;  %v6894_v3 = vrot.slane %v2425_v50, 5  ;;  %v2431_v4 = vrot.slane %v2429_v51, 4  ;;  %v1412_v27 = vsel %vm6560_vm6, %v5580_v7, %v1411_v55  ;;  %v5794_v55 = vld [vmem:[%s6448_s26 + $0x88] sm:$0xf]  ;;  %v1153_v7 = vld [vmem:[#allocation2 + $0x10] sm:$0xff] }
  0xcb   : > { %5562 = vmatmul.msk.bf16.gmra.mxu1 %vm328_vm0, %v981_v35  ;;  %5618 = vmatmul.msk.bf16.gmra.mxu2 %vm328_vm0, %v1506_v45  ;;  %v401_v5 = vpop.f32.mrf.mxu0  ;;  %v1151_v45 = vld [vmem:[#allocation2] sm:$0xff]  ;;  %v1485_v42 = vunpack.c.l.b16 %v1412_v27  ;;  %v1418_v50 = vrot.slane %v1278_v40, 5  ;;  %v2449_v62 = vshll.u32 %v5794_v55, 16 }
  0xcc   : > { %472 = vst.msk [vmem:[#allocation2 + $0x30] sm:$0xff] %vm328_vm0, %v401_v5  ;;  %v783_v5 = vrot.slane %v782_v48, 4  ;;  %v2432_v18 = vor.u32 %v2431_v4, %v6894_v3  ;;  %v2428_v51 = vsel %vm6552_vm5, %v2423_v33, %v6894_v3  ;;  %v531_v4 = vld [vmem:[%s6448_s26 + $0x84] sm:$0xf] }
  0xcd   : > { %v814_v21 = vshrl.u32 %v531_v4, 16 }
  0xce   : > { %5754 = vmatmul.msk.bf16.gmra.mxu3 %vm328_vm0, %v6320_v53  ;;  %v441_v11 = vpop.f32.mrf.mxu2  ;;  %5842 = vmatmul.msk.bf16.gmra.mxu0 %vm328_vm0, %v2631_v2  ;;  %v5792_v2 = vld [vmem:[%s6448_s26 + $0x80] sm:$0x1]  ;;  %v2433_v34 = vrot.slane %v2432_v18, 4  ;;  %v6941_v18 = vrot.slane %v2449_v62, 5 }
  0xcf   : > { %488 = vst.msk [vmem:[#allocation2 + $0xb0] sm:$0xff] %vm328_vm0, %v441_v11  ;;  %v1414_v11 = vrot.slane %v1276_v54, 5  ;;  %v2435_v19 = vshll.u32 %v5792_v2, 16  ;;  %v2610_v2 = vunpack.c.l.b16 %v2428_v51  ;;  %v816_v39 = vrot.slane %v814_v21, 4 }
  0xd0   : > { %v423_v22 = vpop.f32.mrf.mxu1 }
  0xd1   : > { %v461_v16 = vpop.f32.mrf.mxu3  ;;  %481 = vst.msk [vmem:[#allocation2 + $0x78] sm:$0xff] %vm328_vm0, %v423_v22  ;;  %v788_v22 = vsel %vm6552_vm5, %v783_v5, %v787_v1  ;;  %v1415_v28 = vsel %vm6560_vm6, %v1413_v10, %v1414_v11  ;;  %v5581_v1 = vrot.slane %v1277_v49, 9  ;;  %v1420_v10 = vrot.slane %v1418_v50, 4 }
  0xd2   : > { %496 = vst.msk [vmem:[#allocation2 + $0xf0] sm:$0xff] %vm328_vm0, %v461_v16  ;;  %v803_v16 = vshrl.u32 %v529_v61, 16  ;;  %v961_v38 = vunpack.c.l.b16 %v788_v22  ;;  %v1486_v43 = vunpack.c.l.b16 %v1415_v28  ;;  %v817_v22 = vshll.u32 %v531_v4, 16 }
  0xd3   : > { %v403_v35 = vpop.f32.mrf.mxu0 }
  0xd4   : > { %473 = vst.msk [vmem:[#allocation2 + $0x38] sm:$0xff] %vm328_vm0, %v403_v35  ;;  %v805_v32 = vrot.slane %v803_v16, 4  ;;  %v2437_v35 = vrot.slane %v2435_v19, 5  ;;  %v983_v54 = vpack.c.b16 %v961_v38, %v960_v37  ;;  %v1508_v58 = vpack.c.b16 %v1486_v43, %v1485_v42 }
  0xd5   : > { %v1421_v16 = vrot.slane %v1279_v60, 5  ;;  %v2453_v19 = vshrl.u32 %v5794_v55, 16  ;;  %v819_v40 = vrot.slane %v817_v22, 5  ;;  %v1282_v22 = vld [vmem:[%s6448_s26 + $0x8c] sm:$0x1] }
  0xd6   : > { %v443_v44 = vpop.f32.mrf.mxu2  ;;  %v806_v48 = vor.u32 %v805_v32, %v6915_v29 }
  0xd7   : > { %489 = vst.msk [vmem:[#allocation2 + $0xb8] sm:$0xff] %vm328_vm0, %v443_v44  ;;  %v796_v44 = vor.u32 %v795_v24, %v792_v23  ;;  %v2455_v27 = vrot.slane %v2453_v19, 4  ;;  %v1422_v37 = vsel %vm6560_vm6, %v1420_v10, %v1421_v16  ;;  %v534_v10 = vld [vmem:[%s6448_s26 + $0x90] sm:$0xf] }
  0xd8   : > { %v1071_v59 = vpop.f32.mrf.mxu1  ;;  %v807_v9 = vrot.slane %v806_v48, 4 }
  0xd9   : > { %v463_v53 = vpop.f32.mrf.mxu3  ;;  %v1183_v0 = vadd.f32 %v1151_v45, %v1071_v59  ;;  %v797_v59 = vrot.slane %v796_v44, 4  ;;  %v1154_v44 = vld [vmem:[#allocation2 + $0x18] sm:$0xff] }
  0xda   : > { %497 = vst.msk [vmem:[#allocation2 + $0xf8] sm:$0xff] %vm328_vm0, %v463_v53  ;;  %v5793_v53 = vld [vmem:[%s6448_s26 + $0x84] sm:$0xf] }
  0xdb   : > { %1215 = vst.msk [vmem:[#allocation2] sm:$0xff] %vm328_vm0, %v1183_v0  ;;  %5563 = vmatmul.msk.bf16.gmra.mxu1 %vm328_vm0, %v982_v46  ;;  %5619 = vmatmul.msk.bf16.gmra.mxu2 %vm328_vm0, %v1507_v52  ;;  %v6900_v15 = vpop.f32.mrf.mxu0  ;;  %v809_v46 = vshll.u32 %v530_v31, 16  ;;  %v2438_v52 = vsel %vm6552_vm5, %v2433_v34, %v2437_v35  ;;  %v2440_v56 = vshrl.u32 %v5793_v53, 16  ;;  %v2443_v61 = vshll.u32 %v5793_v53, 16 }
  0xdc   : > { %v2611_v3 = vunpack.c.l.b16 %v2438_v52  ;;  %v1419_v31 = vsel %vm6560_vm6, %v5581_v1, %v1418_v50  ;;  %v2459_v34 = vshll.u32 %v5795_v17, 16 }
  0xdd   : > { %v811_v0 = vrot.slane %v809_v46, 5  ;;  %v2442_v11 = vrot.slane %v2440_v56, 4  ;;  %v533_v46 = vld [vmem:[%s6448_s26 + $0x8c] sm:$0x1]  ;;  %v1487_v53 = vunpack.c.l.b16 %v1419_v31  ;;  %v820_v56 = vor.u32 %v819_v40, %v816_v39 }
  0xde   : > { %5755 = vmatmul.msk.bf16.gmra.mxu3 %vm328_vm0, %v6321_v47  ;;  %v1596_v20 = vpop.f32.mrf.mxu2  ;;  %5843 = vmatmul.msk.bf16.gmra.mxu0 %vm328_vm0, %v2632_v13  ;;  %v2445_v13 = vrot.slane %v2443_v61, 5  ;;  %v2633_v24 = vpack.c.b16 %v2611_v3, %v2610_v2  ;;  %v2461_v50 = vrot.slane %v2459_v34, 5  ;;  %v833_v61 = vshll.u32 %v533_v46, 16  ;;  %v5796_v3 = vld [vmem:[%s6448_s26 + $0x90] sm:$0xf] }
  0xdf   : > { %v2464_v17 = vshrl.u32 %v5796_v3, 16  ;;  %v841_v34 = vshll.u32 %v534_v10, 16 }
  0xe0   : > { %v1073_v30 = vpop.f32.mrf.mxu1  ;;  %v2446_v33 = vor.u32 %v2445_v13, %v2442_v11  ;;  %v835_v21 = vrot.slane %v833_v61, 5 }
  0xe1   : > { %v6908_v26 = vpop.f32.mrf.mxu3  ;;  %v1184_v36 = vadd.f32 %v1152_v25, %v1073_v30  ;;  %v532_v25 = vld [vmem:[%s6448_s26 + $0x88] sm:$0xf]  ;;  %v802_v30 = vsel %vm6552_vm5, %v797_v59, %v6915_v29  ;;  %v2456_v29 = vor.u32 %v2455_v27, %v6941_v18 }
  0xe2   : > { %v1676_v41 = vld [vmem:[#allocation2] sm:$0xff]  ;;  %v827_v42 = vshrl.u32 %v532_v25, 16  ;;  %v2447_v48 = vrot.slane %v2446_v33, 4  ;;  %v6972_v59 = vld [vmem:[%s6448_s26 + $0x88] sm:$0xf]  ;;  %v838_v33 = vshrl.u32 %v534_v10, 16 }
  0xe3   : > { %v1708_v45 = vadd.f32 %v1676_v41, %v1596_v20  ;;  %1216 = vst.msk [vmem:[#allocation2 + $0x8] sm:$0xff] %vm328_vm0, %v1184_v36  ;;  %v6923_v47 = vpop.f32.mrf.mxu0  ;;  %v812_v36 = vsel %vm6552_vm5, %v807_v9, %v811_v0  ;;  %v823_v41 = vshll.u32 %v532_v25, 16  ;;  %v2457_v49 = vrot.slane %v2456_v29, 4  ;;  %v535_v25 = vld [vmem:[%s6448_s26 + $0x94] sm:$0xf] }
  0xe4   : > { %v963_v52 = vunpack.c.l.b16 %v812_v36  ;;  %v2452_v1 = vsel %vm6552_vm5, %v2447_v48, %v6941_v18  ;;  %v1425_v9 = vrot.slane %v6972_v59, 5  ;;  %v2467_v18 = vshll.u32 %v5796_v3, 16 }
  0xe5   : > { %1740 = vst.msk [vmem:[#allocation2] sm:$0xff] %vm328_vm0, %v1708_v45  ;;  %v6966_v45 = vunpack.c.l.b16 %v802_v30  ;;  %v2462_v2 = vsel %vm6552_vm5, %v2457_v49, %v2461_v50  ;;  %v6323_v30 = vld [vmem:[%s6448_s26 + $0x84] sm:$0xff] }
  0xe6   : > { %v1598_v57 = vpop.f32.mrf.mxu2 }
  0xe8   : > { %v1076_v5 = vpop.f32.mrf.mxu1 }
  0xe9   : > { %v6936_v63 = vpop.f32.mrf.mxu3  ;;  %v1185_v14 = vadd.f32 %v1153_v7, %v1076_v5  ;;  %v984_v5 = vpack.c.b16 %v963_v52, %v6966_v45 }
  0xea   : > { %v1677_v20 = vld [vmem:[#allocation2 + $0x8] sm:$0xff] }
  0xeb   : > { %v1709_v23 = vadd.f32 %v1677_v20, %v1598_v57  ;;  %1217 = vst.msk [vmem:[#allocation2 + $0x10] sm:$0xff] %vm328_vm0, %v1185_v14  ;;  %5564 = vmatmul.msk.bf16.gmra.mxu1 %vm328_vm0, %v983_v54  ;;  %5620 = vmatmul.msk.bf16.gmra.mxu2 %vm328_vm0, %v1508_v58  ;;  %v6953_v32 = vpop.f32.mrf.mxu0  ;;  %v1488_v54 = vunpack.c.l.b16 %v1422_v37  ;;  %v6969_v57 = vrot.slane %v823_v41, 5  ;;  %v829_v58 = vrot.slane %v827_v42, 4 }
  0xec   : > { %v2055_v28 = vld [vmem:[#allocation2] sm:$0xff]  ;;  %v6991_v14 = vrot.slane %v820_v56, 4  ;;  %v2469_v37 = vrot.slane %v2467_v18, 5  ;;  %v1427_v41 = vrot.slane %v1425_v9, 4  ;;  %v1428_v42 = vrot.slane %v1282_v22, 5 }
  0xed   : > { %v2087_v35 = vadd.f32 %v2055_v28, %v6908_v26  ;;  %1741 = vst.msk [vmem:[#allocation2 + $0x8] sm:$0xff] %vm328_vm0, %v1709_v23  ;;  %v1509_v7 = vpack.c.b16 %v1488_v54, %v1487_v53  ;;  %v830_v16 = vor.u32 %v829_v58, %v6969_v57  ;;  %v2612_v23 = vunpack.c.l.b16 %v2452_v1  ;;  %v1155_v28 = vld [vmem:[#allocation2 + $0x20] sm:$0xff] }
  0xee   : > { %5756 = vmatmul.msk.bf16.gmra.mxu3 %vm328_vm0, %v6322_v8  ;;  %v1601_v38 = vpop.f32.mrf.mxu2  ;;  %5844 = vmatmul.msk.bf16.gmra.mxu0 %vm328_vm0, %v2633_v24  ;;  %v6987_v8 = vld [vmem:[%s6448_s26 + $0x84] sm:$0xe]  ;;  %v2613_v24 = vunpack.c.l.b16 %v2462_v2  ;;  %v843_v56 = vrot.slane %v841_v34, 5  ;;  %v826_v61 = vsel %vm6552_vm5, %v6991_v14, %v6969_v57  ;;  %v1429_v3 = vsel %vm6560_vm6, %v1427_v41, %v1428_v42  ;;  %v5799_v34 = vld [vmem:[%s6448_s26 + $0x9c] sm:$0xf] }
  0xef   : > { %2119 = vst.msk [vmem:[#allocation2] sm:$0xff] %vm328_vm0, %v2087_v35  ;;  %v5582_v31 = vrot.slane %v6987_v8, 9  ;;  %v2466_v35 = vrot.slane %v2464_v17, 4  ;;  %v831_v40 = vrot.slane %v830_v16, 4  ;;  %v6337_v17 = vld [vmem:[%s8463_s1 + $0xa0] sm:$0xff]  ;;  %v2488_v42 = vshrl.u32 %v5799_v34, 16 }
  0xf0   : > { %v1078_v26 = vpop.f32.mrf.mxu1  ;;  %v2634_v45 = vpack.c.b16 %v2613_v24, %v2612_v23  ;;  %3241 = vmatpush.bf16.msra.mxu1 %v6337_v17  ;;  %v5800_v41 = vld [vmem:[%s6448_s26 + $0xa0] sm:$0xf] }
  0xf1   : > { %v6963_v43 = vpop.f32.mrf.mxu3  ;;  %v1186_v51 = vadd.f32 %v1154_v44, %v1078_v26  ;;  %v847_v26 = vshll.u32 %v535_v25, 16  ;;  %v2470_v52 = vor.u32 %v2469_v37, %v2466_v35  ;;  %v1426_v2 = vsel %vm6560_vm6, %v5582_v31, %v1425_v9  ;;  %v1285_v37 = vld [vmem:[%s6448_s26 + $0x98] sm:$0x1] }
  0xf2   : > { %v1678_v55 = vld [vmem:[#allocation2 + $0x10] sm:$0xff]  ;;  %v964_v9 = vunpack.c.l.b16 %v826_v61 }
  0xf3   : > { %v1710_v60 = vadd.f32 %v1678_v55, %v1601_v38  ;;  %1218 = vst.msk [vmem:[#allocation2 + $0x18] sm:$0xff] %vm328_vm0, %v1186_v51  ;;  %v6975_v0 = vpop.f32.mrf.mxu0  ;;  %v851_v51 = vshrl.u32 %v535_v25, 16  ;;  %v840_v55 = vrot.slane %v838_v33, 4  ;;  %v7032_v57 = vrot.slane %v847_v26, 5 }
  0xf4   : > { %v2056_v62 = vld [vmem:[#allocation2 + $0x8] sm:$0xff]  ;;  %v2471_v10 = vrot.slane %v2470_v52, 4  ;;  %v2491_v26 = vshll.u32 %v5799_v34, 16  ;;  %v537_v52 = vld [vmem:[%s6448_s26 + $0x9c] sm:$0xf] }
  0xf5   : > { %v2088_v4 = vadd.f32 %v2056_v62, %v6936_v63  ;;  %1742 = vst.msk [vmem:[#allocation2 + $0x10] sm:$0xff] %vm328_vm0, %v1710_v60  ;;  %v5797_v63 = vld [vmem:[%s6448_s26 + $0x94] sm:$0xf]  ;;  %v836_v62 = vsel %vm6552_vm5, %v831_v40, %v835_v21  ;;  %v853_v8 = vrot.slane %v851_v51, 4  ;;  %v844_v16 = vor.u32 %v843_v56, %v840_v55 }
  0xf6   : > { %v2801_v11 = vld [vmem:[#allocation2] sm:$0xff]  ;;  %v1603_v13 = vpop.f32.mrf.mxu2  ;;  %v2473_v29 = vshll.u32 %v5797_v63, 16  ;;  %v2477_v38 = vshrl.u32 %v5797_v63, 16  ;;  %v965_v14 = vunpack.c.l.b16 %v836_v62  ;;  %v7036_v63 = vld [vmem:[%s6448_s26 + $0x94] sm:$0xf]  ;;  %v1490_v21 = vunpack.c.l.b16 %v1429_v3 }
  0xf7   : > { %2120 = vst.msk [vmem:[#allocation2 + $0x8] sm:$0xff] %vm328_vm0, %v2088_v4  ;;  %v2833_v19 = vadd.f32 %v2801_v11, %v6900_v15  ;;  %v5798_v15 = vld [vmem:[%s6448_s26 + $0x98] sm:$0x1]  ;;  %v1435_v56 = vrot.slane %v1285_v37, 5  ;;  %v2493_v61 = vrot.slane %v2491_v26, 5  ;;  %v2497_v62 = vshll.u32 %v5800_v41, 16 }
  0xf8   : > { %v1081_v27 = vpop.f32.mrf.mxu1  ;;  %v7008_v46 = vrot.slane %v2473_v29, 5  ;;  %v2479_v48 = vrot.slane %v2477_v38, 4  ;;  %v2483_v53 = vshll.u32 %v5798_v15, 16  ;;  %v536_v4 = vld [vmem:[%s6448_s26 + $0x98] sm:$0x1]  ;;  %v7055_v15 = vrot.slane %v844_v16, 4 }
  0xf9   : > { %v6997_v20 = vpop.f32.mrf.mxu3  ;;  %2865 = vst.msk [vmem:[#allocation2] sm:$0xff] %vm328_vm0, %v2833_v19  ;;  %v1187_v36 = vadd.f32 %v1155_v28, %v1081_v27  ;;  %v1489_v19 = vunpack.c.l.b16 %v1426_v2  ;;  %v857_v22 = vshll.u32 %v536_v4, 16  ;;  %v854_v27 = vor.u32 %v853_v8, %v7032_v57  ;;  %v1283_v28 = vld [vmem:[%s6448_s26 + $0x90] sm:$0xe]  ;;  %v538_v8 = vld [vmem:[%s6448_s26 + $0xa0] sm:$0xf] }
  0xfa   : > { %v1679_v39 = vld [vmem:[#allocation2 + $0x18] sm:$0xff]  ;;  %v2480_v58 = vor.u32 %v2479_v48, %v7008_v46  ;;  %v2476_v31 = vsel %vm6552_vm5, %v2471_v10, %v7008_v46  ;;  %v6324_v46 = vld [vmem:[%s6448_s26 + $0x90] sm:$0xff]  ;;  %v5583_v48 = vrot.slane %v1283_v28, 9  ;;  %v862_v3 = vshrl.u32 %v537_v52, 16 }
  0xfb   : > { %v1711_v44 = vadd.f32 %v1679_v39, %v1603_v13  ;;  %1219 = vst.msk [vmem:[#allocation2 + $0x20] sm:$0xff] %vm328_vm0, %v1187_v36  ;;  %5565 = vmatmul.msk.bf16.gmra.mxu1 %vm328_vm0, %v984_v5  ;;  %5621 = vmatmul.msk.bf16.gmra.mxu2 %vm328_vm0, %v1509_v7  ;;  %v7011_v50 = vpop.f32.mrf.mxu0  ;;  %v1156_v7 = vld [vmem:[#allocation2 + $0x28] sm:$0xff]  ;;  %v985_v36 = vpack.c.b16 %v965_v14, %v964_v9  ;;  %v7058_v40 = vrot.slane %v857_v22, 5  ;;  %v865_v4 = vshll.u32 %v537_v52, 16 }
  0xfc   : > { %v2057_v49 = vld [vmem:[#allocation2 + $0x10] sm:$0xff]  ;;  %v2481_v11 = vrot.slane %v2480_v58, 4  ;;  %v1510_v39 = vpack.c.b16 %v1490_v21, %v1489_v19  ;;  %v5801_v58 = vld [vmem:[%s6448_s26 + $0xa4] sm:$0x1]  ;;  %v7076_v10 = vrot.slane %v2497_v62, 5  ;;  %v875_v28 = vshrl.u32 %v538_v8, 16 }
  0xfd   : > { %v2089_v54 = vadd.f32 %v2057_v49, %v6963_v43  ;;  %1743 = vst.msk [vmem:[#allocation2 + $0x18] sm:$0xff] %vm328_vm0, %v1711_v44  ;;  %v1157_v44 = vld [vmem:[#allocation2 + $0x30] sm:$0xff]  ;;  %v2614_v49 = vunpack.c.l.b16 %v2476_v31 }
  0xfe   : > { %5757 = vmatmul.msk.bf16.gmra.mxu3 %vm328_vm0, %v6323_v30  ;;  %v2802_v59 = vld [vmem:[#allocation2 + $0x8] sm:$0xff]  ;;  %v1606_v60 = vpop.f32.mrf.mxu2  ;;  %5845 = vmatmul.msk.bf16.gmra.mxu0 %vm328_vm0, %v2634_v45  ;;  %v1432_v30 = vrot.slane %v7036_v63, 5  ;;  %v2507_v63 = vshll.u32 %v5801_v58, 16 }
  0xff   : > { %2121 = vst.msk [vmem:[#allocation2 + $0x10] sm:$0xff] %vm328_vm0, %v2089_v54  ;;  %v2834_v43 = vadd.f32 %v2802_v59, %v6923_v47  ;;  %v2485_v47 = vrot.slane %v2483_v53, 5  ;;  %v855_v54 = vrot.slane %v854_v27, 4  ;;  %v2490_v59 = vrot.slane %v2488_v42, 4 }
 0x100   : > { %v1083_v5 = vpop.f32.mrf.mxu1  ;;  %v1434_v55 = vrot.slane %v1432_v30, 4  ;;  %v1433_v9 = vsel %vm6560_vm6, %v5583_v48, %v1432_v30  ;;  %v871_v27 = vshll.u32 %v538_v8, 16  ;;  %v2509_v37 = vrot.slane %v2507_v63, 5  ;;  %v6325_v63 = vld [vmem:[%s6448_s26 + $0x9c] sm:$0xff] }
 0x101   : > { %v7024_v1 = vpop.f32.mrf.mxu3  ;;  %2866 = vst.msk [vmem:[#allocation2 + $0x8] sm:$0xff] %vm328_vm0, %v2834_v43  ;;  %v1188_v13 = vadd.f32 %v1156_v7, %v1083_v5  ;;  %v2486_v33 = vsel %vm6552_vm5, %v2481_v11, %v2485_v47  ;;  %v2501_v43 = vshrl.u32 %v5800_v41, 16  ;;  %v2494_v16 = vor.u32 %v2493_v61, %v2490_v59  ;;  %v7125_v59 = vld [vmem:[%s6448_s26 + $0x9c] sm:$0xe] }
 0x102   : > { %v1680_v18 = vld [vmem:[#allocation2 + $0x20] sm:$0xff]  ;;  %v2615_v51 = vunpack.c.l.b16 %v2486_v33  ;;  %v1158_v33 = vld [vmem:[#allocation2 + $0x38] sm:$0xff]  ;;  %v7107_v26 = vrot.slane %v871_v27, 5 }
 0x103   : > { %v1712_v23 = vadd.f32 %v1680_v18, %v1606_v60  ;;  %1220 = vst.msk [vmem:[#allocation2 + $0x28] sm:$0xff] %vm328_vm0, %v1188_v13  ;;  %v7042_v25 = vpop.f32.mrf.mxu0  ;;  %v2503_v11 = vrot.slane %v2501_v43, 4  ;;  %v850_v13 = vsel %vm6552_vm5, %v7055_v15, %v7032_v57  ;;  %v860_v18 = vsel %vm6552_vm5, %v855_v54, %v7058_v40  ;;  %v6361_v40 = vld [vmem:[%s8463_s1 + $0xe0] sm:$0xff]  ;;  %v5802_v54 = vld [vmem:[%s6448_s26 + $0xa8] sm:$0xf] }
 0x104   : > { %v2058_v24 = vld [vmem:[#allocation2 + $0x18] sm:$0xff]  ;;  %v2635_v7 = vpack.c.b16 %v2615_v51, %v2614_v49  ;;  %v1436_v57 = vsel %vm6560_vm6, %v1434_v55, %v1435_v56  ;;  %v7100_v34 = vunpack.c.l.b16 %v850_v13  ;;  %4366 = vmatpush.bf16.msra.mxu3 %v6361_v40  ;;  %v541_v13 = vld [vmem:[%s6448_s26 + $0xac] sm:$0xf] }
 0x105   : > { %v2090_v35 = vadd.f32 %v2058_v24, %v6997_v20  ;;  %1744 = vst.msk [vmem:[#allocation2 + $0x20] sm:$0xff] %vm328_vm0, %v1712_v23  ;;  %v2504_v19 = vor.u32 %v2503_v11, %v7076_v10  ;;  %v864_v23 = vrot.slane %v862_v3, 4  ;;  %v867_v24 = vrot.slane %v865_v4, 5 }
 0x106   : > { %v2803_v29 = vld [vmem:[#allocation2 + $0x10] sm:$0xff]  ;;  %v1608_v38 = vpop.f32.mrf.mxu2  ;;  %v2512_v3 = vshrl.u32 %v5802_v54, 16  ;;  %v2515_v4 = vshll.u32 %v5802_v54, 16 }
 0x107   : > { %2122 = vst.msk [vmem:[#allocation2 + $0x18] sm:$0xff] %vm328_vm0, %v2090_v35  ;;  %v2835_v20 = vadd.f32 %v2803_v29, %v6953_v32  ;;  %v6357_v32 = vld [vmem:[%s8463_s1 + $0xc0] sm:$0xff]  ;;  %v2505_v15 = vrot.slane %v2504_v19, 4  ;;  %v868_v42 = vor.u32 %v867_v24, %v864_v23 }
 0x108   : > { %v1086_v53 = vpop.f32.mrf.mxu1  ;;  %3620 = vmatpush.bf16.msra.mxu2 %v6357_v32  ;;  %v539_v35 = vld [vmem:[%s6448_s26 + $0xa4] sm:$0x1]  ;;  %v540_v32 = vld [vmem:[%s6448_s26 + $0xa8] sm:$0xf]  ;;  %v2514_v19 = vrot.slane %v2512_v3, 4 }
 0x109   : > { %v7063_v45 = vpop.f32.mrf.mxu3  ;;  %2867 = vst.msk [vmem:[#allocation2 + $0x10] sm:$0xff] %vm328_vm0, %v2835_v20  ;;  %v1189_v60 = vadd.f32 %v1157_v44, %v1086_v53  ;;  %v877_v20 = vrot.slane %v875_v28, 4  ;;  %v7110_v44 = vld [vmem:[%s6448_s26 + $0xa0] sm:$0xf]  ;;  %v881_v48 = vshll.u32 %v539_v35, 16  ;;  %v2510_v53 = vsel %vm6552_vm5, %v2505_v15, %v2509_v37 }
 0x10a   : > { %v1681_v2 = vld [vmem:[#allocation2 + $0x28] sm:$0xff]  ;;  %v7129_v43 = vrot.slane %v868_v42, 4 }
 0x10b   : > { %v1713_v5 = vadd.f32 %v1681_v2, %v1608_v38  ;;  %1221 = vst.msk [vmem:[#allocation2 + $0x30] sm:$0xff] %vm328_vm0, %v1189_v60  ;;  %5566 = vmatmul.msk.bf16.gmra.mxu1 %vm328_vm0, %v985_v36  ;;  %5622 = vmatmul.msk.bf16.gmra.mxu2 %vm328_vm0, %v1510_v39  ;;  %v7085_v14 = vpop.f32.mrf.mxu0  ;;  %v2495_v36 = vrot.slane %v2494_v16, 4  ;;  %v967_v38 = vunpack.c.l.b16 %v860_v18  ;;  %v1491_v39 = vunpack.c.l.b16 %v1433_v9  ;;  %v1159_v16 = vld [vmem:[#allocation2 + $0x40] sm:$0xff]  ;;  %v1290_v3 = vld [vmem:[%s6448_s26 + $0xac] sm:$0xf] }
 0x10c   : > { %v2059_v47 = vld [vmem:[#allocation2 + $0x20] sm:$0xff]  ;;  %v1439_v60 = vrot.slane %v7110_v44, 5  ;;  %v878_v2 = vor.u32 %v877_v20, %v7107_v26  ;;  %v883_v8 = vrot.slane %v881_v48, 5  ;;  %v886_v18 = vshrl.u32 %v540_v32, 16 }
 0x10d   : > { %v2091_v17 = vadd.f32 %v2059_v47, %v7024_v1  ;;  %1745 = vst.msk [vmem:[#allocation2 + $0x28] sm:$0xff] %vm328_vm0, %v1713_v5  ;;  %v2500_v52 = vsel %vm6552_vm5, %v2495_v36, %v7076_v10  ;;  %v986_v56 = vpack.c.b16 %v967_v38, %v7100_v34  ;;  %v1288_v10 = vld [vmem:[%s6448_s26 + $0xa4] sm:$0x1]  ;;  %v2617_v47 = vunpack.c.l.b16 %v2510_v53 }
 0x10e   : > { %5758 = vmatmul.msk.bf16.gmra.mxu3 %vm328_vm0, %v6324_v46  ;;  %v2804_v21 = vld [vmem:[#allocation2 + $0x18] sm:$0xff]  ;;  %v1611_v22 = vpop.f32.mrf.mxu2  ;;  %5846 = vmatmul.msk.bf16.gmra.mxu0 %vm328_vm0, %v2635_v7  ;;  %v2616_v11 = vunpack.c.l.b16 %v2500_v52  ;;  %v879_v28 = vrot.slane %v878_v2, 4  ;;  %v899_v38 = vshrl.u32 %v541_v13, 16  ;;  %v874_v48 = vsel %vm6552_vm5, %v7129_v43, %v7107_v26  ;;  %v1160_v52 = vld [vmem:[#allocation2 + $0x48] sm:$0xff]  ;;  %v6365_v2 = vld [vmem:[%s8463_s1 + $0x100] sm:$0xff] }
 0x10f   : > { %2123 = vst.msk [vmem:[#allocation2 + $0x20] sm:$0xff] %vm328_vm0, %v2091_v17  ;;  %v2836_v1 = vadd.f32 %v2804_v21, %v6975_v0  ;;  %v1492_v0 = vunpack.c.l.b16 %v1436_v57  ;;  %v5584_v17 = vrot.slane %v7125_v59, 9  ;;  %v889_v57 = vshll.u32 %v540_v32, 16  ;;  %4888 = vmatpush.bf16.msra.mxu0 %v6365_v2 }
 0x110   : > { %v1088_v31 = vpop.f32.mrf.mxu1  ;;  %v2636_v35 = vpack.c.b16 %v2617_v47, %v2616_v11  ;;  %v901_v59 = vrot.slane %v899_v38, 4  ;;  %v968_v43 = vunpack.c.l.b16 %v874_v48  ;;  %v1289_v47 = vld [vmem:[%s6448_s26 + $0xa8] sm:$0xe]  ;;  %v1161_v38 = vld [vmem:[#allocation2 + $0x50] sm:$0xff] }
 0x111   : > { %v7097_v30 = vpop.f32.mrf.mxu3  ;;  %2868 = vst.msk [vmem:[#allocation2 + $0x18] sm:$0xff] %vm328_vm0, %v2836_v1  ;;  %v1190_v29 = vadd.f32 %v1158_v33, %v1088_v31  ;;  %v1511_v58 = vpack.c.b16 %v1492_v0, %v1491_v39  ;;  %v1441_v1 = vrot.slane %v1439_v60, 4  ;;  %v1442_v31 = vrot.slane %v1288_v10, 5 }
 0x112   : > { %v1682_v41 = vld [vmem:[#allocation2 + $0x30] sm:$0xff]  ;;  %v895_v33 = vshll.u32 %v541_v13, 16  ;;  %v891_v42 = vrot.slane %v889_v57, 5  ;;  %v1440_v54 = vsel %vm6560_vm6, %v5584_v17, %v1439_v60 }
 0x113   : > { %v1714_v46 = vadd.f32 %v1682_v41, %v1611_v22  ;;  %1222 = vst.msk [vmem:[#allocation2 + $0x38] sm:$0xff] %vm328_vm0, %v1190_v29  ;;  %v7113_v51 = vpop.f32.mrf.mxu0  ;;  %v2517_v22 = vrot.slane %v2515_v4, 5  ;;  %v888_v41 = vrot.slane %v886_v18, 4  ;;  %v5805_v57 = vld [vmem:[%s6448_s26 + $0xb4] sm:$0xf] }
 0x114   : > { %v2060_v49 = vld [vmem:[#allocation2 + $0x28] sm:$0xff]  ;;  %v7169_v26 = vrot.slane %v895_v33, 5  ;;  %v2539_v33 = vshll.u32 %v5805_v57, 16 }
 0x115   : > { %v2092_v55 = vadd.f32 %v2060_v49, %v7063_v45  ;;  %1746 = vst.msk [vmem:[#allocation2 + $0x30] sm:$0xff] %vm328_vm0, %v1714_v46  ;;  %v5803_v45 = vld [vmem:[%s6448_s26 + $0xac] sm:$0xf]  ;;  %v2518_v39 = vor.u32 %v2517_v22, %v2514_v19  ;;  %v884_v49 = vsel %vm6552_vm5, %v879_v28, %v883_v8  ;;  %v1291_v22 = vld [vmem:[%s6448_s26 + $0xb0] sm:$0x1]  ;;  %v5585_v28 = vrot.slane %v1289_v47, 9 }
 0x116   : > { %v2805_v61 = vld [vmem:[#allocation2 + $0x20] sm:$0xff]  ;;  %v1613_v62 = vpop.f32.mrf.mxu2  ;;  %v2521_v23 = vshll.u32 %v5803_v45, 16  ;;  %v2525_v24 = vshrl.u32 %v5803_v45, 16  ;;  %v969_v60 = vunpack.c.l.b16 %v884_v49  ;;  %v892_v45 = vor.u32 %v891_v42, %v888_v41 }
 0x117   : > { %2124 = vst.msk [vmem:[#allocation2 + $0x28] sm:$0xff] %vm328_vm0, %v2092_v55  ;;  %v2837_v5 = vadd.f32 %v2805_v61, %v7011_v50  ;;  %v5804_v50 = vld [vmem:[%s6448_s26 + $0xb0] sm:$0x1]  ;;  %v1443_v55 = vsel %vm6560_vm6, %v1441_v1, %v1442_v31  ;;  %v2519_v32 = vrot.slane %v2518_v39, 4  ;;  %v5806_v1 = vld [vmem:[%s6448_s26 + $0xb8] sm:$0xf] }
 0x118   : > { %v1091_v9 = vpop.f32.mrf.mxu1  ;;  %v7146_v36 = vrot.slane %v2521_v23, 5  ;;  %v2527_v15 = vrot.slane %v2525_v24, 4  ;;  %v2531_v0 = vshll.u32 %v5804_v50, 16  ;;  %v1494_v8 = vunpack.c.l.b16 %v1443_v55  ;;  %v6326_v39 = vld [vmem:[%s6448_s26 + $0xa8] sm:$0xff] }
 0x119   : > { %v7135_v7 = vpop.f32.mrf.mxu3  ;;  %2869 = vst.msk [vmem:[#allocation2 + $0x20] sm:$0xff] %vm328_vm0, %v2837_v5  ;;  %v1191_v21 = vadd.f32 %v1159_v16, %v1091_v9  ;;  %v1493_v5 = vunpack.c.l.b16 %v1440_v54  ;;  %v902_v16 = vor.u32 %v901_v59, %v7169_v26  ;;  %v893_v50 = vrot.slane %v892_v45, 4  ;;  %v543_v54 = vld [vmem:[%s6448_s26 + $0xb4] sm:$0xf] }
 0x11a   : > { %v1683_v27 = vld [vmem:[#allocation2 + $0x38] sm:$0xff]  ;;  %v2528_v20 = vor.u32 %v2527_v15, %v7146_v36  ;;  %v2524_v17 = vsel %vm6552_vm5, %v2519_v32, %v7146_v36  ;;  %v2536_v31 = vshrl.u32 %v5805_v57, 16  ;;  %v1449_v41 = vrot.slane %v1291_v22, 5 }
 0x11b   : > { %v1715_v34 = vadd.f32 %v1683_v27, %v1613_v62  ;;  %1223 = vst.msk [vmem:[#allocation2 + $0x40] sm:$0xff] %vm328_vm0, %v1191_v21  ;;  %5567 = vmatmul.msk.bf16.gmra.mxu1 %vm328_vm0, %v986_v56  ;;  %5623 = vmatmul.msk.bf16.gmra.mxu2 %vm328_vm0, %v1511_v58  ;;  %v7149_v29 = vpop.f32.mrf.mxu0  ;;  %v542_v58 = vld [vmem:[%s6448_s26 + $0xb0] sm:$0x1]  ;;  %v987_v21 = vpack.c.b16 %v969_v60, %v968_v43  ;;  %v2618_v36 = vunpack.c.l.b16 %v2524_v17  ;;  %v2549_v48 = vshrl.u32 %v5806_v1, 16 }
 0x11c   : > { %v2061_v37 = vld [vmem:[#allocation2 + $0x30] sm:$0xff]  ;;  %v2529_v61 = vrot.slane %v2528_v20, 4  ;;  %v905_v11 = vshll.u32 %v542_v58, 16  ;;  %v1512_v27 = vpack.c.b16 %v1494_v8, %v1493_v5  ;;  %v2538_v42 = vrot.slane %v2536_v31, 4  ;;  %v544_v58 = vld [vmem:[%s6448_s26 + $0xb8] sm:$0xf] }
 0x11d   : > { %v2093_v40 = vadd.f32 %v2061_v37, %v7097_v30  ;;  %1747 = vst.msk [vmem:[#allocation2 + $0x38] sm:$0xff] %vm328_vm0, %v1715_v34  ;;  %v2551_v32 = vrot.slane %v2549_v48, 4  ;;  %v910_v45 = vshrl.u32 %v543_v54, 16  ;;  %v545_v31 = vld [vmem:[%s6448_s26 + $0xbc] sm:$0x1] }
 0x11e   : > { %5759 = vmatmul.msk.bf16.gmra.mxu3 %vm328_vm0, %v6325_v63  ;;  %v2806_v44 = vld [vmem:[#allocation2 + $0x28] sm:$0xff]  ;;  %v1616_v46 = vpop.f32.mrf.mxu2  ;;  %5847 = vmatmul.msk.bf16.gmra.mxu0 %vm328_vm0, %v2636_v35  ;;  %v1446_v63 = vrot.slane %v1290_v3, 5  ;;  %v913_v3 = vshll.u32 %v543_v54, 16  ;;  %v929_v48 = vshll.u32 %v545_v31, 16 }
 0x11f   : > { %2125 = vst.msk [vmem:[#allocation2 + $0x30] sm:$0xff] %vm328_vm0, %v2093_v40  ;;  %v2838_v30 = vadd.f32 %v2806_v44, %v7042_v25  ;;  %v2533_v25 = vrot.slane %v2531_v0, 5  ;;  %v903_v0 = vrot.slane %v902_v16, 4  ;;  %v5807_v44 = vld [vmem:[%s6448_s26 + $0xbc] sm:$0x1]  ;;  %v912_v22 = vrot.slane %v910_v45, 4 }
 0x120   : > { %v1093_v56 = vpop.f32.mrf.mxu1  ;;  %v1448_v40 = vrot.slane %v1446_v63, 4  ;;  %v2555_v60 = vshll.u32 %v5807_v44, 16 }
 0x121   : > { %v7162_v53 = vpop.f32.mrf.mxu3  ;;  %2870 = vst.msk [vmem:[#allocation2 + $0x28] sm:$0xff] %vm328_vm0, %v2838_v30  ;;  %v1192_v62 = vadd.f32 %v1160_v52, %v1093_v56  ;;  %v2534_v18 = vsel %vm6552_vm5, %v2529_v61, %v2533_v25  ;;  %v898_v30 = vsel %vm6552_vm5, %v893_v50, %v7169_v26  ;;  %v1447_v52 = vsel %vm6560_vm6, %v5585_v28, %v1446_v63 }
 0x122   : > { %v1684_v4 = vld [vmem:[#allocation2 + $0x40] sm:$0xff]  ;;  %v2619_v15 = vunpack.c.l.b16 %v2534_v18  ;;  %v1450_v25 = vsel %vm6560_vm6, %v1448_v40, %v1449_v41  ;;  %v7225_v16 = vunpack.c.l.b16 %v898_v30  ;;  %v1162_v18 = vld [vmem:[#allocation2 + $0x58] sm:$0xff]  ;;  %v2557_v50 = vrot.slane %v2555_v60, 5 }
 0x123   : > { %v1716_v10 = vadd.f32 %v1684_v4, %v1616_v46  ;;  %1224 = vst.msk [vmem:[#allocation2 + $0x48] sm:$0xff] %vm328_vm0, %v1192_v62  ;;  %v7179_v9 = vpop.f32.mrf.mxu0  ;;  %v2541_v46 = vrot.slane %v2539_v33, 5  ;;  %v1496_v57 = vunpack.c.l.b16 %v1450_v25  ;;  %v5809_v41 = vld [vmem:[%s6448_s26 + $0xc4] sm:$0xf] }
 0x124   : > { %v2062_v13 = vld [vmem:[#allocation2 + $0x38] sm:$0xff]  ;;  %v2637_v56 = vpack.c.b16 %v2619_v15, %v2618_v36  ;;  %v2573_v30 = vshrl.u32 %v5809_v41, 16 }
 0x125   : > { %v2094_v19 = vadd.f32 %v2062_v13, %v7135_v7  ;;  %1748 = vst.msk [vmem:[#allocation2 + $0x40] sm:$0xff] %vm328_vm0, %v1716_v10  ;;  %v907_v7 = vrot.slane %v905_v11, 5  ;;  %v2542_v43 = vor.u32 %v2541_v46, %v2538_v42  ;;  %v919_v10 = vshll.u32 %v544_v58, 16  ;;  %v1293_v15 = vld [vmem:[%s6448_s26 + $0xb8] sm:$0xf] }
 0x126   : > { %v2807_v23 = vld [vmem:[#allocation2 + $0x30] sm:$0xff]  ;;  %v1618_v24 = vpop.f32.mrf.mxu2  ;;  %v923_v11 = vshrl.u32 %v544_v58, 16  ;;  %v1453_v58 = vrot.slane %v1293_v15, 5 }
 0x127   : > { %2126 = vst.msk [vmem:[#allocation2 + $0x38] sm:$0xff] %vm328_vm0, %v2094_v19  ;;  %v2839_v34 = vadd.f32 %v2807_v23, %v7085_v14  ;;  %v2545_v14 = vshll.u32 %v5806_v1, 16  ;;  %v908_v26 = vsel %vm6552_vm5, %v903_v0, %v907_v7  ;;  %v2543_v19 = vrot.slane %v2542_v43, 4 }
 0x128   : > { %v1096_v37 = vpop.f32.mrf.mxu1  ;;  %v7227_v63 = vunpack.c.l.b16 %v908_v26  ;;  %v915_v23 = vrot.slane %v913_v3, 5  ;;  %v925_v28 = vrot.slane %v923_v11, 4  ;;  %v1294_v26 = vld [vmem:[%s6448_s26 + $0xbc] sm:$0x1] }
 0x129   : > { %v7194_v35 = vpop.f32.mrf.mxu3  ;;  %2871 = vst.msk [vmem:[#allocation2 + $0x30] sm:$0xff] %vm328_vm0, %v2839_v34  ;;  %v1193_v20 = vadd.f32 %v1161_v38, %v1096_v37  ;;  %v7209_v59 = vrot.slane %v2545_v14, 5 }
 0x12a   : > { %v1685_v49 = vld [vmem:[#allocation2 + $0x48] sm:$0xff]  ;;  %v988_v34 = vpack.c.b16 %v7227_v63, %v7225_v16  ;;  %v916_v40 = vor.u32 %v915_v23, %v912_v22  ;;  %v1456_v16 = vrot.slane %v1294_v26, 5 }
 0x12b   : > { %v1717_v55 = vadd.f32 %v1685_v49, %v1618_v24  ;;  %1225 = vst.msk [vmem:[#allocation2 + $0x50] sm:$0xff] %vm328_vm0, %v1193_v20  ;;  %5568 = vmatmul.msk.bf16.gmra.mxu1 %vm328_vm0, %v987_v21  ;;  %5624 = vmatmul.msk.bf16.gmra.mxu2 %vm328_vm0, %v1512_v27  ;;  %v7216_v62 = vpop.f32.mrf.mxu0  ;;  %v2552_v4 = vor.u32 %v2551_v32, %v7209_v59  ;;  %v7231_v27 = vrot.slane %v919_v10, 5  ;;  %v2569_v49 = vshll.u32 %v5809_v41, 16 }
 0x12c   : > { %v2063_v61 = vld [vmem:[#allocation2 + $0x40] sm:$0xff]  ;;  %v2548_v37 = vsel %vm6552_vm5, %v2543_v19, %v7209_v59 }
 0x12d   : > { %v2095_v2 = vadd.f32 %v2063_v61, %v7162_v53  ;;  %1749 = vst.msk [vmem:[#allocation2 + $0x48] sm:$0xff] %vm328_vm0, %v1717_v55  ;;  %v1495_v53 = vunpack.c.l.b16 %v1447_v52  ;;  %v2553_v21 = vrot.slane %v2552_v4, 4  ;;  %v926_v14 = vor.u32 %v925_v28, %v7231_v27  ;;  %v1163_v52 = vld [vmem:[#allocation2 + $0x60] sm:$0xff]  ;;  %v6327_v55 = vld [vmem:[%s6448_s26 + $0xb4] sm:$0xff]  ;;  %v6092_v28 = vld [vmem:[%s6448_s26 + $0x1c] sm:$0xf] }
 0x12e   : > { %5760 = vmatmul.msk.bf16.gmra.mxu3 %vm328_vm0, %v6326_v39  ;;  %v2808_v5 = vld [vmem:[#allocation2 + $0x38] sm:$0xff]  ;;  %v1621_v8 = vpop.f32.mrf.mxu2  ;;  %5848 = vmatmul.msk.bf16.gmra.mxu0 %vm328_vm0, %v2637_v56  ;;  %v5808_v39 = vld [vmem:[%s6448_s26 + $0xc0] sm:$0xf]  ;;  %v1292_v56 = vld [vmem:[%s6448_s26 + $0xb4] sm:$0xe]  ;;  %v2620_v59 = vunpack.c.l.b16 %v2548_v37  ;;  %v7257_v60 = vrot.slane %v2569_v49, 5 }
 0x12f   : > { %2127 = vst.msk [vmem:[#allocation2 + $0x40] sm:$0xff] %vm328_vm0, %v2095_v2  ;;  %v2840_v47 = vadd.f32 %v2808_v5, %v7113_v51  ;;  %v1513_v7 = vpack.c.b16 %v1496_v57, %v1495_v53  ;;  %v2558_v38 = vsel %vm6552_vm5, %v2553_v21, %v2557_v50  ;;  %v2560_v42 = vshrl.u32 %v5808_v39, 16  ;;  %v6091_v21 = vld [vmem:[%s6448_s26 + $0x18] sm:$0xf] }
 0x130   : > { %v1098_v17 = vpop.f32.mrf.mxu1  ;;  %v2563_v20 = vshll.u32 %v5808_v39, 16  ;;  %v2621_v32 = vunpack.c.l.b16 %v2558_v38  ;;  %v2575_v2 = vrot.slane %v2573_v30, 4  ;;  %v917_v4 = vrot.slane %v916_v40, 4  ;;  %v5852_v30 = vld [vmem:[%s6448_s26 + $0x10] sm:$0xf] }
 0x131   : > { %v7223_v13 = vpop.f32.mrf.mxu3  ;;  %2872 = vst.msk [vmem:[#allocation2 + $0x38] sm:$0xff] %vm328_vm0, %v2840_v47  ;;  %v1194_v51 = vadd.f32 %v1162_v18, %v1098_v17  ;;  %v2562_v25 = vrot.slane %v2560_v42, 4  ;;  %v927_v5 = vrot.slane %v926_v14, 4  ;;  %v5586_v10 = vrot.slane %v1292_v56, 9 }
 0x132   : > { %v1686_v24 = vld [vmem:[#allocation2 + $0x50] sm:$0xff]  ;;  %v2565_v43 = vrot.slane %v2563_v20, 5  ;;  %v1455_v47 = vrot.slane %v1453_v58, 4  ;;  %v2638_v63 = vpack.c.b16 %v2621_v32, %v2620_v59  ;;  %v2576_v57 = vor.u32 %v2575_v2, %v7257_v60  ;;  %v6093_v59 = vld [vmem:[%s6448_s26 + $0x20] sm:$0x1] }
 0x133   : > { %v1718_v1 = vadd.f32 %v1686_v24, %v1621_v8  ;;  %1226 = vst.msk [vmem:[#allocation2 + $0x58] sm:$0xff] %vm328_vm0, %v1194_v51  ;;  %v7237_v36 = vpop.f32.mrf.mxu0  ;;  %v931_v8 = vrot.slane %v929_v48, 5  ;;  %v922_v23 = vsel %vm6552_vm5, %v917_v4, %v7231_v27  ;;  %v1454_v24 = vsel %vm6560_vm6, %v5586_v10, %v1453_v58  ;;  %v6328_v10 = vld [vmem:[%s6448_s26 + $0xc0] sm:$0xff] }
 0x134   : > { %v2064_v33 = vld [vmem:[#allocation2 + $0x48] sm:$0xff]  ;;  %v2566_v18 = vor.u32 %v2565_v43, %v2562_v25  ;;  %v2577_v37 = vrot.slane %v2576_v57, 4  ;;  %v3850_v39 = vshll.u32 %v6091_v21, 16  ;;  %v3860_v40 = vshrl.u32 %v6092_v28, 16 }
 0x135   : > { %v2096_v0 = vadd.f32 %v2064_v33, %v7194_v35  ;;  %1750 = vst.msk [vmem:[#allocation2 + $0x50] sm:$0xff] %vm328_vm0, %v1718_v1  ;;  %v1457_v33 = vsel %vm6560_vm6, %v1455_v47, %v1456_v16  ;;  %v972_v42 = vunpack.c.l.b16 %v922_v23  ;;  %v3866_v16 = vshll.u32 %v6093_v59, 16  ;;  %v5855_v59 = vld [vmem:[%s6448_s26 + $0x1c] sm:$0xf] }
 0x136   : > { %v2809_v44 = vld [vmem:[#allocation2 + $0x40] sm:$0xff]  ;;  %v1623_v46 = vpop.f32.mrf.mxu2  ;;  %v2567_v15 = vrot.slane %v2566_v18, 4  ;;  %v3852_v56 = vrot.slane %v3850_v39, 5  ;;  %v6180_v18 = vld [vmem:[%s6448_s26 + $0x1c] sm:$0xf] }
 0x137   : > { %2128 = vst.msk [vmem:[#allocation2 + $0x48] sm:$0xff] %vm328_vm0, %v2096_v0  ;;  %v2841_v35 = vadd.f32 %v2809_v44, %v7149_v29  ;;  %v5810_v29 = vld [vmem:[%s6448_s26 + $0xc8] sm:$0x1]  ;;  %v3856_v0 = vshll.u32 %v6092_v28, 16  ;;  %v1497_v44 = vunpack.c.l.b16 %v1454_v24 }
 0x138   : > { %v1101_v61 = vpop.f32.mrf.mxu1  ;;  %v2579_v19 = vshll.u32 %v5810_v29, 16  ;;  %v2995_v29 = vrot.slane %v5852_v30, 5 }
 0x139   : > { %v7252_v54 = vpop.f32.mrf.mxu3  ;;  %2873 = vst.msk [vmem:[#allocation2 + $0x40] sm:$0xff] %vm328_vm0, %v2841_v35  ;;  %v1195_v45 = vadd.f32 %v1163_v52, %v1101_v61  ;;  %v2572_v35 = vsel %vm6552_vm5, %v2567_v15, %v7257_v60  ;;  %v7299_v32 = vrot.slane %v3856_v0, 5  ;;  %v3862_v61 = vrot.slane %v3860_v40, 4  ;;  %v6181_v15 = vld [vmem:[%s6448_s26 + $0x20] sm:$0x1] }
 0x13a   : > { %v1687_v3 = vld [vmem:[#allocation2 + $0x58] sm:$0xff]  ;;  %v2581_v38 = vrot.slane %v2579_v19, 5  ;;  %v4645_v30 = vrot.slane %v6181_v15, 5 }
 0x13b   : > { %v1719_v11 = vadd.f32 %v1687_v3, %v1623_v46  ;;  %1227 = vst.msk [vmem:[#allocation2 + $0x60] sm:$0xff] %vm328_vm0, %v1195_v45  ;;  %5569 = vmatmul.msk.bf16.gmra.mxu1 %vm328_vm0, %v988_v34  ;;  %5625 = vmatmul.msk.bf16.gmra.mxu2 %vm328_vm0, %v1513_v7  ;;  %v7265_v17 = vpop.f32.mrf.mxu0  ;;  %v3847_v34 = vshrl.u32 %v6091_v21, 16  ;;  %v1164_v7 = vld [vmem:[#allocation2 + $0x68] sm:$0xff]  ;;  %v1498_v46 = vunpack.c.l.b16 %v1457_v33  ;;  %v2622_v3 = vunpack.c.l.b16 %v2572_v35 }
 0x13c   : > { %v2065_v53 = vld [vmem:[#allocation2 + $0x50] sm:$0xff]  ;;  %v2582_v52 = vsel %vm6552_vm5, %v2577_v37, %v2581_v38  ;;  %v2997_v21 = vrot.slane %v2995_v29, 4  ;;  %v4642_v33 = vrot.slane %v6180_v18, 5 }
 0x13d   : > { %v2097_v50 = vadd.f32 %v2065_v53, %v7223_v13  ;;  %1751 = vst.msk [vmem:[#allocation2 + $0x58] sm:$0xff] %vm328_vm0, %v1719_v11  ;;  %v932_v13 = vsel %vm6552_vm5, %v927_v5, %v931_v8  ;;  %v1514_v60 = vpack.c.b16 %v1498_v46, %v1497_v44  ;;  %v2623_v4 = vunpack.c.l.b16 %v2582_v52  ;;  %v1165_v8 = vld [vmem:[#allocation2 + $0x70] sm:$0xff]  ;;  %v1166_v46 = vld [vmem:[#allocation2 + $0x78] sm:$0xff] }
 0x13e   : > { %5761 = vmatmul.msk.bf16.gmra.mxu3 %vm328_vm0, %v6327_v55  ;;  %v2810_v51 = vld [vmem:[#allocation2 + $0x48] sm:$0xff]  ;;  %v1626_v22 = vpop.f32.mrf.mxu2  ;;  %5849 = vmatmul.msk.bf16.gmra.mxu0 %vm328_vm0, %v2638_v63  ;;  %v973_v20 = vunpack.c.l.b16 %v932_v13  ;;  %v3849_v55 = vrot.slane %v3847_v34, 4  ;;  %v5853_v11 = vld [vmem:[%s6448_s26 + $0x14] sm:$0x1]  ;;  %v3863_v53 = vor.u32 %v3862_v61, %v7299_v32 }
 0x13f   : > { %2129 = vst.msk [vmem:[#allocation2 + $0x50] sm:$0xff] %vm328_vm0, %v2097_v50  ;;  %v2842_v1 = vadd.f32 %v2810_v51, %v7179_v9  ;;  %v2998_v50 = vrot.slane %v5853_v11, 5  ;;  %v2639_v51 = vpack.c.b16 %v2623_v4, %v2622_v3  ;;  %v6095_v13 = vld [vmem:[%s6448_s26 + $0x28] sm:$0xf] }
 0x140   : > { %v1103_v27 = vpop.f32.mrf.mxu1  ;;  %v989_v43 = vpack.c.b16 %v973_v20, %v972_v42  ;;  %v3853_v47 = vor.u32 %v3852_v56, %v3849_v55  ;;  %v3880_v42 = vshll.u32 %v6095_v13, 16  ;;  %v3884_v20 = vshrl.u32 %v6095_v13, 16  ;;  %v6183_v13 = vld [vmem:[%s6448_s26 + $0x28] sm:$0xf] }
 0x141   : > { %v7279_v31 = vpop.f32.mrf.mxu3  ;;  %2874 = vst.msk [vmem:[#allocation2 + $0x48] sm:$0xff] %vm328_vm0, %v2842_v1  ;;  %v1196_v9 = vadd.f32 %v1164_v7, %v1103_v27  ;;  %v3868_v1 = vrot.slane %v3866_v16, 5  ;;  %v3864_v27 = vrot.slane %v3863_v53, 4  ;;  %v6179_v7 = vld [vmem:[%s6448_s26 + $0x18] sm:$0xe]  ;;  %v3002_v16 = vrot.slane %v5855_v59, 5 }
 0x142   : > { %v1688_v41 = vld [vmem:[#allocation2 + $0x60] sm:$0xff]  ;;  %v3854_v28 = vrot.slane %v3853_v47, 4  ;;  %v1168_v59 = vld [vmem:[#allocation2 + $0x88] sm:$0xff] }
 0x143   : > { %v1720_v14 = vadd.f32 %v1688_v41, %v1626_v22  ;;  %1228 = vst.msk [vmem:[#allocation2 + $0x68] sm:$0xff] %vm328_vm0, %v1196_v9  ;;  %v7288_v49 = vpop.f32.mrf.mxu0  ;;  %v6094_v22 = vld [vmem:[%s6448_s26 + $0x24] sm:$0xf]  ;;  %v3869_v52 = vsel %vm6552_vm5, %v3864_v27, %v3868_v1 }
 0x144   : > { %v2066_v48 = vld [vmem:[#allocation2 + $0x58] sm:$0xff]  ;;  %v3871_v9 = vshrl.u32 %v6094_v22, 16  ;;  %v3874_v0 = vshll.u32 %v6094_v22, 16 }
 0x145   : > { %v2098_v58 = vadd.f32 %v2066_v48, %v7252_v54  ;;  %1752 = vst.msk [vmem:[#allocation2 + $0x60] sm:$0xff] %vm328_vm0, %v1720_v14  ;;  %v5851_v54 = vld [vmem:[%s6448_s26 + $0xc] sm:$0xe]  ;;  %v6227_v14 = vrot.slane %v6179_v7, 9  ;;  %v4644_v48 = vrot.slane %v4642_v33, 4 }
 0x146   : > { %v2811_v26 = vld [vmem:[#allocation2 + $0x50] sm:$0xff]  ;;  %v1628_v25 = vpop.f32.mrf.mxu2  ;;  %v5899_v57 = vrot.slane %v5851_v54, 9  ;;  %v3873_v61 = vrot.slane %v3871_v9, 4 }
 0x147   : > { %2130 = vst.msk [vmem:[#allocation2 + $0x58] sm:$0xff] %vm328_vm0, %v2098_v58  ;;  %v2843_v2 = vadd.f32 %v2811_v26, %v7216_v62  ;;  %v3876_v26 = vrot.slane %v3874_v0, 5  ;;  %v4643_v4 = vsel %vm6560_vm6, %v6227_v14, %v4642_v33 }
 0x148   : > { %v1106_v5 = vpop.f32.mrf.mxu1  ;;  %v2996_v39 = vsel %vm6560_vm6, %v5899_v57, %v2995_v29 }
 0x149   : > { %v7303_v45 = vpop.f32.mrf.mxu3  ;;  %2875 = vst.msk [vmem:[#allocation2 + $0x50] sm:$0xff] %vm328_vm0, %v2843_v2  ;;  %v1197_v63 = vadd.f32 %v1165_v8, %v1106_v5  ;;  %v3114_v56 = vunpack.c.l.b16 %v2996_v39  ;;  %v3886_v2 = vrot.slane %v3884_v20, 4  ;;  %v4646_v5 = vsel %vm6560_vm6, %v4644_v48, %v4645_v30  ;;  %v6182_v20 = vld [vmem:[%s6448_s26 + $0x24] sm:$0xe] }
 0x14a   : > { %v1689_v62 = vld [vmem:[#allocation2 + $0x68] sm:$0xff] }
 0x14b   : > { %v1721_v19 = vadd.f32 %v1689_v62, %v1628_v25  ;;  %1229 = vst.msk [vmem:[#allocation2 + $0x70] sm:$0xff] %vm328_vm0, %v1197_v63  ;;  %5570 = vmatmul.msk.bf16.gmra.mxu1 %vm328_vm0, %v989_v43  ;;  %5626 = vmatmul.msk.bf16.gmra.mxu2 %vm328_vm0, %v1514_v60  ;;  %v7316_v24 = vpop.f32.mrf.mxu0  ;;  %v6096_v43 = vld [vmem:[%s6448_s26 + $0x2c] sm:$0x1]  ;;  %v7341_v60 = vrot.slane %v3880_v42, 5  ;;  %v3877_v63 = vor.u32 %v3876_v26, %v3873_v61  ;;  %v6341_v62 = vld [vmem:[%s6448_s26 + $0x18] sm:$0xff]  ;;  %v6228_v26 = vrot.slane %v6182_v20, 9 }
 0x14c   : > { %v2067_v23 = vld [vmem:[#allocation2 + $0x60] sm:$0xff]  ;;  %v3890_v53 = vshll.u32 %v6096_v43, 16 }
 0x14d   : > { %v2099_v34 = vadd.f32 %v2067_v23, %v7279_v31  ;;  %1753 = vst.msk [vmem:[#allocation2 + $0x68] sm:$0xff] %vm328_vm0, %v1721_v19  ;;  %v2999_v31 = vsel %vm6560_vm6, %v2997_v21, %v2998_v50  ;;  %v5854_v19 = vld [vmem:[%s6448_s26 + $0x18] sm:$0xe]  ;;  %v5856_v21 = vld [vmem:[%s6448_s26 + $0x20] sm:$0x1]  ;;  %v4761_v50 = vunpack.c.l.b16 %v4643_v4 }
 0x14e   : > { %5762 = vmatmul.msk.bf16.gmra.mxu3 %vm328_vm0, %v6328_v10  ;;  %v2812_v37 = vld [vmem:[#allocation2 + $0x58] sm:$0xff]  ;;  %v1631_v38 = vpop.f32.mrf.mxu2  ;;  %5850 = vmatmul.msk.bf16.gmra.mxu0 %vm328_vm0, %v2639_v51  ;;  %v3115_v58 = vunpack.c.l.b16 %v2999_v31  ;;  %v4762_v51 = vunpack.c.l.b16 %v4646_v5  ;;  %v1167_v23 = vld [vmem:[#allocation2 + $0x80] sm:$0xff]  ;;  %v3005_v27 = vrot.slane %v5856_v21, 5  ;;  %v3892_v7 = vrot.slane %v3890_v53, 5 }
 0x14f   : > { %2131 = vst.msk [vmem:[#allocation2 + $0x60] sm:$0xff] %vm328_vm0, %v2099_v34  ;;  %v2844_v40 = vadd.f32 %v2812_v37, %v7237_v36  ;;  %v3859_v36 = vsel %vm6552_vm5, %v3854_v28, %v7299_v32  ;;  %v4240_v32 = vunpack.c.l.b16 %v3869_v52  ;;  %v5900_v34 = vrot.slane %v5854_v19, 9  ;;  %v6099_v19 = vld [vmem:[%s6448_s26 + $0x38] sm:$0x1] }
 0x150   : > { %v1108_v44 = vpop.f32.mrf.mxu1  ;;  %v4239_v29 = vunpack.c.l.b16 %v3859_v36  ;;  %v3146_v47 = vpack.c.b16 %v3115_v58, %v3114_v56  ;;  %v3878_v37 = vrot.slane %v3877_v63, 4  ;;  %v4793_v39 = vpack.c.b16 %v4762_v51, %v4761_v50 }
 0x151   : > { %v7327_v41 = vpop.f32.mrf.mxu3  ;;  %2876 = vst.msk [vmem:[#allocation2 + $0x58] sm:$0xff] %vm328_vm0, %v2844_v40  ;;  %v1198_v35 = vadd.f32 %v1166_v46, %v1108_v44  ;;  %v6097_v40 = vld [vmem:[%s6448_s26 + $0x30] sm:$0xf]  ;;  %v4649_v31 = vrot.slane %v6183_v13, 5  ;;  %v6184_v44 = vld [vmem:[%s6448_s26 + $0x2c] sm:$0x1]  ;;  %v3003_v48 = vsel %vm6560_vm6, %v5900_v34, %v3002_v16 }
 0x152   : > { %v1690_v55 = vld [vmem:[#allocation2 + $0x70] sm:$0xff]  ;;  %v4271_v28 = vpack.c.b16 %v4240_v32, %v4239_v29  ;;  %v3895_v56 = vshrl.u32 %v6097_v40, 16  ;;  %v3898_v61 = vshll.u32 %v6097_v40, 16  ;;  %v4652_v43 = vrot.slane %v6184_v44, 5  ;;  %v5857_v13 = vld [vmem:[%s6448_s26 + $0x24] sm:$0xe] }
 0x153   : > { %v1722_v25 = vadd.f32 %v1690_v55, %v1631_v38  ;;  %1230 = vst.msk [vmem:[#allocation2 + $0x78] sm:$0xff] %vm328_vm0, %v1198_v35  ;;  %v7343_v3 = vpop.f32.mrf.mxu0  ;;  %v6098_v35 = vld [vmem:[%s6448_s26 + $0x34] sm:$0xf]  ;;  %v4650_v53 = vsel %vm6560_vm6, %v6228_v26, %v4649_v31 }
 0x154   : > { %v2068_v54 = vld [vmem:[#allocation2 + $0x68] sm:$0xff]  ;;  %v3900_v63 = vrot.slane %v3898_v61, 5  ;;  %v6187_v61 = vld [vmem:[%s6448_s26 + $0x38] sm:$0x1] }
 0x155   : > { %v2100_v8 = vadd.f32 %v2068_v54, %v7303_v45  ;;  %1754 = vst.msk [vmem:[#allocation2 + $0x70] sm:$0xff] %vm328_vm0, %v1722_v25  ;;  %v3887_v45 = vor.u32 %v3886_v2, %v7341_v60  ;;  %v4651_v25 = vrot.slane %v4649_v31, 4  ;;  %v3904_v2 = vshll.u32 %v6098_v35, 16 }
 0x156   : > { %v2813_v10 = vld [vmem:[#allocation2 + $0x60] sm:$0xff]  ;;  %v1633_v11 = vpop.f32.mrf.mxu2  ;;  %v3908_v54 = vshrl.u32 %v6098_v35, 16  ;;  %v5901_v31 = vrot.slane %v5857_v13, 9 }
 0x157   : > { %2132 = vst.msk [vmem:[#allocation2 + $0x68] sm:$0xff] %vm328_vm0, %v2100_v8  ;;  %v2845_v18 = vadd.f32 %v2813_v10, %v7265_v17  ;;  %v3004_v17 = vrot.slane %v3002_v16, 4  ;;  %v3888_v38 = vrot.slane %v3887_v45, 4  ;;  %v3897_v16 = vrot.slane %v3895_v56, 4 }
 0x158   : > { %v1111_v22 = vpop.f32.mrf.mxu1  ;;  %v7399_v21 = vrot.slane %v3904_v2, 5  ;;  %v3910_v45 = vrot.slane %v3908_v54, 4 }
 0x159   : > { %v7354_v57 = vpop.f32.mrf.mxu3  ;;  %2877 = vst.msk [vmem:[#allocation2 + $0x60] sm:$0xff] %vm328_vm0, %v2845_v18  ;;  %v1199_v1 = vadd.f32 %v1167_v23, %v1111_v22  ;;  %v3006_v30 = vsel %vm6560_vm6, %v3004_v17, %v3005_v27  ;;  %v3893_v55 = vsel %vm6552_vm5, %v3888_v38, %v3892_v7  ;;  %v4653_v18 = vsel %vm6560_vm6, %v4651_v25, %v4652_v43  ;;  %v1169_v27 = vld [vmem:[#allocation2 + $0x90] sm:$0xff] }
 0x15a   : > { %v1691_v33 = vld [vmem:[#allocation2 + $0x78] sm:$0xff]  ;;  %v3117_v32 = vunpack.c.l.b16 %v3006_v30  ;;  %v4242_v8 = vunpack.c.l.b16 %v3893_v55  ;;  %v4764_v34 = vunpack.c.l.b16 %v4653_v18  ;;  %v3914_v38 = vshll.u32 %v6099_v19, 16  ;;  %v5861_v19 = vld [vmem:[%s6448_s26 + $0x34] sm:$0xf] }
 0x15b   : > { %v1723_v15 = vadd.f32 %v1691_v33, %v1633_v11  ;;  %1231 = vst.msk [vmem:[#allocation2 + $0x80] sm:$0xff] %vm328_vm0, %v1199_v1  ;;  %5939 = vmatmul.msk.bf16.vlgmr.msra.gmra.mxu1 %vm328_vm0, %v3146_v47  ;;  %6075 = vmatmul.msk.bf16.vlgmr.msra.gmra.mxu2 %vm328_vm0, %v6341_v62  ;;  %v7365_v0 = vpop.f32.mrf.mxu0  ;;  %v5858_v47 = vld [vmem:[%s6448_s26 + $0x28] sm:$0xf]  ;;  %v4763_v33 = vunpack.c.l.b16 %v4650_v53 }
 0x15c   : > { %v2069_v9 = vld [vmem:[#allocation2 + $0x70] sm:$0xff] }
 0x15d   : > { %v2101_v42 = vadd.f32 %v2069_v9, %v7327_v41  ;;  %1755 = vst.msk [vmem:[#allocation2 + $0x78] sm:$0xff] %vm328_vm0, %v1723_v15  ;;  %v3883_v41 = vsel %vm6552_vm5, %v3878_v37, %v7341_v60  ;;  %v3116_v60 = vunpack.c.l.b16 %v3003_v48  ;;  %v5859_v15 = vld [vmem:[%s6448_s26 + $0x2c] sm:$0x1]  ;;  %v3901_v37 = vor.u32 %v3900_v63, %v3897_v16  ;;  %v6186_v9 = vld [vmem:[%s6448_s26 + $0x34] sm:$0xf] }
 0x15e   : > { %6163 = vmatmul.msk.bf16.vlgmr.msra.gmra.mxu3 %vm328_vm0, %v4271_v28  ;;  %v2814_v46 = vld [vmem:[#allocation2 + $0x68] sm:$0xff]  ;;  %v1636_v14 = vpop.f32.mrf.mxu2  ;;  %6267 = vmatmul.msk.bf16.vlgmr.msra.gmra.mxu0 %vm328_vm0, %v4793_v39  ;;  %v4241_v5 = vunpack.c.l.b16 %v3883_v41  ;;  %v3012_v44 = vrot.slane %v5859_v15, 5  ;;  %v6101_v41 = vld [vmem:[%s6448_s26 + $0x40] sm:$0xf]  ;;  %v4656_v55 = vrot.slane %v6186_v9, 5 }
 0x15f   : > { %2133 = vst.msk [vmem:[#allocation2 + $0x70] sm:$0xff] %vm328_vm0, %v2101_v42  ;;  %v2846_v36 = vadd.f32 %v2814_v46, %v7288_v49  ;;  %v3147_v22 = vpack.c.b16 %v3117_v32, %v3116_v60  ;;  %v6342_v28 = vld [vmem:[%s6448_s26 + $0x24] sm:$0xff]  ;;  %v4794_v46 = vpack.c.b16 %v4764_v34, %v4763_v33  ;;  %v3902_v35 = vrot.slane %v3901_v37, 4 }
 0x160   : > { %v1113_v58 = vpop.f32.mrf.mxu1  ;;  %v4272_v7 = vpack.c.b16 %v4242_v8, %v4241_v5  ;;  %v3928_v60 = vshll.u32 %v6101_v41, 16  ;;  %v3932_v32 = vshrl.u32 %v6101_v41, 16  ;;  %v1170_v5 = vld [vmem:[#allocation2 + $0x98] sm:$0xff]  ;;  %v6189_v41 = vld [vmem:[%s6448_s26 + $0x40] sm:$0xf] }
 0x161   : > { %v7379_v52 = vpop.f32.mrf.mxu3  ;;  %2878 = vst.msk [vmem:[#allocation2 + $0x68] sm:$0xff] %vm328_vm0, %v2846_v36  ;;  %v1200_v49 = vadd.f32 %v1168_v59, %v1113_v58  ;;  %v3916_v36 = vrot.slane %v3914_v38, 5  ;;  %v6185_v59 = vld [vmem:[%s6448_s26 + $0x30] sm:$0xe]  ;;  %v3016_v38 = vrot.slane %v5861_v19, 5  ;;  %v1172_v19 = vld [vmem:[#allocation2 + $0xa8] sm:$0xff] }
 0x162   : > { %v1692_v29 = vld [vmem:[#allocation2 + $0x80] sm:$0xff]  ;;  %v6229_v8 = vrot.slane %v6185_v59, 9 }
 0x163   : > { %v1724_v4 = vadd.f32 %v1692_v29, %v1636_v14  ;;  %1232 = vst.msk [vmem:[#allocation2 + $0x88] sm:$0xff] %vm328_vm0, %v1200_v49  ;;  %v7389_v11 = vpop.f32.mrf.mxu0  ;;  %v6100_v14 = vld [vmem:[%s6448_s26 + $0x3c] sm:$0xf] }
 0x164   : > { %v2070_v10 = vld [vmem:[#allocation2 + $0x78] sm:$0xff]  ;;  %v3919_v49 = vshrl.u32 %v6100_v14, 16  ;;  %v3922_v2 = vshll.u32 %v6100_v14, 16  ;;  %v4657_v34 = vsel %vm6560_vm6, %v6229_v8, %v4656_v55 }
 0x165   : > { %v2102_v62 = vadd.f32 %v2070_v10, %v7354_v57  ;;  %1756 = vst.msk [vmem:[#allocation2 + $0x80] sm:$0xff] %vm328_vm0, %v1724_v4  ;;  %v3009_v57 = vrot.slane %v5858_v47, 5  ;;  %v4658_v10 = vrot.slane %v4656_v55, 4  ;;  %v4659_v47 = vrot.slane %v6187_v61, 5 }
 0x166   : > { %v2815_v50 = vld [vmem:[#allocation2 + $0x70] sm:$0xff]  ;;  %v1638_v51 = vpop.f32.mrf.mxu2 }
 0x167   : > { %2134 = vst.msk [vmem:[#allocation2 + $0x78] sm:$0xff] %vm328_vm0, %v2102_v62  ;;  %v2847_v23 = vadd.f32 %v2815_v50, %v7316_v24  ;;  %v3911_v24 = vor.u32 %v3910_v45, %v7399_v21  ;;  %v3011_v20 = vrot.slane %v3009_v57, 4  ;;  %v3010_v43 = vsel %vm6560_vm6, %v5901_v31, %v3009_v57 }
 0x168   : > { %v1116_v17 = vpop.f32.mrf.mxu1  ;;  %v3118_v18 = vunpack.c.l.b16 %v3010_v43  ;;  %v3921_v45 = vrot.slane %v3919_v49, 4  ;;  %v3924_v50 = vrot.slane %v3922_v2, 5 }
 0x169   : > { %v7404_v1 = vpop.f32.mrf.mxu3  ;;  %2879 = vst.msk [vmem:[#allocation2 + $0x70] sm:$0xff] %vm328_vm0, %v2847_v23  ;;  %v1201_v39 = vadd.f32 %v1169_v27, %v1116_v17  ;;  %v3912_v58 = vrot.slane %v3911_v24, 4  ;;  %v7441_v23 = vrot.slane %v3928_v60, 5  ;;  %v4660_v17 = vsel %vm6560_vm6, %v4658_v10, %v4659_v47 }
 0x16a   : > { %v1693_v40 = vld [vmem:[#allocation2 + $0x88] sm:$0xff] }
 0x16b   : > { %v1725_v42 = vadd.f32 %v1693_v40, %v1638_v51  ;;  %1233 = vst.msk [vmem:[#allocation2 + $0x90] sm:$0xff] %vm328_vm0, %v1201_v39  ;;  %5940 = vmatmul.msk.bf16.gmra.mxu1 %vm328_vm0, %v3147_v22  ;;  %6076 = vmatmul.msk.bf16.gmra.mxu2 %vm328_vm0, %v6342_v28  ;;  %v7416_v30 = vpop.f32.mrf.mxu0  ;;  %v3917_v63 = vsel %vm6552_vm5, %v3912_v58, %v3916_v36  ;;  %v6102_v22 = vld [vmem:[%s6448_s26 + $0x44] sm:$0x1]  ;;  %v3934_v28 = vrot.slane %v3932_v32, 4  ;;  %v6343_v40 = vld [vmem:[%s6448_s26 + $0x30] sm:$0xff] }
 0x16c   : > { %v2071_v48 = vld [vmem:[#allocation2 + $0x80] sm:$0xff]  ;;  %v3925_v39 = vor.u32 %v3924_v50, %v3921_v45  ;;  %v3938_v24 = vshll.u32 %v6102_v22, 16  ;;  %v6188_v32 = vld [vmem:[%s6448_s26 + $0x3c] sm:$0xe] }
 0x16d   : > { %v2103_v56 = vadd.f32 %v2071_v48, %v7379_v52  ;;  %1757 = vst.msk [vmem:[#allocation2 + $0x88] sm:$0xff] %vm328_vm0, %v1725_v42  ;;  %v3013_v52 = vsel %vm6560_vm6, %v3011_v20, %v3012_v44  ;;  %v5860_v42 = vld [vmem:[%s6448_s26 + $0x30] sm:$0xe]  ;;  %v5862_v20 = vld [vmem:[%s6448_s26 + $0x38] sm:$0x1]  ;;  %v4765_v44 = vunpack.c.l.b16 %v4657_v34  ;;  %v1171_v48 = vld [vmem:[#allocation2 + $0xa0] sm:$0xff] }
 0x16e   : > { %6164 = vmatmul.msk.bf16.gmra.mxu3 %vm328_vm0, %v4272_v7  ;;  %v2816_v26 = vld [vmem:[#allocation2 + $0x78] sm:$0xff]  ;;  %v1641_v25 = vpop.f32.mrf.mxu2  ;;  %6268 = vmatmul.msk.bf16.gmra.mxu0 %vm328_vm0, %v4794_v46  ;;  %v3119_v62 = vunpack.c.l.b16 %v3013_v52  ;;  %v4766_v46 = vunpack.c.l.b16 %v4660_v17  ;;  %v3019_v58 = vrot.slane %v5862_v20, 5  ;;  %v3940_v59 = vrot.slane %v3938_v24, 5 }
 0x16f   : > { %2135 = vst.msk [vmem:[#allocation2 + $0x80] sm:$0xff] %vm328_vm0, %v2103_v56  ;;  %v2848_v54 = vadd.f32 %v2816_v26, %v7343_v3  ;;  %v3907_v3 = vsel %vm6552_vm5, %v3902_v35, %v7399_v21  ;;  %v4244_v21 = vunpack.c.l.b16 %v3917_v63  ;;  %v5902_v56 = vrot.slane %v5860_v42, 9  ;;  %v6105_v42 = vld [vmem:[%s6448_s26 + $0x50] sm:$0x1] }
 0x170   : > { %v1118_v4 = vpop.f32.mrf.mxu1  ;;  %v4243_v57 = vunpack.c.l.b16 %v3907_v3  ;;  %v3148_v37 = vpack.c.b16 %v3119_v62, %v3118_v18  ;;  %v3926_v26 = vrot.slane %v3925_v39, 4  ;;  %v4795_v43 = vpack.c.b16 %v4766_v46, %v4765_v44  ;;  %v3337_v12 = vld [vmem:[#allocation2 + $0x70] sm:$0xff] }
 0x171   : > { %v7427_v29 = vpop.f32.mrf.mxu3  ;;  %2880 = vst.msk [vmem:[#allocation2 + $0x78] sm:$0xff] %vm328_vm0, %v2848_v54  ;;  %v1202_v16 = vadd.f32 %v1170_v5, %v1118_v4  ;;  %v6103_v54 = vld [vmem:[%s6448_s26 + $0x48] sm:$0xf]  ;;  %v4663_v52 = vrot.slane %v6189_v41, 5  ;;  %v6190_v4 = vld [vmem:[%s6448_s26 + $0x44] sm:$0x1]  ;;  %v3017_v10 = vsel %vm6560_vm6, %v5902_v56, %v3016_v38 }
 0x172   : > { %v1694_v53 = vld [vmem:[#allocation2 + $0x90] sm:$0xff]  ;;  %v4273_v35 = vpack.c.b16 %v4244_v21, %v4243_v57  ;;  %v3943_v18 = vshrl.u32 %v6103_v54, 16  ;;  %v3946_v45 = vshll.u32 %v6103_v54, 16  ;;  %v6230_v50 = vrot.slane %v6188_v32, 9  ;;  %v5863_v41 = vld [vmem:[%s6448_s26 + $0x3c] sm:$0xe] }
 0x173   : > { %v1726_v51 = vadd.f32 %v1694_v53, %v1641_v25  ;;  %1234 = vst.msk [vmem:[#allocation2 + $0x98] sm:$0xff] %vm328_vm0, %v1202_v16  ;;  %v7443_v33 = vpop.f32.mrf.mxu0  ;;  %v6104_v16 = vld [vmem:[%s6448_s26 + $0x4c] sm:$0xf]  ;;  %v4666_v22 = vrot.slane %v6190_v4, 5 }
 0x174   : > { %v2072_v13 = vld [vmem:[#allocation2 + $0x88] sm:$0xff]  ;;  %v3948_v39 = vrot.slane %v3946_v45, 5  ;;  %v4664_v24 = vsel %vm6560_vm6, %v6230_v50, %v4663_v52  ;;  %v6193_v45 = vld [vmem:[%s6448_s26 + $0x50] sm:$0x1] }
 0x175   : > { %v2104_v27 = vadd.f32 %v2072_v13, %v7404_v1  ;;  %1758 = vst.msk [vmem:[#allocation2 + $0x90] sm:$0xff] %vm328_vm0, %v1726_v51  ;;  %v3935_v1 = vor.u32 %v3934_v28, %v7441_v23  ;;  %v4665_v51 = vrot.slane %v4663_v52, 4  ;;  %v3952_v28 = vshll.u32 %v6104_v16, 16 }
 0x176   : > { %v2817_v7 = vld [vmem:[#allocation2 + $0x80] sm:$0xff]  ;;  %v1643_v15 = vpop.f32.mrf.mxu2  ;;  %v3956_v13 = vshrl.u32 %v6104_v16, 16  ;;  %v5903_v52 = vrot.slane %v5863_v41, 9 }
 0x177   : > { %2136 = vst.msk [vmem:[#allocation2 + $0x88] sm:$0xff] %vm328_vm0, %v2104_v27  ;;  %v2849_v9 = vadd.f32 %v2817_v7, %v7365_v0  ;;  %v3018_v0 = vrot.slane %v3016_v38, 4  ;;  %v3936_v25 = vrot.slane %v3935_v1, 4  ;;  %v3945_v38 = vrot.slane %v3943_v18, 4 }
 0x178   : > { %v1121_v14 = vpop.f32.mrf.mxu1  ;;  %v7499_v20 = vrot.slane %v3952_v28, 5  ;;  %v3958_v1 = vrot.slane %v3956_v13, 4 }
 0x179   : > { %v7454_v31 = vpop.f32.mrf.mxu3  ;;  %2881 = vst.msk [vmem:[#allocation2 + $0x80] sm:$0xff] %vm328_vm0, %v2849_v9  ;;  %v1203_v36 = vadd.f32 %v1171_v48, %v1121_v14  ;;  %v3020_v47 = vsel %vm6560_vm6, %v3018_v0, %v3019_v58  ;;  %v3941_v53 = vsel %vm6552_vm5, %v3936_v25, %v3940_v59  ;;  %v4667_v9 = vsel %vm6560_vm6, %v4665_v51, %v4666_v22  ;;  %v1173_v58 = vld [vmem:[#allocation2 + $0xb0] sm:$0xff] }
 0x17a   : > { %v1695_v55 = vld [vmem:[#allocation2 + $0x98] sm:$0xff]  ;;  %v3121_v21 = vunpack.c.l.b16 %v3020_v47  ;;  %v4246_v27 = vunpack.c.l.b16 %v3941_v53  ;;  %v4768_v56 = vunpack.c.l.b16 %v4667_v9  ;;  %v3962_v25 = vshll.u32 %v6105_v42, 16  ;;  %v5867_v42 = vld [vmem:[%s6448_s26 + $0x4c] sm:$0xf] }
 0x17b   : > { %v1727_v61 = vadd.f32 %v1695_v55, %v1643_v15  ;;  %1235 = vst.msk [vmem:[#allocation2 + $0xa0] sm:$0xff] %vm328_vm0, %v1203_v36  ;;  %5941 = vmatmul.msk.bf16.gmra.mxu1 %vm328_vm0, %v3148_v37  ;;  %6077 = vmatmul.msk.bf16.gmra.mxu2 %vm328_vm0, %v6343_v40  ;;  %v7465_v2 = vpop.f32.mrf.mxu0  ;;  %v5864_v37 = vld [vmem:[%s6448_s26 + $0x40] sm:$0xf]  ;;  %v4767_v55 = vunpack.c.l.b16 %v4664_v24 }
 0x17c   : > { %v2073_v49 = vld [vmem:[#allocation2 + $0x90] sm:$0xff] }
 0x17d   : > { %v2105_v60 = vadd.f32 %v2073_v49, %v7427_v29  ;;  %1759 = vst.msk [vmem:[#allocation2 + $0x98] sm:$0xff] %vm328_vm0, %v1727_v61  ;;  %v3931_v29 = vsel %vm6552_vm5, %v3926_v26, %v7441_v23  ;;  %v3120_v23 = vunpack.c.l.b16 %v3017_v10  ;;  %v5865_v61 = vld [vmem:[%s6448_s26 + $0x44] sm:$0x1]  ;;  %v3949_v26 = vor.u32 %v3948_v39, %v3945_v38  ;;  %v6192_v49 = vld [vmem:[%s6448_s26 + $0x4c] sm:$0xf] }
 0x17e   : > { %6165 = vmatmul.msk.bf16.gmra.mxu3 %vm328_vm0, %v4273_v35  ;;  %v2818_v5 = vld [vmem:[#allocation2 + $0x88] sm:$0xff]  ;;  %v1646_v8 = vpop.f32.mrf.mxu2  ;;  %6269 = vmatmul.msk.bf16.gmra.mxu0 %vm328_vm0, %v4795_v43  ;;  %v4245_v17 = vunpack.c.l.b16 %v3931_v29  ;;  %v6344_v35 = vld [vmem:[%s6448_s26 + $0x3c] sm:$0xff]  ;;  %v3026_v4 = vrot.slane %v5865_v61, 5  ;;  %v6107_v29 = vld [vmem:[%s6448_s26 + $0x58] sm:$0xf]  ;;  %v4670_v53 = vrot.slane %v6192_v49, 5 }
 0x17f   : > { %2137 = vst.msk [vmem:[#allocation2 + $0x90] sm:$0xff] %vm328_vm0, %v2105_v60  ;;  %v2850_v3 = vadd.f32 %v2818_v5, %v7389_v11  ;;  %v3149_v14 = vpack.c.b16 %v3121_v21, %v3120_v23  ;;  %v4796_v5 = vpack.c.b16 %v4768_v56, %v4767_v55  ;;  %v3950_v16 = vrot.slane %v3949_v26, 4 }
 0x180   : > { %v1123_v62 = vpop.f32.mrf.mxu1  ;;  %v4274_v59 = vpack.c.b16 %v4246_v27, %v4245_v17  ;;  %v3976_v23 = vshll.u32 %v6107_v29, 16  ;;  %v3980_v21 = vshrl.u32 %v6107_v29, 16  ;;  %v1174_v17 = vld [vmem:[#allocation2 + $0xb8] sm:$0xff] }
 0x181   : > { %v7479_v63 = vpop.f32.mrf.mxu3  ;;  %2882 = vst.msk [vmem:[#allocation2 + $0x88] sm:$0xff] %vm328_vm0, %v2850_v3  ;;  %v1204_v11 = vadd.f32 %v1172_v19, %v1123_v62  ;;  %v3964_v3 = vrot.slane %v3962_v25, 5  ;;  %v6191_v19 = vld [vmem:[%s6448_s26 + $0x48] sm:$0xe]  ;;  %v3030_v25 = vrot.slane %v5867_v42, 5 }
 0x182   : > { %v1696_v57 = vld [vmem:[#allocation2 + $0xa0] sm:$0xff]  ;;  %v6231_v27 = vrot.slane %v6191_v19, 9  ;;  %v6195_v29 = vld [vmem:[%s6448_s26 + $0x58] sm:$0xf]  ;;  %v1176_v42 = vld [vmem:[#allocation2 + $0xc8] sm:$0xff] }
 0x183   : > { %v1728_v34 = vadd.f32 %v1696_v57, %v1646_v8  ;;  %1236 = vst.msk [vmem:[#allocation2 + $0xa8] sm:$0xff] %vm328_vm0, %v1204_v11  ;;  %v7489_v15 = vpop.f32.mrf.mxu0  ;;  %v6106_v8 = vld [vmem:[%s6448_s26 + $0x54] sm:$0xf] }
 0x184   : > { %v2074_v7 = vld [vmem:[#allocation2 + $0x98] sm:$0xff]  ;;  %v3967_v11 = vshrl.u32 %v6106_v8, 16  ;;  %v3970_v28 = vshll.u32 %v6106_v8, 16  ;;  %v4671_v56 = vsel %vm6560_vm6, %v6231_v27, %v4670_v53 }
 0x185   : > { %v2106_v40 = vadd.f32 %v2074_v7, %v7454_v31  ;;  %1760 = vst.msk [vmem:[#allocation2 + $0xa0] sm:$0xff] %vm328_vm0, %v1728_v34  ;;  %v3023_v31 = vrot.slane %v5864_v37, 5  ;;  %v4672_v7 = vrot.slane %v4670_v53, 4  ;;  %v4673_v37 = vrot.slane %v6193_v45, 5 }
 0x186   : > { %v2819_v44 = vld [vmem:[#allocation2 + $0x90] sm:$0xff]  ;;  %v1648_v46 = vpop.f32.mrf.mxu2 }
 0x187   : > { %2138 = vst.msk [vmem:[#allocation2 + $0x98] sm:$0xff] %vm328_vm0, %v2106_v40  ;;  %v2851_v48 = vadd.f32 %v2819_v44, %v7416_v30  ;;  %v3959_v30 = vor.u32 %v3958_v1, %v7499_v20  ;;  %v3025_v32 = vrot.slane %v3023_v31, 4  ;;  %v3024_v22 = vsel %vm6560_vm6, %v5903_v52, %v3023_v31 }
 0x188   : > { %v1126_v0 = vpop.f32.mrf.mxu1  ;;  %v3122_v9 = vunpack.c.l.b16 %v3024_v22  ;;  %v3969_v1 = vrot.slane %v3967_v11, 4  ;;  %v3972_v44 = vrot.slane %v3970_v28, 5 }
 0x189   : > { %v7504_v36 = vpop.f32.mrf.mxu3  ;;  %2883 = vst.msk [vmem:[#allocation2 + $0x90] sm:$0xff] %vm328_vm0, %v2851_v48  ;;  %v1205_v43 = vadd.f32 %v1173_v58, %v1126_v0  ;;  %v3960_v62 = vrot.slane %v3959_v30, 4  ;;  %v7541_v48 = vrot.slane %v3976_v23, 5  ;;  %v4674_v0 = vsel %vm6560_vm6, %v4672_v7, %v4673_v37 }
 0x18a   : > { %v1697_v54 = vld [vmem:[#allocation2 + $0xa8] sm:$0xff] }
 0x18b   : > { %v1729_v60 = vadd.f32 %v1697_v54, %v1648_v46  ;;  %1237 = vst.msk [vmem:[#allocation2 + $0xb0] sm:$0xff] %vm328_vm0, %v1205_v43  ;;  %5942 = vmatmul.msk.bf16.gmra.mxu1 %vm328_vm0, %v3149_v14  ;;  %6078 = vmatmul.msk.bf16.gmra.mxu2 %vm328_vm0, %v6344_v35  ;;  %v7516_v47 = vpop.f32.mrf.mxu0  ;;  %v3965_v39 = vsel %vm6552_vm5, %v3960_v62, %v3964_v3  ;;  %v6108_v14 = vld [vmem:[%s6448_s26 + $0x5c] sm:$0x1]  ;;  %v3982_v35 = vrot.slane %v3980_v21, 4  ;;  %v6345_v54 = vld [vmem:[%s6448_s26 + $0x48] sm:$0xff] }
 0x18c   : > { %v2075_v10 = vld [vmem:[#allocation2 + $0xa0] sm:$0xff]  ;;  %v3973_v43 = vor.u32 %v3972_v44, %v3969_v1  ;;  %v3986_v30 = vshll.u32 %v6108_v14, 16  ;;  %v6194_v21 = vld [vmem:[%s6448_s26 + $0x54] sm:$0xe] }
 0x18d   : > { %v2107_v18 = vadd.f32 %v2075_v10, %v7479_v63  ;;  %1761 = vst.msk [vmem:[#allocation2 + $0xa8] sm:$0xff] %vm328_vm0, %v1729_v60  ;;  %v3027_v63 = vsel %vm6560_vm6, %v3025_v32, %v3026_v4  ;;  %v5866_v60 = vld [vmem:[%s6448_s26 + $0x48] sm:$0xe]  ;;  %v5868_v32 = vld [vmem:[%s6448_s26 + $0x50] sm:$0x1]  ;;  %v4769_v4 = vunpack.c.l.b16 %v4671_v56  ;;  %v1175_v10 = vld [vmem:[#allocation2 + $0xc0] sm:$0xff] }
 0x18e   : > { %6166 = vmatmul.msk.bf16.gmra.mxu3 %vm328_vm0, %v4274_v59  ;;  %v2820_v50 = vld [vmem:[#allocation2 + $0x98] sm:$0xff]  ;;  %v1651_v51 = vpop.f32.mrf.mxu2  ;;  %6270 = vmatmul.msk.bf16.gmra.mxu0 %vm328_vm0, %v4796_v5  ;;  %v3123_v40 = vunpack.c.l.b16 %v3027_v63  ;;  %v4770_v5 = vunpack.c.l.b16 %v4674_v0  ;;  %v3033_v62 = vrot.slane %v5868_v32, 5  ;;  %v3988_v19 = vrot.slane %v3986_v30, 5 }
 0x18f   : > { %2139 = vst.msk [vmem:[#allocation2 + $0xa0] sm:$0xff] %vm328_vm0, %v2107_v18  ;;  %v2852_v13 = vadd.f32 %v2820_v50, %v7443_v33  ;;  %v3955_v33 = vsel %vm6552_vm5, %v3950_v16, %v7499_v20  ;;  %v4248_v20 = vunpack.c.l.b16 %v3965_v39  ;;  %v5904_v18 = vrot.slane %v5866_v60, 9  ;;  %v6111_v60 = vld [vmem:[%s6448_s26 + $0x68] sm:$0x1] }
 0x190   : > { %v1128_v34 = vpop.f32.mrf.mxu1  ;;  %v4247_v31 = vunpack.c.l.b16 %v3955_v33  ;;  %v3150_v26 = vpack.c.b16 %v3123_v40, %v3122_v9  ;;  %v3974_v50 = vrot.slane %v3973_v43, 4  ;;  %v4797_v22 = vpack.c.b16 %v4770_v5, %v4769_v4 }
 0x191   : > { %v7527_v57 = vpop.f32.mrf.mxu3  ;;  %2884 = vst.msk [vmem:[#allocation2 + $0x98] sm:$0xff] %vm328_vm0, %v2852_v13  ;;  %v1206_v38 = vadd.f32 %v1174_v17, %v1128_v34  ;;  %v6109_v13 = vld [vmem:[%s6448_s26 + $0x60] sm:$0xf]  ;;  %v4677_v63 = vrot.slane %v6195_v29, 5  ;;  %v6196_v34 = vld [vmem:[%s6448_s26 + $0x5c] sm:$0x1]  ;;  %v3031_v7 = vsel %vm6560_vm6, %v5904_v18, %v3030_v25 }
 0x192   : > { %v1698_v24 = vld [vmem:[#allocation2 + $0xb0] sm:$0xff]  ;;  %v4275_v16 = vpack.c.b16 %v4248_v20, %v4247_v31  ;;  %v3991_v9 = vshrl.u32 %v6109_v13, 16  ;;  %v3994_v1 = vshll.u32 %v6109_v13, 16  ;;  %v6232_v44 = vrot.slane %v6194_v21, 9 }
 0x193   : > { %v1730_v46 = vadd.f32 %v1698_v24, %v1651_v51  ;;  %1238 = vst.msk [vmem:[#allocation2 + $0xb8] sm:$0xff] %vm328_vm0, %v1206_v38  ;;  %v7543_v55 = vpop.f32.mrf.mxu0  ;;  %v6110_v38 = vld [vmem:[%s6448_s26 + $0x64] sm:$0xf]  ;;  %v4680_v14 = vrot.slane %v6196_v34, 5  ;;  %v5869_v29 = vld [vmem:[%s6448_s26 + $0x54] sm:$0xe] }
 0x194   : > { %v2076_v41 = vld [vmem:[#allocation2 + $0xa8] sm:$0xff]  ;;  %v3996_v43 = vrot.slane %v3994_v1, 5  ;;  %v4678_v30 = vsel %vm6560_vm6, %v6232_v44, %v4677_v63 }
 0x195   : > { %v2108_v58 = vadd.f32 %v2076_v41, %v7504_v36  ;;  %1762 = vst.msk [vmem:[#allocation2 + $0xb0] sm:$0xff] %vm328_vm0, %v1730_v46  ;;  %v3983_v36 = vor.u32 %v3982_v35, %v7541_v48  ;;  %v4679_v46 = vrot.slane %v4677_v63, 4  ;;  %v4000_v35 = vshll.u32 %v6110_v38, 16  ;;  %v6199_v1 = vld [vmem:[%s6448_s26 + $0x68] sm:$0x1] }
 0x196   : > { %v2821_v59 = vld [vmem:[#allocation2 + $0xa0] sm:$0xff]  ;;  %v1653_v61 = vpop.f32.mrf.mxu2  ;;  %v4004_v41 = vshrl.u32 %v6110_v38, 16  ;;  %v5905_v63 = vrot.slane %v5869_v29, 9 }
 0x197   : > { %2140 = vst.msk [vmem:[#allocation2 + $0xa8] sm:$0xff] %vm328_vm0, %v2108_v58  ;;  %v2853_v49 = vadd.f32 %v2821_v59, %v7465_v2  ;;  %v3032_v2 = vrot.slane %v3030_v25, 4  ;;  %v3984_v51 = vrot.slane %v3983_v36, 4  ;;  %v3993_v25 = vrot.slane %v3991_v9, 4 }
 0x198   : > { %v1131_v8 = vpop.f32.mrf.mxu1  ;;  %v7599_v32 = vrot.slane %v4000_v35, 5  ;;  %v4006_v36 = vrot.slane %v4004_v41, 4 }
 0x199   : > { %v7554_v52 = vpop.f32.mrf.mxu3  ;;  %2885 = vst.msk [vmem:[#allocation2 + $0xa0] sm:$0xff] %vm328_vm0, %v2853_v49  ;;  %v1207_v3 = vadd.f32 %v1175_v10, %v1131_v8  ;;  %v3034_v37 = vsel %vm6560_vm6, %v3032_v2, %v3033_v62  ;;  %v3989_v24 = vsel %vm6552_vm5, %v3984_v51, %v3988_v19  ;;  %v4681_v49 = vsel %vm6560_vm6, %v4679_v46, %v4680_v14  ;;  %v1177_v62 = vld [vmem:[#allocation2 + $0xd0] sm:$0xff] }
 0x19a   : > { %v1699_v53 = vld [vmem:[#allocation2 + $0xb8] sm:$0xff]  ;;  %v3125_v20 = vunpack.c.l.b16 %v3034_v37  ;;  %v4250_v58 = vunpack.c.l.b16 %v3989_v24  ;;  %v4772_v18 = vunpack.c.l.b16 %v4681_v49  ;;  %v4010_v51 = vshll.u32 %v6111_v60, 16  ;;  %v5873_v60 = vld [vmem:[%s6448_s26 + $0x64] sm:$0xf] }
 0x19b   : > { %v1731_v45 = vadd.f32 %v1699_v53, %v1653_v61  ;;  %1239 = vst.msk [vmem:[#allocation2 + $0xc0] sm:$0xff] %vm328_vm0, %v1207_v3  ;;  %5943 = vmatmul.msk.bf16.gmra.mxu1 %vm328_vm0, %v3150_v26  ;;  %6079 = vmatmul.msk.bf16.gmra.mxu2 %vm328_vm0, %v6345_v54  ;;  %v7565_v28 = vpop.f32.mrf.mxu0  ;;  %v5870_v26 = vld [vmem:[%s6448_s26 + $0x58] sm:$0xf]  ;;  %v4771_v53 = vunpack.c.l.b16 %v4678_v30 }
 0x19c   : > { %v2077_v11 = vld [vmem:[#allocation2 + $0xb0] sm:$0xff] }
 0x19d   : > { %v2109_v23 = vadd.f32 %v2077_v11, %v7527_v57  ;;  %1763 = vst.msk [vmem:[#allocation2 + $0xb8] sm:$0xff] %vm328_vm0, %v1731_v45  ;;  %v3979_v57 = vsel %vm6552_vm5, %v3974_v50, %v7541_v48  ;;  %v3124_v48 = vunpack.c.l.b16 %v3031_v7  ;;  %v5871_v45 = vld [vmem:[%s6448_s26 + $0x5c] sm:$0x1]  ;;  %v3997_v50 = vor.u32 %v3996_v43, %v3993_v25  ;;  %v6198_v11 = vld [vmem:[%s6448_s26 + $0x64] sm:$0xf] }
 0x19e   : > { %6167 = vmatmul.msk.bf16.gmra.mxu3 %vm328_vm0, %v4275_v16  ;;  %v2822_v17 = vld [vmem:[#allocation2 + $0xa8] sm:$0xff]  ;;  %v1656_v27 = vpop.f32.mrf.mxu2  ;;  %6271 = vmatmul.msk.bf16.gmra.mxu0 %vm328_vm0, %v4797_v22  ;;  %v4249_v0 = vunpack.c.l.b16 %v3979_v57  ;;  %v6346_v16 = vld [vmem:[%s6448_s26 + $0x54] sm:$0xff]  ;;  %v3040_v34 = vrot.slane %v5871_v45, 5  ;;  %v6113_v57 = vld [vmem:[%s6448_s26 + $0x70] sm:$0xf]  ;;  %v4684_v24 = vrot.slane %v6198_v11, 5 }
 0x19f   : > { %2141 = vst.msk [vmem:[#allocation2 + $0xb0] sm:$0xff] %vm328_vm0, %v2109_v23  ;;  %v2854_v33 = vadd.f32 %v2822_v17, %v7489_v15  ;;  %v3151_v8 = vpack.c.b16 %v3125_v20, %v3124_v48  ;;  %v4798_v17 = vpack.c.b16 %v4772_v18, %v4771_v53  ;;  %v3998_v38 = vrot.slane %v3997_v50, 4 }
 0x1a0   : > { %v1133_v40 = vpop.f32.mrf.mxu1  ;;  %v4276_v19 = vpack.c.b16 %v4250_v58, %v4249_v0  ;;  %v4024_v48 = vshll.u32 %v6113_v57, 16  ;;  %v4028_v20 = vshrl.u32 %v6113_v57, 16  ;;  %v1178_v0 = vld [vmem:[#allocation2 + $0xd8] sm:$0xff]  ;;  %v6201_v57 = vld [vmem:[%s6448_s26 + $0x70] sm:$0xf] }
 0x1a1   : > { %v7579_v39 = vpop.f32.mrf.mxu3  ;;  %2886 = vst.msk [vmem:[#allocation2 + $0xa8] sm:$0xff] %vm328_vm0, %v2854_v33  ;;  %v1208_v15 = vadd.f32 %v1176_v42, %v1133_v40  ;;  %v4012_v33 = vrot.slane %v4010_v51, 5  ;;  %v6197_v42 = vld [vmem:[%s6448_s26 + $0x60] sm:$0xe]  ;;  %v3044_v51 = vrot.slane %v5873_v60, 5  ;;  %v1180_v60 = vld [vmem:[#allocation2 + $0xe8] sm:$0xff] }
 0x1a2   : > { %v1700_v31 = vld [vmem:[#allocation2 + $0xc0] sm:$0xff]  ;;  %v6233_v58 = vrot.slane %v6197_v42, 9 }
 0x1a3   : > { %v1732_v56 = vadd.f32 %v1700_v31, %v1656_v27  ;;  %1240 = vst.msk [vmem:[#allocation2 + $0xc8] sm:$0xff] %vm328_vm0, %v1208_v15  ;;  %v7589_v61 = vpop.f32.mrf.mxu0  ;;  %v6112_v27 = vld [vmem:[%s6448_s26 + $0x6c] sm:$0xf] }
 0x1a4   : > { %v2078_v59 = vld [vmem:[#allocation2 + $0xb8] sm:$0xff]  ;;  %v4015_v15 = vshrl.u32 %v6112_v27, 16  ;;  %v4018_v35 = vshll.u32 %v6112_v27, 16  ;;  %v4685_v18 = vsel %vm6560_vm6, %v6233_v58, %v4684_v24 }
 0x1a5   : > { %v2110_v54 = vadd.f32 %v2078_v59, %v7554_v52  ;;  %1764 = vst.msk [vmem:[#allocation2 + $0xc0] sm:$0xff] %vm328_vm0, %v1732_v56  ;;  %v3037_v52 = vrot.slane %v5870_v26, 5  ;;  %v4686_v59 = vrot.slane %v4684_v24, 4  ;;  %v4687_v26 = vrot.slane %v6199_v1, 5 }
 0x1a6   : > { %v2823_v4 = vld [vmem:[#allocation2 + $0xb0] sm:$0xff]  ;;  %v1658_v5 = vpop.f32.mrf.mxu2 }
 0x1a7   : > { %2142 = vst.msk [vmem:[#allocation2 + $0xb8] sm:$0xff] %vm328_vm0, %v2110_v54  ;;  %v2855_v10 = vadd.f32 %v2823_v4, %v7516_v47  ;;  %v4007_v47 = vor.u32 %v4006_v36, %v7599_v32  ;;  %v3039_v21 = vrot.slane %v3037_v52, 4  ;;  %v3038_v14 = vsel %vm6560_vm6, %v5905_v63, %v3037_v52 }
 0x1a8   : > { %v1136_v2 = vpop.f32.mrf.mxu1  ;;  %v3126_v49 = vunpack.c.l.b16 %v3038_v14  ;;  %v4017_v36 = vrot.slane %v4015_v15, 4  ;;  %v4020_v4 = vrot.slane %v4018_v35, 5 }
 0x1a9   : > { %v7604_v3 = vpop.f32.mrf.mxu3  ;;  %2887 = vst.msk [vmem:[#allocation2 + $0xb0] sm:$0xff] %vm328_vm0, %v2855_v10  ;;  %v1209_v22 = vadd.f32 %v1177_v62, %v1136_v2  ;;  %v4008_v40 = vrot.slane %v4007_v47, 4  ;;  %v7641_v10 = vrot.slane %v4024_v48, 5  ;;  %v4688_v2 = vsel %vm6560_vm6, %v4686_v59, %v4687_v26 }
 0x1aa   : > { %v1701_v13 = vld [vmem:[#allocation2 + $0xc8] sm:$0xff] }
 0x1ab   : > { %v1733_v23 = vadd.f32 %v1701_v13, %v1658_v5  ;;  %1241 = vst.msk [vmem:[#allocation2 + $0xd0] sm:$0xff] %vm328_vm0, %v1209_v22  ;;  %5944 = vmatmul.msk.bf16.gmra.mxu1 %vm328_vm0, %v3151_v8  ;;  %6080 = vmatmul.msk.bf16.gmra.mxu2 %vm328_vm0, %v6346_v16  ;;  %v7616_v37 = vpop.f32.mrf.mxu0  ;;  %v4013_v43 = vsel %vm6552_vm5, %v4008_v40, %v4012_v33  ;;  %v6114_v8 = vld [vmem:[%s6448_s26 + $0x74] sm:$0x1]  ;;  %v4030_v16 = vrot.slane %v4028_v20, 4  ;;  %v6347_v13 = vld [vmem:[%s6448_s26 + $0x60] sm:$0xff] }
 0x1ac   : > { %v2079_v7 = vld [vmem:[#allocation2 + $0xc0] sm:$0xff]  ;;  %v4021_v22 = vor.u32 %v4020_v4, %v4017_v36  ;;  %v4034_v47 = vshll.u32 %v6114_v8, 16  ;;  %v6200_v20 = vld [vmem:[%s6448_s26 + $0x6c] sm:$0xe] }
 0x1ad   : > { %v2111_v9 = vadd.f32 %v2079_v7, %v7579_v39  ;;  %1765 = vst.msk [vmem:[#allocation2 + $0xc8] sm:$0xff] %vm328_vm0, %v1733_v23  ;;  %v3041_v39 = vsel %vm6560_vm6, %v3039_v21, %v3040_v34  ;;  %v5872_v23 = vld [vmem:[%s6448_s26 + $0x60] sm:$0xe]  ;;  %v5874_v21 = vld [vmem:[%s6448_s26 + $0x68] sm:$0x1]  ;;  %v4773_v34 = vunpack.c.l.b16 %v4685_v18  ;;  %v6234_v4 = vrot.slane %v6200_v20, 9 }
 0x1ae   : > { %6168 = vmatmul.msk.bf16.gmra.mxu3 %vm328_vm0, %v4276_v19  ;;  %v2824_v44 = vld [vmem:[#allocation2 + $0xb8] sm:$0xff]  ;;  %v1661_v46 = vpop.f32.mrf.mxu2  ;;  %6272 = vmatmul.msk.bf16.gmra.mxu0 %vm328_vm0, %v4798_v17  ;;  %v3127_v54 = vunpack.c.l.b16 %v3041_v39  ;;  %v4774_v17 = vunpack.c.l.b16 %v4688_v2  ;;  %v1179_v7 = vld [vmem:[#allocation2 + $0xe0] sm:$0xff]  ;;  %v3047_v40 = vrot.slane %v5874_v21, 5  ;;  %v4036_v42 = vrot.slane %v4034_v47, 5 }
 0x1af   : > { %2143 = vst.msk [vmem:[#allocation2 + $0xc0] sm:$0xff] %vm328_vm0, %v2111_v9  ;;  %v2856_v41 = vadd.f32 %v2824_v44, %v7543_v55  ;;  %v4003_v55 = vsel %vm6552_vm5, %v3998_v38, %v7599_v32  ;;  %v4252_v32 = vunpack.c.l.b16 %v4013_v43  ;;  %v5906_v9 = vrot.slane %v5872_v23, 9  ;;  %v6117_v23 = vld [vmem:[%s6448_s26 + $0x80] sm:$0x1] }
 0x1b0   : > { %v1138_v56 = vpop.f32.mrf.mxu1  ;;  %v4251_v52 = vunpack.c.l.b16 %v4003_v55  ;;  %v3152_v50 = vpack.c.b16 %v3127_v54, %v3126_v49  ;;  %v4022_v44 = vrot.slane %v4021_v22, 4  ;;  %v4799_v14 = vpack.c.b16 %v4774_v17, %v4773_v34 }
 0x1b1   : > { %v7627_v31 = vpop.f32.mrf.mxu3  ;;  %2888 = vst.msk [vmem:[#allocation2 + $0xb8] sm:$0xff] %vm328_vm0, %v2856_v41  ;;  %v1210_v25 = vadd.f32 %v1178_v0, %v1138_v56  ;;  %v6115_v41 = vld [vmem:[%s6448_s26 + $0x78] sm:$0xf]  ;;  %v4691_v39 = vrot.slane %v6201_v57, 5  ;;  %v6202_v56 = vld [vmem:[%s6448_s26 + $0x74] sm:$0x1]  ;;  %v3045_v59 = vsel %vm6560_vm6, %v5906_v9, %v3044_v51 }
 0x1b2   : > { %v1702_v30 = vld [vmem:[#allocation2 + $0xd0] sm:$0xff]  ;;  %v4277_v38 = vpack.c.b16 %v4252_v32, %v4251_v52  ;;  %v4039_v49 = vshrl.u32 %v6115_v41, 16  ;;  %v4042_v36 = vshll.u32 %v6115_v41, 16  ;;  %v4694_v8 = vrot.slane %v6202_v56, 5  ;;  %v5875_v57 = vld [vmem:[%s6448_s26 + $0x6c] sm:$0xe] }
 0x1b3   : > { %v1734_v5 = vadd.f32 %v1702_v30, %v1661_v46  ;;  %1242 = vst.msk [vmem:[#allocation2 + $0xd8] sm:$0xff] %vm328_vm0, %v1210_v25  ;;  %v7643_v53 = vpop.f32.mrf.mxu0  ;;  %v6116_v25 = vld [vmem:[%s6448_s26 + $0x7c] sm:$0xf]  ;;  %v4692_v47 = vsel %vm6560_vm6, %v6234_v4, %v4691_v39 }
 0x1b4   : > { %v2080_v29 = vld [vmem:[#allocation2 + $0xc8] sm:$0xff]  ;;  %v4044_v22 = vrot.slane %v4042_v36, 5  ;;  %v6205_v36 = vld [vmem:[%s6448_s26 + $0x80] sm:$0x1] }
 0x1b5   : > { %v2112_v62 = vadd.f32 %v2080_v29, %v7604_v3  ;;  %1766 = vst.msk [vmem:[#allocation2 + $0xd0] sm:$0xff] %vm328_vm0, %v1734_v5  ;;  %v4031_v3 = vor.u32 %v4030_v16, %v7641_v10  ;;  %v4693_v5 = vrot.slane %v4691_v39, 4  ;;  %v4048_v16 = vshll.u32 %v6116_v25, 16 }
 0x1b6   : > { %v2825_v19 = vld [vmem:[#allocation2 + $0xc0] sm:$0xff]  ;;  %v1663_v45 = vpop.f32.mrf.mxu2  ;;  %v4052_v29 = vshrl.u32 %v6116_v25, 16  ;;  %v5907_v39 = vrot.slane %v5875_v57, 9 }
 0x1b7   : > { %2144 = vst.msk [vmem:[#allocation2 + $0xc8] sm:$0xff] %vm328_vm0, %v2112_v62  ;;  %v2857_v11 = vadd.f32 %v2825_v19, %v7565_v28  ;;  %v3046_v28 = vrot.slane %v3044_v51, 4  ;;  %v4032_v46 = vrot.slane %v4031_v3, 4  ;;  %v4041_v51 = vrot.slane %v4039_v49, 4 }
 0x1b8   : > { %v1141_v27 = vpop.f32.mrf.mxu1  ;;  %v7699_v21 = vrot.slane %v4048_v16, 5  ;;  %v4054_v3 = vrot.slane %v4052_v29, 4 }
 0x1b9   : > { %v7654_v63 = vpop.f32.mrf.mxu3  ;;  %2889 = vst.msk [vmem:[#allocation2 + $0xc0] sm:$0xff] %vm328_vm0, %v2857_v11  ;;  %v1211_v33 = vadd.f32 %v1179_v7, %v1141_v27  ;;  %v3048_v26 = vsel %vm6560_vm6, %v3046_v28, %v3047_v40  ;;  %v4037_v30 = vsel %vm6552_vm5, %v4032_v46, %v4036_v42  ;;  %v4695_v11 = vsel %vm6560_vm6, %v4693_v5, %v4694_v8  ;;  %v1181_v40 = vld [vmem:[#allocation2 + $0xf0] sm:$0xff] }
 0x1ba   : > { %v1703_v24 = vld [vmem:[#allocation2 + $0xd8] sm:$0xff]  ;;  %v3129_v32 = vunpack.c.l.b16 %v3048_v26  ;;  %v4254_v62 = vunpack.c.l.b16 %v4037_v30  ;;  %v4776_v9 = vunpack.c.l.b16 %v4695_v11  ;;  %v4058_v46 = vshll.u32 %v6117_v23, 16 }
 0x1bb   : > { %v1735_v1 = vadd.f32 %v1703_v24, %v1663_v45  ;;  %1243 = vst.msk [vmem:[#allocation2 + $0xe0] sm:$0xff] %vm328_vm0, %v1211_v33  ;;  %5945 = vmatmul.msk.bf16.gmra.mxu1 %vm328_vm0, %v3152_v50  ;;  %6081 = vmatmul.msk.bf16.gmra.mxu2 %vm328_vm0, %v6347_v13  ;;  %v7665_v35 = vpop.f32.mrf.mxu0  ;;  %v5876_v50 = vld [vmem:[%s6448_s26 + $0x70] sm:$0xf]  ;;  %v4775_v24 = vunpack.c.l.b16 %v4692_v47  ;;  %v5879_v23 = vld [vmem:[%s6448_s26 + $0x7c] sm:$0xf] }
 0x1bc   : > { %v2081_v15 = vld [vmem:[#allocation2 + $0xd0] sm:$0xff] }
 0x1bd   : > { %v2113_v48 = vadd.f32 %v2081_v15, %v7627_v31  ;;  %1767 = vst.msk [vmem:[#allocation2 + $0xd8] sm:$0xff] %vm328_vm0, %v1735_v1  ;;  %v4027_v31 = vsel %vm6552_vm5, %v4022_v44, %v7641_v10  ;;  %v3128_v10 = vunpack.c.l.b16 %v3045_v59  ;;  %v5877_v1 = vld [vmem:[%s6448_s26 + $0x74] sm:$0x1]  ;;  %v4045_v44 = vor.u32 %v4044_v22, %v4041_v51  ;;  %v6204_v15 = vld [vmem:[%s6448_s26 + $0x7c] sm:$0xf] }
 0x1be   : > { %6169 = vmatmul.msk.bf16.gmra.mxu3 %vm328_vm0, %v4277_v38  ;;  %v2826_v0 = vld [vmem:[#allocation2 + $0xc8] sm:$0xff]  ;;  %v1666_v58 = vpop.f32.mrf.mxu2  ;;  %6273 = vmatmul.msk.bf16.gmra.mxu0 %vm328_vm0, %v4799_v14  ;;  %v4253_v2 = vunpack.c.l.b16 %v4027_v31  ;;  %v3054_v56 = vrot.slane %v5877_v1, 5  ;;  %v4698_v30 = vrot.slane %v6204_v15, 5 }
 0x1bf   : > { %2145 = vst.msk [vmem:[#allocation2 + $0xd0] sm:$0xff] %vm328_vm0, %v2113_v48  ;;  %v2858_v55 = vadd.f32 %v2826_v0, %v7589_v61  ;;  %v3153_v27 = vpack.c.b16 %v3129_v32, %v3128_v10  ;;  %v6348_v38 = vld [vmem:[%s6448_s26 + $0x6c] sm:$0xff]  ;;  %v4800_v0 = vpack.c.b16 %v4776_v9, %v4775_v24  ;;  %v4046_v25 = vrot.slane %v4045_v44, 4  ;;  %v6119_v31 = vld [vmem:[%s6448_s26 + $0x88] sm:$0xf] }
 0x1c0   : > { %v1143_v54 = vpop.f32.mrf.mxu1  ;;  %v4278_v42 = vpack.c.b16 %v4254_v62, %v4253_v2  ;;  %v4072_v10 = vshll.u32 %v6119_v31, 16  ;;  %v4076_v32 = vshrl.u32 %v6119_v31, 16  ;;  %v1182_v2 = vld [vmem:[#allocation2 + $0xf8] sm:$0xff]  ;;  %v6207_v31 = vld [vmem:[%s6448_s26 + $0x88] sm:$0xf] }
 0x1c1   : > { %v7679_v43 = vpop.f32.mrf.mxu3  ;;  %2890 = vst.msk [vmem:[#allocation2 + $0xc8] sm:$0xff] %vm328_vm0, %v2858_v55  ;;  %v1212_v61 = vadd.f32 %v1180_v60, %v1143_v54  ;;  %v4060_v55 = vrot.slane %v4058_v46, 5  ;;  %v6203_v60 = vld [vmem:[%s6448_s26 + $0x78] sm:$0xe]  ;;  %v3058_v46 = vrot.slane %v5879_v23, 5  ;;  %v3324_v23 = vld [vmem:[#allocation2 + $0x8] sm:$0xff] }
 0x1c2   : > { %v1704_v52 = vld [vmem:[#allocation2 + $0xe0] sm:$0xff]  ;;  %v6235_v62 = vrot.slane %v6203_v60, 9 }
 0x1c3   : > { %v1736_v18 = vadd.f32 %v1704_v52, %v1666_v58  ;;  %1244 = vst.msk [vmem:[#allocation2 + $0xe8] sm:$0xff] %vm328_vm0, %v1212_v61  ;;  %v7689_v45 = vpop.f32.mrf.mxu0  ;;  %v6118_v58 = vld [vmem:[%s6448_s26 + $0x84] sm:$0xf] }
 0x1c4   : > { %v2082_v19 = vld [vmem:[#allocation2 + $0xd8] sm:$0xff]  ;;  %v4063_v61 = vshrl.u32 %v6118_v58, 16  ;;  %v4066_v16 = vshll.u32 %v6118_v58, 16  ;;  %v4699_v9 = vsel %vm6560_vm6, %v6235_v62, %v4698_v30 }
 0x1c5   : > { %v2114_v13 = vadd.f32 %v2082_v19, %v7654_v63  ;;  %1768 = vst.msk [vmem:[#allocation2 + $0xe0] sm:$0xff] %vm328_vm0, %v1736_v18  ;;  %v3051_v63 = vrot.slane %v5876_v50, 5  ;;  %v4700_v19 = vrot.slane %v4698_v30, 4  ;;  %v4701_v50 = vrot.slane %v6205_v36, 5 }
 0x1c6   : > { %v2827_v34 = vld [vmem:[#allocation2 + $0xd0] sm:$0xff]  ;;  %v1668_v17 = vpop.f32.mrf.mxu2 }
 0x1c7   : > { %2146 = vst.msk [vmem:[#allocation2 + $0xd8] sm:$0xff] %vm328_vm0, %v2114_v13  ;;  %v2859_v7 = vadd.f32 %v2827_v34, %v7616_v37  ;;  %v4055_v37 = vor.u32 %v4054_v3, %v7699_v21  ;;  %v3053_v20 = vrot.slane %v3051_v63, 4  ;;  %v3052_v8 = vsel %vm6560_vm6, %v5907_v39, %v3051_v63 }
 0x1c8   : > { %v1146_v28 = vpop.f32.mrf.mxu1  ;;  %v3130_v11 = vunpack.c.l.b16 %v3052_v8  ;;  %v4065_v3 = vrot.slane %v4063_v61, 4  ;;  %v4068_v34 = vrot.slane %v4066_v16, 5 }
 0x1c9   : > { %v7704_v33 = vpop.f32.mrf.mxu3  ;;  %2891 = vst.msk [vmem:[#allocation2 + $0xd0] sm:$0xff] %vm328_vm0, %v2859_v7  ;;  %v1213_v14 = vadd.f32 %v1181_v40, %v1146_v28  ;;  %v4056_v54 = vrot.slane %v4055_v37, 4  ;;  %v7741_v7 = vrot.slane %v4072_v10, 5  ;;  %v4702_v28 = vsel %vm6560_vm6, %v4700_v19, %v4701_v50 }
 0x1ca   : > { %v1705_v41 = vld [vmem:[#allocation2 + $0xe8] sm:$0xff] }
 0x1cb   : > { %v1737_v48 = vadd.f32 %v1705_v41, %v1668_v17  ;;  %1245 = vst.msk [vmem:[#allocation2 + $0xf0] sm:$0xff] %vm328_vm0, %v1213_v14  ;;  %5946 = vmatmul.msk.bf16.gmra.mxu1 %vm328_vm0, %v3153_v27  ;;  %6082 = vmatmul.msk.bf16.gmra.mxu2 %vm328_vm0, %v6348_v38  ;;  %v7716_v26 = vpop.f32.mrf.mxu0  ;;  %v4061_v22 = vsel %vm6552_vm5, %v4056_v54, %v4060_v55  ;;  %v6120_v27 = vld [vmem:[%s6448_s26 + $0x8c] sm:$0x1]  ;;  %v4078_v38 = vrot.slane %v4076_v32, 4  ;;  %v6349_v41 = vld [vmem:[%s6448_s26 + $0x78] sm:$0xff] }
 0x1cc   : > { %v2083_v59 = vld [vmem:[#allocation2 + $0xe0] sm:$0xff]  ;;  %v4069_v14 = vor.u32 %v4068_v34, %v4065_v3  ;;  %v4082_v37 = vshll.u32 %v6120_v27, 16 }
 0x1cd   : > { %v2115_v49 = vadd.f32 %v2083_v59, %v7679_v43  ;;  %1769 = vst.msk [vmem:[#allocation2 + $0xe8] sm:$0xff] %vm328_vm0, %v1737_v48  ;;  %v3055_v43 = vsel %vm6560_vm6, %v3053_v20, %v3054_v56  ;;  %v5878_v48 = vld [vmem:[%s6448_s26 + $0x78] sm:$0xe]  ;;  %v5880_v20 = vld [vmem:[%s6448_s26 + $0x80] sm:$0x1]  ;;  %v4777_v56 = vunpack.c.l.b16 %v4699_v9 }
 0x1ce   : > { %6170 = vmatmul.msk.bf16.gmra.mxu3 %vm328_vm0, %v4278_v42  ;;  %v2828_v4 = vld [vmem:[#allocation2 + $0xd8] sm:$0xff]  ;;  %v1671_v5 = vpop.f32.mrf.mxu2  ;;  %6274 = vmatmul.msk.bf16.gmra.mxu0 %vm328_vm0, %v4800_v0  ;;  %v3131_v13 = vunpack.c.l.b16 %v3055_v43  ;;  %v4778_v0 = vunpack.c.l.b16 %v4702_v28  ;;  %v3323_v59 = vld [vmem:[#allocation2] sm:$0xff]  ;;  %v3061_v54 = vrot.slane %v5880_v20, 5  ;;  %v4084_v60 = vrot.slane %v4082_v37, 5 }
 0x1cf   : > { %2147 = vst.msk [vmem:[#allocation2 + $0xe0] sm:$0xff] %vm328_vm0, %v2115_v49  ;;  %v2860_v29 = vadd.f32 %v2828_v4, %v7643_v53  ;;  %v4051_v53 = vsel %vm6552_vm5, %v4046_v25, %v7699_v21  ;;  %v4256_v21 = vunpack.c.l.b16 %v4061_v22  ;;  %v5908_v49 = vrot.slane %v5878_v48, 9  ;;  %v6206_v32 = vld [vmem:[%s6448_s26 + $0x84] sm:$0xe]  ;;  %v6123_v48 = vld [vmem:[%s6448_s26 + $0x98] sm:$0x1] }
 0x1d0   : > { %v1148_v18 = vpop.f32.mrf.mxu1  ;;  %v4255_v63 = vunpack.c.l.b16 %v4051_v53  ;;  %v3154_v44 = vpack.c.b16 %v3131_v13, %v3130_v11  ;;  %v4070_v4 = vrot.slane %v4069_v14, 4  ;;  %v4801_v8 = vpack.c.b16 %v4778_v0, %v4777_v56 }
 0x1d1   : > { %v7727_v52 = vpop.f32.mrf.mxu3  ;;  %2892 = vst.msk [vmem:[#allocation2 + $0xd8] sm:$0xff] %vm328_vm0, %v2860_v29  ;;  %v1214_v51 = vadd.f32 %v1182_v2, %v1148_v18  ;;  %v6121_v29 = vld [vmem:[%s6448_s26 + $0x90] sm:$0xf]  ;;  %v4705_v43 = vrot.slane %v6207_v31, 5  ;;  %v6208_v18 = vld [vmem:[%s6448_s26 + $0x8c] sm:$0x1]  ;;  %v3059_v19 = vsel %vm6560_vm6, %v5908_v49, %v3058_v46 }
 0x1d2   : > { %v1706_v47 = vld [vmem:[#allocation2 + $0xf0] sm:$0xff]  ;;  %v4279_v25 = vpack.c.b16 %v4256_v21, %v4255_v63  ;;  %v4087_v11 = vshrl.u32 %v6121_v29, 16  ;;  %v4090_v3 = vshll.u32 %v6121_v29, 16  ;;  %v6236_v34 = vrot.slane %v6206_v32, 9  ;;  %v5881_v31 = vld [vmem:[%s6448_s26 + $0x84] sm:$0xe] }
 0x1d3   : > { %v1738_v17 = vadd.f32 %v1706_v47, %v1671_v5  ;;  %1246 = vst.msk [vmem:[#allocation2 + $0xf8] sm:$0xff] %vm328_vm0, %v1214_v51  ;;  %v7743_v24 = vpop.f32.mrf.mxu0  ;;  %v6122_v51 = vld [vmem:[%s6448_s26 + $0x94] sm:$0xf]  ;;  %v4708_v27 = vrot.slane %v6208_v18, 5 }
 0x1d4   : > { %v2084_v57 = vld [vmem:[#allocation2 + $0xe8] sm:$0xff]  ;;  %v4092_v14 = vrot.slane %v4090_v3, 5  ;;  %v4706_v37 = vsel %vm6560_vm6, %v6236_v34, %v4705_v43  ;;  %v6211_v3 = vld [vmem:[%s6448_s26 + $0x98] sm:$0x1] }
 0x1d5   : > { %v2116_v40 = vadd.f32 %v2084_v57, %v7704_v33  ;;  %1770 = vst.msk [vmem:[#allocation2 + $0xf0] sm:$0xff] %vm328_vm0, %v1738_v17  ;;  %v4079_v33 = vor.u32 %v4078_v38, %v7741_v7  ;;  %v4707_v17 = vrot.slane %v4705_v43, 4  ;;  %v4096_v38 = vshll.u32 %v6122_v51, 16 }
 0x1d6   : > { %v2829_v42 = vld [vmem:[#allocation2 + $0xe0] sm:$0xff]  ;;  %v1673_v1 = vpop.f32.mrf.mxu2  ;;  %v4100_v57 = vshrl.u32 %v6122_v51, 16  ;;  %v5909_v43 = vrot.slane %v5881_v31, 9 }
 0x1d7   : > { %2148 = vst.msk [vmem:[#allocation2 + $0xe8] sm:$0xff] %vm328_vm0, %v2116_v40  ;;  %v2861_v15 = vadd.f32 %v2829_v42, %v7665_v35  ;;  %v3060_v35 = vrot.slane %v3058_v46, 4  ;;  %v4080_v5 = vrot.slane %v4079_v33, 4  ;;  %v4089_v46 = vrot.slane %v4087_v11, 4 }
 0x1d8   : > { %v3243_v58 = vpop.f32.mrf.mxu1  ;;  %v7799_v20 = vrot.slane %v4096_v38, 5  ;;  %v4102_v33 = vrot.slane %v4100_v57, 4 }
 0x1d9   : > { %v7754_v39 = vpop.f32.mrf.mxu3  ;;  %2893 = vst.msk [vmem:[#allocation2 + $0xe0] sm:$0xff] %vm328_vm0, %v2861_v15  ;;  %v3355_v55 = vadd.f32 %v3323_v59, %v3243_v58  ;;  %v3062_v50 = vsel %vm6560_vm6, %v3060_v35, %v3061_v54  ;;  %v4085_v47 = vsel %vm6552_vm5, %v4080_v5, %v4084_v60  ;;  %v4709_v15 = vsel %vm6560_vm6, %v4707_v17, %v4708_v27  ;;  %v3325_v54 = vld [vmem:[#allocation2 + $0x10] sm:$0xff] }
 0x1da   : > { %v1707_v30 = vld [vmem:[#allocation2 + $0xf8] sm:$0xff]  ;;  %v3133_v21 = vunpack.c.l.b16 %v3062_v50  ;;  %v4258_v40 = vunpack.c.l.b16 %v4085_v47  ;;  %v4780_v49 = vunpack.c.l.b16 %v4709_v15  ;;  %v4106_v5 = vshll.u32 %v6123_v48, 16  ;;  %v7843_v48 = vld [vmem:[%s6448_s26 + $0x94] sm:$0xf] }
 0x1db   : > { %v1739_v36 = vadd.f32 %v1707_v30, %v1673_v1  ;;  %3387 = vst.msk [vmem:[#allocation2] sm:$0xff] %vm328_vm0, %v3355_v55  ;;  %5947 = vmatmul.msk.bf16.gmra.mxu1 %vm328_vm0, %v3154_v44  ;;  %6083 = vmatmul.msk.bf16.gmra.mxu2 %vm328_vm0, %v6349_v41  ;;  %v7765_v16 = vpop.f32.mrf.mxu0  ;;  %v5882_v44 = vld [vmem:[%s6448_s26 + $0x88] sm:$0xf]  ;;  %v4779_v30 = vunpack.c.l.b16 %v4706_v37 }
 0x1dc   : > { %v2085_v61 = vld [vmem:[#allocation2 + $0xf0] sm:$0xff] }
 0x1dd   : > { %v2117_v10 = vadd.f32 %v2085_v61, %v7727_v52  ;;  %1771 = vst.msk [vmem:[#allocation2 + $0xf8] sm:$0xff] %vm328_vm0, %v1739_v36  ;;  %v4075_v52 = vsel %vm6552_vm5, %v4070_v4, %v7741_v7  ;;  %v3132_v7 = vunpack.c.l.b16 %v3059_v19  ;;  %v5883_v36 = vld [vmem:[%s6448_s26 + $0x8c] sm:$0x1]  ;;  %v4093_v4 = vor.u32 %v4092_v14, %v4089_v46  ;;  %v7811_v61 = vld [vmem:[%s6448_s26 + $0x94] sm:$0xf] }
 0x1de   : > { %6171 = vmatmul.msk.bf16.gmra.mxu3 %vm328_vm0, %v4279_v25  ;;  %v2830_v2 = vld [vmem:[#allocation2 + $0xe8] sm:$0xff]  ;;  %v3622_v62 = vpop.f32.mrf.mxu2  ;;  %6275 = vmatmul.msk.bf16.gmra.mxu0 %vm328_vm0, %v4801_v8  ;;  %v4257_v28 = vunpack.c.l.b16 %v4075_v52  ;;  %v3068_v18 = vrot.slane %v5883_v36, 5  ;;  %v6125_v52 = vld [vmem:[%s6448_s26 + $0xa0] sm:$0xf]  ;;  %v4712_v47 = vrot.slane %v7811_v61, 5 }
 0x1df   : > { %2149 = vst.msk [vmem:[#allocation2 + $0xf0] sm:$0xff] %vm328_vm0, %v2117_v10  ;;  %v2862_v53 = vadd.f32 %v2830_v2, %v7689_v45  ;;  %v3155_v58 = vpack.c.b16 %v3133_v21, %v3132_v7  ;;  %v6350_v25 = vld [vmem:[%s6448_s26 + $0x84] sm:$0xff]  ;;  %v4802_v2 = vpack.c.b16 %v4780_v49, %v4779_v30  ;;  %v4094_v51 = vrot.slane %v4093_v4, 4 }
 0x1e0   : > { %v3245_v13 = vpop.f32.mrf.mxu1  ;;  %v4280_v60 = vpack.c.b16 %v4258_v40, %v4257_v28  ;;  %v4120_v7 = vshll.u32 %v6125_v52, 16  ;;  %v4124_v21 = vshrl.u32 %v6125_v52, 16  ;;  %v3326_v28 = vld [vmem:[#allocation2 + $0x18] sm:$0xff] }
 0x1e1   : > { %v7779_v22 = vpop.f32.mrf.mxu3  ;;  %2894 = vst.msk [vmem:[#allocation2 + $0xe8] sm:$0xff] %vm328_vm0, %v2862_v53  ;;  %v3356_v45 = vadd.f32 %v3324_v23, %v3245_v13  ;;  %v4108_v53 = vrot.slane %v4106_v5, 5  ;;  %v6209_v23 = vld [vmem:[%s6448_s26 + $0x90] sm:$0xe]  ;;  %v4099_v46 = vsel %vm6552_vm5, %v4094_v51, %v7799_v20 }
 0x1e2   : > { %v3702_v63 = vld [vmem:[#allocation2] sm:$0xff]  ;;  %v6237_v40 = vrot.slane %v6209_v23, 9  ;;  %v5884_v5 = vld [vmem:[%s6448_s26 + $0x90] sm:$0xe] }
 0x1e3   : > { %v3734_v9 = vadd.f32 %v3702_v63, %v3622_v62  ;;  %3388 = vst.msk [vmem:[#allocation2 + $0x8] sm:$0xff] %vm328_vm0, %v3356_v45  ;;  %v7789_v1 = vpop.f32.mrf.mxu0  ;;  %v6124_v62 = vld [vmem:[%s6448_s26 + $0x9c] sm:$0xf]  ;;  %v5910_v52 = vrot.slane %v5884_v5, 9 }
 0x1e4   : > { %v2086_v42 = vld [vmem:[#allocation2 + $0xf8] sm:$0xff]  ;;  %v4111_v45 = vshrl.u32 %v6124_v62, 16  ;;  %v4114_v38 = vshll.u32 %v6124_v62, 16  ;;  %v4713_v49 = vsel %vm6560_vm6, %v6237_v40, %v4712_v47 }
 0x1e5   : > { %v2118_v41 = vadd.f32 %v2086_v42, %v7754_v39  ;;  %3766 = vst.msk [vmem:[#allocation2] sm:$0xff] %vm328_vm0, %v3734_v9  ;;  %v3065_v39 = vrot.slane %v5882_v44, 5  ;;  %v4714_v42 = vrot.slane %v4712_v47, 4  ;;  %v4715_v44 = vrot.slane %v6211_v3, 5  ;;  %v7881_v47 = vld [vmem:[%s6448_s26 + $0xa0] sm:$0xf] }
 0x1e6   : > { %v2831_v56 = vld [vmem:[#allocation2 + $0xf0] sm:$0xff]  ;;  %v3624_v0 = vpop.f32.mrf.mxu2  ;;  %v6212_v40 = vld [vmem:[%s6448_s26 + $0x9c] sm:$0xe] }
 0x1e7   : > { %2150 = vst.msk [vmem:[#allocation2 + $0xf8] sm:$0xff] %vm328_vm0, %v2118_v41  ;;  %v2863_v59 = vadd.f32 %v2831_v56, %v7716_v26  ;;  %v4103_v26 = vor.u32 %v4102_v33, %v7799_v20  ;;  %v3067_v32 = vrot.slane %v3065_v39, 4  ;;  %v3066_v27 = vsel %vm6560_vm6, %v5909_v43, %v3065_v39  ;;  %v6351_v43 = vld [vmem:[%s6448_s26 + $0x90] sm:$0xff] }
 0x1e8   : > { %v3248_v35 = vpop.f32.mrf.mxu1  ;;  %v3134_v15 = vunpack.c.l.b16 %v3066_v27  ;;  %v4113_v33 = vrot.slane %v4111_v45, 4  ;;  %v4116_v56 = vrot.slane %v4114_v38, 5  ;;  %v4259_v20 = vunpack.c.l.b16 %v4099_v46  ;;  %v6128_v38 = vld [vmem:[%s6448_s26 + $0xac] sm:$0xf] }
 0x1e9   : > { %v7804_v55 = vpop.f32.mrf.mxu3  ;;  %2895 = vst.msk [vmem:[#allocation2 + $0xf0] sm:$0xff] %vm328_vm0, %v2863_v59  ;;  %v3357_v8 = vadd.f32 %v3325_v54, %v3248_v35  ;;  %v4104_v13 = vrot.slane %v4103_v26, 4  ;;  %v7847_v59 = vrot.slane %v4120_v7, 5  ;;  %v4716_v35 = vsel %vm6560_vm6, %v4714_v42, %v4715_v44  ;;  %v6214_v42 = vld [vmem:[%s6448_s26 + $0xa4] sm:$0x1] }
 0x1ea   : > { %v3703_v29 = vld [vmem:[#allocation2 + $0x8] sm:$0xff]  ;;  %v4117_v26 = vor.u32 %v4116_v56, %v4113_v33  ;;  %v5887_v56 = vld [vmem:[%s6448_s26 + $0x9c] sm:$0xe] }
 0x1eb   : > { %v3735_v10 = vadd.f32 %v3703_v29, %v3624_v0  ;;  %3389 = vst.msk [vmem:[#allocation2 + $0x10] sm:$0xff] %vm328_vm0, %v3357_v8  ;;  %5948 = vmatmul.msk.bf16.gmra.mxu1 %vm328_vm0, %v3155_v58  ;;  %6084 = vmatmul.msk.bf16.gmra.mxu2 %vm328_vm0, %v6350_v25  ;;  %v7818_v50 = vpop.f32.mrf.mxu0  ;;  %v4109_v14 = vsel %vm6552_vm5, %v4104_v13, %v4108_v53  ;;  %v6126_v58 = vld [vmem:[%s6448_s26 + $0xa4] sm:$0x1]  ;;  %v4126_v25 = vrot.slane %v4124_v21, 4  ;;  %v3072_v8 = vrot.slane %v7843_v48, 5 }
 0x1ec   : > { %v4448_v19 = vld [vmem:[#allocation2] sm:$0xff]  ;;  %v4260_v39 = vunpack.c.l.b16 %v4109_v14  ;;  %v4130_v61 = vshll.u32 %v6126_v58, 16  ;;  %v6127_v53 = vld [vmem:[%s6448_s26 + $0xa8] sm:$0xf]  ;;  %v4118_v3 = vrot.slane %v4117_v26, 4 }
 0x1ed   : > { %v4480_v11 = vadd.f32 %v4448_v19, %v7779_v22  ;;  %3767 = vst.msk [vmem:[#allocation2 + $0x8] sm:$0xff] %vm328_vm0, %v3735_v10  ;;  %v3069_v22 = vsel %vm6560_vm6, %v3067_v32, %v3068_v18  ;;  %v5886_v10 = vld [vmem:[%s6448_s26 + $0x98] sm:$0x1]  ;;  %v4127_v32 = vor.u32 %v4126_v25, %v7847_v59  ;;  %v4781_v18 = vunpack.c.l.b16 %v4713_v49  ;;  %v3327_v19 = vld [vmem:[#allocation2 + $0x20] sm:$0xff] }
 0x1ee   : > { %6172 = vmatmul.msk.bf16.gmra.mxu3 %vm328_vm0, %v4280_v60  ;;  %v2832_v34 = vld [vmem:[#allocation2 + $0xf8] sm:$0xff]  ;;  %v3627_v17 = vpop.f32.mrf.mxu2  ;;  %6276 = vmatmul.msk.bf16.gmra.mxu0 %vm328_vm0, %v4802_v2  ;;  %v3135_v41 = vunpack.c.l.b16 %v3069_v22  ;;  %v4782_v2 = vunpack.c.l.b16 %v4716_v35  ;;  %v4281_v51 = vpack.c.b16 %v4260_v39, %v4259_v20  ;;  %v3074_v13 = vrot.slane %v3072_v8, 4 }
 0x1ef   : > { %4512 = vst.msk [vmem:[#allocation2] sm:$0xff] %vm328_vm0, %v4480_v11  ;;  %v2864_v57 = vadd.f32 %v2832_v34, %v7743_v24  ;;  %v3075_v23 = vrot.slane %v5886_v10, 5  ;;  %v4132_v34 = vrot.slane %v4130_v61, 5  ;;  %v4128_v27 = vrot.slane %v4127_v32, 4  ;;  %v5889_v32 = vld [vmem:[%s6448_s26 + $0xa4] sm:$0x1] }
 0x1f0   : > { %v3250_v9 = vpop.f32.mrf.mxu1  ;;  %v3156_v4 = vpack.c.b16 %v3135_v41, %v3134_v15  ;;  %v4803_v45 = vpack.c.b16 %v4782_v2, %v4781_v18  ;;  %v4138_v21 = vshll.u32 %v6127_v53, 16  ;;  %v3073_v46 = vsel %vm6560_vm6, %v5910_v52, %v3072_v8 }
 0x1f1   : > { %v7830_v63 = vpop.f32.mrf.mxu3  ;;  %2896 = vst.msk [vmem:[#allocation2 + $0xf8] sm:$0xff] %vm328_vm0, %v2864_v57  ;;  %v3358_v24 = vadd.f32 %v3326_v28, %v3250_v9  ;;  %v4135_v57 = vshrl.u32 %v6127_v53, 16  ;;  %v4719_v9 = vrot.slane %v7881_v47, 5  ;;  %v3076_v14 = vsel %vm6560_vm6, %v3074_v13, %v3075_v23 }
 0x1f2   : > { %v3704_v37 = vld [vmem:[#allocation2 + $0x10] sm:$0xff]  ;;  %v4148_v15 = vshrl.u32 %v6128_v38, 16  ;;  %v4123_v48 = vsel %vm6552_vm5, %v4118_v3, %v7847_v59  ;;  %v4133_v33 = vsel %vm6552_vm5, %v4128_v27, %v4132_v34  ;;  %v4140_v20 = vrot.slane %v4138_v21, 5 }
 0x1f3   : > { %v3736_v0 = vadd.f32 %v3704_v37, %v3627_v17  ;;  %3390 = vst.msk [vmem:[#allocation2 + $0x18] sm:$0xff] %vm328_vm0, %v3358_v24  ;;  %v7855_v30 = vpop.f32.mrf.mxu0  ;;  %v4144_v37 = vshll.u32 %v6128_v38, 16  ;;  %v4137_v58 = vrot.slane %v4135_v57, 4  ;;  %v6238_v59 = vrot.slane %v6212_v40, 9  ;;  %v3329_v40 = vld [vmem:[#allocation2 + $0x30] sm:$0xff] }
 0x1f4   : > { %v4449_v31 = vld [vmem:[#allocation2 + $0x8] sm:$0xff]  ;;  %v4721_v39 = vrot.slane %v4719_v9, 4  ;;  %v4722_v49 = vrot.slane %v6214_v42, 5  ;;  %v4150_v61 = vrot.slane %v4148_v15, 4  ;;  %v4262_v10 = vunpack.c.l.b16 %v4133_v33  ;;  %v6130_v15 = vld [vmem:[%s6448_s26 + $0xb4] sm:$0xf] }
 0x1f5   : > { %v4481_v54 = vadd.f32 %v4449_v31, %v7804_v55  ;;  %3768 = vst.msk [vmem:[#allocation2 + $0x10] sm:$0xff] %vm328_vm0, %v3736_v0  ;;  %v5888_v0 = vld [vmem:[%s6448_s26 + $0xa0] sm:$0xf]  ;;  %v3328_v31 = vld [vmem:[#allocation2 + $0x28] sm:$0xff]  ;;  %v7919_v26 = vrot.slane %v4144_v37, 5  ;;  %v5911_v18 = vrot.slane %v5887_v56, 9  ;;  %v4720_v53 = vsel %vm6560_vm6, %v6238_v59, %v4719_v9 }
 0x1f6   : > { %v4970_v60 = vld [vmem:[#allocation2] sm:$0xff]  ;;  %v3629_v36 = vpop.f32.mrf.mxu2  ;;  %v3079_v8 = vrot.slane %v5888_v0, 5  ;;  %v3082_v34 = vrot.slane %v5889_v32, 5  ;;  %v7957_v0 = vld [vmem:[%s6448_s26 + $0xac] sm:$0xf]  ;;  %v4162_v32 = vshll.u32 %v6130_v15, 16 }
 0x1f7   : > { %4513 = vst.msk [vmem:[#allocation2 + $0x8] sm:$0xff] %vm328_vm0, %v4481_v54  ;;  %v5002_v29 = vadd.f32 %v4970_v60, %v7765_v16  ;;  %v3136_v60 = vunpack.c.l.b16 %v3073_v46 }
 0x1f8   : > { %v3253_v62 = vpop.f32.mrf.mxu1  ;;  %v3081_v3 = vrot.slane %v3079_v8, 4  ;;  %v7942_v42 = vsel %vm6560_vm6, %v5911_v18, %v3079_v8 }
 0x1f9   : > { %v7868_v55 = vpop.f32.mrf.mxu3  ;;  %5034 = vst.msk [vmem:[#allocation2] sm:$0xff] %vm328_vm0, %v5002_v29  ;;  %v3359_v16 = vadd.f32 %v3327_v19, %v3253_v62  ;;  %v4141_v19 = vor.u32 %v4140_v20, %v4137_v58  ;;  %v6131_v58 = vld [vmem:[%s6448_s26 + $0xb8] sm:$0xf]  ;;  %v6216_v20 = vld [vmem:[%s6448_s26 + $0xac] sm:$0xf] }
 0x1fa   : > { %v3705_v11 = vld [vmem:[#allocation2 + $0x18] sm:$0xff]  ;;  %v7954_v33 = vsel %vm6560_vm6, %v3081_v3, %v3082_v34  ;;  %v4168_v18 = vshll.u32 %v6131_v58, 16 }
 0x1fb   : > { %v3737_v17 = vadd.f32 %v3705_v11, %v3629_v36  ;;  %3391 = vst.msk [vmem:[#allocation2 + $0x20] sm:$0xff] %vm328_vm0, %v3359_v16  ;;  %5949 = vmatmul.msk.bf16.gmra.mxu1 %vm328_vm0, %v3156_v4  ;;  %6085 = vmatmul.msk.bf16.gmra.mxu2 %vm328_vm0, %v6351_v43  ;;  %v7889_v7 = vpop.f32.mrf.mxu0  ;;  %v3137_v36 = vunpack.c.l.b16 %v3076_v14  ;;  %v6129_v4 = vld [vmem:[%s6448_s26 + $0xb0] sm:$0x1]  ;;  %v4261_v43 = vunpack.c.l.b16 %v4123_v48  ;;  %v4723_v16 = vsel %vm6560_vm6, %v4721_v39, %v4722_v49 }
 0x1fc   : > { %v4450_v22 = vld [vmem:[#allocation2 + $0x10] sm:$0xff] }
 0x1fd   : > { %v4482_v28 = vadd.f32 %v4450_v22, %v7830_v63  ;;  %3769 = vst.msk [vmem:[#allocation2 + $0x18] sm:$0xff] %vm328_vm0, %v3737_v17  ;;  %v3157_v47 = vpack.c.b16 %v3137_v36, %v3136_v60  ;;  %v4151_v17 = vor.u32 %v4150_v61, %v7919_v26  ;;  %v4282_v57 = vpack.c.b16 %v4262_v10, %v4261_v43  ;;  %v6215_v61 = vld [vmem:[%s6448_s26 + $0xa8] sm:$0xe] }
 0x1fe   : > { %6173 = vmatmul.msk.bf16.gmra.mxu3 %vm328_vm0, %v4281_v51  ;;  %v4971_v44 = vld [vmem:[#allocation2 + $0x8] sm:$0xff]  ;;  %v3632_v24 = vpop.f32.mrf.mxu2  ;;  %6277 = vmatmul.msk.bf16.gmra.mxu0 %vm328_vm0, %v4803_v45  ;;  %v4154_v51 = vshll.u32 %v6129_v4, 16  ;;  %v6352_v45 = vld [vmem:[%s6448_s26 + $0x9c] sm:$0xff]  ;;  %v4784_v22 = vunpack.c.l.b16 %v4723_v16  ;;  %v4159_v60 = vshrl.u32 %v6130_v15, 16  ;;  %v3138_v4 = vunpack.c.l.b16 %v7942_v42 }
 0x1ff   : > { %4514 = vst.msk [vmem:[#allocation2 + $0x10] sm:$0xff] %vm328_vm0, %v4482_v28  ;;  %v5003_v63 = vadd.f32 %v4971_v44, %v7789_v1  ;;  %v4152_v56 = vrot.slane %v4151_v17, 4  ;;  %v3086_v16 = vrot.slane %v7957_v0, 5 }
 0x200   : > { %v5066_v1 = vld [vmem:[#allocation2] sm:$0xff]  ;;  %v3255_v25 = vpop.f32.mrf.mxu1  ;;  %v7946_v44 = vrot.slane %v4154_v51, 5 }
 0x201   : > { %v7902_v41 = vpop.f32.mrf.mxu3  ;;  %v5098_v35 = vpack.c.bf16 %v5066_v1, %v5066_v1  ;;  %5035 = vst.msk [vmem:[#allocation2 + $0x8] sm:$0xff] %vm328_vm0, %v5003_v63  ;;  %v3360_v54 = vadd.f32 %v3328_v31, %v3255_v25  ;;  %v5233_v11 = vmul.f32 %v5066_v1, %v5066_v1  ;;  %v5163_v21 = vsel %vm328_vm0, %v5066_v1, 0.0 }
 0x202   : > { %v3706_v5 = vld [vmem:[#allocation2 + $0x20] sm:$0xff] }
 0x203   : > { %5131 = vst.msk [vmem:[%s7915_s25] sm:$0xf] %vm5130_vm7, %v5098_v35  ;;  %v3738_v29 = vadd.f32 %v3706_v5, %v3632_v24  ;;  %v7925_v62 = vpop.f32.mrf.mxu0  ;;  %v5265_v63 = vsel %vm328_vm0, %v5233_v11, 0.0  ;;  %v3139_v5 = vunpack.c.l.b16 %v7954_v33  ;;  %v3330_v11 = vld [vmem:[#allocation2 + $0x38] sm:$0xff]  ;;  %v3088_v33 = vrot.slane %v3086_v16, 4 }
 0x204   : > { %v4451_v2 = vld [vmem:[#allocation2 + $0x18] sm:$0xff]  ;;  %3392 = vst.msk [vmem:[#allocation2 + $0x28] sm:$0xff] %vm328_vm0, %v3360_v54  ;;  %v7971_v54 = vld [vmem:[%s6448_s26 + $0xa8] sm:$0xe] }
 0x205   : > { %v4483_v52 = vadd.f32 %v4451_v2, %v7868_v55  ;;  %3770 = vst.msk [vmem:[#allocation2 + $0x20] sm:$0xff] %vm328_vm0, %v3738_v29  ;;  %v4783_v55 = vunpack.c.l.b16 %v4720_v53  ;;  %v6217_v29 = vld [vmem:[%s6448_s26 + $0xb0] sm:$0x1]  ;;  %v4172_v2 = vshrl.u32 %v6131_v58, 16  ;;  %v5912_v53 = vrot.slane %v7971_v54, 9 }
 0x206   : > { %v4972_v13 = vld [vmem:[#allocation2 + $0x10] sm:$0xff]  ;;  %v3634_v23 = vpop.f32.mrf.mxu2 }
 0x207   : > { %4515 = vst.msk [vmem:[#allocation2 + $0x18] sm:$0xff] %vm328_vm0, %v4483_v52  ;;  %v5004_v27 = vadd.f32 %v4972_v13, %v7818_v50  ;;  %v7944_v50 = vrot.slane %v4141_v19, 4  ;;  %v4804_v31 = vpack.c.b16 %v4784_v22, %v4783_v55  ;;  %v4726_v19 = vrot.slane %v6216_v20, 5 }
 0x208   : > { %v5067_v9 = vld [vmem:[#allocation2 + $0x8] sm:$0xff]  ;;  %v3258_v28 = vpop.f32.mrf.mxu1  ;;  %v4161_v13 = vrot.slane %v4159_v60, 4  ;;  %v4164_v55 = vrot.slane %v4162_v32, 5  ;;  %v7995_v22 = vrot.slane %v4168_v18, 5 }
 0x209   : > { %v7937_v38 = vpop.f32.mrf.mxu3  ;;  %v5099_v24 = vpack.c.bf16 %v5067_v9, %v5067_v9  ;;  %v5164_v46 = vsel %vm328_vm0, %v5067_v9, 0.0  ;;  %v5234_v14 = vmul.f32 %v5067_v9, %v5067_v9  ;;  %5036 = vst.msk [vmem:[#allocation2 + $0x10] sm:$0xff] %vm328_vm0, %v5004_v27  ;;  %v3361_v37 = vadd.f32 %v3329_v40, %v3258_v28 }
 0x20a   : > { %v5165_v48 = vadd.f32 %v5164_v46, %v5163_v21  ;;  %v4147_v8 = vsel %vm6552_vm5, %v7944_v50, %v7919_v26  ;;  %v4157_v26 = vsel %vm6552_vm5, %v4152_v56, %v7946_v44  ;;  %v4728_v3 = vrot.slane %v4726_v19, 4  ;;  %v6132_v50 = vld [vmem:[%s6448_s26 + $0xbc] sm:$0x1] }
 0x20b   : > { %5132 = vst.msk [vmem:[%s7915_s25 + $0x4] sm:$0xf] %vm5130_vm7, %v5099_v24  ;;  %v5266_v1 = vsel %vm328_vm0, %v5234_v14, 0.0  ;;  %v3707_v25 = vld [vmem:[#allocation2 + $0x28] sm:$0xff]  ;;  %5950 = vmatmul.msk.bf16.gmra.mxu1 %vm328_vm0, %v3157_v47  ;;  %6086 = vmatmul.msk.bf16.gmra.mxu2 %vm328_vm0, %v6352_v45  ;;  %v7968_v35 = vpop.f32.mrf.mxu0  ;;  %v4174_v21 = vrot.slane %v4172_v2, 4  ;;  %v4263_v40 = vunpack.c.l.b16 %v4147_v8  ;;  %v4264_v42 = vunpack.c.l.b16 %v4157_v26 }
 0x20c   : > { %v5267_v59 = vadd.f32 %v5266_v1, %v5265_v63  ;;  %v4452_v39 = vld [vmem:[#allocation2 + $0x20] sm:$0xff]  ;;  %v3739_v49 = vadd.f32 %v3707_v25, %v3634_v23  ;;  %3393 = vst.msk [vmem:[#allocation2 + $0x30] sm:$0xff] %vm328_vm0, %v3361_v37  ;;  %v6239_v23 = vrot.slane %v6215_v61, 9  ;;  %v5892_v14 = vld [vmem:[%s6448_s26 + $0xb0] sm:$0x1]  ;;  %v4165_v1 = vor.u32 %v4164_v55, %v4161_v13 }
 0x20d   : > { %v4484_v36 = vadd.f32 %v4452_v39, %v7902_v41  ;;  %v4175_v25 = vor.u32 %v4174_v21, %v7995_v22  ;;  %v8019_v8 = vsel %vm6560_vm6, %v5912_v53, %v3086_v16 }
 0x20e   : > { %6174 = vmatmul.msk.bf16.gmra.mxu3 %vm328_vm0, %v4282_v57  ;;  %3771 = vst.msk [vmem:[#allocation2 + $0x28] sm:$0xff] %vm328_vm0, %v3739_v49  ;;  %v4973_v43 = vld [vmem:[#allocation2 + $0x18] sm:$0xff]  ;;  %v3637_v10 = vpop.f32.mrf.mxu2  ;;  %6278 = vmatmul.msk.bf16.gmra.mxu0 %vm328_vm0, %v4804_v31  ;;  %v4727_v37 = vsel %vm6560_vm6, %v6239_v23, %v4726_v19  ;;  %v4178_v31 = vshll.u32 %v6132_v50, 16  ;;  %v3089_v49 = vrot.slane %v5892_v14, 5  ;;  %v4166_v32 = vrot.slane %v4165_v1, 4 }
 0x20f   : > { %4516 = vst.msk [vmem:[#allocation2 + $0x20] sm:$0xff] %vm328_vm0, %v4484_v36  ;;  %v5005_v41 = vadd.f32 %v4973_v43, %v7855_v30  ;;  %v4729_v30 = vrot.slane %v6217_v29, 5  ;;  %v4785_v54 = vunpack.c.l.b16 %v4727_v37  ;;  %v4176_v18 = vrot.slane %v4175_v25, 4  ;;  %v8024_v19 = vld [vmem:[%s6448_s26 + $0xb8] sm:$0xf] }
 0x210   : > { %v5068_v52 = vld [vmem:[#allocation2 + $0x10] sm:$0xff]  ;;  %v3260_v47 = vpop.f32.mrf.mxu1  ;;  %v4180_v2 = vrot.slane %v4178_v31, 5  ;;  %v8033_v53 = vsel %vm6560_vm6, %v3088_v33, %v3089_v49  ;;  %v6134_v23 = vld [vmem:[%s6448_s26 + $0xc4] sm:$0xf]  ;;  %v8061_v31 = vld [vmem:[%s6448_s26 + $0xb8] sm:$0xf] }
 0x211   : > { %v7985_v51 = vpop.f32.mrf.mxu3  ;;  %v5100_v34 = vpack.c.bf16 %v5068_v52, %v5068_v52  ;;  %v5166_v17 = vsel %vm328_vm0, %v5068_v52, 0.0  ;;  %v5235_v27 = vmul.f32 %v5068_v52, %v5068_v52  ;;  %5037 = vst.msk [vmem:[#allocation2 + $0x18] sm:$0xff] %vm328_vm0, %v5005_v41  ;;  %v3362_v45 = vadd.f32 %v3330_v11, %v3260_v47  ;;  %v6133_v52 = vld [vmem:[%s6448_s26 + $0xc0] sm:$0xf] }
 0x212   : > { %v5167_v57 = vadd.f32 %v5166_v17, %v5165_v48  ;;  %v4730_v15 = vsel %vm6560_vm6, %v4728_v3, %v4729_v30  ;;  %v3158_v48 = vpack.c.b16 %v3139_v5, %v3138_v4  ;;  %v3331_v4 = vld [vmem:[#allocation2 + $0x40] sm:$0xff]  ;;  %v4283_v5 = vpack.c.b16 %v4264_v42, %v4263_v40  ;;  %v6220_v17 = vld [vmem:[%s6448_s26 + $0xbc] sm:$0x1] }
 0x213   : > { %5133 = vst.msk [vmem:[%s7915_s25 + $0x8] sm:$0xf] %vm5130_vm7, %v5100_v34  ;;  %v5268_v9 = vsel %vm328_vm0, %v5235_v27, 0.0  ;;  %v3708_v28 = vld [vmem:[#allocation2 + $0x30] sm:$0xff]  ;;  %v8002_v46 = vpop.f32.mrf.mxu0  ;;  %v4786_v60 = vunpack.c.l.b16 %v4730_v15  ;;  %v3140_v30 = vunpack.c.l.b16 %v8019_v8  ;;  %v4733_v27 = vrot.slane %v8024_v19, 5  ;;  %v3332_v15 = vld [vmem:[#allocation2 + $0x48] sm:$0xff] }
 0x214   : > { %v5269_v44 = vadd.f32 %v5268_v9, %v5267_v59  ;;  %v3740_v24 = vadd.f32 %v3708_v28, %v3637_v10  ;;  %3394 = vst.msk [vmem:[#allocation2 + $0x38] sm:$0xff] %vm328_vm0, %v3362_v45  ;;  %v6353_v59 = vld [vmem:[%s6448_s26 + $0xa8] sm:$0xff]  ;;  %v6218_v34 = vld [vmem:[%s6448_s26 + $0xb4] sm:$0xe]  ;;  %v3141_v55 = vunpack.c.l.b16 %v8033_v53  ;;  %v4183_v21 = vshrl.u32 %v6133_v52, 16 }
 0x215   : > { %v4453_v63 = vld [vmem:[#allocation2 + $0x28] sm:$0xff]  ;;  %v4805_v16 = vpack.c.b16 %v4786_v60, %v4785_v54  ;;  %v4186_v9 = vshll.u32 %v6133_v52, 16  ;;  %v4171_v42 = vsel %vm6552_vm5, %v4166_v32, %v7995_v22  ;;  %v4181_v50 = vsel %vm6552_vm5, %v4176_v18, %v4180_v2  ;;  %v5895_v19 = vld [vmem:[%s6448_s26 + $0xbc] sm:$0x1]  ;;  %v6354_v53 = vld [vmem:[%s6448_s26 + $0xb4] sm:$0xff] }
 0x216   : > { %v4485_v56 = vadd.f32 %v4453_v63, %v7937_v38  ;;  %3772 = vst.msk [vmem:[#allocation2 + $0x30] sm:$0xff] %vm328_vm0, %v3740_v24  ;;  %v4974_v0 = vld [vmem:[#allocation2 + $0x20] sm:$0xff]  ;;  %v3639_v58 = vpop.f32.mrf.mxu2  ;;  %v6240_v63 = vrot.slane %v6218_v34, 9  ;;  %v4736_v33 = vrot.slane %v6220_v17, 5  ;;  %v4265_v25 = vunpack.c.l.b16 %v4171_v42  ;;  %v6135_v8 = vld [vmem:[%s6448_s26 + $0xc8] sm:$0x1] }
 0x217   : > { %v5006_v20 = vadd.f32 %v4974_v0, %v7889_v7  ;;  %v4266_v54 = vunpack.c.l.b16 %v4181_v50  ;;  %v3159_v2 = vpack.c.b16 %v3141_v55, %v3140_v30  ;;  %v3333_v34 = vld [vmem:[#allocation2 + $0x50] sm:$0xff]  ;;  %v3096_v55 = vrot.slane %v5895_v19, 5 }
 0x218   : > { %v5069_v36 = vld [vmem:[#allocation2 + $0x18] sm:$0xff]  ;;  %4517 = vst.msk [vmem:[#allocation2 + $0x28] sm:$0xff] %vm328_vm0, %v4485_v56  ;;  %v3263_v38 = vpop.f32.mrf.mxu1 }
 0x219   : > { %v8014_v39 = vpop.f32.mrf.mxu3  ;;  %v5101_v61 = vpack.c.bf16 %v5069_v36, %v5069_v36  ;;  %v5168_v7 = vsel %vm328_vm0, %v5069_v36, 0.0  ;;  %v5236_v29 = vmul.f32 %v5069_v36, %v5069_v36  ;;  %5038 = vst.msk [vmem:[#allocation2 + $0x20] sm:$0xff] %vm328_vm0, %v5006_v20  ;;  %v3363_v43 = vadd.f32 %v3331_v4, %v3263_v38 }
 0x21a   : > { %v5169_v10 = vadd.f32 %v5168_v7, %v5167_v57  ;;  %v4185_v20 = vrot.slane %v4183_v21, 4  ;;  %v4284_v30 = vpack.c.b16 %v4266_v54, %v4265_v25  ;;  %v6136_v21 = vld [vmem:[%s6448_s26 + $0xcc] sm:$0xf]  ;;  %v6223_v25 = vld [vmem:[%s6448_s26 + $0xc8] sm:$0x1] }
 0x21b   : > { %5134 = vst.msk [vmem:[%s7915_s25 + $0xc] sm:$0xf] %vm5130_vm7, %v5101_v61  ;;  %v5270_v41 = vsel %vm328_vm0, %v5236_v29, 0.0  ;;  %v3709_v26 = vld [vmem:[#allocation2 + $0x38] sm:$0xff]  ;;  %5951 = vmatmul.msk.bf16.gmra.mxu1 %vm328_vm0, %v3158_v48  ;;  %6087 = vmatmul.msk.bf16.gmra.mxu2 %vm328_vm0, %v6353_v59  ;;  %v8038_v13 = vpop.f32.mrf.mxu0  ;;  %v4735_v48 = vrot.slane %v4733_v27, 4  ;;  %v4734_v61 = vsel %vm6560_vm6, %v6240_v63, %v4733_v27  ;;  %v4210_v54 = vshll.u32 %v6136_v21, 16 }
 0x21c   : > { %v5271_v47 = vadd.f32 %v5270_v41, %v5269_v44  ;;  %v3741_v11 = vadd.f32 %v3709_v26, %v3639_v58  ;;  %3395 = vst.msk [vmem:[#allocation2 + $0x40] sm:$0xff] %vm328_vm0, %v3363_v43  ;;  %v4196_v44 = vshrl.u32 %v6134_v23, 16  ;;  %v5893_v43 = vld [vmem:[%s6448_s26 + $0xb4] sm:$0xe] }
 0x21d   : > { %v4454_v3 = vld [vmem:[#allocation2 + $0x30] sm:$0xff]  ;;  %v4737_v7 = vsel %vm6560_vm6, %v4735_v48, %v4736_v33  ;;  %v5913_v17 = vrot.slane %v5893_v43, 9 }
 0x21e   : > { %6175 = vmatmul.msk.bf16.gmra.mxu3 %vm328_vm0, %v4283_v5  ;;  %v4486_v45 = vadd.f32 %v4454_v3, %v7985_v51  ;;  %3773 = vst.msk [vmem:[#allocation2 + $0x38] sm:$0xff] %vm328_vm0, %v3741_v11  ;;  %v3642_v57 = vpop.f32.mrf.mxu2  ;;  %6279 = vmatmul.msk.bf16.gmra.mxu0 %vm328_vm0, %v4805_v16  ;;  %v4192_v51 = vshll.u32 %v6134_v23, 16  ;;  %v4198_v36 = vrot.slane %v4196_v44, 4  ;;  %v4787_v11 = vunpack.c.l.b16 %v4734_v61 }
 0x21f   : > { %v4975_v28 = vld [vmem:[#allocation2 + $0x28] sm:$0xff]  ;;  %v4788_v23 = vunpack.c.l.b16 %v4737_v7 }
 0x220   : > { %v5070_v24 = vld [vmem:[#allocation2 + $0x20] sm:$0xff]  ;;  %4518 = vst.msk [vmem:[#allocation2 + $0x30] sm:$0xff] %vm328_vm0, %v4486_v45  ;;  %v5007_v14 = vadd.f32 %v4975_v28, %v7925_v62  ;;  %v3265_v37 = vpop.f32.mrf.mxu1  ;;  %v4188_v62 = vrot.slane %v4186_v9, 5  ;;  %v8066_v60 = vrot.slane %v4192_v51, 5 }
 0x221   : > { %v8048_v40 = vpop.f32.mrf.mxu3  ;;  %v5102_v22 = vpack.c.bf16 %v5070_v24, %v5070_v24  ;;  %v5170_v56 = vsel %vm328_vm0, %v5070_v24, 0.0  ;;  %v5237_v0 = vmul.f32 %v5070_v24, %v5070_v24  ;;  %v3364_v58 = vadd.f32 %v3332_v15, %v3265_v37  ;;  %v8091_v51 = vld [vmem:[%s6448_s26 + $0xc4] sm:$0xf] }
 0x222   : > { %v5171_v1 = vadd.f32 %v5170_v56, %v5169_v10  ;;  %5039 = vst.msk [vmem:[#allocation2 + $0x28] sm:$0xff] %vm328_vm0, %v5007_v14  ;;  %v3093_v10 = vrot.slane %v8061_v31, 5  ;;  %v4189_v41 = vor.u32 %v4188_v62, %v4185_v20  ;;  %v4199_v52 = vor.u32 %v4198_v36, %v8066_v60 }
 0x223   : > { %5135 = vst.msk [vmem:[%s7915_s25 + $0x10] sm:$0xf] %vm5130_vm7, %v5102_v22  ;;  %v5272_v59 = vsel %vm328_vm0, %v5237_v0, 0.0  ;;  %v3710_v49 = vld [vmem:[#allocation2 + $0x40] sm:$0xff]  ;;  %v8069_v5 = vpop.f32.mrf.mxu0  ;;  %v4806_v37 = vpack.c.b16 %v4788_v23, %v4787_v11  ;;  %v6137_v22 = vld [vmem:[%s6448_s26 + $0xd0] sm:$0xf] }
 0x224   : > { %v5273_v38 = vadd.f32 %v5272_v59, %v5271_v47  ;;  %v3742_v4 = vadd.f32 %v3710_v49, %v3642_v57  ;;  %3396 = vst.msk [vmem:[#allocation2 + $0x48] sm:$0xff] %vm328_vm0, %v3364_v58  ;;  %v4202_v47 = vshll.u32 %v6135_v8, 16  ;;  %v3095_v57 = vrot.slane %v3093_v10, 4  ;;  %v8130_v11 = vld [vmem:[%s6448_s26 + $0xc4] sm:$0xf] }
 0x225   : > { %v4455_v29 = vld [vmem:[#allocation2 + $0x38] sm:$0xff]  ;;  %v4190_v50 = vrot.slane %v4189_v41, 4  ;;  %v4200_v24 = vrot.slane %v4199_v52, 4  ;;  %v8102_v48 = vsel %vm6560_vm6, %v5913_v17, %v3093_v10  ;;  %v4207_v56 = vshrl.u32 %v6136_v21, 16 }
 0x226   : > { %v4487_v32 = vadd.f32 %v4455_v29, %v8014_v39  ;;  %3774 = vst.msk [vmem:[#allocation2 + $0x40] sm:$0xff] %vm328_vm0, %v3742_v4  ;;  %v3644_v18 = vpop.f32.mrf.mxu2  ;;  %v4204_v14 = vrot.slane %v4202_v47, 5  ;;  %v4740_v31 = vrot.slane %v8091_v51, 5  ;;  %v3097_v59 = vsel %vm6560_vm6, %v3095_v57, %v3096_v55 }
 0x227   : > { %v4976_v26 = vld [vmem:[#allocation2 + $0x30] sm:$0xff]  ;;  %v4195_v49 = vsel %vm6552_vm5, %v4190_v50, %v8066_v60  ;;  %v3142_v4 = vunpack.c.l.b16 %v8102_v48  ;;  %v4220_v61 = vshrl.u32 %v6137_v22, 16  ;;  %v3334_v60 = vld [vmem:[#allocation2 + $0x58] sm:$0xff]  ;;  %v3143_v19 = vunpack.c.l.b16 %v3097_v59 }
 0x228   : > { %4519 = vst.msk [vmem:[#allocation2 + $0x38] sm:$0xff] %vm328_vm0, %v4487_v32  ;;  %v5008_v39 = vadd.f32 %v4976_v26, %v7968_v35  ;;  %v3268_v3 = vpop.f32.mrf.mxu1  ;;  %v4205_v8 = vsel %vm6552_vm5, %v4200_v24, %v4204_v14  ;;  %v4742_v10 = vrot.slane %v4740_v31, 4  ;;  %v4743_v32 = vrot.slane %v6223_v25, 5 }
 0x229   : > { %v8082_v16 = vpop.f32.mrf.mxu3  ;;  %v5071_v27 = vld [vmem:[#allocation2 + $0x28] sm:$0xff]  ;;  %v3365_v45 = vadd.f32 %v3333_v34, %v3268_v3  ;;  %v8125_v41 = vunpack.c.l.b16 %v4195_v49  ;;  %v4209_v26 = vrot.slane %v4207_v56, 4  ;;  %v4212_v23 = vrot.slane %v4210_v54, 5  ;;  %v6225_v54 = vld [vmem:[%s6448_s26 + $0xd0] sm:$0xf] }
 0x22a   : > { %v5103_v9 = vpack.c.bf16 %v5071_v27, %v5071_v27  ;;  %v5172_v28 = vsel %vm328_vm0, %v5071_v27, 0.0  ;;  %v5238_v42 = vmul.f32 %v5071_v27, %v5071_v27  ;;  %5040 = vst.msk [vmem:[#allocation2 + $0x30] sm:$0xff] %vm328_vm0, %v5008_v39  ;;  %v4268_v34 = vunpack.c.l.b16 %v4205_v8 }
 0x22b   : > { %v5173_v35 = vadd.f32 %v5172_v28, %v5171_v1  ;;  %v3711_v44 = vld [vmem:[#allocation2 + $0x48] sm:$0xff]  ;;  %3397 = vst.msk [vmem:[#allocation2 + $0x50] sm:$0xff] %vm328_vm0, %v3365_v45  ;;  %5952 = vmatmul.msk.bf16.gmra.mxu1 %vm328_vm0, %v3159_v2  ;;  %6088 = vmatmul.msk.bf16.gmra.mxu2 %vm328_vm0, %v6354_v53  ;;  %v8104_v33 = vpop.f32.mrf.mxu0  ;;  %v6221_v1 = vld [vmem:[%s6448_s26 + $0xc0] sm:$0xe]  ;;  %v4222_v45 = vrot.slane %v4220_v61, 4  ;;  %v4744_v55 = vsel %vm6560_vm6, %v4742_v10, %v4743_v32 }
 0x22c   : > { %5136 = vst.msk [vmem:[%s7915_s25 + $0x14] sm:$0xf] %vm5130_vm7, %v5103_v9  ;;  %v5274_v15 = vsel %vm328_vm0, %v5238_v42, 0.0  ;;  %v3743_v63 = vadd.f32 %v3711_v44, %v3644_v18  ;;  %v6241_v43 = vrot.slane %v6221_v1, 9  ;;  %v5896_v28 = vld [vmem:[%s6448_s26 + $0xc0] sm:$0xe]  ;;  %v4213_v24 = vor.u32 %v4212_v23, %v4209_v26 }
 0x22d   : > { %v5275_v0 = vadd.f32 %v5274_v15, %v5273_v38  ;;  %v4456_v58 = vld [vmem:[#allocation2 + $0x40] sm:$0xff]  ;;  %v3100_v42 = vrot.slane %v8130_v11, 5  ;;  %v6138_v44 = vld [vmem:[%s6448_s26 + $0xd4] sm:$0x1]  ;;  %v5914_v1 = vrot.slane %v5896_v28, 9 }
 0x22e   : > { %6176 = vmatmul.msk.bf16.gmra.mxu3 %vm328_vm0, %v4284_v30  ;;  %v4488_v20 = vadd.f32 %v4456_v58, %v8048_v40  ;;  %3775 = vst.msk [vmem:[#allocation2 + $0x48] sm:$0xff] %vm328_vm0, %v3743_v63  ;;  %v3647_v62 = vpop.f32.mrf.mxu2  ;;  %6280 = vmatmul.msk.bf16.gmra.mxu0 %vm328_vm0, %v4806_v37  ;;  %v4216_v40 = vshll.u32 %v6137_v22, 16  ;;  %v4741_v57 = vsel %vm6560_vm6, %v6241_v43, %v4740_v31  ;;  %v6355_v15 = vld [vmem:[%s6448_s26 + $0xc0] sm:$0xff]  ;;  %v4790_v22 = vunpack.c.l.b16 %v4744_v55  ;;  %v6224_v26 = vld [vmem:[%s6448_s26 + $0xcc] sm:$0xe] }
 0x22f   : > { %v4977_v36 = vld [vmem:[#allocation2 + $0x38] sm:$0xff]  ;;  %v3160_v37 = vpack.c.b16 %v3143_v19, %v3142_v4  ;;  %v4789_v48 = vunpack.c.l.b16 %v4741_v57  ;;  %v3335_v58 = vld [vmem:[#allocation2 + $0x60] sm:$0xff]  ;;  %v4226_v49 = vshll.u32 %v6138_v44, 16  ;;  %v3101_v11 = vsel %vm6560_vm6, %v5914_v1, %v3100_v42 }
 0x230   : > { %4520 = vst.msk [vmem:[#allocation2 + $0x40] sm:$0xff] %vm328_vm0, %v4488_v20  ;;  %v5009_v7 = vadd.f32 %v4977_v36, %v8002_v46  ;;  %v3270_v29 = vpop.f32.mrf.mxu1  ;;  %v8133_v30 = vrot.slane %v4216_v40, 5  ;;  %v4214_v40 = vrot.slane %v4213_v24, 4 }
 0x231   : > { %v8117_v38 = vpop.f32.mrf.mxu3  ;;  %v5072_v18 = vld [vmem:[#allocation2 + $0x30] sm:$0xff]  ;;  %v3366_v2 = vadd.f32 %v3334_v60, %v3270_v29  ;;  %v4807_v29 = vpack.c.b16 %v4790_v22, %v4789_v48 }
 0x232   : > { %v5104_v53 = vpack.c.bf16 %v5072_v18, %v5072_v18  ;;  %v5174_v52 = vsel %vm328_vm0, %v5072_v18, 0.0  ;;  %v5239_v47 = vmul.f32 %v5072_v18, %v5072_v18  ;;  %5041 = vst.msk [vmem:[#allocation2 + $0x38] sm:$0xff] %vm328_vm0, %v5009_v7  ;;  %v3712_v46 = vld [vmem:[#allocation2 + $0x50] sm:$0xff]  ;;  %v4223_v25 = vor.u32 %v4222_v45, %v8133_v30 }
 0x233   : > { %v5175_v39 = vadd.f32 %v5174_v52, %v5173_v35  ;;  %v3744_v3 = vadd.f32 %v3712_v46, %v3647_v62  ;;  %3398 = vst.msk [vmem:[#allocation2 + $0x58] sm:$0xff] %vm328_vm0, %v3366_v2  ;;  %v8138_v27 = vpop.f32.mrf.mxu0  ;;  %v5898_v35 = vld [vmem:[%s6448_s26 + $0xc8] sm:$0x1]  ;;  %v3102_v62 = vrot.slane %v3100_v42, 4  ;;  %v4747_v18 = vrot.slane %v6225_v54, 5 }
 0x234   : > { %5137 = vst.msk [vmem:[%s7915_s25 + $0x18] sm:$0xf] %vm5130_vm7, %v5104_v53  ;;  %v5276_v17 = vsel %vm328_vm0, %v5239_v47, 0.0  ;;  %v3103_v59 = vrot.slane %v5898_v35, 5  ;;  %v4224_v32 = vrot.slane %v4223_v25, 4 }
 0x235   : > { %v5277_v21 = vadd.f32 %v5276_v17, %v5275_v0  ;;  %v4457_v9 = vld [vmem:[#allocation2 + $0x48] sm:$0xff]  ;;  %3776 = vst.msk [vmem:[#allocation2 + $0x50] sm:$0xff] %vm328_vm0, %v3744_v3  ;;  %v6226_v53 = vld [vmem:[%s6448_s26 + $0xd4] sm:$0x1]  ;;  %v6242_v17 = vrot.slane %v6224_v26, 9  ;;  %v4749_v45 = vrot.slane %v4747_v18, 4 }
 0x236   : > { %v4489_v50 = vadd.f32 %v4457_v9, %v8082_v16  ;;  %v3649_v51 = vpop.f32.mrf.mxu2  ;;  %v4285_v16 = vpack.c.b16 %v4268_v34, %v8125_v41  ;;  %v4228_v41 = vrot.slane %v4226_v49, 5  ;;  %v3104_v23 = vsel %vm6560_vm6, %v3102_v62, %v3103_v59  ;;  %v3336_v34 = vld [vmem:[#allocation2 + $0x68] sm:$0xff] }
 0x237   : > { %v4978_v14 = vld [vmem:[#allocation2 + $0x40] sm:$0xff]  ;;  %v4750_v57 = vrot.slane %v6226_v53, 5  ;;  %v3145_v44 = vunpack.c.l.b16 %v3104_v23  ;;  %v4748_v48 = vsel %vm6560_vm6, %v6242_v17, %v4747_v18 }
 0x238   : > { %4521 = vst.msk [vmem:[#allocation2 + $0x48] sm:$0xff] %vm328_vm0, %v4489_v50  ;;  %v5010_v56 = vadd.f32 %v4978_v14, %v8038_v13  ;;  %v3273_v0 = vpop.f32.mrf.mxu1  ;;  %v4229_v9 = vsel %vm6552_vm5, %v4224_v32, %v4228_v41  ;;  %v4791_v62 = vunpack.c.l.b16 %v4748_v48 }
 0x239   : > { %v8151_v63 = vpop.f32.mrf.mxu3  ;;  %v5073_v31 = vld [vmem:[#allocation2 + $0x38] sm:$0xff]  ;;  %v3367_v20 = vadd.f32 %v3335_v58, %v3273_v0  ;;  %v4751_v22 = vsel %vm6560_vm6, %v4749_v45, %v4750_v57 }
 0x23a   : > { %v5105_v36 = vpack.c.bf16 %v5073_v31, %v5073_v31  ;;  %v5176_v4 = vsel %vm328_vm0, %v5073_v31, 0.0  ;;  %v5240_v8 = vmul.f32 %v5073_v31, %v5073_v31  ;;  %5042 = vst.msk [vmem:[#allocation2 + $0x40] sm:$0xff] %vm328_vm0, %v5010_v56  ;;  %v3713_v13 = vld [vmem:[#allocation2 + $0x58] sm:$0xff]  ;;  %v6356_v31 = vld [vmem:[%s6448_s26 + $0xcc] sm:$0xff]  ;;  %v4792_v59 = vunpack.c.l.b16 %v4751_v22  ;;  %s5434_s26 = sshll.u32 %s6436_s18, 1 }
 0x23b   : > { %v5177_v61 = vadd.f32 %v5176_v4, %v5175_v39  ;;  %v3745_v7 = vadd.f32 %v3713_v13, %v3649_v51  ;;  %3399 = vst.msk [vmem:[#allocation2 + $0x60] sm:$0xff] %vm328_vm0, %v3367_v20  ;;  %5953 = vmatmul.msk.bf16.gmra.mxu1 %vm328_vm0, %v3160_v37  ;;  %6089 = vmatmul.msk.bf16.gmra.mxu2 %vm328_vm0, %v6355_v15  ;;  %v8167_v10 = vpop.f32.mrf.mxu0  ;;  %v3144_v51 = vunpack.c.l.b16 %v3101_v11  ;;  %v4270_v37 = vunpack.c.l.b16 %v4229_v9  ;;  %s182_s29 = scalar_lea.vmem %s8465_s3, %s5434_s26 }
 0x23c   : > { %5138 = vst.msk [vmem:[%s7915_s25 + $0x1c] sm:$0xf] %vm5130_vm7, %v5105_v36  ;;  %v5278_v60 = vsel %vm328_vm0, %v5240_v8, 0.0  ;;  %v4458_v43 = vld [vmem:[#allocation2 + $0x50] sm:$0xff] }
 0x23d   : > { %v5279_v2 = vadd.f32 %v5278_v60, %v5277_v21  ;;  %v4490_v19 = vadd.f32 %v4458_v43, %v8117_v38  ;;  %3777 = vst.msk [vmem:[#allocation2 + $0x58] sm:$0xff] %vm328_vm0, %v3745_v7  ;;  %v4219_v38 = vsel %vm6552_vm5, %v4214_v40, %v8133_v30  ;;  %v3161_v25 = vpack.c.b16 %v3145_v44, %v3144_v51  ;;  %v3339_v51 = vld [vmem:[#allocation2 + $0x80] sm:$0xff] }
 0x23e   : > { %6177 = vmatmul.msk.bf16.gmra.mxu3 %vm328_vm0, %v4285_v16  ;;  %v3652_v52 = vpop.f32.mrf.mxu2  ;;  %6281 = vmatmul.msk.bf16.gmra.mxu0 %vm328_vm0, %v4807_v29  ;;  %v4269_v24 = vunpack.c.l.b16 %v4219_v38  ;;  %v4808_v7 = vpack.c.b16 %v4792_v59, %v4791_v62  ;;  %v3340_v62 = vld [vmem:[#allocation2 + $0x88] sm:$0xff] }
 0x23f   : > { %4522 = vst.msk [vmem:[#allocation2 + $0x50] sm:$0xff] %vm328_vm0, %v4490_v19  ;;  %v4979_v47 = vld [vmem:[#allocation2 + $0x48] sm:$0xff] }
 0x240   : > { %v5011_v39 = vadd.f32 %v4979_v47, %v8069_v5  ;;  %v3275_v3 = vpop.f32.mrf.mxu1  ;;  %v4286_v54 = vpack.c.b16 %v4270_v37, %v4269_v24  ;;  %v3338_v47 = vld [vmem:[#allocation2 + $0x78] sm:$0xff] }
 0x241   : > { %v8174_v46 = vpop.f32.mrf.mxu3  ;;  %v5074_v55 = vld [vmem:[#allocation2 + $0x40] sm:$0xff]  ;;  %v3368_v21 = vadd.f32 %v3336_v34, %v3275_v3 }
 0x242   : > { %v5106_v28 = vpack.c.bf16 %v5074_v55, %v5074_v55  ;;  %v5178_v42 = vsel %vm328_vm0, %v5074_v55, 0.0  ;;  %v5241_v50 = vmul.f32 %v5074_v55, %v5074_v55  ;;  %5043 = vst.msk [vmem:[#allocation2 + $0x48] sm:$0xff] %vm328_vm0, %v5011_v39  ;;  %v3714_v30 = vld [vmem:[#allocation2 + $0x60] sm:$0xff] }
 0x243   : > { %v5179_v5 = vadd.f32 %v5178_v42, %v5177_v61  ;;  %v3746_v35 = vadd.f32 %v3714_v30, %v3652_v52  ;;  %3400 = vst.msk [vmem:[#allocation2 + $0x68] sm:$0xff] %vm328_vm0, %v3368_v21  ;;  %v8193_v15 = vpop.f32.mrf.mxu0 }
 0x244   : > { %5139 = vst.msk [vmem:[%s7915_s25 + $0x20] sm:$0xf] %vm5130_vm7, %v5106_v28  ;;  %v5280_v6 = vsel %vm328_vm0, %v5241_v50, 0.0  ;;  %v4459_v14 = vld [vmem:[#allocation2 + $0x58] sm:$0xff] }
 0x245   : > { %v5281_v56 = vadd.f32 %v5280_v6, %v5279_v2  ;;  %v4491_v0 = vadd.f32 %v4459_v14, %v8151_v63  ;;  %3778 = vst.msk [vmem:[#allocation2 + $0x60] sm:$0xff] %vm328_vm0, %v3746_v35 }
 0x246   : > { %v4980_v58 = vld [vmem:[#allocation2 + $0x50] sm:$0xff]  ;;  %v3654_v16 = vpop.f32.mrf.mxu2 }
 0x247   : > { %4523 = vst.msk [vmem:[#allocation2 + $0x58] sm:$0xff] %vm328_vm0, %v4491_v0  ;;  %v5012_v1 = vadd.f32 %v4980_v58, %v8104_v33 }
 0x248   : > { %v3278_v49 = vpop.f32.mrf.mxu1 }
 0x249   : > { %v4400_v20 = vpop.f32.mrf.mxu3  ;;  %v5075_v36 = vld [vmem:[#allocation2 + $0x48] sm:$0xff]  ;;  %5044 = vst.msk [vmem:[#allocation2 + $0x50] sm:$0xff] %vm328_vm0, %v5012_v1  ;;  %v3369_v63 = vadd.f32 %v3337_v12, %v3278_v49 }
 0x24a   : > { %v5107_v4 = vpack.c.bf16 %v5075_v36, %v5075_v36  ;;  %v5180_v8 = vsel %vm328_vm0, %v5075_v36, 0.0  ;;  %v5242_v13 = vmul.f32 %v5075_v36, %v5075_v36  ;;  %v3715_v40 = vld [vmem:[#allocation2 + $0x68] sm:$0xff] }
 0x24b   : > { %v5181_v61 = vadd.f32 %v5180_v8, %v5179_v5  ;;  %v3747_v33 = vadd.f32 %v3715_v40, %v3654_v16  ;;  %3401 = vst.msk [vmem:[#allocation2 + $0x70] sm:$0xff] %vm328_vm0, %v3369_v63  ;;  %5954 = vmatmul.msk.bf16.gmra.mxu1 %vm328_vm0, %v3161_v25  ;;  %6090 = vmatmul.msk.bf16.gmra.mxu2 %vm328_vm0, %v6356_v31  ;;  %v8213_v43 = vpop.f32.mrf.mxu0 }
 0x24c   : > { %5140 = vst.msk [vmem:[%s7915_s25 + $0x24] sm:$0xf] %vm5130_vm7, %v5107_v4  ;;  %v5282_v29 = vsel %vm328_vm0, %v5242_v13, 0.0  ;;  %v4460_v60 = vld [vmem:[#allocation2 + $0x60] sm:$0xff] }
 0x24d   : > { %v5283_v32 = vadd.f32 %v5282_v29, %v5281_v56  ;;  %v4492_v18 = vadd.f32 %v4460_v60, %v8174_v46  ;;  %3779 = vst.msk [vmem:[#allocation2 + $0x68] sm:$0xff] %vm328_vm0, %v3747_v33 }
 0x24e   : > { %6178 = vmatmul.msk.bf16.gmra.mxu3 %vm328_vm0, %v4286_v54  ;;  %v4981_v2 = vld [vmem:[#allocation2 + $0x58] sm:$0xff]  ;;  %v3657_v19 = vpop.f32.mrf.mxu2  ;;  %6282 = vmatmul.msk.bf16.gmra.mxu0 %vm328_vm0, %v4808_v7 }
 0x24f   : > { %4524 = vst.msk [vmem:[#allocation2 + $0x60] sm:$0xff] %vm328_vm0, %v4492_v18  ;;  %v5013_v41 = vadd.f32 %v4981_v2, %v8138_v27  ;;  %v3341_v2 = vld [vmem:[#allocation2 + $0x90] sm:$0xff] }
 0x250   : > { %v5076_v53 = vld [vmem:[#allocation2 + $0x50] sm:$0xff]  ;;  %v3280_v52 = vpop.f32.mrf.mxu1 }
 0x251   : > { %v4403_v26 = vpop.f32.mrf.mxu3  ;;  %v5108_v11 = vpack.c.bf16 %v5076_v53, %v5076_v53  ;;  %v5182_v23 = vsel %vm328_vm0, %v5076_v53, 0.0  ;;  %v5243_v38 = vmul.f32 %v5076_v53, %v5076_v53  ;;  %5045 = vst.msk [vmem:[#allocation2 + $0x58] sm:$0xff] %vm328_vm0, %v5013_v41  ;;  %v3370_v46 = vadd.f32 %v3338_v47, %v3280_v52 }
 0x252   : > { %v5183_v39 = vadd.f32 %v5182_v23, %v5181_v61  ;;  %v3716_v3 = vld [vmem:[#allocation2 + $0x70] sm:$0xff] }
 0x253   : > { %5141 = vst.msk [vmem:[%s7915_s25 + $0x28] sm:$0xf] %vm5130_vm7, %v5108_v11  ;;  %v5284_v34 = vsel %vm328_vm0, %v5243_v38, 0.0  ;;  %v3748_v27 = vadd.f32 %v3716_v3, %v3657_v19  ;;  %v8226_v57 = vpop.f32.mrf.mxu0 }
 0x254   : > { %v5285_v17 = vadd.f32 %v5284_v34, %v5283_v32  ;;  %v4461_v45 = vld [vmem:[#allocation2 + $0x68] sm:$0xff]  ;;  %3402 = vst.msk [vmem:[#allocation2 + $0x78] sm:$0xff] %vm328_vm0, %v3370_v46 }
 0x255   : > { %v4493_v55 = vadd.f32 %v4461_v45, %v4400_v20  ;;  %3780 = vst.msk [vmem:[#allocation2 + $0x70] sm:$0xff] %vm328_vm0, %v3748_v27 }
 0x256   : > { %v4982_v21 = vld [vmem:[#allocation2 + $0x60] sm:$0xff]  ;;  %v3659_v9 = vpop.f32.mrf.mxu2 }
 0x257   : > { %4525 = vst.msk [vmem:[#allocation2 + $0x68] sm:$0xff] %vm328_vm0, %v4493_v55  ;;  %v5014_v28 = vadd.f32 %v4982_v21, %v8167_v10  ;;  %v3342_v21 = vld [vmem:[#allocation2 + $0x98] sm:$0xff] }
 0x258   : > { %v5077_v50 = vld [vmem:[#allocation2 + $0x58] sm:$0xff]  ;;  %v3283_v30 = vpop.f32.mrf.mxu1 }
 0x259   : > { %v4405_v42 = vpop.f32.mrf.mxu3  ;;  %v5109_v5 = vpack.c.bf16 %v5077_v50, %v5077_v50  ;;  %v5184_v35 = vsel %vm328_vm0, %v5077_v50, 0.0  ;;  %v5244_v44 = vmul.f32 %v5077_v50, %v5077_v50  ;;  %5046 = vst.msk [vmem:[#allocation2 + $0x60] sm:$0xff] %vm328_vm0, %v5014_v28  ;;  %v3371_v24 = vadd.f32 %v3339_v51, %v3283_v30 }
 0x25a   : > { %v5185_v6 = vadd.f32 %v5184_v35, %v5183_v39 }
 0x25b   : > { %5142 = vst.msk [vmem:[%s7915_s25 + $0x2c] sm:$0xf] %vm5130_vm7, %v5109_v5  ;;  %v5286_v14 = vsel %vm328_vm0, %v5244_v44, 0.0  ;;  %v3717_v37 = vld [vmem:[#allocation2 + $0x78] sm:$0xff]  ;;  %v8237_v56 = vpop.f32.mrf.mxu0 }
 0x25c   : > { %v5287_v48 = vadd.f32 %v5286_v14, %v5285_v17  ;;  %v4462_v22 = vld [vmem:[#allocation2 + $0x70] sm:$0xff]  ;;  %v3749_v10 = vadd.f32 %v3717_v37, %v3659_v9  ;;  %3403 = vst.msk [vmem:[#allocation2 + $0x80] sm:$0xff] %vm328_vm0, %v3371_v24 }
 0x25d   : > { %v4494_v0 = vadd.f32 %v4462_v22, %v4403_v26 }
 0x25e   : > { %3781 = vst.msk [vmem:[#allocation2 + $0x78] sm:$0xff] %vm328_vm0, %v3749_v10  ;;  %v4983_v58 = vld [vmem:[#allocation2 + $0x68] sm:$0xff]  ;;  %v3662_v16 = vpop.f32.mrf.mxu2 }
 0x25f   : > { %4526 = vst.msk [vmem:[#allocation2 + $0x70] sm:$0xff] %vm328_vm0, %v4494_v0  ;;  %v5015_v1 = vadd.f32 %v4983_v58, %v8193_v15  ;;  %v3343_v0 = vld [vmem:[#allocation2 + $0xa0] sm:$0xff] }
 0x260   : > { %v5078_v31 = vld [vmem:[#allocation2 + $0x60] sm:$0xff]  ;;  %v3285_v20 = vpop.f32.mrf.mxu1 }
 0x261   : > { %v4408_v25 = vpop.f32.mrf.mxu3  ;;  %v5110_v59 = vpack.c.bf16 %v5078_v31, %v5078_v31  ;;  %v5186_v49 = vsel %vm328_vm0, %v5078_v31, 0.0  ;;  %v5245_v12 = vmul.f32 %v5078_v31, %v5078_v31  ;;  %5047 = vst.msk [vmem:[#allocation2 + $0x68] sm:$0xff] %vm328_vm0, %v5015_v1  ;;  %v3372_v54 = vadd.f32 %v3340_v62, %v3285_v20 }
 0x262   : > { %v5187_v36 = vadd.f32 %v5186_v49, %v5185_v6 }
 0x263   : > { %5143 = vst.msk [vmem:[%s7915_s25 + $0x30] sm:$0xf] %vm5130_vm7, %v5110_v59  ;;  %v5288_v63 = vsel %vm328_vm0, %v5245_v12, 0.0  ;;  %v3718_v4 = vld [vmem:[#allocation2 + $0x80] sm:$0xff]  ;;  %v8248_v15 = vpop.f32.mrf.mxu0 }
 0x264   : > { %v5289_v8 = vadd.f32 %v5288_v63, %v5287_v48  ;;  %v3750_v13 = vadd.f32 %v3718_v4, %v3662_v16  ;;  %3404 = vst.msk [vmem:[#allocation2 + $0x88] sm:$0xff] %vm328_vm0, %v3372_v54 }
 0x265   : > { %v4463_v40 = vld [vmem:[#allocation2 + $0x78] sm:$0xff] }
 0x266   : > { %v4495_v61 = vadd.f32 %v4463_v40, %v4405_v42  ;;  %3782 = vst.msk [vmem:[#allocation2 + $0x80] sm:$0xff] %vm328_vm0, %v3750_v13  ;;  %v4984_v33 = vld [vmem:[#allocation2 + $0x70] sm:$0xff]  ;;  %v3664_v7 = vpop.f32.mrf.mxu2 }
 0x267   : > { %v5016_v29 = vadd.f32 %v4984_v33, %v8213_v43 }
 0x268   : > { %v5079_v32 = vld [vmem:[#allocation2 + $0x68] sm:$0xff]  ;;  %4527 = vst.msk [vmem:[#allocation2 + $0x78] sm:$0xff] %vm328_vm0, %v4495_v61  ;;  %v3288_v18 = vpop.f32.mrf.mxu1 }
 0x269   : > { %v4410_v60 = vpop.f32.mrf.mxu3  ;;  %v5111_v19 = vpack.c.bf16 %v5079_v32, %v5079_v32  ;;  %v5188_v41 = vsel %vm328_vm0, %v5079_v32, 0.0  ;;  %v5246_v26 = vmul.f32 %v5079_v32, %v5079_v32  ;;  %5048 = vst.msk [vmem:[#allocation2 + $0x70] sm:$0xff] %vm328_vm0, %v5016_v29  ;;  %v3373_v53 = vadd.f32 %v3341_v2, %v3288_v18  ;;  %v3344_v61 = vld [vmem:[#allocation2 + $0xa8] sm:$0xff] }
 0x26a   : > { %v5189_v52 = vadd.f32 %v5188_v41, %v5187_v36 }
 0x26b   : > { %5144 = vst.msk [vmem:[%s7915_s25 + $0x34] sm:$0xf] %vm5130_vm7, %v5111_v19  ;;  %v5290_v47 = vsel %vm328_vm0, %v5246_v26, 0.0  ;;  %v3719_v11 = vld [vmem:[#allocation2 + $0x88] sm:$0xff]  ;;  %v8259_v38 = vpop.f32.mrf.mxu0 }
 0x26c   : > { %v5291_v43 = vadd.f32 %v5290_v47, %v5289_v8  ;;  %v3751_v23 = vadd.f32 %v3719_v11, %v3664_v7  ;;  %3405 = vst.msk [vmem:[#allocation2 + $0x90] sm:$0xff] %vm328_vm0, %v3373_v53 }
 0x26d   : > { %v4464_v46 = vld [vmem:[#allocation2 + $0x80] sm:$0xff] }
 0x26e   : > { %v4496_v39 = vadd.f32 %v4464_v46, %v4408_v25  ;;  %3783 = vst.msk [vmem:[#allocation2 + $0x88] sm:$0xff] %vm328_vm0, %v3751_v23  ;;  %v3667_v3 = vpop.f32.mrf.mxu2  ;;  %v3345_v46 = vld [vmem:[#allocation2 + $0xb0] sm:$0xff] }
 0x26f   : > { %v4985_v34 = vld [vmem:[#allocation2 + $0x78] sm:$0xff] }
 0x270   : > { %v5080_v17 = vld [vmem:[#allocation2 + $0x70] sm:$0xff]  ;;  %4528 = vst.msk [vmem:[#allocation2 + $0x80] sm:$0xff] %vm328_vm0, %v4496_v39  ;;  %v5017_v45 = vadd.f32 %v4985_v34, %v8226_v57  ;;  %v3290_v55 = vpop.f32.mrf.mxu1 }
 0x271   : > { %v4413_v27 = vpop.f32.mrf.mxu3  ;;  %v5112_v9 = vpack.c.bf16 %v5080_v17, %v5080_v17  ;;  %v5190_v28 = vsel %vm328_vm0, %v5080_v17, 0.0  ;;  %v5247_v42 = vmul.f32 %v5080_v17, %v5080_v17  ;;  %v3374_v50 = vadd.f32 %v3342_v21, %v3290_v55 }
 0x272   : > { %v5191_v30 = vadd.f32 %v5190_v28, %v5189_v52  ;;  %5049 = vst.msk [vmem:[#allocation2 + $0x78] sm:$0xff] %vm328_vm0, %v5017_v45 }
 0x273   : > { %5145 = vst.msk [vmem:[%s7915_s25 + $0x38] sm:$0xf] %vm5130_vm7, %v5112_v9  ;;  %v5292_v51 = vsel %vm328_vm0, %v5247_v42, 0.0  ;;  %v3720_v5 = vld [vmem:[#allocation2 + $0x90] sm:$0xff]  ;;  %v8270_v24 = vpop.f32.mrf.mxu0 }
 0x274   : > { %v5293_v35 = vadd.f32 %v5292_v51, %v5291_v43  ;;  %v3752_v44 = vadd.f32 %v3720_v5, %v3667_v3  ;;  %3406 = vst.msk [vmem:[#allocation2 + $0x98] sm:$0xff] %vm328_vm0, %v3374_v50 }
 0x275   : > { %v4465_v57 = vld [vmem:[#allocation2 + $0x88] sm:$0xff] }
 0x276   : > { %v4497_v6 = vadd.f32 %v4465_v57, %v4410_v60  ;;  %3784 = vst.msk [vmem:[#allocation2 + $0x90] sm:$0xff] %vm328_vm0, %v3752_v44  ;;  %v3669_v14 = vpop.f32.mrf.mxu2  ;;  %v3346_v57 = vld [vmem:[#allocation2 + $0xb8] sm:$0xff] }
 0x277   : > { %v4986_v37 = vld [vmem:[#allocation2 + $0x80] sm:$0xff] }
 0x278   : > { %4529 = vst.msk [vmem:[#allocation2 + $0x88] sm:$0xff] %vm328_vm0, %v4497_v6  ;;  %v5018_v22 = vadd.f32 %v4986_v37, %v8237_v56  ;;  %v3293_v10 = vpop.f32.mrf.mxu1 }
 0x279   : > { %v4415_v48 = vpop.f32.mrf.mxu3  ;;  %v5081_v58 = vld [vmem:[#allocation2 + $0x78] sm:$0xff]  ;;  %v3375_v16 = vadd.f32 %v3343_v0, %v3293_v10 }
 0x27a   : > { %v5113_v1 = vpack.c.bf16 %v5081_v58, %v5081_v58  ;;  %v5192_v25 = vsel %vm328_vm0, %v5081_v58, 0.0  ;;  %v5248_v31 = vmul.f32 %v5081_v58, %v5081_v58  ;;  %5050 = vst.msk [vmem:[#allocation2 + $0x80] sm:$0xff] %vm328_vm0, %v5018_v22 }
 0x27b   : > { %v5193_v20 = vadd.f32 %v5192_v25, %v5191_v30  ;;  %v3721_v62 = vld [vmem:[#allocation2 + $0x98] sm:$0xff]  ;;  %3407 = vst.msk [vmem:[#allocation2 + $0xa0] sm:$0xff] %vm328_vm0, %v3375_v16  ;;  %v8282_v8 = vpop.f32.mrf.mxu0 }
 0x27c   : > { %5146 = vst.msk [vmem:[%s7915_s25 + $0x3c] sm:$0xf] %vm5130_vm7, %v5113_v1  ;;  %v5294_v59 = vsel %vm328_vm0, %v5248_v31, 0.0  ;;  %v3753_v49 = vadd.f32 %v3721_v62, %v3669_v14 }
 0x27d   : > { %v5295_v56 = vadd.f32 %v5294_v59, %v5293_v35  ;;  %v4466_v12 = vld [vmem:[#allocation2 + $0x90] sm:$0xff] }
 0x27e   : > { %v4498_v54 = vadd.f32 %v4466_v12, %v4413_v27  ;;  %3785 = vst.msk [vmem:[#allocation2 + $0x98] sm:$0xff] %vm328_vm0, %v3753_v49  ;;  %v3672_v36 = vpop.f32.mrf.mxu2  ;;  %v3347_v12 = vld [vmem:[#allocation2 + $0xc0] sm:$0xff] }
 0x27f   : > { %v4987_v63 = vld [vmem:[#allocation2 + $0x88] sm:$0xff] }
 0x280   : > { %4530 = vst.msk [vmem:[#allocation2 + $0x90] sm:$0xff] %vm328_vm0, %v4498_v54  ;;  %v5019_v13 = vadd.f32 %v4987_v63, %v8248_v15  ;;  %v3295_v40 = vpop.f32.mrf.mxu1 }
 0x281   : > { %v4418_v4 = vpop.f32.mrf.mxu3  ;;  %v5082_v33 = vld [vmem:[#allocation2 + $0x80] sm:$0xff]  ;;  %v3376_v7 = vadd.f32 %v3344_v61, %v3295_v40 }
 0x282   : > { %v5114_v29 = vpack.c.bf16 %v5082_v33, %v5082_v33  ;;  %v5194_v60 = vsel %vm328_vm0, %v5082_v33, 0.0  ;;  %v5249_v32 = vmul.f32 %v5082_v33, %v5082_v33  ;;  %5051 = vst.msk [vmem:[#allocation2 + $0x88] sm:$0xff] %vm328_vm0, %v5019_v13  ;;  %v3722_v18 = vld [vmem:[#allocation2 + $0xa0] sm:$0xff] }
 0x283   : > { %v5195_v2 = vadd.f32 %v5194_v60, %v5193_v20  ;;  %v3754_v19 = vadd.f32 %v3722_v18, %v3672_v36  ;;  %3408 = vst.msk [vmem:[#allocation2 + $0xa8] sm:$0xff] %vm328_vm0, %v3376_v7  ;;  %v8295_v34 = vpop.f32.mrf.mxu0 }
 0x284   : > { %5147 = vst.msk [vmem:[%s7915_s25 + $0x40] sm:$0xf] %vm5130_vm7, %v5114_v29  ;;  %v5296_v41 = vsel %vm328_vm0, %v5249_v32, 0.0 }
 0x285   : > { %v5297_v15 = vadd.f32 %v5296_v41, %v5295_v56  ;;  %v4467_v26 = vld [vmem:[#allocation2 + $0x98] sm:$0xff]  ;;  %3786 = vst.msk [vmem:[#allocation2 + $0xa0] sm:$0xff] %vm328_vm0, %v3754_v19 }
 0x286   : > { %v4499_v53 = vadd.f32 %v4467_v26, %v4415_v48  ;;  %v3674_v52 = vpop.f32.mrf.mxu2 }
 0x287   : > { %v4988_v47 = vld [vmem:[#allocation2 + $0x90] sm:$0xff] }
 0x288   : > { %4531 = vst.msk [vmem:[#allocation2 + $0x98] sm:$0xff] %vm328_vm0, %v4499_v53  ;;  %v5020_v43 = vadd.f32 %v4988_v47, %v8259_v38  ;;  %v3298_v23 = vpop.f32.mrf.mxu1  ;;  %v3348_v53 = vld [vmem:[#allocation2 + $0xc8] sm:$0xff] }
 0x289   : > { %v4420_v11 = vpop.f32.mrf.mxu3  ;;  %v5083_v39 = vld [vmem:[#allocation2 + $0x88] sm:$0xff]  ;;  %v3377_v3 = vadd.f32 %v3345_v46, %v3298_v23 }
 0x28a   : > { %v5115_v27 = vpack.c.bf16 %v5083_v39, %v5083_v39  ;;  %v5196_v17 = vsel %vm328_vm0, %v5083_v39, 0.0  ;;  %v5250_v45 = vmul.f32 %v5083_v39, %v5083_v39  ;;  %5052 = vst.msk [vmem:[#allocation2 + $0x90] sm:$0xff] %vm328_vm0, %v5020_v43  ;;  %v3723_v55 = vld [vmem:[#allocation2 + $0xa8] sm:$0xff] }
 0x28b   : > { %v5197_v21 = vadd.f32 %v5196_v17, %v5195_v2  ;;  %v3755_v9 = vadd.f32 %v3723_v55, %v3674_v52  ;;  %3409 = vst.msk [vmem:[#allocation2 + $0xb0] sm:$0xff] %vm328_vm0, %v3377_v3  ;;  %v4945_v16 = vpop.f32.mrf.mxu0 }
 0x28c   : > { %5148 = vst.msk [vmem:[%s7915_s25 + $0x44] sm:$0xf] %vm5130_vm7, %v5115_v27  ;;  %v5298_v38 = vsel %vm328_vm0, %v5250_v45, 0.0  ;;  %v4468_v28 = vld [vmem:[#allocation2 + $0xa0] sm:$0xff] }
 0x28d   : > { %v5299_v42 = vadd.f32 %v5298_v38, %v5297_v15  ;;  %v4500_v50 = vadd.f32 %v4468_v28, %v4418_v4  ;;  %3787 = vst.msk [vmem:[#allocation2 + $0xa8] sm:$0xff] %vm328_vm0, %v3755_v9 }
 0x28e   : > { %v3677_v30 = vpop.f32.mrf.mxu2 }
 0x28f   : > { %4532 = vst.msk [vmem:[#allocation2 + $0xa0] sm:$0xff] %vm328_vm0, %v4500_v50  ;;  %v4989_v51 = vld [vmem:[#allocation2 + $0x98] sm:$0xff]  ;;  %v3349_v50 = vld [vmem:[#allocation2 + $0xd0] sm:$0xff] }
 0x290   : > { %v5021_v35 = vadd.f32 %v4989_v51, %v8270_v24  ;;  %v3300_v44 = vpop.f32.mrf.mxu1 }
 0x291   : > { %v4423_v5 = vpop.f32.mrf.mxu3  ;;  %v5084_v6 = vld [vmem:[#allocation2 + $0x90] sm:$0xff]  ;;  %v3378_v14 = vadd.f32 %v3346_v57, %v3300_v44 }
 0x292   : > { %v5116_v37 = vpack.c.bf16 %v5084_v6, %v5084_v6  ;;  %v5198_v48 = vsel %vm328_vm0, %v5084_v6, 0.0  ;;  %v5251_v22 = vmul.f32 %v5084_v6, %v5084_v6  ;;  %5053 = vst.msk [vmem:[#allocation2 + $0x98] sm:$0xff] %vm328_vm0, %v5021_v35  ;;  %v3724_v10 = vld [vmem:[#allocation2 + $0xb0] sm:$0xff] }
 0x293   : > { %v5199_v0 = vadd.f32 %v5198_v48, %v5197_v21  ;;  %v3756_v58 = vadd.f32 %v3724_v10, %v3677_v30  ;;  %3410 = vst.msk [vmem:[#allocation2 + $0xb8] sm:$0xff] %vm328_vm0, %v3378_v14  ;;  %v4947_v32 = vpop.f32.mrf.mxu0  ;;  %v3350_v10 = vld [vmem:[#allocation2 + $0xd8] sm:$0xff] }
 0x294   : > { %5149 = vst.msk [vmem:[%s7915_s25 + $0x48] sm:$0xf] %vm5130_vm7, %v5116_v37  ;;  %v5300_v24 = vsel %vm328_vm0, %v5251_v22, 0.0  ;;  %v4469_v1 = vld [vmem:[#allocation2 + $0xa8] sm:$0xff] }
 0x295   : > { %v5301_v25 = vadd.f32 %v5300_v24, %v5299_v42  ;;  %v4501_v31 = vadd.f32 %v4469_v1, %v4420_v11  ;;  %3788 = vst.msk [vmem:[#allocation2 + $0xb0] sm:$0xff] %vm328_vm0, %v3756_v58 }
 0x296   : > { %v4990_v20 = vld [vmem:[#allocation2 + $0xa0] sm:$0xff]  ;;  %v3679_v62 = vpop.f32.mrf.mxu2 }
 0x297   : > { %4533 = vst.msk [vmem:[#allocation2 + $0xa8] sm:$0xff] %vm328_vm0, %v4501_v31  ;;  %v5022_v59 = vadd.f32 %v4990_v20, %v8282_v8 }
 0x298   : > { %v3303_v56 = vpop.f32.mrf.mxu1 }
 0x299   : > { %v4425_v49 = vpop.f32.mrf.mxu3  ;;  %v5085_v54 = vld [vmem:[#allocation2 + $0x98] sm:$0xff]  ;;  %5054 = vst.msk [vmem:[#allocation2 + $0xa0] sm:$0xff] %vm328_vm0, %v5022_v59  ;;  %v3379_v36 = vadd.f32 %v3347_v12, %v3303_v56 }
 0x29a   : > { %v5117_v63 = vpack.c.bf16 %v5085_v54, %v5085_v54  ;;  %v5200_v4 = vsel %vm328_vm0, %v5085_v54, 0.0  ;;  %v5252_v13 = vmul.f32 %v5085_v54, %v5085_v54  ;;  %v3725_v40 = vld [vmem:[#allocation2 + $0xb8] sm:$0xff]  ;;  %v3351_v54 = vld [vmem:[#allocation2 + $0xe0] sm:$0xff] }
 0x29b   : > { %v5201_v61 = vadd.f32 %v5200_v4, %v5199_v0  ;;  %v3757_v33 = vadd.f32 %v3725_v40, %v3679_v62  ;;  %3411 = vst.msk [vmem:[#allocation2 + $0xc0] sm:$0xff] %vm328_vm0, %v3379_v36  ;;  %v4950_v38 = vpop.f32.mrf.mxu0 }
 0x29c   : > { %5150 = vst.msk [vmem:[%s7915_s25 + $0x4c] sm:$0xf] %vm5130_vm7, %v5117_v63  ;;  %v5302_v8 = vsel %vm328_vm0, %v5252_v13, 0.0  ;;  %v4470_v7 = vld [vmem:[#allocation2 + $0xb0] sm:$0xff] }
 0x29d   : > { %v5303_v29 = vadd.f32 %v5302_v8, %v5301_v25  ;;  %v4502_v60 = vadd.f32 %v4470_v7, %v4423_v5  ;;  %3789 = vst.msk [vmem:[#allocation2 + $0xb8] sm:$0xff] %vm328_vm0, %v3757_v33 }
 0x29e   : > { %v4991_v18 = vld [vmem:[#allocation2 + $0xa8] sm:$0xff]  ;;  %v3682_v2 = vpop.f32.mrf.mxu2 }
 0x29f   : > { %4534 = vst.msk [vmem:[#allocation2 + $0xb0] sm:$0xff] %vm328_vm0, %v4502_v60  ;;  %v5023_v19 = vadd.f32 %v4991_v18, %v8295_v34 }
 0x2a0   : > { %v5086_v15 = vld [vmem:[#allocation2 + $0xa0] sm:$0xff]  ;;  %v3305_v26 = vpop.f32.mrf.mxu1 }
 0x2a1   : > { %v4428_v41 = vpop.f32.mrf.mxu3  ;;  %v5118_v52 = vpack.c.bf16 %v5086_v15, %v5086_v15  ;;  %v5202_v47 = vsel %vm328_vm0, %v5086_v15, 0.0  ;;  %v5253_v11 = vmul.f32 %v5086_v15, %v5086_v15  ;;  %5055 = vst.msk [vmem:[#allocation2 + $0xa8] sm:$0xff] %vm328_vm0, %v5023_v19  ;;  %v3380_v43 = vadd.f32 %v3348_v53, %v3305_v26 }
 0x2a2   : > { %v8326_v23 = vadd.f32 %v5202_v47, %v5201_v61  ;;  %v3726_v46 = vld [vmem:[#allocation2 + $0xc0] sm:$0xff] }
 0x2a3   : > { %5151 = vst.msk [vmem:[%s7915_s25 + $0x50] sm:$0xf] %vm5130_vm7, %v5118_v52  ;;  %v5304_v39 = vsel %vm328_vm0, %v5253_v11, 0.0  ;;  %v3758_v3 = vadd.f32 %v3726_v46, %v3682_v2  ;;  %v4952_v24 = vpop.f32.mrf.mxu0  ;;  %v3352_v2 = vld [vmem:[#allocation2 + $0xe8] sm:$0xff] }
 0x2a4   : > { %v8331_v34 = vadd.f32 %v5304_v39, %v5303_v29  ;;  %v4471_v27 = vld [vmem:[#allocation2 + $0xb8] sm:$0xff]  ;;  %3412 = vst.msk [vmem:[#allocation2 + $0xc8] sm:$0xff] %vm328_vm0, %v3380_v43 }
 0x2a5   : > { %v4503_v17 = vadd.f32 %v4471_v27, %v4425_v49  ;;  %3790 = vst.msk [vmem:[#allocation2 + $0xc0] sm:$0xff] %vm328_vm0, %v3758_v3  ;;  %v3353_v27 = vld [vmem:[#allocation2 + $0xf0] sm:$0xff] }
 0x2a6   : > { %v4992_v45 = vld [vmem:[#allocation2 + $0xb0] sm:$0xff]  ;;  %v3684_v55 = vpop.f32.mrf.mxu2 }
 0x2a7   : > { %4535 = vst.msk [vmem:[#allocation2 + $0xb8] sm:$0xff] %vm328_vm0, %v4503_v17  ;;  %v5024_v21 = vadd.f32 %v4992_v45, %v4945_v16 }
 0x2a8   : > { %v8336_v28 = vld [vmem:[#allocation2 + $0xa8] sm:$0xff]  ;;  %v3308_v42 = vpop.f32.mrf.mxu1 }
 0x2a9   : > { %v4430_v9 = vpop.f32.mrf.mxu3  ;;  %v5119_v30 = vpack.c.bf16 %v8336_v28, %v8336_v28  ;;  %5056 = vst.msk [vmem:[#allocation2 + $0xb0] sm:$0xff] %vm328_vm0, %v5024_v21  ;;  %v3381_v51 = vadd.f32 %v3349_v50, %v3308_v42 }
 0x2ab   : > { %5152 = vst.msk [vmem:[%s7915_s25 + $0x54] sm:$0xf] %vm5130_vm7, %v5119_v30  ;;  %v3727_v5 = vld [vmem:[#allocation2 + $0xc8] sm:$0xff]  ;;  %v4955_v40 = vpop.f32.mrf.mxu0 }
 0x2ac   : > { %v4472_v35 = vld [vmem:[#allocation2 + $0xc0] sm:$0xff]  ;;  %v3759_v44 = vadd.f32 %v3727_v5, %v3684_v55  ;;  %3413 = vst.msk [vmem:[#allocation2 + $0xd0] sm:$0xff] %vm328_vm0, %v3381_v51 }
 0x2ad   : > { %v4504_v57 = vadd.f32 %v4472_v35, %v4428_v41 }
 0x2ae   : > { %3791 = vst.msk [vmem:[#allocation2 + $0xc8] sm:$0xff] %vm328_vm0, %v3759_v44  ;;  %v4993_v6 = vld [vmem:[#allocation2 + $0xb8] sm:$0xff]  ;;  %v3687_v14 = vpop.f32.mrf.mxu2 }
 0x2af   : > { %4536 = vst.msk [vmem:[#allocation2 + $0xc0] sm:$0xff] %vm328_vm0, %v4504_v57  ;;  %v5025_v37 = vadd.f32 %v4993_v6, %v4947_v32  ;;  %v3354_v57 = vld [vmem:[#allocation2 + $0xf8] sm:$0xff] }
 0x2b0   : > { %v8346_v48 = vld [vmem:[#allocation2 + $0xb0] sm:$0xff]  ;;  %v3310_v22 = vpop.f32.mrf.mxu1 }
 0x2b1   : > { %v5120_v0 = vpack.c.bf16 %v8346_v48, %v8346_v48  ;;  %5057 = vst.msk [vmem:[#allocation2 + $0xb8] sm:$0xff] %vm328_vm0, %v5025_v37  ;;  %v3382_v58 = vadd.f32 %v3350_v10, %v3310_v22  ;;  %v4433_v16 = vpop.f32.mrf.mxu3 }
 0x2b3   : > { %5153 = vst.msk [vmem:[%s7915_s25 + $0x58] sm:$0xf] %vm5130_vm7, %v5120_v0  ;;  %v3728_v1 = vld [vmem:[#allocation2 + $0xd0] sm:$0xff]  ;;  %v4957_v47 = vpop.f32.mrf.mxu0 }
 0x2b4   : > { %v3760_v25 = vadd.f32 %v3728_v1, %v3687_v14  ;;  %3414 = vst.msk [vmem:[#allocation2 + $0xd8] sm:$0xff] %vm328_vm0, %v3382_v58 }
 0x2b5   : > { %v4473_v31 = vld [vmem:[#allocation2 + $0xc8] sm:$0xff] }
 0x2b6   : > { %v4505_v20 = vadd.f32 %v4473_v31, %v4430_v9  ;;  %3792 = vst.msk [vmem:[#allocation2 + $0xd0] sm:$0xff] %vm328_vm0, %v3760_v25  ;;  %v4994_v62 = vld [vmem:[#allocation2 + $0xc0] sm:$0xff]  ;;  %v3689_v59 = vpop.f32.mrf.mxu2 }
 0x2b7   : > { %v5026_v49 = vadd.f32 %v4994_v62, %v4950_v38 }
 0x2b8   : > { %v8355_v56 = vld [vmem:[#allocation2 + $0xb8] sm:$0xff]  ;;  %4537 = vst.msk [vmem:[#allocation2 + $0xc8] sm:$0xff] %vm328_vm0, %v4505_v20  ;;  %v3313_v12 = vpop.f32.mrf.mxu1 }
 0x2b9   : > { %v5121_v36 = vpack.c.bf16 %v8355_v56, %v8355_v56  ;;  %5058 = vst.msk [vmem:[#allocation2 + $0xc0] sm:$0xff] %vm328_vm0, %v5026_v49  ;;  %v3383_v63 = vadd.f32 %v3351_v54, %v3313_v12  ;;  %v4435_v13 = vpop.f32.mrf.mxu3 }
 0x2bb   : > { %5154 = vst.msk [vmem:[%s7915_s25 + $0x5c] sm:$0xf] %vm5130_vm7, %v5121_v36  ;;  %v3729_v4 = vld [vmem:[#allocation2 + $0xd8] sm:$0xff]  ;;  %v4960_v51 = vpop.f32.mrf.mxu0 }
 0x2bc   : > { %v3761_v61 = vadd.f32 %v3729_v4, %v3689_v59  ;;  %3415 = vst.msk [vmem:[#allocation2 + $0xe0] sm:$0xff] %vm328_vm0, %v3383_v63  ;;  %v5254_v4 = vmul.f32 %v8336_v28, %v8336_v28 }
 0x2bd   : > { %v4474_v33 = vld [vmem:[#allocation2 + $0xd0] sm:$0xff] }
 0x2be   : > { %v4506_v8 = vadd.f32 %v4474_v33, %v4433_v16  ;;  %3793 = vst.msk [vmem:[#allocation2 + $0xd8] sm:$0xff] %vm328_vm0, %v3761_v61  ;;  %v3692_v7 = vpop.f32.mrf.mxu2  ;;  %v5204_v61 = vsel %vm328_vm0, %v8336_v28, 0.0  ;;  %v5255_v33 = vmul.f32 %v8346_v48, %v8346_v48 }
 0x2bf   : > { %v4995_v29 = vld [vmem:[#allocation2 + $0xc8] sm:$0xff] }
 0x2c0   : > { %v8365_v60 = vld [vmem:[#allocation2 + $0xc0] sm:$0xff]  ;;  %4538 = vst.msk [vmem:[#allocation2 + $0xd0] sm:$0xff] %vm328_vm0, %v4506_v8  ;;  %v5027_v32 = vadd.f32 %v4995_v29, %v4952_v24  ;;  %v3315_v18 = vpop.f32.mrf.mxu1 }
 0x2c1   : > { %v5122_v19 = vpack.c.bf16 %v8365_v60, %v8365_v60  ;;  %v3384_v41 = vadd.f32 %v3352_v2, %v3315_v18  ;;  %v4438_v52 = vpop.f32.mrf.mxu3  ;;  %v5206_v18 = vsel %vm328_vm0, %v8346_v48, 0.0  ;;  %v5256_v2 = vmul.f32 %v8355_v56, %v8355_v56 }
 0x2c2   : > { %5059 = vst.msk [vmem:[#allocation2 + $0xc8] sm:$0xff] %vm328_vm0, %v5027_v32  ;;  %v5306_v32 = vsel %vm328_vm0, %v5254_v4, 0.0 }
 0x2c3   : > { %5155 = vst.msk [vmem:[%s7915_s25 + $0x60] sm:$0xf] %vm5130_vm7, %v5122_v19  ;;  %v3730_v15 = vld [vmem:[#allocation2 + $0xe0] sm:$0xff]  ;;  %v4962_v25 = vpop.f32.mrf.mxu0  ;;  %v5307_v48 = vadd.f32 %v5306_v32, %v8331_v34 }
 0x2c4   : > { %v3762_v26 = vadd.f32 %v3730_v15, %v3692_v7  ;;  %3416 = vst.msk [vmem:[#allocation2 + $0xe8] sm:$0xff] %vm328_vm0, %v3384_v41  ;;  %v5205_v41 = vadd.f32 %v5204_v61, %v8326_v23  ;;  %v5308_v15 = vsel %vm328_vm0, %v5255_v33, 0.0  ;;  %v5210_v23 = vsel %vm328_vm0, %v8365_v60, 0.0 }
 0x2c5   : > { %v4475_v53 = vld [vmem:[#allocation2 + $0xd8] sm:$0xff] }
 0x2c6   : > { %v4507_v11 = vadd.f32 %v4475_v53, %v4435_v13  ;;  %3794 = vst.msk [vmem:[#allocation2 + $0xe0] sm:$0xff] %vm328_vm0, %v3762_v26  ;;  %v3694_v43 = vpop.f32.mrf.mxu2  ;;  %v5208_v26 = vsel %vm328_vm0, %v8355_v56, 0.0  ;;  %v5257_v53 = vmul.f32 %v8365_v60, %v8365_v60  ;;  %v5309_v56 = vadd.f32 %v5308_v15, %v5307_v48 }
 0x2c7   : > { %v4996_v46 = vld [vmem:[#allocation2 + $0xd0] sm:$0xff] }
 0x2c8   : > { %4539 = vst.msk [vmem:[#allocation2 + $0xd8] sm:$0xff] %vm328_vm0, %v4507_v11  ;;  %v5028_v39 = vadd.f32 %v4996_v46, %v4955_v40  ;;  %v3318_v3 = vpop.f32.mrf.mxu1  ;;  %v5310_v11 = vsel %vm328_vm0, %v5256_v2, 0.0 }
 0x2c9   : > { %v8376_v17 = vld [vmem:[#allocation2 + $0xc8] sm:$0xff]  ;;  %v3385_v45 = vadd.f32 %v3353_v27, %v3318_v3  ;;  %v4440_v30 = vpop.f32.mrf.mxu3  ;;  %v5312_v27 = vsel %vm328_vm0, %v5257_v53, 0.0 }
 0x2ca   : > { %v5123_v55 = vpack.c.bf16 %v8376_v17, %v8376_v17  ;;  %5060 = vst.msk [vmem:[#allocation2 + $0xd0] sm:$0xff] %vm328_vm0, %v5028_v39  ;;  %v5212_v34 = vsel %vm328_vm0, %v8376_v17, 0.0 }
 0x2cb   : > { %v3731_v21 = vld [vmem:[#allocation2 + $0xe8] sm:$0xff]  ;;  %3417 = vst.msk [vmem:[#allocation2 + $0xf0] sm:$0xff] %vm328_vm0, %v3385_v45  ;;  %v4965_v29 = vpop.f32.mrf.mxu0 }
 0x2cc   : > { %5156 = vst.msk [vmem:[%s7915_s25 + $0x64] sm:$0xf] %vm5130_vm7, %v5123_v55  ;;  %v3763_v9 = vadd.f32 %v3731_v21, %v3694_v43  ;;  %v5258_v43 = vmul.f32 %v8376_v17, %v8376_v17  ;;  %v5311_v55 = vadd.f32 %v5310_v11, %v5309_v56 }
 0x2cd   : > { %v4476_v38 = vld [vmem:[#allocation2 + $0xe0] sm:$0xff] }
 0x2ce   : > { %v4508_v42 = vadd.f32 %v4476_v38, %v4438_v52  ;;  %3795 = vst.msk [vmem:[#allocation2 + $0xe8] sm:$0xff] %vm328_vm0, %v3763_v9  ;;  %v3697_v35 = vpop.f32.mrf.mxu2  ;;  %v5314_v60 = vsel %vm328_vm0, %v5258_v43, 0.0 }
 0x2cf   : > { %v4997_v50 = vld [vmem:[#allocation2 + $0xd8] sm:$0xff] }
 0x2d0   : > { %4540 = vst.msk [vmem:[#allocation2 + $0xe0] sm:$0xff] %vm328_vm0, %v4508_v42  ;;  %v5029_v5 = vadd.f32 %v4997_v50, %v4957_v47  ;;  %v3320_v44 = vpop.f32.mrf.mxu1  ;;  %v5207_v47 = vadd.f32 %v5206_v18, %v5205_v41  ;;  %v5313_v42 = vadd.f32 %v5312_v27, %v5311_v55 }
 0x2d1   : > { %v8386_v6 = vld [vmem:[#allocation2 + $0xd0] sm:$0xff]  ;;  %v3386_v14 = vadd.f32 %v3354_v57, %v3320_v44  ;;  %v4443_v20 = vpop.f32.mrf.mxu3 }
 0x2d2   : > { %v5124_v37 = vpack.c.bf16 %v8386_v6, %v8386_v6  ;;  %5061 = vst.msk [vmem:[#allocation2 + $0xd8] sm:$0xff] %vm328_vm0, %v5029_v5  ;;  %v3732_v22 = vld [vmem:[#allocation2 + $0xf0] sm:$0xff]  ;;  %v5209_v39 = vadd.f32 %v5208_v26, %v5207_v47  ;;  %v5259_v45 = vmul.f32 %v8386_v6, %v8386_v6  ;;  %v5214_v9 = vsel %vm328_vm0, %v8386_v6, 0.0 }
 0x2d3   : > { %v3764_v10 = vadd.f32 %v3732_v22, %v3697_v35  ;;  %3418 = vst.msk [vmem:[#allocation2 + $0xf8] sm:$0xff] %vm328_vm0, %v3386_v14  ;;  %v5315_v57 = vadd.f32 %v5314_v60, %v5313_v42 }
 0x2d4   : > { %5157 = vst.msk [vmem:[%s7915_s25 + $0x68] sm:$0xf] %vm5130_vm7, %v5124_v37  ;;  %v5211_v21 = vadd.f32 %v5210_v23, %v5209_v39  ;;  %v5316_v5 = vsel %vm328_vm0, %v5259_v45, 0.0 }
 0x2d5   : > { %v4477_v0 = vld [vmem:[#allocation2 + $0xe8] sm:$0xff]  ;;  %3796 = vst.msk [vmem:[#allocation2 + $0xf0] sm:$0xff] %vm328_vm0, %v3764_v10 }
 0x2d6   : > { %v4509_v58 = vadd.f32 %v4477_v0, %v4440_v30  ;;  %v3699_v62 = vpop.f32.mrf.mxu2  ;;  %v5213_v50 = vadd.f32 %v5212_v34, %v5211_v21  ;;  %v4967_v30 = vpop.f32.mrf.mxu0 }
 0x2d7   : > { %v4998_v16 = vld [vmem:[#allocation2 + $0xe0] sm:$0xff] }
 0x2d8   : > { %4541 = vst.msk [vmem:[#allocation2 + $0xe8] sm:$0xff] %vm328_vm0, %v4509_v58  ;;  %v5030_v24 = vadd.f32 %v4998_v16, %v4960_v51  ;;  %v5215_v14 = vadd.f32 %v5214_v9, %v5213_v50  ;;  %v5317_v58 = vadd.f32 %v5316_v5, %v5315_v57 }
 0x2d9   : > { %v5093_v1 = vld [vmem:[#allocation2 + $0xd8] sm:$0xff]  ;;  %v4445_v8 = vpop.f32.mrf.mxu3 }
 0x2da   : > { %v5125_v31 = vpack.c.bf16 %v5093_v1, %v5093_v1  ;;  %5062 = vst.msk [vmem:[#allocation2 + $0xe0] sm:$0xff] %vm328_vm0, %v5030_v24  ;;  %v3733_v59 = vld [vmem:[#allocation2 + $0xf8] sm:$0xff]  ;;  %v5260_v38 = vmul.f32 %v5093_v1, %v5093_v1  ;;  %v5216_v17 = vsel %vm328_vm0, %v5093_v1, 0.0 }
 0x2db   : > { %v3765_v49 = vadd.f32 %v3733_v59, %v3699_v62  ;;  %v5217_v16 = vadd.f32 %v5216_v17, %v5215_v14 }
 0x2dc   : > { %5158 = vst.msk [vmem:[%s7915_s25 + $0x6c] sm:$0xf] %vm5130_vm7, %v5125_v31  ;;  %v4478_v12 = vld [vmem:[#allocation2 + $0xf0] sm:$0xff]  ;;  %v5318_v22 = vsel %vm328_vm0, %v5260_v38, 0.0 }
 0x2dd   : > { %v4510_v54 = vadd.f32 %v4478_v12, %v4443_v20  ;;  %3797 = vst.msk [vmem:[#allocation2 + $0xf8] sm:$0xff] %vm328_vm0, %v3765_v49  ;;  %v5319_v31 = vadd.f32 %v5318_v22, %v5317_v58 }
 0x2df   : > { %4542 = vst.msk [vmem:[#allocation2 + $0xf0] sm:$0xff] %vm328_vm0, %v4510_v54  ;;  %v4999_v36 = vld [vmem:[#allocation2 + $0xe8] sm:$0xff] }
 0x2e0   : > { %v5031_v63 = vadd.f32 %v4999_v36, %v4962_v25 }
 0x2e1   : > { %v5094_v13 = vld [vmem:[#allocation2 + $0xe0] sm:$0xff] }
 0x2e2   : > { %v5126_v40 = vpack.c.bf16 %v5094_v13, %v5094_v13  ;;  %5063 = vst.msk [vmem:[#allocation2 + $0xe8] sm:$0xff] %vm328_vm0, %v5031_v63  ;;  %v5261_v35 = vmul.f32 %v5094_v13, %v5094_v13  ;;  %v5218_v10 = vsel %vm328_vm0, %v5094_v13, 0.0 }
 0x2e3   : > { %v5219_v20 = vadd.f32 %v5218_v10, %v5217_v16 }
 0x2e4   : > { %5159 = vst.msk [vmem:[%s7915_s25 + $0x70] sm:$0xf] %vm5130_vm7, %v5126_v40  ;;  %v4479_v7 = vld [vmem:[#allocation2 + $0xf8] sm:$0xff]  ;;  %v5320_v24 = vsel %vm328_vm0, %v5261_v35, 0.0 }
 0x2e5   : > { %v4511_v19 = vadd.f32 %v4479_v7, %v4445_v8  ;;  %v5321_v49 = vadd.f32 %v5320_v24, %v5319_v31 }
 0x2e6   : > { %v5000_v28 = vld [vmem:[#allocation2 + $0xf0] sm:$0xff] }
 0x2e7   : > { %4543 = vst.msk [vmem:[#allocation2 + $0xf8] sm:$0xff] %vm328_vm0, %v4511_v19  ;;  %v5032_v52 = vadd.f32 %v5000_v28, %v4965_v29 }
 0x2e9   : > { %v5095_v46 = vld [vmem:[#allocation2 + $0xe8] sm:$0xff]  ;;  %5064 = vst.msk [vmem:[#allocation2 + $0xf0] sm:$0xff] %vm328_vm0, %v5032_v52 }
 0x2ea   : > { %v5127_v3 = vpack.c.bf16 %v5095_v46, %v5095_v46  ;;  %v5262_v6 = vmul.f32 %v5095_v46, %v5095_v46  ;;  %v5220_v25 = vsel %vm328_vm0, %v5095_v46, 0.0 }
 0x2eb   : > { %v5221_v12 = vadd.f32 %v5220_v25, %v5219_v20 }
 0x2ec   : > { %5160 = vst.msk [vmem:[%s7915_s25 + $0x74] sm:$0xf] %vm5130_vm7, %v5127_v3  ;;  %v5322_v62 = vsel %vm328_vm0, %v5262_v6, 0.0 }
 0x2ed   : > { %v5323_v36 = vadd.f32 %v5322_v62, %v5321_v49 }
 0x2ee   : > { %v5001_v51 = vld [vmem:[#allocation2 + $0xf8] sm:$0xff] }
 0x2ef   : > { %v5033_v44 = vadd.f32 %v5001_v51, %v4967_v30 }
 0x2f0   : > { %v5096_v37 = vld [vmem:[#allocation2 + $0xf0] sm:$0xff] }
 0x2f1   : > { %v5128_v0 = vpack.c.bf16 %v5096_v37, %v5096_v37  ;;  %5065 = vst.msk [vmem:[#allocation2 + $0xf8] sm:$0xff] %vm328_vm0, %v5033_v44  ;;  %v5263_v1 = vmul.f32 %v5096_v37, %v5096_v37  ;;  %v5222_v59 = vsel %vm328_vm0, %v5096_v37, 0.0 }
 0x2f2   : > { %v5223_v63 = vadd.f32 %v5222_v59, %v5221_v12 }
 0x2f3   : > { %5161 = vst.msk [vmem:[%s7915_s25 + $0x78] sm:$0xf] %vm5130_vm7, %v5128_v0  ;;  %v5324_v54 = vsel %vm328_vm0, %v5263_v1, 0.0 }
 0x2f4   : > { %v5325_v33 = vadd.f32 %v5324_v54, %v5323_v36 }
 0x2f8   : > { %v5097_v4 = vld [vmem:[#allocation2 + $0xf8] sm:$0xff] }
 0x2f9   : > { %v5129_v13 = vpack.c.bf16 %v5097_v4, %v5097_v4  ;;  %v5224_v40 = vsel %vm328_vm0, %v5097_v4, 0.0  ;;  %v5264_v61 = vmul.f32 %v5097_v4, %v5097_v4 }
 0x2fa   : > { %v5225_v8 = vadd.f32 %v5224_v40, %v5223_v63 }
 0x2fb   : > { %5162 = vst.msk [vmem:[%s7915_s25 + $0x7c] sm:$0xf] %vm5130_vm7, %v5129_v13  ;;  %v5326_v7 = vsel %vm328_vm0, %v5264_v61, 0.0 }
 0x2fc   : > { %v5226_v29 = vrot.slane %v5225_v8, 4  ;;  %v5327_v32 = vadd.f32 %v5326_v7, %v5325_v33 }
 0x2fe   : > { %v5227_v18 = vadd.f32 %v5226_v29, %v5225_v8  ;;  %v5328_v2 = vrot.slane %v5327_v32, 4 }
 0x300   : > { %v5228_v19 = vrot.slane %v5227_v18, 2  ;;  %v5329_v41 = vadd.f32 %v5328_v2, %v5327_v32 }
 0x302   : > { %v5229_v28 = vadd.f32 %v5228_v19, %v5227_v18  ;;  %v5330_v15 = vrot.slane %v5329_v41, 2 }
 0x304   : > { %v5230_v26 = vrot.slane %v5229_v28, 1  ;;  %v5331_v53 = vadd.f32 %v5330_v15, %v5329_v41 }
 0x306   : > { %v5332_v52 = vrot.slane %v5331_v53, 1  ;;  %v5231_v48 = vadd.f32 %v5230_v26, %v5229_v28 }
 0x308   : > { %v5333_v47 = vadd.f32 %v5332_v52, %v5331_v53 }
 0x30a   : > { %v5336_v11 = vsel %vm5335_vm8, %v5231_v48, %v5333_v47 }
 0x30b   : > { %5338 = vst.msk [vmem:[%s182_s29] sm:$0x3] %vm5337_vm9, %v5336_v11 }
 0x30c PF: > { %s14_s12 = sadd.s32 1, %s6396_s12  }
 0x30d   : > { %p11_p5 = scmp.ge.s32.totalorder %s14_s12, 4  }
 0x30f   :  { %13 = sbr.rel (!%p11_p5) target bundleno = 1 (0x1), region = 80 }

// kernel: discriminator_32_forward.7
= control target key start
LH: loop header
LB: loop body
LE: loop exit
PB: predicated region body
PF: predicated region fallthrough
CT: control target
= control target key end

     0   :  { %s2171_s12 = smov 0   ;;  %s2559_s0 = inlined_call_operand.vmem [shape: bf16[2,9,9,256], index: 0, kind: input, shape index: {}]   ;;  %s2560_s1 = inlined_call_operand.vmem [shape: bf16[4,256,128], index: 1, kind: input, shape index: {}]   ;;  %s2561_s2 = inlined_call_operand.vmem [shape: bf16[128,128], index: 2, kind: output, shape index: {0}]   ;;  %s2562_s3 = inlined_call_operand.vmem [shape: f32[2,2,128], index: 3, kind: output, shape index: {1}]  }
   0x1 LB: > { %s2177_s13 = sadd.s32 4294967295, %s2149_s12   ;;  %p1584_p0 = scmp.ge.s32.totalorder %s2149_s12, 1  ;;  %s2149_s12 = sphi %s2171_s12, %s14_s12  }
   0x2   : > { %p140_p1 = scmp.lt.s32.totalorder %s2149_s12, 3 }
   0x4   : > { %p141_p2 = pnand %p1584_p0, %p140_p1 }
   0x5   : > { %p168_p3 = scmp.lt.s32.totalorder (!%p141_p2), %s2177_s13, 1 }
   0x6   : > { %144 = sbr.rel (%p141_p2) target bundleno = 320 (0x140), region = 28 }
   0xb   : > { %v2046_v0 = vld [vmem:[%s2560_s1 + $0x38] sm:$0xff]  ;;  %v2045_v4 = vld [vmem:[%s2560_s1 + $0x30] sm:$0xff]  ;;  %s2201_s26 = scalar_select %p168_p3, %s2177_s13, 1  ;;  %v2044_v8 = vld [vmem:[%s2560_s1 + $0x28] sm:$0xff]  ;;  %vm441_vm0 = vsmask.f32 3328 }
   0xc   : > { %v2054_v1 = vld [vmem:[%s2560_s1 + $0x78] sm:$0xff]  ;;  %359 = vmatpush.bf16.msra.mxu0 %v2046_v0  ;;  %v2053_v5 = vld [vmem:[%s2560_s1 + $0x70] sm:$0xff]  ;;  %v2052_v9 = vld [vmem:[%s2560_s1 + $0x68] sm:$0xff]  ;;  %vm442_vm1 = vsmask.f32 7440  ;;  %vm1490_vm3 = vcmask 1040384  }
   0xd   : > { %v2062_v2 = vld [vmem:[%s2560_s1 + $0xb8] sm:$0xff]  ;;  %388 = vmatpush.bf16.msra.mxu1 %v2054_v1  ;;  %v2061_v6 = vld [vmem:[%s2560_s1 + $0xb0] sm:$0xff]  ;;  %s2134_s4 = smul.u32 144, %s2201_s26  ;;  %v2060_v10 = vld [vmem:[%s2560_s1 + $0xa8] sm:$0xff]  ;;  %s1588_s7 = sshll.u32 %s2201_s26, 1 }
   0xe   : > { %v2070_v3 = vld [vmem:[%s2560_s1 + $0xf8] sm:$0xff]  ;;  %717 = vmatpush.bf16.msra.mxu2 %v2062_v2  ;;  %v2069_v7 = vld [vmem:[%s2560_s1 + $0xf0] sm:$0xff]  ;;  %v2068_v11 = vld [vmem:[%s2560_s1 + $0xe8] sm:$0xff]  ;;  %s182_s10 = scalar_lea.vmem %s2562_s3, %s1588_s7 }
   0xf   : > { %746 = vmatpush.bf16.msra.mxu3 %v2070_v3  ;;  %s2225_s17 = scalar_lea.vmem %s2559_s0, %s2134_s4  ;;  %v2043_v12 = vld [vmem:[%s2560_s1 + $0x20] sm:$0xff]  ;;  %v2042_v23 = vld [vmem:[%s2560_s1 + $0x18] sm:$0xff]  ;;  %v2041_v35 = vld [vmem:[%s2560_s1 + $0x10] sm:$0xff] }
  0x10   : > { %360 = vmatpush.bf16.msra.mxu0 %v2045_v4  ;;  %v2051_v13 = vld [vmem:[%s2560_s1 + $0x60] sm:$0xff]  ;;  %v426_v17 = vld [vmem:[%s2225_s17 + $0x8] sm:$0x11]  ;;  %v427_v18 = vld [vmem:[%s2225_s17 + $0x10] sm:$0xff] }
  0x11   : > { %389 = vmatpush.bf16.msra.mxu1 %v2053_v5  ;;  %v2059_v14 = vld [vmem:[%s2560_s1 + $0xa0] sm:$0xff]  ;;  %v428_v19 = vld [vmem:[%s2225_s17 + $0x18] sm:$0x11]  ;;  %v459_v22 = vshrl.u32 %v427_v18, 16  ;;  %v454_v25 = vshll.u32 %v426_v17, 16  ;;  %v462_v26 = vshll.u32 %v427_v18, 16  ;;  %vm2270_vm2 = vmor %vm441_vm0, %vm442_vm1 }
  0x12   : > { %718 = vmatpush.bf16.msra.mxu2 %v2061_v6  ;;  %v2067_v15 = vld [vmem:[%s2560_s1 + $0xe0] sm:$0xff]  ;;  %v2050_v24 = vld [vmem:[%s2560_s1 + $0x58] sm:$0xff]  ;;  %v468_v32 = vshll.u32 %v428_v19, 16  ;;  %v2049_v36 = vld [vmem:[%s2560_s1 + $0x50] sm:$0xff] }
  0x13   : > { %747 = vmatpush.bf16.msra.mxu3 %v2069_v7  ;;  %v425_v16 = vld [vmem:[%s2225_s17] sm:$0xff]  ;;  %v2058_v27 = vld [vmem:[%s2560_s1 + $0x98] sm:$0xff]  ;;  %v461_v31 = vrot.slane %v459_v22, 4  ;;  %v464_v33 = vrot.slane %v462_v26, 5  ;;  %v2057_v39 = vld [vmem:[%s2560_s1 + $0x90] sm:$0xff]  ;;  %v456_v42 = vrot.slane %v454_v25, 5 }
  0x14   : > { %361 = vmatpush.bf16.msra.mxu0 %v2044_v8  ;;  %v445_v20 = vshrl.u32 %v425_v16, 16  ;;  %v448_v21 = vshll.u32 %v425_v16, 16  ;;  %v2066_v28 = vld [vmem:[%s2560_s1 + $0xd8] sm:$0xff]  ;;  %v429_v38 = vld [vmem:[%s2225_s17 + $0x20] sm:$0xff]  ;;  %v2065_v40 = vld [vmem:[%s2560_s1 + $0xd0] sm:$0xff]  ;;  %v470_v43 = vrot.slane %v468_v32, 5 }
  0x15   : > { %390 = vmatpush.bf16.msra.mxu1 %v2052_v9  ;;  %v465_v37 = vor.u32 %v464_v33, %v461_v31  ;;  %v431_v46 = vld [vmem:[%s2225_s17 + $0x30] sm:$0xff]  ;;  %v473_v47 = vshrl.u32 %v429_v38, 16  ;;  %v476_v48 = vshll.u32 %v429_v38, 16  ;;  %v2040_v49 = vld [vmem:[%s2560_s1 + $0x8] sm:$0xff]  ;;  %v2039_v57 = vld [vmem:[%s2560_s1] sm:$0xff] }
  0x16   : > { %719 = vmatpush.bf16.msra.mxu2 %v2060_v10  ;;  %v447_v29 = vrot.slane %v445_v20, 4  ;;  %v450_v30 = vrot.slane %v448_v21, 5  ;;  %v2048_v50 = vld [vmem:[%s2560_s1 + $0x48] sm:$0xff]  ;;  %v487_v55 = vshrl.u32 %v431_v46, 16  ;;  %v490_v56 = vshll.u32 %v431_v46, 16  ;;  %v2047_v58 = vld [vmem:[%s2560_s1 + $0x40] sm:$0xff] }
  0x17   : > { %748 = vmatpush.bf16.msra.mxu3 %v2068_v11  ;;  %v2274_v45 = vrot.slane %v465_v37, 4  ;;  %v2056_v51 = vld [vmem:[%s2560_s1 + $0x88] sm:$0xff]  ;;  %v1591_v59 = vld [vmem:[%s2225_s17] sm:$0xf]  ;;  %v475_v60 = vrot.slane %v473_v47, 4  ;;  %v478_v61 = vrot.slane %v476_v48, 5 }
  0x18   : > { %362 = vmatpush.bf16.msra.mxu0 %v2043_v12  ;;  %v451_v34 = vor.u32 %v450_v30, %v447_v29  ;;  %v2064_v52 = vld [vmem:[%s2560_s1 + $0xc8] sm:$0xff]  ;;  %v2032_v62 = vld [vmem:[%s2225_s17 + $0xc] sm:$0xf0]  ;;  %v2031_v63 = vld [vmem:[%s2225_s17 + $0x4] sm:$0xf]  ;;  %v489_v8 = vrot.slane %v487_v55, 4 }
  0x19   : > { %391 = vmatpush.bf16.msra.mxu1 %v2051_v13  ;;  %v471_v54 = vsel %vm2270_vm2, %v2274_v45, %v470_v43  ;;  %v1593_v0 = vld [vmem:[%s2225_s17 + $0x10] sm:$0xf0]  ;;  %v2055_v5 = vld [vmem:[%s2560_s1 + $0x80] sm:$0xff]  ;;  %v430_v7 = vld [vmem:[%s2225_s17 + $0x28] sm:$0x11]  ;;  %v492_v9 = vrot.slane %v490_v56, 5  ;;  %v1592_v13 = vor.u32 %v2032_v62, %v1591_v59  ;;  %v479_v17 = vor.u32 %v478_v61, %v475_v60 }
  0x1a   : > { %720 = vmatpush.bf16.msra.mxu2 %v2059_v14  ;;  %v452_v41 = vrot.slane %v451_v34, 4  ;;  %v591_v2 = vunpack.c.l.b16 %v471_v54  ;;  %v592_v4 = vunpack.c.h.b16 %v471_v54  ;;  %v2063_v6 = vld [vmem:[%s2560_s1 + $0xc0] sm:$0xff]  ;;  %v2102_v10 = vld [vmem:[%s2560_s1 + $0x1b8] sm:$0xff]  ;;  %v1596_v14 = vor.u32 %v2031_v63, %v1593_v0  ;;  %v2093_v29 = vld [vmem:[%s2560_s1 + $0x170] sm:$0xff] }
  0x1b   : > { %749 = vmatpush.bf16.msra.mxu3 %v2067_v15  ;;  %v2110_v11 = vld [vmem:[%s2560_s1 + $0x1f8] sm:$0xff]  ;;  %v482_v18 = vshll.u32 %v430_v7, 16  ;;  %v493_v21 = vor.u32 %v492_v9, %v489_v8  ;;  %v2330_v25 = vrot.slane %v479_v17, 4  ;;  %v435_v32 = vld [vmem:[%s2225_s17 + $0x50] sm:$0xff]  ;;  %v2100_v33 = vld [vmem:[%s2560_s1 + $0x1a8] sm:$0xff] }
  0x1c   : > { %363 = vmatpush.bf16.msra.mxu0 %v2042_v23  ;;  %v457_v53 = vsel %vm2270_vm2, %v452_v41, %v456_v42  ;;  %v432_v12 = vld [vmem:[%s2225_s17 + $0x38] sm:$0x11]  ;;  %v2101_v23 = vld [vmem:[%s2560_s1 + $0x1b0] sm:$0xff]  ;;  %v2108_v34 = vld [vmem:[%s2560_s1 + $0x1e8] sm:$0xff]  ;;  %v515_v38 = vshrl.u32 %v435_v32, 16 }
  0x1d   : > { %392 = vmatpush.bf16.msra.mxu1 %v2050_v24  ;;  %v589_v1 = vunpack.c.l.b16 %v457_v53  ;;  %v590_v3 = vunpack.c.h.b16 %v457_v53  ;;  %v2086_v19 = vld [vmem:[%s2560_s1 + $0x138] sm:$0xff]  ;;  %v496_v22 = vshll.u32 %v432_v12, 16  ;;  %v2109_v24 = vld [vmem:[%s2560_s1 + $0x1f0] sm:$0xff]  ;;  %v484_v26 = vrot.slane %v482_v18, 5  ;;  %v2084_v41 = vld [vmem:[%s2560_s1 + $0x128] sm:$0xff] }
  0x1e   : > { %721 = vmatpush.bf16.msra.mxu2 %v2058_v27  ;;  %v2094_v20 = vld [vmem:[%s2560_s1 + $0x178] sm:$0xff]  ;;  %v433_v27 = vld [vmem:[%s2225_s17 + $0x40] sm:$0xff]  ;;  %v2339_v30 = vrot.slane %v493_v21, 4  ;;  %v2092_v42 = vld [vmem:[%s2560_s1 + $0x168] sm:$0xff]  ;;  %v517_v59 = vrot.slane %v515_v38, 4 }
  0x1f   : > { %750 = vmatpush.bf16.msra.mxu3 %v2066_v28  ;;  %v605_v15 = vpack.c.b16 %v591_v2, %v589_v1  ;;  %v606_v16 = vpack.c.b16 %v592_v4, %v590_v3  ;;  %v2085_v28 = vld [vmem:[%s2560_s1 + $0x130] sm:$0xff]  ;;  %v498_v31 = vrot.slane %v496_v22, 5  ;;  %v485_v37 = vsel %vm2270_vm2, %v2330_v25, %v484_v26  ;;  %v1599_v43 = vld [vmem:[%s2225_s17 + $0x20] sm:$0xf]  ;;  %v2098_v63 = vld [vmem:[%s2560_s1 + $0x198] sm:$0xff] }
  0x20   : > { %364 = vmatpush.bf16.msra.mxu0 %v2041_v35  ;;  %v501_v35 = vshrl.u32 %v433_v27, 16  ;;  %v2034_v46 = vld [vmem:[%s2225_s17 + $0x2c] sm:$0xf0]  ;;  %v2099_v47 = vld [vmem:[%s2560_s1 + $0x1a0] sm:$0xff]  ;;  %v2106_v0 = vld [vmem:[%s2560_s1 + $0x1d8] sm:$0xff] }
  0x21   : > { %393 = vmatpush.bf16.msra.mxu1 %v2049_v36  ;;  %v504_v36 = vshll.u32 %v433_v27, 16  ;;  %v2107_v48 = vld [vmem:[%s2560_s1 + $0x1e0] sm:$0xff]  ;;  %v1600_v1 = vor.u32 %v2034_v46, %v1599_v43  ;;  %v2082_v9 = vld [vmem:[%s2560_s1 + $0x118] sm:$0xff]  ;;  %v2105_v12 = vld [vmem:[%s2560_s1 + $0x1d0] sm:$0xff] }
  0x22   : > { %722 = vmatpush.bf16.msra.mxu2 %v2057_v39  ;;  %v518_v39 = vshll.u32 %v435_v32, 16  ;;  %v503_v53 = vrot.slane %v501_v35, 4  ;;  %v2083_v61 = vld [vmem:[%s2560_s1 + $0x120] sm:$0xff]  ;;  %v2081_v17 = vld [vmem:[%s2560_s1 + $0x110] sm:$0xff]  ;;  %v2096_v21 = vld [vmem:[%s2560_s1 + $0x188] sm:$0xff] }
  0x23   : > { %751 = vmatpush.bf16.msra.mxu3 %v2065_v40  ;;  %v499_v40 = vsel %vm2270_vm2, %v2339_v30, %v498_v31  ;;  %v506_v54 = vrot.slane %v504_v36, 5  ;;  %v2091_v62 = vld [vmem:[%s2560_s1 + $0x160] sm:$0xff]  ;;  %v2089_v18 = vld [vmem:[%s2560_s1 + $0x150] sm:$0xff]  ;;  %v2104_v22 = vld [vmem:[%s2560_s1 + $0x1c8] sm:$0xff] }
  0x24   : > { %365 = vmatpush.bf16.msra.mxu0 %v2040_v49  ;;  %v2033_v49 = vld [vmem:[%s2225_s17 + $0x24] sm:$0xf]  ;;  %v595_v55 = vunpack.c.l.b16 %v499_v40  ;;  %v596_v56 = vunpack.c.h.b16 %v499_v40  ;;  %v520_v60 = vrot.slane %v518_v39, 5  ;;  %v2080_v31 = vld [vmem:[%s2560_s1 + $0x108] sm:$0xff]  ;;  %v1607_v35 = vld [vmem:[%s2225_s17 + $0x40] sm:$0xf] }
  0x25   : > { %394 = vmatpush.bf16.msra.mxu1 %v2048_v50  ;;  %v1601_v50 = vld [vmem:[%s2225_s17 + $0x30] sm:$0xf0]  ;;  %v507_v7 = vor.u32 %v506_v54, %v503_v53  ;;  %v2088_v32 = vld [vmem:[%s2560_s1 + $0x148] sm:$0xff]  ;;  %v2036_v36 = vld [vmem:[%s2225_s17 + $0x4c] sm:$0xf0] }
  0x26   : > { %723 = vmatpush.bf16.msra.mxu2 %v2056_v51  ;;  %v593_v51 = vunpack.c.l.b16 %v485_v37  ;;  %v1604_v2 = vor.u32 %v2033_v49, %v1601_v50  ;;  %v521_v8 = vor.u32 %v520_v60, %v517_v59  ;;  %v1609_v38 = vld [vmem:[%s2225_s17 + $0x50] sm:$0xf0]  ;;  %v2079_v49 = vld [vmem:[%s2560_s1 + $0x100] sm:$0xff]  ;;  %v1608_v53 = vor.u32 %v2036_v36, %v1607_v35  ;;  %v1922_v35 = vld [vmem:[%s2225_s17 + $0x38] sm:$0x11] }
  0x27   : > { %752 = vmatpush.bf16.msra.mxu3 %v2064_v52  ;;  %v594_v52 = vunpack.c.h.b16 %v485_v37  ;;  %v2035_v37 = vld [vmem:[%s2225_s17 + $0x44] sm:$0xf]  ;;  %v1924_v36 = vld [vmem:[%s2225_s17 + $0x48] sm:$0x11] }
  0x28   : > { %366 = vmatpush.bf16.msra.mxu0 %v2039_v57  ;;  %v434_v57 = vld [vmem:[%s2225_s17 + $0x48] sm:$0x11]  ;;  %v2087_v50 = vld [vmem:[%s2560_s1 + $0x140] sm:$0xff]  ;;  %v1612_v54 = vor.u32 %v2035_v37, %v1609_v38 }
  0x29   : > { %395 = vmatpush.bf16.msra.mxu1 %v2047_v58  ;;  %v436_v58 = vld [vmem:[%s2225_s17 + $0x58] sm:$0x11]  ;;  %v510_v3 = vshll.u32 %v434_v57, 16 }
  0x2a   : > { %724 = vmatpush.bf16.msra.mxu2 %v2055_v5  ;;  %v524_v4 = vshll.u32 %v436_v58, 16  ;;  %v607_v5 = vpack.c.b16 %v595_v55, %v593_v51  ;;  %v438_v51 = vld [vmem:[%s2225_s17 + $0x68] sm:$0x11] }
  0x2b   : > { %753 = vmatpush.bf16.msra.mxu3 %v2063_v6  ;;  %367 = vmatmul.bf16.vlgmr.msra.gmra.mxu0 %v1592_v13  ;;  %v608_v6 = vpack.c.b16 %v596_v56, %v594_v52  ;;  %v2396_v13 = vrot.slane %v507_v7, 4  ;;  %v440_v52 = vld [vmem:[%s2225_s17 + $0x78] sm:$0x11]  ;;  %v538_v58 = vshll.u32 %v438_v51, 16 }
  0x2c   : > { %396 = vmatmul.bf16.vlgmr.msra.gmra.mxu1 %v1596_v14  ;;  %977 = vmatpush.bf16.msrb.mxu0 %v2086_v19  ;;  %v512_v14 = vrot.slane %v510_v3, 5  ;;  %v437_v19 = vld [vmem:[%s2225_s17 + $0x60] sm:$0xff]  ;;  %v552_v60 = vshll.u32 %v440_v52, 16 }
  0x2d   : > { %725 = vmatmul.bf16.vlgmr.msra.gmra.mxu2 %v605_v15  ;;  %1006 = vmatpush.bf16.msrb.mxu1 %v2094_v20  ;;  %v2398_v15 = vrot.slane %v521_v8, 4  ;;  %v439_v20 = vld [vmem:[%s2225_s17 + $0x70] sm:$0xff]  ;;  %v529_v26 = vshrl.u32 %v437_v19, 16  ;;  %v532_v27 = vshll.u32 %v437_v19, 16  ;;  %v1615_v3 = vld [vmem:[%s2225_s17 + $0x60] sm:$0xf] }
  0x2e   : > { %1348 = vmatpush.bf16.msrb.mxu2 %v2102_v10  ;;  %754 = vmatmul.bf16.vlgmr.msra.gmra.mxu3 %v606_v16  ;;  %v2090_v10 = vld [vmem:[%s2560_s1 + $0x158] sm:$0xff]  ;;  %v526_v16 = vrot.slane %v524_v4, 5  ;;  %v2038_v4 = vld [vmem:[%s2225_s17 + $0x6c] sm:$0xf0] }
  0x2f   : > { %1377 = vmatpush.bf16.msrb.mxu3 %v2110_v11  ;;  %v2097_v11 = vld [vmem:[%s2560_s1 + $0x190] sm:$0xff]  ;;  %v531_v43 = vrot.slane %v529_v26, 4  ;;  %v534_v46 = vrot.slane %v532_v27, 5  ;;  %v2072_v27 = vld [vmem:[%s2225_s17 + $0x1c] sm:$0xf0] }
  0x30   : > { %978 = vmatpush.bf16.msrb.mxu0 %v2085_v28  ;;  %v543_v28 = vshrl.u32 %v439_v20, 16  ;;  %v1823_v26 = vld [vmem:[%s2225_s17 + $0x10] sm:$0xf] }
  0x31   : > { %1007 = vmatpush.bf16.msrb.mxu1 %v2093_v29  ;;  %v546_v29 = vshll.u32 %v439_v20, 16  ;;  %v535_v57 = vor.u32 %v534_v46, %v531_v43  ;;  %v1824_v37 = vor.u32 %v2072_v27, %v1823_v26 }
  0x32   : > { %1349 = vmatpush.bf16.msrb.mxu2 %v2101_v23  ;;  %v513_v23 = vsel %vm2270_vm2, %v2396_v13, %v512_v14  ;;  %v1616_v14 = vor.u32 %v2038_v4, %v1615_v3 }
  0x33   : > { %1378 = vmatpush.bf16.msrb.mxu3 %v2109_v24  ;;  %v527_v24 = vsel %vm2270_vm2, %v2398_v15, %v526_v16  ;;  %v597_v39 = vunpack.c.l.b16 %v513_v23 }
  0x34   : > { %979 = vmatpush.bf16.msrb.mxu0 %v2084_v41  ;;  %v599_v40 = vunpack.c.l.b16 %v527_v24  ;;  %v598_v41 = vunpack.c.h.b16 %v513_v23 }
  0x35   : > { %1008 = vmatpush.bf16.msrb.mxu1 %v2092_v42  ;;  %v600_v42 = vunpack.c.h.b16 %v527_v24 }
  0x36   : > { %1350 = vmatpush.bf16.msrb.mxu2 %v2100_v33  ;;  %v2095_v33 = vld [vmem:[%s2560_s1 + $0x180] sm:$0xff]  ;;  %v609_v55 = vpack.c.b16 %v599_v40, %v597_v39  ;;  %v1113_v40 = vshll.u32 %v1922_v35, 16 }
  0x37   : > { %1379 = vmatpush.bf16.msrb.mxu3 %v2108_v34  ;;  %v2103_v34 = vld [vmem:[%s2560_s1 + $0x1c0] sm:$0xff]  ;;  %v610_v56 = vpack.c.b16 %v600_v42, %v598_v41 }
  0x38   : > { %980 = vmatpush.bf16.msrb.mxu0 %v2083_v61  ;;  %v2444_v61 = vrot.slane %v535_v57, 4  ;;  %v1115_v41 = vrot.slane %v1113_v40, 5  ;;  %v1849_v35 = vld [vmem:[%s2225_s17 + $0x80] sm:$0xf0] }
  0x39   : > { %1009 = vmatpush.bf16.msrb.mxu1 %v2091_v62  ;;  %v540_v62 = vrot.slane %v538_v58, 5 }
  0x3a   : > { %1351 = vmatpush.bf16.msrb.mxu2 %v2099_v47  ;;  %v545_v47 = vrot.slane %v543_v28, 4  ;;  %v2071_v28 = vld [vmem:[%s2225_s17 + $0x14] sm:$0xf]  ;;  %v1116_v43 = vsel %vm2270_vm2, %v2339_v30, %v1115_v41 }
  0x3b   : > { %1380 = vmatpush.bf16.msrb.mxu3 %v2107_v48  ;;  %372 = vmatmul.bf16.gmra.mxu0 %v1600_v1  ;;  %v548_v48 = vrot.slane %v546_v29, 5  ;;  %v541_v1 = vsel %vm2270_vm2, %v2444_v61, %v540_v62  ;;  %v1825_v29 = vld [vmem:[%s2225_s17 + $0x20] sm:$0xf0]  ;;  %v1224_v51 = vunpack.c.l.b16 %v1116_v43 }
  0x3c   : > { %401 = vmatmul.bf16.gmra.mxu1 %v1604_v2  ;;  %981 = vmatpush.bf16.msrb.mxu0 %v2082_v9  ;;  %v601_v7 = vunpack.c.l.b16 %v541_v1  ;;  %v602_v9 = vunpack.c.h.b16 %v541_v1  ;;  %v1828_v38 = vor.u32 %v2071_v28, %v1825_v29  ;;  %v1931_v1 = vld [vmem:[%s2225_s17 + $0x80] sm:$0xff] }
  0x3d   : > { %730 = vmatmul.bf16.gmra.mxu2 %v607_v5  ;;  %1010 = vmatpush.bf16.msrb.mxu1 %v2090_v10  ;;  %v549_v59 = vor.u32 %v548_v48, %v545_v47  ;;  %v2037_v5 = vld [vmem:[%s2225_s17 + $0x64] sm:$0xf]  ;;  %v1831_v47 = vld [vmem:[%s2225_s17 + $0x30] sm:$0xf]  ;;  %v2074_v48 = vld [vmem:[%s2225_s17 + $0x3c] sm:$0xf0] }
  0x3e   : > { %1352 = vmatpush.bf16.msrb.mxu2 %v2098_v63  ;;  %759 = vmatmul.bf16.gmra.mxu3 %v608_v6  ;;  %v1617_v6 = vld [vmem:[%s2225_s17 + $0x70] sm:$0xf0]  ;;  %v1832_v57 = vor.u32 %v2074_v48, %v1831_v47  ;;  %v1174_v4 = vshrl.u32 %v1931_v1, 16 }
  0x3f   : > { %1381 = vmatpush.bf16.msrb.mxu3 %v2106_v0  ;;  %v2446_v63 = vrot.slane %v549_v59, 4  ;;  %v554_v0 = vrot.slane %v552_v60, 5  ;;  %v1620_v16 = vor.u32 %v2037_v5, %v1617_v6  ;;  %v1177_v5 = vshll.u32 %v1931_v1, 16  ;;  %v1839_v6 = vld [vmem:[%s2225_s17 + $0x50] sm:$0xf] }
  0x40   : > { %982 = vmatpush.bf16.msrb.mxu0 %v2081_v17 }
  0x41   : > { %1011 = vmatpush.bf16.msrb.mxu1 %v2089_v18  ;;  %v555_v2 = vsel %vm2270_vm2, %v2446_v63, %v554_v0 }
  0x42   : > { %1353 = vmatpush.bf16.msrb.mxu2 %v2097_v11  ;;  %v603_v8 = vunpack.c.l.b16 %v555_v2  ;;  %v604_v10 = vunpack.c.h.b16 %v555_v2  ;;  %v1918_v11 = vld [vmem:[%s2225_s17 + $0x18] sm:$0x11] }
  0x43   : > { %1382 = vmatpush.bf16.msrb.mxu3 %v2105_v12  ;;  %v1920_v12 = vld [vmem:[%s2225_s17 + $0x28] sm:$0x11]  ;;  %v1085_v19 = vshll.u32 %v1918_v11, 16 }
  0x44   : > { %983 = vmatpush.bf16.msrb.mxu0 %v2080_v31  ;;  %v611_v17 = vpack.c.b16 %v603_v8, %v601_v7  ;;  %v612_v18 = vpack.c.b16 %v604_v10, %v602_v9  ;;  %v1099_v20 = vshll.u32 %v1920_v12, 16  ;;  %v2076_v7 = vld [vmem:[%s2225_s17 + $0x5c] sm:$0xf0]  ;;  %v2075_v8 = vld [vmem:[%s2225_s17 + $0x54] sm:$0xf] }
  0x45   : > { %1012 = vmatpush.bf16.msrb.mxu1 %v2088_v32  ;;  %v1841_v9 = vld [vmem:[%s2225_s17 + $0x60] sm:$0xf0] }
  0x46   : > { %1354 = vmatpush.bf16.msrb.mxu2 %v2096_v21  ;;  %v1087_v21 = vrot.slane %v1085_v19, 5  ;;  %v1932_v19 = vld [vmem:[%s2225_s17 + $0x88] sm:$0x11] }
  0x47   : > { %1383 = vmatpush.bf16.msrb.mxu3 %v2104_v22  ;;  %v1101_v22 = vrot.slane %v1099_v20, 5  ;;  %v1840_v20 = vor.u32 %v2076_v7, %v1839_v6 }
  0x48   : > { %984 = vmatpush.bf16.msrb.mxu0 %v2079_v49  ;;  %v1088_v23 = vsel %vm2270_vm2, %v2274_v45, %v1087_v21  ;;  %v2073_v49 = vld [vmem:[%s2225_s17 + $0x34] sm:$0xf] }
  0x49   : > { %1013 = vmatpush.bf16.msrb.mxu1 %v2087_v50  ;;  %v1102_v24 = vsel %vm2270_vm2, %v2330_v25, %v1101_v22  ;;  %v1220_v31 = vunpack.c.l.b16 %v1088_v23  ;;  %v1127_v25 = vshll.u32 %v1924_v36, 16  ;;  %v1833_v50 = vld [vmem:[%s2225_s17 + $0x40] sm:$0xf0] }
  0x4a   : > { %1355 = vmatpush.bf16.msrb.mxu2 %v2095_v33  ;;  %v1222_v32 = vunpack.c.l.b16 %v1102_v24  ;;  %v1221_v33 = vunpack.c.h.b16 %v1088_v23  ;;  %v1836_v58 = vor.u32 %v2073_v49, %v1833_v50 }
  0x4b   : > { %1384 = vmatpush.bf16.msrb.mxu3 %v2103_v34  ;;  %377 = vmatmul.bf16.gmra.mxu0 %v1608_v53  ;;  %v1223_v34 = vunpack.c.h.b16 %v1102_v24  ;;  %v1129_v42 = vrot.slane %v1127_v25, 5  ;;  %v1225_v53 = vunpack.c.h.b16 %v1116_v43  ;;  %v1183_v24 = vshll.u32 %v1932_v19, 16 }
  0x4c   : > { %406 = vmatmul.bf16.gmra.mxu1 %v1612_v54  ;;  %v1236_v45 = vpack.c.b16 %v1222_v32, %v1220_v31  ;;  %v1847_v32 = vld [vmem:[%s2225_s17 + $0x70] sm:$0xf] }
  0x4d   : > { %735 = vmatmul.bf16.gmra.mxu2 %v609_v55  ;;  %v1237_v39 = vpack.c.b16 %v1223_v34, %v1221_v33  ;;  %v1130_v46 = vsel %vm2270_vm2, %v2396_v13, %v1129_v42  ;;  %v1926_v55 = vld [vmem:[%s2225_s17 + $0x58] sm:$0x11]  ;;  %v1185_v28 = vrot.slane %v1183_v24, 5  ;;  %v2078_v33 = vld [vmem:[%s2225_s17 + $0x7c] sm:$0xf0] }
  0x4e   : > { %764 = vmatmul.bf16.gmra.mxu3 %v610_v56  ;;  %v1226_v52 = vunpack.c.l.b16 %v1130_v46  ;;  %v1227_v54 = vunpack.c.h.b16 %v1130_v46  ;;  %v1928_v56 = vld [vmem:[%s2225_s17 + $0x68] sm:$0x11]  ;;  %v1141_v60 = vshll.u32 %v1926_v55, 16  ;;  %v2077_v34 = vld [vmem:[%s2225_s17 + $0x74] sm:$0xf] }
  0x4f   : > { %v1155_v13 = vshll.u32 %v1928_v56, 16  ;;  %v1852_v40 = vor.u32 %v2077_v34, %v1849_v35 }
  0x50   : > { %v1238_v59 = vpack.c.b16 %v1226_v52, %v1224_v51  ;;  %v1239_v30 = vpack.c.b16 %v1227_v54, %v1225_v53  ;;  %v1143_v62 = vrot.slane %v1141_v60, 5 }
  0x51   : > { %v1157_v0 = vrot.slane %v1155_v13, 5 }
  0x52   : > { %v1144_v2 = vsel %vm2270_vm2, %v2398_v15, %v1143_v62  ;;  %v1844_v15 = vor.u32 %v2075_v8, %v1841_v9 }
  0x53   : > { %v1158_v3 = vsel %vm2270_vm2, %v2444_v61, %v1157_v0  ;;  %v1228_v10 = vunpack.c.l.b16 %v1144_v2  ;;  %v1229_v12 = vunpack.c.h.b16 %v1144_v2 }
  0x54   : > { %v1230_v11 = vunpack.c.l.b16 %v1158_v3 }
  0x56   : > { %v1240_v21 = vpack.c.b16 %v1230_v11, %v1228_v10 }
  0x5b   : > { %382 = vmatmul.bf16.gmra.mxu0 %v1616_v14  ;;  %v1231_v14 = vunpack.c.h.b16 %v1158_v3 }
  0x5c   : > { %411 = vmatmul.bf16.gmra.mxu1 %v1620_v16  ;;  %v1176_v16 = vrot.slane %v1174_v4, 4 }
  0x5d   : > { %740 = vmatmul.bf16.gmra.mxu2 %v611_v17  ;;  %v1179_v17 = vrot.slane %v1177_v5, 5  ;;  %v1241_v61 = vpack.c.b16 %v1231_v14, %v1229_v12 }
  0x5e   : > { %769 = vmatmul.bf16.gmra.mxu3 %v612_v18  ;;  %v1930_v18 = vld [vmem:[%s2225_s17 + $0x78] sm:$0x11]  ;;  %s1586_s17 = sshll.u32 %s2177_s13, 3 }
  0x5f   : > { %v1169_v22 = vshll.u32 %v1930_v18, 16  ;;  %v1180_v23 = vor.u32 %v1179_v17, %v1176_v16  ;;  %p174_p4 = scmp.lt.s32.totalorder %s1586_s17, 15 }
  0x61   : > { %v1171_v26 = vrot.slane %v1169_v22, 5  ;;  %v1181_v27 = vrot.slane %v1180_v23, 4  ;;  %s2566_s17 = smov (!%p174_p4, %s1586_s17), 15 }
  0x62   : > { %s1587_s4 = sshll.u32 %s2566_s17, 2 }
  0x63   : > { %v1172_v29 = vsel %vm2270_vm2, %v2446_v63, %v1171_v26  ;;  %v1186_v31 = vsel %vm2270_vm2, %v1181_v27, %v1185_v28  ;;  %s2534_s6 = scalar_lea.vmem %s2561_s2, %s1587_s4 }
  0x64   : > { %v1232_v36 = vunpack.c.l.b16 %v1172_v29 }
  0x6b   : > { %985 = vmatmul.bf16.vlgmr.msrb.gmra.mxu0 %v1824_v37  ;;  %v1234_v37 = vunpack.c.l.b16 %v1186_v31 }
  0x6c   : > { %1014 = vmatmul.bf16.vlgmr.msrb.gmra.mxu1 %v1828_v38  ;;  %v1233_v38 = vunpack.c.h.b16 %v1172_v29 }
  0x6d   : > { %1356 = vmatmul.bf16.vlgmr.msrb.gmra.mxu2 %v1236_v45  ;;  %v1235_v45 = vunpack.c.h.b16 %v1186_v31  ;;  %v1242_v25 = vpack.c.b16 %v1234_v37, %v1232_v36 }
  0x6e   : > { %1385 = vmatmul.bf16.vlgmr.msrb.gmra.mxu3 %v1237_v39  ;;  %v1848_v39 = vor.u32 %v2078_v33, %v1847_v32 }
  0x6f   : > { %v1243_v41 = vpack.c.b16 %v1235_v45, %v1233_v38 }
  0x7b   : > { %990 = vmatmul.bf16.gmra.mxu0 %v1832_v57 }
  0x7c   : > { %1019 = vmatmul.bf16.gmra.mxu1 %v1836_v58 }
  0x7d   : > { %1361 = vmatmul.bf16.gmra.mxu2 %v1238_v59 }
  0x7e   : > { %1390 = vmatmul.bf16.gmra.mxu3 %v1239_v30 }
  0x8b   : > { %995 = vmatmul.bf16.gmra.mxu0 %v1840_v20 }
  0x8c   : > { %1024 = vmatmul.bf16.gmra.mxu1 %v1844_v15 }
  0x8d   : > { %1366 = vmatmul.bf16.gmra.mxu2 %v1240_v21 }
  0x8e   : > { %1395 = vmatmul.bf16.gmra.mxu3 %v1241_v61 }
  0x9b   : > { %1000 = vmatmul.bf16.gmra.mxu0 %v1848_v39 }
  0x9c   : > { %1029 = vmatmul.bf16.gmra.mxu1 %v1852_v40 }
  0x9d   : > { %1371 = vmatmul.bf16.gmra.mxu2 %v1242_v25 }
  0x9e   : > { %1400 = vmatmul.bf16.gmra.mxu3 %v1243_v41 }
  0xa8   : > { %v368_v63 = vpop.f32.mrf.mxu0 }
  0xa9   : > { %v397_v42 = vpop.f32.mrf.mxu1 }
  0xaa   : > { %v398_v44 = vadd.f32 %v397_v42, %v368_v63 }
  0xb0   : > { %v726_v43 = vpop.f32.mrf.mxu2  ;;  %v370_v48 = vpop.f32.mrf.mxu0 }
  0xb1   : > { %v755_v46 = vpop.f32.mrf.mxu3  ;;  %v399_v49 = vpop.f32.mrf.mxu1 }
  0xb2   : > { %v756_v47 = vadd.f32 %v755_v46, %v726_v43  ;;  %v400_v31 = vadd.f32 %v399_v49, %v370_v48 }
  0xb4   : > { %v783_v50 = vadd.f32 %v756_v47, %v398_v44 }
  0xb8   : > { %v728_v51 = vpop.f32.mrf.mxu2  ;;  %v373_v53 = vpop.f32.mrf.mxu0 }
  0xb9   : > { %v757_v52 = vpop.f32.mrf.mxu3  ;;  %v402_v54 = vpop.f32.mrf.mxu1 }
  0xba   : > { %v403_v55 = vadd.f32 %v402_v54, %v373_v53  ;;  %v758_v29 = vadd.f32 %v757_v52, %v728_v51 }
  0xbc   : > { %v784_v34 = vadd.f32 %v758_v29, %v400_v31 }
  0xc0   : > { %v731_v56 = vpop.f32.mrf.mxu2  ;;  %v2506_v59 = vpop.f32.mrf.mxu0 }
  0xc1   : > { %v760_v57 = vpop.f32.mrf.mxu3  ;;  %v2508_v30 = vpop.f32.mrf.mxu1 }
  0xc2   : > { %v761_v58 = vadd.f32 %v760_v57, %v731_v56  ;;  %v405_v56 = vadd.f32 %v2508_v30, %v2506_v59 }
  0xc4   : > { %v785_v60 = vadd.f32 %v761_v58, %v403_v55 }
  0xc8   : > { %v733_v13 = vpop.f32.mrf.mxu2  ;;  %v378_v0 = vpop.f32.mrf.mxu0 }
  0xc9   : > { %v762_v62 = vpop.f32.mrf.mxu3  ;;  %v407_v1 = vpop.f32.mrf.mxu1 }
  0xca   : > { %v408_v2 = vadd.f32 %v407_v1, %v378_v0  ;;  %v763_v52 = vadd.f32 %v762_v62, %v733_v13 }
  0xd0   : > { %v736_v3 = vpop.f32.mrf.mxu2  ;;  %v2510_v6 = vpop.f32.mrf.mxu0 }
  0xd1   : > { %v765_v4 = vpop.f32.mrf.mxu3  ;;  %v2512_v7 = vpop.f32.mrf.mxu1 }
  0xd2   : > { %v766_v5 = vadd.f32 %v765_v4, %v736_v3  ;;  %v410_v29 = vadd.f32 %v2512_v7, %v2510_v6 }
  0xd4   : > { %v2514_v8 = vadd.f32 %v766_v5, %v408_v2  ;;  %v786_v2 = vadd.f32 %v763_v52, %v405_v56 }
  0xd8   : > { %v2516_v9 = vpop.f32.mrf.mxu2  ;;  %v383_v11 = vpop.f32.mrf.mxu0 }
  0xd9   : > { %v2518_v10 = vpop.f32.mrf.mxu3  ;;  %v412_v12 = vpop.f32.mrf.mxu1 }
  0xda   : > { %v413_v14 = vadd.f32 %v412_v12, %v383_v11 }
  0xe0   : > { %v741_v16 = vpop.f32.mrf.mxu2  ;;  %v2520_v19 = vpop.f32.mrf.mxu0 }
  0xe1   : > { %v770_v17 = vpop.f32.mrf.mxu3  ;;  %v2522_v20 = vpop.f32.mrf.mxu1 }
  0xe2   : > { %v771_v18 = vadd.f32 %v770_v17, %v741_v16 }
  0xe4   : > { %v2524_v15 = vadd.f32 %v771_v18, %v413_v14 }
  0xe8   : > { %v2526_v21 = vpop.f32.mrf.mxu2  ;;  %v986_v22 = vpop.f32.mrf.mxu0 }
  0xe9   : > { %v2528_v61 = vpop.f32.mrf.mxu3  ;;  %v1015_v23 = vpop.f32.mrf.mxu1 }
  0xea   : > { %v1016_v32 = vadd.f32 %v1015_v23, %v986_v22 }
  0xec   : > { %v1043_v38 = vadd.f32 %v1016_v32, %v783_v50 }
  0xf0   : > { %v1357_v24 = vpop.f32.mrf.mxu2  ;;  %v988_v27 = vpop.f32.mrf.mxu0 }
  0xf1   : > { %v1386_v26 = vpop.f32.mrf.mxu3  ;;  %v1017_v28 = vpop.f32.mrf.mxu1 }
  0xf2   : > { %v1018_v33 = vadd.f32 %v1017_v28, %v988_v27  ;;  %v1387_v35 = vadd.f32 %v1386_v26, %v1357_v24  ;;  %v768_v26 = vadd.f32 %v2518_v10, %v2516_v9 }
  0xf4   : > { %v1044_v45 = vadd.f32 %v1018_v33, %v784_v34  ;;  %v1414_v41 = vadd.f32 %v1387_v35, %v1043_v38  ;;  %v788_v35 = vadd.f32 %v768_v26, %v410_v29 }
  0xf6   : > { %v1468_v53 = vmul.f32 %v1414_v41, %v1414_v41 }
  0xf8   : > { %v1359_v36 = vpop.f32.mrf.mxu2  ;;  %v991_v40 = vpop.f32.mrf.mxu0 }
  0xf9   : > { %v1388_v37 = vpop.f32.mrf.mxu3  ;;  %v1020_v25 = vpop.f32.mrf.mxu1 }
  0xfa   : > { %v1389_v39 = vadd.f32 %v1388_v37, %v1359_v36  ;;  %v1021_v44 = vadd.f32 %v1020_v25, %v991_v40 }
  0xfc   : > { %v1415_v63 = vadd.f32 %v1389_v39, %v1044_v45  ;;  %v1045_v48 = vadd.f32 %v1021_v44, %v785_v60 }
  0xfe   : > { %v2114_v42 = vpack.c.bf16 %v1415_v63, %v1414_v41  ;;  %v1469_v47 = vmul.f32 %v1415_v63, %v1415_v63  ;;  %v1454_v54 = vadd.f32 %v1415_v63, %v1414_v41 }
 0x100   : > { %2115 = vst [vmem:[%s2534_s6] sm:$0xff] %v2114_v42   ;;  %v1362_v43 = vpop.f32.mrf.mxu2  ;;  %v993_v50 = vpop.f32.mrf.mxu0  ;;  %v1476_v57 = vadd.f32 %v1469_v47, %v1468_v53 }
 0x101   : > { %v1391_v46 = vpop.f32.mrf.mxu3  ;;  %v1022_v51 = vpop.f32.mrf.mxu1 }
 0x102   : > { %v1392_v49 = vadd.f32 %v1391_v46, %v1362_v43  ;;  %v1023_v1 = vadd.f32 %v1022_v51, %v993_v50  ;;  %v773_v46 = vadd.f32 %v2528_v61, %v2526_v21 }
 0x104   : > { %v1416_v55 = vadd.f32 %v1392_v49, %v1045_v48  ;;  %v1046_v60 = vadd.f32 %v1023_v1, %v786_v2  ;;  %v415_v49 = vadd.f32 %v2522_v20, %v2520_v19 }
 0x106   : > { %v1455_v58 = vadd.f32 %v1454_v54, %v1416_v55  ;;  %v1470_v0 = vmul.f32 %v1416_v55, %v1416_v55  ;;  %v790_v54 = vadd.f32 %v773_v46, %v415_v49 }
 0x108   : > { %v1477_v3 = vadd.f32 %v1476_v57, %v1470_v0  ;;  %v1364_v4 = vpop.f32.mrf.mxu2  ;;  %v996_v12 = vpop.f32.mrf.mxu0 }
 0x109   : > { %v1393_v5 = vpop.f32.mrf.mxu3  ;;  %v1025_v14 = vpop.f32.mrf.mxu1 }
 0x10a   : > { %v1394_v11 = vadd.f32 %v1393_v5, %v1364_v4  ;;  %v1026_v16 = vadd.f32 %v1025_v14, %v996_v12 }
 0x10c   : > { %v1417_v13 = vadd.f32 %v1394_v11, %v1046_v60  ;;  %v1047_v30 = vadd.f32 %v1026_v16, %v2514_v8 }
 0x10e   : > { %v2119_v62 = vpack.c.bf16 %v1417_v13, %v1416_v55  ;;  %v1471_v59 = vmul.f32 %v1417_v13, %v1417_v13  ;;  %v1456_v27 = vadd.f32 %v1455_v58, %v1417_v13 }
 0x110   : > { %2131 = vst [vmem:[%s2534_s6 + $0x8] sm:$0xff] %v2119_v62   ;;  %v1367_v17 = vpop.f32.mrf.mxu2  ;;  %v998_v23 = vpop.f32.mrf.mxu0  ;;  %v1478_v31 = vadd.f32 %v1477_v3, %v1471_v59 }
 0x111   : > { %v1396_v18 = vpop.f32.mrf.mxu3  ;;  %v1027_v24 = vpop.f32.mrf.mxu1 }
 0x112   : > { %v1397_v22 = vadd.f32 %v1396_v18, %v1367_v17  ;;  %v1028_v34 = vadd.f32 %v1027_v24, %v998_v23 }
 0x114   : > { %v1418_v28 = vadd.f32 %v1397_v22, %v1047_v30  ;;  %v1048_v38 = vadd.f32 %v1028_v34, %v788_v35 }
 0x116   : > { %v1457_v32 = vadd.f32 %v1456_v27, %v1418_v28  ;;  %v1472_v33 = vmul.f32 %v1418_v28, %v1418_v28 }
 0x118   : > { %v1479_v36 = vadd.f32 %v1478_v31, %v1472_v33  ;;  %v1369_v37 = vpop.f32.mrf.mxu2  ;;  %v1001_v39 = vpop.f32.mrf.mxu0 }
 0x119   : > { %v1398_v8 = vpop.f32.mrf.mxu3  ;;  %v1030_v40 = vpop.f32.mrf.mxu1 }
 0x11a   : > { %v1399_v45 = vadd.f32 %v1398_v8, %v1369_v37  ;;  %v1031_v10 = vadd.f32 %v1030_v40, %v1001_v39 }
 0x11c   : > { %v1419_v25 = vadd.f32 %v1399_v45, %v1048_v38  ;;  %v1049_v7 = vadd.f32 %v1031_v10, %v2524_v15 }
 0x11e   : > { %v2124_v9 = vpack.c.bf16 %v1419_v25, %v1418_v28  ;;  %v1473_v6 = vmul.f32 %v1419_v25, %v1419_v25  ;;  %v1458_v47 = vadd.f32 %v1457_v32, %v1419_v25 }
 0x120   : > { %2132 = vst [vmem:[%s2534_s6 + $0x10] sm:$0xff] %v2124_v9   ;;  %v1372_v41 = vpop.f32.mrf.mxu2  ;;  %v1003_v44 = vpop.f32.mrf.mxu0  ;;  %v1480_v50 = vadd.f32 %v1479_v36, %v1473_v6 }
 0x121   : > { %v1401_v63 = vpop.f32.mrf.mxu3  ;;  %v1032_v43 = vpop.f32.mrf.mxu1 }
 0x122   : > { %v1402_v42 = vadd.f32 %v1401_v63, %v1372_v41  ;;  %v1033_v53 = vadd.f32 %v1032_v43, %v1003_v44 }
 0x124   : > { %v1420_v48 = vadd.f32 %v1402_v42, %v1049_v7  ;;  %v1050_v57 = vadd.f32 %v1033_v53, %v790_v54 }
 0x126   : > { %v1459_v51 = vadd.f32 %v1458_v47, %v1420_v48  ;;  %v1474_v52 = vmul.f32 %v1420_v48, %v1420_v48 }
 0x128   : > { %v1481_v55 = vadd.f32 %v1480_v50, %v1474_v52  ;;  %v1374_v56 = vpop.f32.mrf.mxu2 }
 0x129   : > { %v1403_v15 = vpop.f32.mrf.mxu3 }
 0x12a   : > { %v1404_v58 = vadd.f32 %v1403_v15, %v1374_v56 }
 0x12c   : > { %v1421_v0 = vadd.f32 %v1404_v58, %v1050_v57 }
 0x12e   : > { %v2129_v1 = vpack.c.bf16 %v1421_v0, %v1420_v48  ;;  %v1460_v21 = vadd.f32 %v1459_v51, %v1421_v0  ;;  %v1475_v61 = vmul.f32 %v1421_v0, %v1421_v0 }
 0x130   : > { %2133 = vst [vmem:[%s2534_s6 + $0x18] sm:$0xff] %v2129_v1   ;;  %v1461_v2 = vrot.slane %v1460_v21, 4  ;;  %v1482_v3 = vadd.f32 %v1481_v55, %v1475_v61 }
 0x132   : > { %v1462_v4 = vadd.f32 %v1461_v2, %v1460_v21  ;;  %v1483_v19 = vrot.slane %v1482_v3, 4 }
 0x134   : > { %v1463_v20 = vrot.slane %v1462_v4, 2  ;;  %v1484_v5 = vadd.f32 %v1483_v19, %v1482_v3 }
 0x136   : > { %v1464_v60 = vadd.f32 %v1463_v20, %v1462_v4  ;;  %v1485_v11 = vrot.slane %v1484_v5, 2 }
 0x138   : > { %v1465_v12 = vrot.slane %v1464_v60, 1  ;;  %v1486_v14 = vadd.f32 %v1485_v11, %v1484_v5 }
 0x13a   : > { %v1487_v13 = vrot.slane %v1486_v14, 1  ;;  %v1466_v62 = vadd.f32 %v1465_v12, %v1464_v60 }
 0x13c   : > { %v1488_v16 = vadd.f32 %v1487_v13, %v1486_v14 }
 0x13e   : > { %v1491_v17 = vsel %vm1490_vm3, %v1466_v62, %v1488_v16 }
 0x13f   : > { %1492 = vst [vmem:[%s182_s10] sm:$0x3] %v1491_v17 }
 0x140 PF: > { %s14_s12 = sadd.s32 1, %s2149_s12  }
 0x141   : > { %p11_p5 = scmp.ge.s32.totalorder %s14_s12, 4  }
 0x143   :  { %13 = sbr.rel (!%p11_p5) target bundleno = 1 (0x1), region = 74 }

// kernel: discriminator_32_forward.9
= control target key start
LH: loop header
LB: loop body
LE: loop exit
PB: predicated region body
PF: predicated region fallthrough
CT: control target
= control target key end

     0   :  { %vm93_vm0 = vcmask 1041408   ;;  %vm95_vm1 = vcmask 1045508   ;;  %vm97_vm2 = vcmask 1043456   ;;  %vm514_vm11 = vcmask 1024   ;;  %s901_s0 = inlined_call_operand.vmem [shape: bf16[2,4096], index: 0, kind: input, shape index: {}]   ;;  %s902_s1 = inlined_call_operand.vmem [shape: f32[1,4096], index: 1, kind: input, shape index: {}]   ;;  %s903_s2 = inlined_call_operand.vmem [shape: f32[1,4096], index: 2, kind: input, shape index: {}]   ;;  %s904_s3 = inlined_call_operand.vmem [shape: f32[1,4096], index: 3, kind: input, shape index: {}]   ;;  %s905_s4 = inlined_call_operand.vmem [shape: f32[2,1], index: 4, kind: output, shape index: {}]  }
   0x1   :  { %v548_v0 = vld [vmem:[%s901_s0] sm:$0xff]  ;;  %v553_v1 = vld [vmem:[%s901_s0 + $0x8] sm:$0xff]  ;;  %v558_v2 = vld [vmem:[%s901_s0 + $0x10] sm:$0xff] }
   0x2   :  { %v563_v3 = vld [vmem:[%s902_s1] sm:$0xff]  ;;  %v21_v4 = vunpack.c.l.bf16 %v548_v0  ;;  %v22_v5 = vunpack.c.h.bf16 %v548_v0  ;;  %v23_v6 = vunpack.c.l.bf16 %v553_v1  ;;  %v24_v7 = vunpack.c.h.bf16 %v553_v1  ;;  %v573_v9 = vld [vmem:[%s902_s1 + $0x8] sm:$0xff]  ;;  %v582_v14 = vld [vmem:[%s902_s1 + $0x10] sm:$0xff] }
   0x3   :  { %v25_v8 = vunpack.c.l.bf16 %v558_v2  ;;  %v37_v10 = vperm.slane %v563_v3, 0  ;;  %v38_v11 = vperm.slane %v563_v3, 1  ;;  %v39_v12 = vperm.slane %v563_v3, 2  ;;  %v595_v23 = vld [vmem:[%s902_s1 + $0x18] sm:$0xff]  ;;  %v683_v0 = vld [vmem:[%s903_s2 + $0x8] sm:$0xff] }
   0x4   :  { %v40_v13 = vperm.slane %v563_v3, 3  ;;  %v41_v15 = vperm.slane %v563_v3, 4  ;;  %v42_v16 = vperm.slane %v563_v3, 5  ;;  %v43_v17 = vperm.slane %v563_v3, 6 }
   0x5   :  { %v44_v18 = vperm.slane %v563_v3, 7  ;;  %v45_v19 = vperm.slane %v573_v9, 0  ;;  %v46_v20 = vperm.slane %v573_v9, 1  ;;  %v47_v21 = vperm.slane %v573_v9, 2 }
   0x6   :  { %v48_v22 = vperm.slane %v573_v9, 3  ;;  %v49_v24 = vperm.slane %v573_v9, 4  ;;  %v50_v25 = vperm.slane %v573_v9, 5  ;;  %v51_v26 = vperm.slane %v573_v9, 6 }
   0x7   :  { %v52_v27 = vperm.slane %v573_v9, 7  ;;  %v53_v28 = vperm.slane %v582_v14, 0  ;;  %v54_v29 = vperm.slane %v582_v14, 1  ;;  %v55_v30 = vperm.slane %v582_v14, 2 }
   0x8   :  { %v56_v31 = vperm.slane %v582_v14, 3  ;;  %v57_v32 = vperm.slane %v582_v14, 4  ;;  %v58_v33 = vperm.slane %v582_v14, 5  ;;  %v59_v34 = vperm.slane %v582_v14, 6 }
   0x9   :  { %v60_v35 = vperm.slane %v582_v14, 7  ;;  %v61_v36 = vperm.slane %v595_v23, 0  ;;  %v62_v37 = vperm.slane %v595_v23, 1  ;;  %v63_v38 = vperm.slane %v595_v23, 2 }
   0xa   :  { %v64_v39 = vperm.slane %v595_v23, 3  ;;  %v65_v40 = vperm.slane %v595_v23, 4  ;;  %v66_v41 = vperm.slane %v595_v23, 5  ;;  %v69_v42 = vrot.slane %v38_v11, 6 }
   0xb   :  { %v70_v43 = vrot.slane %v39_v12, 4  ;;  %v71_v44 = vrot.slane %v40_v13, 2  ;;  %v72_v45 = vrot.slane %v42_v16, 6  ;;  %v73_v46 = vrot.slane %v43_v17, 4  ;;  %v623_v13 = vld [vmem:[%s901_s0 + $0x18] sm:$0xff] }
   0xc   :  { %v74_v47 = vrot.slane %v44_v18, 2  ;;  %v75_v48 = vrot.slane %v46_v20, 6  ;;  %v76_v49 = vrot.slane %v47_v21, 4  ;;  %v77_v50 = vrot.slane %v48_v22, 2 }
   0xd   :  { %v78_v51 = vrot.slane %v50_v25, 6  ;;  %v79_v52 = vrot.slane %v51_v26, 4  ;;  %v80_v53 = vrot.slane %v52_v27, 2  ;;  %v81_v54 = vrot.slane %v54_v29, 6 }
   0xe   :  { %v82_v55 = vrot.slane %v55_v30, 4  ;;  %v83_v56 = vrot.slane %v56_v31, 2  ;;  %v84_v57 = vrot.slane %v58_v33, 6  ;;  %v85_v58 = vrot.slane %v59_v34, 4 }
   0xf   :  { %v86_v59 = vrot.slane %v60_v35, 2  ;;  %v67_v60 = vperm.slane %v595_v23, 6  ;;  %v87_v61 = vrot.slane %v62_v37, 6  ;;  %v88_v62 = vrot.slane %v63_v38, 4 }
  0x10   :  { %v89_v63 = vrot.slane %v64_v39, 2  ;;  %v94_v3 = vsel %vm93_vm0, %v37_v10, %v69_v42  ;;  %v96_v9 = vsel %vm95_vm1, %v70_v43, %v71_v44  ;;  %v99_v11 = vsel %vm93_vm0, %v41_v15, %v72_v45 }
  0x11   :  { %v100_v12 = vsel %vm95_vm1, %v73_v46, %v74_v47  ;;  %v102_v14 = vsel %vm93_vm0, %v45_v19, %v75_v48  ;;  %v103_v16 = vsel %vm95_vm1, %v76_v49, %v77_v50  ;;  %v105_v17 = vsel %vm93_vm0, %v49_v24, %v78_v51  ;;  %v706_v51 = vld [vmem:[%s903_s2 + $0x18] sm:$0xff] }
  0x12   :  { %v106_v18 = vsel %vm95_vm1, %v79_v52, %v80_v53  ;;  %v108_v10 = vsel %vm93_vm0, %v53_v28, %v81_v54  ;;  %v109_v20 = vsel %vm95_vm1, %v82_v55, %v83_v56  ;;  %v111_v15 = vsel %vm93_vm0, %v57_v32, %v84_v57 }
  0x13   :  { %v112_v21 = vsel %vm95_vm1, %v85_v58, %v86_v59  ;;  %v68_v22 = vperm.slane %v595_v23, 7  ;;  %v90_v25 = vrot.slane %v66_v41, 6  ;;  %v114_v26 = vsel %vm93_vm0, %v61_v36, %v87_v61  ;;  %v651_v36 = vld [vmem:[%s903_s2] sm:$0xff] }
  0x14   :  { %v115_v19 = vsel %vm95_vm1, %v88_v62, %v89_v63  ;;  %v26_v27 = vunpack.c.h.bf16 %v558_v2  ;;  %v27_v24 = vunpack.c.l.bf16 %v623_v13  ;;  %v98_v29 = vsel %vm97_vm2, %v94_v3, %v96_v9  ;;  %v693_v2 = vld [vmem:[%s903_s2 + $0x10] sm:$0xff] }
  0x15   :  { %v101_v28 = vsel %vm97_vm2, %v99_v11, %v100_v12  ;;  %v104_v30 = vsel %vm97_vm2, %v102_v14, %v103_v16  ;;  %v107_v31 = vsel %vm97_vm2, %v105_v17, %v106_v18  ;;  %v110_v32 = vsel %vm97_vm2, %v108_v10, %v109_v20 }
  0x16   :  { %v113_v23 = vsel %vm97_vm2, %v111_v15, %v112_v21  ;;  %v28_v33 = vunpack.c.h.bf16 %v623_v13  ;;  %v645_v34 = vrot.slane %v67_v60, 4  ;;  %v116_v35 = vsel %vm97_vm2, %v114_v26, %v115_v19 }
  0x17   :  { %v653_v37 = vrot.slane %v68_v22, 2  ;;  %v656_v38 = vsel %vm93_vm0, %v65_v40, %v90_v25  ;;  %v660_v39 = vmul.f32 %v98_v29, %v21_v4  ;;  %v664_v41 = vmul.f32 %v101_v28, %v22_v5 }
  0x18   :  { %v668_v42 = vmul.f32 %v104_v30, %v23_v6  ;;  %v672_v43 = vmul.f32 %v107_v31, %v24_v7  ;;  %v676_v40 = vmul.f32 %v110_v32, %v25_v8  ;;  %v678_v44 = vmul.f32 %v113_v23, %v26_v27 }
  0x19   :  { %v685_v4 = vmul.f32 %v116_v35, %v27_v24  ;;  %v144_v5 = vperm.slane %v651_v36, 0  ;;  %v145_v6 = vperm.slane %v651_v36, 1  ;;  %v146_v1 = vperm.slane %v651_v36, 2 }
  0x1a   :  { %v147_v7 = vperm.slane %v651_v36, 3  ;;  %v148_v8 = vperm.slane %v651_v36, 4  ;;  %v149_v45 = vperm.slane %v651_v36, 5  ;;  %v150_v46 = vperm.slane %v651_v36, 6 }
  0x1b   :  { %v151_v47 = vperm.slane %v651_v36, 7  ;;  %v152_v48 = vperm.slane %v683_v0, 0  ;;  %v153_v49 = vperm.slane %v683_v0, 1  ;;  %v154_v50 = vperm.slane %v683_v0, 2 }
  0x1c   :  { %v155_v52 = vperm.slane %v683_v0, 3  ;;  %v156_v53 = vperm.slane %v683_v0, 4  ;;  %v157_v54 = vperm.slane %v683_v0, 5  ;;  %v158_v55 = vperm.slane %v683_v0, 6 }
  0x1d   :  { %v159_v56 = vperm.slane %v683_v0, 7  ;;  %v160_v57 = vperm.slane %v693_v2, 0  ;;  %v161_v58 = vperm.slane %v693_v2, 1  ;;  %v162_v59 = vperm.slane %v693_v2, 2 }
  0x1e   :  { %v163_v60 = vperm.slane %v693_v2, 3  ;;  %v164_v61 = vperm.slane %v693_v2, 4  ;;  %v165_v62 = vperm.slane %v693_v2, 5  ;;  %v166_v63 = vperm.slane %v693_v2, 6 }
  0x1f   :  { %v167_v3 = vperm.slane %v693_v2, 7  ;;  %v168_v9 = vperm.slane %v706_v51, 0  ;;  %v169_v11 = vperm.slane %v706_v51, 1  ;;  %v170_v12 = vperm.slane %v706_v51, 2 }
  0x20   :  { %v171_v14 = vperm.slane %v706_v51, 3  ;;  %v172_v16 = vperm.slane %v706_v51, 4  ;;  %v173_v17 = vperm.slane %v706_v51, 5  ;;  %v174_v18 = vperm.slane %v706_v51, 6 }
  0x21   :  { %v175_v10 = vperm.slane %v706_v51, 7  ;;  %v176_v20 = vrot.slane %v145_v6, 6  ;;  %v177_v15 = vrot.slane %v146_v1, 4  ;;  %v178_v21 = vrot.slane %v147_v7, 2 }
  0x22   :  { %v179_v22 = vrot.slane %v149_v45, 6  ;;  %v180_v25 = vrot.slane %v150_v46, 4  ;;  %v181_v26 = vrot.slane %v151_v47, 2  ;;  %v182_v19 = vrot.slane %v153_v49, 6 }
  0x23   :  { %v183_v27 = vrot.slane %v154_v50, 4  ;;  %v184_v24 = vrot.slane %v155_v52, 2  ;;  %v185_v29 = vrot.slane %v157_v54, 6  ;;  %v186_v28 = vrot.slane %v158_v55, 4  ;;  %v264_v52 = vld [vmem:[%s904_s3] sm:$0xff] }
  0x24   :  { %v187_v30 = vrot.slane %v159_v56, 2  ;;  %v188_v31 = vrot.slane %v161_v58, 6  ;;  %v189_v32 = vrot.slane %v162_v59, 4  ;;  %v190_v23 = vrot.slane %v163_v60, 2 }
  0x25   :  { %v191_v35 = vrot.slane %v165_v62, 6  ;;  %v192_v36 = vrot.slane %v166_v63, 4  ;;  %v200_v0 = vsel %vm93_vm0, %v144_v5, %v176_v20  ;;  %v201_v6 = vsel %vm95_vm1, %v177_v15, %v178_v21 }
  0x26   :  { %v193_v1 = vrot.slane %v167_v3, 2  ;;  %v194_v2 = vrot.slane %v169_v11, 6  ;;  %v195_v7 = vrot.slane %v170_v12, 4  ;;  %v196_v45 = vrot.slane %v171_v14, 2 }
  0x27   :  { %v731_v46 = vrot.slane %v173_v17, 6  ;;  %v733_v47 = vrot.slane %v174_v18, 4  ;;  %v203_v49 = vsel %vm93_vm0, %v148_v8, %v179_v22  ;;  %v204_v50 = vsel %vm95_vm1, %v180_v25, %v181_v26 }
  0x28   :  { %v740_v54 = vrot.slane %v175_v10, 2  ;;  %v202_v5 = vsel %vm97_vm2, %v200_v0, %v201_v6  ;;  %v206_v55 = vsel %vm93_vm0, %v152_v48, %v182_v19  ;;  %v207_v56 = vsel %vm95_vm1, %v183_v27, %v184_v24  ;;  %v265_v24 = vld [vmem:[%s904_s3 + $0x8] sm:$0xff] }
  0x29   :  { %v209_v58 = vsel %vm93_vm0, %v156_v53, %v185_v29  ;;  %v210_v59 = vsel %vm95_vm1, %v186_v28, %v187_v30  ;;  %v212_v8 = vsel %vm93_vm0, %v160_v57, %v188_v31  ;;  %v213_v60 = vsel %vm95_vm1, %v189_v32, %v190_v23 }
  0x2a   :  { %v205_v62 = vsel %vm97_vm2, %v203_v49, %v204_v50  ;;  %v273_v63 = vperm.slane %v264_v52, 1  ;;  %v274_v3 = vperm.slane %v264_v52, 2  ;;  %v275_v11 = vperm.slane %v264_v52, 3 }
  0x2b   :  { %v208_v12 = vsel %vm97_vm2, %v206_v55, %v207_v56  ;;  %v277_v14 = vperm.slane %v264_v52, 5  ;;  %v278_v17 = vperm.slane %v264_v52, 6  ;;  %v279_v48 = vperm.slane %v264_v52, 7 }
  0x2c   :  { %v211_v18 = vsel %vm97_vm2, %v209_v58, %v210_v59  ;;  %v214_v53 = vsel %vm97_vm2, %v212_v8, %v213_v60  ;;  %v215_v10 = vsel %vm93_vm0, %v164_v61, %v191_v35  ;;  %v216_v57 = vsel %vm95_vm1, %v192_v36, %v193_v1 }
  0x2d   :  { %v218_v20 = vsel %vm93_vm0, %v168_v9, %v194_v2  ;;  %v219_v15 = vsel %vm95_vm1, %v195_v7, %v196_v45  ;;  %v232_v21 = vadd.f32 %v202_v5, %v660_v39  ;;  %v233_v22 = vadd.f32 %v205_v62, %v664_v41 }
  0x2e   :  { %v272_v25 = vperm.slane %v264_v52, 0  ;;  %v304_v26 = vrot.slane %v273_v63, 6  ;;  %v305_v19 = vrot.slane %v274_v3, 4  ;;  %v306_v27 = vrot.slane %v275_v11, 2 }
  0x2f   :  { %v276_v29 = vperm.slane %v264_v52, 4  ;;  %v307_v61 = vrot.slane %v277_v14, 6  ;;  %v308_v28 = vrot.slane %v278_v17, 4  ;;  %v309_v30 = vrot.slane %v279_v48, 2 }
  0x30   :  { %v217_v9 = vsel %vm97_vm2, %v215_v10, %v216_v57  ;;  %v220_v31 = vsel %vm97_vm2, %v218_v20, %v219_v15  ;;  %v234_v39 = vadd.f32 %v208_v12, %v668_v42  ;;  %v235_v41 = vadd.f32 %v211_v18, %v672_v43 }
  0x31   :  { %vm240_vm3 = vcmp.ge.f32.partialorder %v232_v21, 0.0  ;;  %vm241_vm4 = vcmp.ge.f32.partialorder %v233_v22, 0.0  ;;  %v248_v32 = vmul.f32 0.2, %v232_v21  ;;  %v249_v23 = vmul.f32 0.2, %v233_v22 }
  0x32   :  { %v281_v35 = vperm.slane %v265_v24, 1  ;;  %v282_v36 = vperm.slane %v265_v24, 2  ;;  %v328_v0 = vsel %vm93_vm0, %v272_v25, %v304_v26  ;;  %v329_v6 = vsel %vm95_vm1, %v305_v19, %v306_v27 }
  0x33   :  { %v283_v1 = vperm.slane %v265_v24, 3  ;;  %v285_v2 = vperm.slane %v265_v24, 5  ;;  %v331_v7 = vsel %vm93_vm0, %v276_v29, %v307_v61  ;;  %v332_v45 = vsel %vm95_vm1, %v308_v28, %v309_v30 }
  0x34   :  { %v771_v42 = vadd.f32 %v214_v53, %v676_v40  ;;  %v774_v43 = vadd.f32 %v217_v9, %v678_v44  ;;  %v286_v49 = vperm.slane %v265_v24, 6  ;;  %v287_v50 = vperm.slane %v265_v24, 7  ;;  %v783_v40 = vld [vmem:[%s904_s3 + $0x10] sm:$0xff] }
  0x35   :  { %v256_v52 = vsel %vm240_vm3, %v232_v21, %v248_v32  ;;  %v257_v5 = vsel %vm241_vm4, %v233_v22, %v249_v23  ;;  %v330_v55 = vsel %vm97_vm2, %v328_v0, %v329_v6  ;;  %v333_v56 = vsel %vm97_vm2, %v331_v7, %v332_v45 }
  0x36   :  { %vm242_vm5 = vcmp.ge.f32.partialorder %v234_v39, 0.0  ;;  %vm243_vm6 = vcmp.ge.f32.partialorder %v235_v41, 0.0  ;;  %v280_v58 = vperm.slane %v265_v24, 0  ;;  %v284_v59 = vperm.slane %v265_v24, 4 }
  0x37   :  { %v310_v44 = vrot.slane %v281_v35, 6  ;;  %v311_v8 = vrot.slane %v282_v36, 4  ;;  %v312_v60 = vrot.slane %v283_v1, 2  ;;  %v313_v62 = vrot.slane %v285_v2, 6 }
  0x38   :  { %v314_v63 = vrot.slane %v286_v49, 4  ;;  %v315_v3 = vrot.slane %v287_v50, 2  ;;  %v360_v11 = vmul.f32 %v330_v55, %v256_v52  ;;  %v361_v12 = vmul.f32 %v333_v56, %v257_v5 }
  0x39   :  { %v786_v14 = vadd.f32 %v220_v31, %v685_v4  ;;  %v250_v17 = vmul.f32 0.2, %v234_v39  ;;  %v251_v48 = vmul.f32 0.2, %v235_v41  ;;  %v789_v18 = vmul.f32 0.2, %v771_v42 }
  0x3a   :  { %v118_v53 = vsel %vm95_vm1, %v645_v34, %v653_v37  ;;  %v795_v10 = vmul.f32 0.2, %v774_v43  ;;  %v289_v57 = vperm.slane %v783_v40, 1  ;;  %v290_v20 = vperm.slane %v783_v40, 2  ;;  %376 = vst [vmem:[#allocation1] ss:$4 sm:$0xff] %v360_v11 }
  0x3b   :  { %v802_v4 = vld [vmem:[%s904_s3 + $0x18] sm:$0xff]  ;;  %v291_v15 = vperm.slane %v783_v40, 3  ;;  %v293_v21 = vperm.slane %v783_v40, 5  ;;  %v334_v22 = vsel %vm93_vm0, %v280_v58, %v310_v44  ;;  %v335_v34 = vsel %vm95_vm1, %v311_v8, %v312_v60  ;;  %378 = vst [vmem:[#allocation1 + $0x20] ss:$4 sm:$0xff] %v361_v12 }
  0x3c   :  { %v294_v37 = vperm.slane %v783_v40, 6  ;;  %v295_v25 = vperm.slane %v783_v40, 7  ;;  %v337_v26 = vsel %vm93_vm0, %v284_v59, %v313_v62  ;;  %v338_v19 = vsel %vm95_vm1, %v314_v63, %v315_v3 }
  0x3d   :  { %vm244_vm7 = vcmp.ge.f32.partialorder %v771_v42, 0.0  ;;  %vm245_vm8 = vcmp.ge.f32.partialorder %v774_v43, 0.0  ;;  %v815_v27 = vmul.f32 0.2, %v786_v14  ;;  %v258_v24 = vsel %vm242_vm5, %v234_v39, %v250_v17 }
  0x3e   :  { %v259_v29 = vsel %vm243_vm6, %v235_v41, %v251_v48  ;;  %v288_v61 = vperm.slane %v783_v40, 0  ;;  %v292_v28 = vperm.slane %v783_v40, 4  ;;  %v297_v30 = vperm.slane %v802_v4, 1 }
  0x3f   :  { %v298_v9 = vperm.slane %v802_v4, 2  ;;  %v336_v31 = vsel %vm97_vm2, %v334_v22, %v335_v34  ;;  %v299_v32 = vperm.slane %v802_v4, 3  ;;  %v316_v23 = vrot.slane %v289_v57, 6 }
  0x40   :  { %v317_v35 = vrot.slane %v290_v20, 4  ;;  %v339_v36 = vsel %vm97_vm2, %v337_v26, %v338_v19  ;;  %v318_v0 = vrot.slane %v291_v15, 2  ;;  %v319_v39 = vrot.slane %v293_v21, 6 }
  0x41   :  { %v320_v6 = vrot.slane %v294_v37, 4  ;;  %v321_v41 = vrot.slane %v295_v25, 2  ;;  %v119_v1 = vsel %vm97_vm2, %v656_v38, %v118_v53  ;;  %v221_v2 = vsel %vm93_vm0, %v172_v16, %v731_v46  ;;  %v379_v49 = vld.sshfl [vmem:[#allocation1] sm:$0xff pattern:$0x73625140] }
  0x42   :  { %v222_v7 = vsel %vm95_vm1, %v733_v47, %v740_v54  ;;  %v362_v45 = vmul.f32 %v336_v31, %v258_v24  ;;  %v380_v50 = vld.sshfl [vmem:[#allocation1 + $0x8] sm:$0xff pattern:$0x73625140]  ;;  %v363_v52 = vmul.f32 %v339_v36, %v259_v29  ;;  %v381_v5 = vld.sshfl [vmem:[#allocation1 + $0x10] sm:$0xff pattern:$0x73625140]  ;;  %v135_v38 = vmul.f32 %v119_v1, %v28_v33 }
  0x43   :  { %v382_v55 = vld.sshfl [vmem:[#allocation1 + $0x18] sm:$0xff pattern:$0x73625140]  ;;  %v383_v56 = vld.sshfl [vmem:[#allocation1 + $0x20] sm:$0xff pattern:$0x73625140]  ;;  %v223_v59 = vsel %vm97_vm2, %v221_v2, %v222_v7  ;;  %v340_v8 = vsel %vm93_vm0, %v288_v61, %v316_v23  ;;  %v341_v13 = vsel %vm95_vm1, %v317_v35, %v318_v0  ;;  %v343_v62 = vsel %vm93_vm0, %v292_v28, %v319_v39 }
  0x44   :  { %v384_v58 = vld.sshfl [vmem:[#allocation1 + $0x28] sm:$0xff pattern:$0x73625140]  ;;  %v385_v51 = vld.sshfl [vmem:[#allocation1 + $0x30] sm:$0xff pattern:$0x73625140]  ;;  %v344_v63 = vsel %vm95_vm1, %v320_v6, %v321_v41  ;;  %v260_v11 = vsel %vm244_vm7, %v771_v42, %v789_v18  ;;  %v261_v12 = vsel %vm245_vm8, %v774_v43, %v795_v10  ;;  %v342_v20 = vsel %vm97_vm2, %v340_v8, %v341_v13 }
  0x45   :  { %v386_v40 = vld.sshfl [vmem:[#allocation1 + $0x38] sm:$0xff pattern:$0x73625140]  ;;  %v301_v16 = vperm.slane %v802_v4, 5  ;;  %387 = vst [vmem:[#allocation1] ss:$4 sm:$0xff] %v362_v45  ;;  %v345_v34 = vsel %vm97_vm2, %v343_v62, %v344_v63  ;;  %v364_v10 = vmul.f32 %v342_v20, %v260_v11  ;;  %v239_v29 = vadd.f32 %v223_v59, %v135_v38 }
  0x46   :  { %v449_v46 = vsel %vm93_vm0, %v379_v49, 0.0  ;;  %v450_v47 = vsel %vm93_vm0, %v380_v50, 0.0  ;;  %v452_v54 = vsel %vm93_vm0, %v381_v5, 0.0  ;;  %v302_v44 = vperm.slane %v802_v4, 6  ;;  %388 = vst [vmem:[#allocation1 + $0x20] ss:$4 sm:$0xff] %v363_v52 }
  0x47   :  { %v451_v33 = vadd.f32 %v450_v47, %v449_v46  ;;  %v303_v60 = vperm.slane %v802_v4, 7  ;;  %v454_v3 = vsel %vm93_vm0, %v382_v55, 0.0  ;;  %v296_v17 = vperm.slane %v802_v4, 0 }
  0x48   :  { %v300_v53 = vperm.slane %v802_v4, 4  ;;  %v322_v57 = vrot.slane %v297_v30, 6  ;;  %v456_v15 = vsel %vm93_vm0, %v383_v56, 0.0  ;;  %v323_v21 = vrot.slane %v298_v9, 4 }
  0x49   :  { %v453_v48 = vadd.f32 %v452_v54, %v451_v33  ;;  %v324_v22 = vrot.slane %v299_v32, 2  ;;  %v325_v18 = vrot.slane %v301_v16, 6  ;;  %v326_v37 = vrot.slane %v302_v44, 4 }
  0x4a   :  { %v327_v25 = vrot.slane %v303_v60, 2  ;;  %v458_v43 = vsel %vm93_vm0, %v384_v58, 0.0  ;;  %v460_v4 = vsel %vm93_vm0, %v385_v51, 0.0  ;;  %v462_v24 = vsel %vm93_vm0, %v386_v40, 0.0 }
  0x4b   :  { %v455_v42 = vadd.f32 %v454_v3, %v453_v48  ;;  %v365_v61 = vmul.f32 %v345_v34, %v261_v12  ;;  %vm246_vm9 = vcmp.ge.f32.partialorder %v786_v14, 0.0  ;;  %v255_v39 = vmul.f32 0.2, %v239_v29 }
  0x4c   :  { %v389_v26 = vld.sshfl [vmem:[#allocation1] sm:$0xff pattern:$0x73625140]  ;;  %v390_v28 = vld.sshfl [vmem:[#allocation1 + $0x8] sm:$0xff pattern:$0x73625140]  ;;  %v346_v6 = vsel %vm93_vm0, %v296_v17, %v322_v57  ;;  %v347_v41 = vsel %vm95_vm1, %v323_v21, %v324_v22  ;;  %v349_v2 = vsel %vm93_vm0, %v300_v53, %v325_v18  ;;  %v350_v7 = vsel %vm95_vm1, %v326_v37, %v327_v25 }
  0x4d   :  { %v457_v19 = vadd.f32 %v456_v15, %v455_v42  ;;  %v391_v30 = vld.sshfl [vmem:[#allocation1 + $0x10] sm:$0xff pattern:$0x73625140]  ;;  %v392_v9 = vld.sshfl [vmem:[#allocation1 + $0x18] sm:$0xff pattern:$0x73625140]  ;;  %v262_v50 = vsel %vm246_vm9, %v786_v14, %v815_v27  ;;  %v348_v52 = vsel %vm97_vm2, %v346_v6, %v347_v41  ;;  %v351_v56 = vsel %vm97_vm2, %v349_v2, %v350_v7 }
  0x4e   :  { %v393_v31 = vld.sshfl [vmem:[#allocation1 + $0x20] sm:$0xff pattern:$0x73625140]  ;;  %v394_v23 = vld.sshfl [vmem:[#allocation1 + $0x28] sm:$0xff pattern:$0x73625140]  ;;  %v366_v59 = vmul.f32 %v348_v52, %v262_v50 }
  0x4f   :  { %v459_v32 = vadd.f32 %v458_v43, %v457_v19  ;;  %v395_v35 = vld.sshfl [vmem:[#allocation1 + $0x30] sm:$0xff pattern:$0x73625140]  ;;  %v396_v36 = vld.sshfl [vmem:[#allocation1 + $0x38] sm:$0xff pattern:$0x73625140] }
  0x50   :  { %397 = vst [vmem:[#allocation1] ss:$4 sm:$0xff] %v364_v10  ;;  %v464_v1 = vsel %vm93_vm0, %v389_v26, 0.0  ;;  %vm247_vm10 = vcmp.ge.f32.partialorder %v239_v29, 0.0  ;;  %v466_v49 = vsel %vm93_vm0, %v390_v28, 0.0  ;;  %v468_v58 = vsel %vm93_vm0, %v391_v30, 0.0 }
  0x51   :  { %v461_v0 = vadd.f32 %v460_v4, %v459_v32  ;;  %398 = vst [vmem:[#allocation1 + $0x20] ss:$4 sm:$0xff] %v365_v61  ;;  %v263_v55 = vsel %vm247_vm10, %v239_v29, %v255_v39  ;;  %v470_v51 = vsel %vm93_vm0, %v392_v9, 0.0  ;;  %v472_v40 = vsel %vm93_vm0, %v393_v31, 0.0 }
  0x52   :  { %v367_v16 = vmul.f32 %v351_v56, %v263_v55  ;;  %v474_v62 = vsel %vm93_vm0, %v394_v23, 0.0  ;;  %v476_v3 = vsel %vm93_vm0, %v395_v35, 0.0  ;;  %v478_v12 = vsel %vm93_vm0, %v396_v36, 0.0 }
  0x53   :  { %v463_v45 = vadd.f32 %v462_v24, %v461_v0 }
  0x55   :  { %v465_v5 = vadd.f32 %v464_v1, %v463_v45 }
  0x57   :  { %v467_v38 = vadd.f32 %v466_v49, %v465_v5  ;;  %v399_v46 = vld.sshfl [vmem:[#allocation1] sm:$0xff pattern:$0x73625140]  ;;  %v400_v47 = vld.sshfl [vmem:[#allocation1 + $0x8] sm:$0xff pattern:$0x73625140] }
  0x58   :  { %v401_v54 = vld.sshfl [vmem:[#allocation1 + $0x10] sm:$0xff pattern:$0x73625140]  ;;  %v402_v14 = vld.sshfl [vmem:[#allocation1 + $0x18] sm:$0xff pattern:$0x73625140] }
  0x59   :  { %v469_v44 = vadd.f32 %v468_v58, %v467_v38  ;;  %v403_v27 = vld.sshfl [vmem:[#allocation1 + $0x20] sm:$0xff pattern:$0x73625140]  ;;  %v404_v8 = vld.sshfl [vmem:[#allocation1 + $0x28] sm:$0xff pattern:$0x73625140] }
  0x5a   :  { %v405_v13 = vld.sshfl [vmem:[#allocation1 + $0x30] sm:$0xff pattern:$0x73625140]  ;;  %v406_v60 = vld.sshfl [vmem:[#allocation1 + $0x38] sm:$0xff pattern:$0x73625140] }
  0x5b   :  { %v471_v33 = vadd.f32 %v470_v51, %v469_v44  ;;  %407 = vst [vmem:[#allocation1] ss:$4 sm:$0xff] %v366_v59  ;;  %v480_v48 = vsel %vm93_vm0, %v399_v46, 0.0  ;;  %v482_v57 = vsel %vm93_vm0, %v400_v47, 0.0  ;;  %v484_v15 = vsel %vm93_vm0, %v401_v54, 0.0 }
  0x5c   :  { %408 = vst [vmem:[#allocation1 + $0x20] ss:$4 sm:$0xff] %v367_v16  ;;  %v486_v22 = vsel %vm93_vm0, %v402_v14, 0.0  ;;  %v488_v42 = vsel %vm93_vm0, %v403_v27, 0.0  ;;  %v490_v37 = vsel %vm93_vm0, %v404_v8, 0.0  ;;  %v492_v43 = vsel %vm93_vm0, %v405_v13, 0.0 }
  0x5d   :  { %v473_v63 = vadd.f32 %v472_v40, %v471_v33  ;;  %v494_v19 = vsel %vm93_vm0, %v406_v60, 0.0 }
  0x5f   :  { %v475_v11 = vadd.f32 %v474_v62, %v473_v63 }
  0x61   :  { %v477_v17 = vadd.f32 %v476_v3, %v475_v11 }
  0x62   :  { %v409_v10 = vld.sshfl [vmem:[#allocation1] sm:$0xff pattern:$0x73625140]  ;;  %v410_v4 = vld.sshfl [vmem:[#allocation1 + $0x8] sm:$0xff pattern:$0x73625140] }
  0x63   :  { %v479_v53 = vadd.f32 %v478_v12, %v477_v17  ;;  %v496_v29 = vsel %vm93_vm0, %v409_v10, 0.0  ;;  %v411_v61 = vld.sshfl [vmem:[#allocation1 + $0x10] sm:$0xff pattern:$0x73625140]  ;;  %v498_v30 = vsel %vm93_vm0, %v410_v4, 0.0 }
  0x64   :  { %v412_v9 = vld.sshfl [vmem:[#allocation1 + $0x18] sm:$0xff pattern:$0x73625140]  ;;  %v500_v32 = vsel %vm93_vm0, %v411_v61, 0.0 }
  0x65   :  { %v481_v20 = vadd.f32 %v480_v48, %v479_v53  ;;  %v413_v23 = vld.sshfl [vmem:[#allocation1 + $0x20] sm:$0xff pattern:$0x73625140]  ;;  %v502_v36 = vsel %vm93_vm0, %v412_v9, 0.0 }
  0x66   :  { %v414_v0 = vld.sshfl [vmem:[#allocation1 + $0x28] sm:$0xff pattern:$0x73625140]  ;;  %v504_v6 = vsel %vm93_vm0, %v413_v23, 0.0 }
  0x67   :  { %v483_v21 = vadd.f32 %v482_v57, %v481_v20  ;;  %v415_v41 = vld.sshfl [vmem:[#allocation1 + $0x30] sm:$0xff pattern:$0x73625140]  ;;  %v506_v2 = vsel %vm93_vm0, %v414_v0, 0.0 }
  0x68   :  { %v416_v7 = vld.sshfl [vmem:[#allocation1 + $0x38] sm:$0xff pattern:$0x73625140]  ;;  %v508_v49 = vsel %vm93_vm0, %v415_v41, 0.0 }
  0x69   :  { %v485_v34 = vadd.f32 %v484_v15, %v483_v21  ;;  %v510_v52 = vsel %vm93_vm0, %v416_v7, 0.0 }
  0x6b   :  { %v487_v18 = vadd.f32 %v486_v22, %v485_v34 }
  0x6d   :  { %v489_v25 = vadd.f32 %v488_v42, %v487_v18 }
  0x6f   :  { %v491_v26 = vadd.f32 %v490_v37, %v489_v25 }
  0x71   :  { %v493_v24 = vadd.f32 %v492_v43, %v491_v26 }
  0x73   :  { %v495_v28 = vadd.f32 %v494_v19, %v493_v24 }
  0x75   :  { %v497_v31 = vadd.f32 %v496_v29, %v495_v28 }
  0x77   :  { %v499_v35 = vadd.f32 %v498_v30, %v497_v31 }
  0x79   :  { %v501_v39 = vadd.f32 %v500_v32, %v499_v35 }
  0x7b   :  { %v503_v1 = vadd.f32 %v502_v36, %v501_v39 }
  0x7d   :  { %v505_v45 = vadd.f32 %v504_v6, %v503_v1 }
  0x7f   :  { %v507_v50 = vadd.f32 %v506_v2, %v505_v45 }
  0x81   :  { %v509_v5 = vadd.f32 %v508_v49, %v507_v50 }
  0x83   :  { %v511_v55 = vadd.f32 %v510_v52, %v509_v5 }
  0x85   :  { %512 = vadd.xlane.f32.xlu0 %v511_v55 }
  0xf8   :  { %v513_v56 = vpop.xlane.xlu0 %512 }
  0xf9   :  { %515 = vst.msk [vmem:[%s905_s4] sm:$0x3] %vm514_vm11, %v513_v56 }

// kernel: discriminator_32_forward.8
= control target key start
LH: loop header
LB: loop body
LE: loop exit
PB: predicated region body
PF: predicated region fallthrough
CT: control target
= control target key end

     0   :  { %s4348_s12 = smov 0   ;;  %s6722_s0 = inlined_call_operand.vmem [shape: bf16[2,5,5,512], index: 0, kind: input, shape index: {}]   ;;  %s6723_s1 = inlined_call_operand.vmem [shape: bf16[4,512,256], index: 1, kind: input, shape index: {}]   ;;  %s6724_s2 = inlined_call_operand.vmem [shape: bf16[32,256], index: 2, kind: output, shape index: {0}]   ;;  %s6725_s3 = inlined_call_operand.vmem [shape: f32[2,2,256], index: 3, kind: output, shape index: {1}]  }
   0x1 LB: > { %s4354_s13 = sadd.s32 4294967295, %s4326_s12   ;;  %p2812_p0 = scmp.ge.s32.totalorder %s4326_s12, 1  ;;  %s4326_s12 = sphi %s4348_s12, %s14_s12  }
   0x2   : > { %p140_p1 = scmp.lt.s32.totalorder %s4326_s12, 3 }
   0x4   : > { %p141_p2 = pnand %p2812_p0, %p140_p1 }
   0x6   : > { %144 = sbr.rel (%p141_p2) target bundleno = 441 (0x1b9), region = 28 }
   0xb   : > { %v2877_v0 = vld [vmem:[%s6723_s1 + $0x70] sm:$0xf]  ;;  %v4070_v1 = vld [vmem:[%s6723_s1 + $0x74] sm:$0xf0]  ;;  %v2869_v11 = vld [vmem:[%s6723_s1 + $0x60] sm:$0xf] }
   0xc   : > { %v2941_v2 = vld [vmem:[%s6723_s1 + $0xf0] sm:$0xf]  ;;  %v2878_v3 = vor.u32 %v4070_v1, %v2877_v0  ;;  %v4086_v4 = vld [vmem:[%s6723_s1 + $0xf4] sm:$0xf0]  ;;  %v4068_v13 = vld [vmem:[%s6723_s1 + $0x64] sm:$0xf0] }
   0xd   : > { %v3005_v5 = vld [vmem:[%s6723_s1 + $0x170] sm:$0xf]  ;;  %v4102_v6 = vld [vmem:[%s6723_s1 + $0x174] sm:$0xf0]  ;;  %v2942_v7 = vor.u32 %v4086_v4, %v2941_v2  ;;  %v2933_v14 = vld [vmem:[%s6723_s1 + $0xe0] sm:$0xf]  ;;  %v2870_v16 = vor.u32 %v4068_v13, %v2869_v11 }
   0xe   : > { %v3006_v8 = vor.u32 %v4102_v6, %v3005_v5  ;;  %v3069_v9 = vld [vmem:[%s6723_s1 + $0x1f0] sm:$0xf]  ;;  %v4118_v10 = vld [vmem:[%s6723_s1 + $0x1f4] sm:$0xf0]  ;;  %645 = vmatpush.bf16.msra.mxu0 %v2878_v3  ;;  %v4084_v15 = vld [vmem:[%s6723_s1 + $0xe4] sm:$0xf0] }
   0xf   : > { %v3070_v12 = vor.u32 %v4118_v10, %v3069_v9  ;;  %659 = vmatpush.bf16.msra.mxu1 %v2942_v7  ;;  %v2934_v17 = vor.u32 %v4084_v15, %v2933_v14  ;;  %v2997_v18 = vld [vmem:[%s6723_s1 + $0x160] sm:$0xf]  ;;  %v4100_v19 = vld [vmem:[%s6723_s1 + $0x164] sm:$0xf0]  ;;  %v2861_v23 = vld [vmem:[%s6723_s1 + $0x50] sm:$0xf] }
  0x10   : > { %673 = vmatpush.bf16.msra.mxu2 %v3006_v8  ;;  %v3061_v20 = vld [vmem:[%s6723_s1 + $0x1e0] sm:$0xf]  ;;  %v2998_v21 = vor.u32 %v4100_v19, %v2997_v18  ;;  %v4116_v22 = vld [vmem:[%s6723_s1 + $0x1e4] sm:$0xf0]  ;;  %v4066_v24 = vld [vmem:[%s6723_s1 + $0x54] sm:$0xf0] }
  0x11   : > { %687 = vmatpush.bf16.msra.mxu3 %v3070_v12  ;;  %v3062_v25 = vor.u32 %v4116_v22, %v3061_v20  ;;  %v2925_v26 = vld [vmem:[%s6723_s1 + $0xd0] sm:$0xf]  ;;  %v4082_v27 = vld [vmem:[%s6723_s1 + $0xd4] sm:$0xf0]  ;;  %v2862_v29 = vor.u32 %v4066_v24, %v2861_v23  ;;  %v2853_v35 = vld [vmem:[%s6723_s1 + $0x40] sm:$0xf] }
  0x12   : > { %v2989_v28 = vld [vmem:[%s6723_s1 + $0x150] sm:$0xf]  ;;  %646 = vmatpush.bf16.msra.mxu0 %v2870_v16  ;;  %v4098_v30 = vld [vmem:[%s6723_s1 + $0x154] sm:$0xf0]  ;;  %v2926_v33 = vor.u32 %v4082_v27, %v2925_v26  ;;  %v4064_v36 = vld [vmem:[%s6723_s1 + $0x44] sm:$0xf0] }
  0x13   : > { %v3053_v31 = vld [vmem:[%s6723_s1 + $0x1d0] sm:$0xf]  ;;  %v4114_v32 = vld [vmem:[%s6723_s1 + $0x1d4] sm:$0xf0]  ;;  %660 = vmatpush.bf16.msra.mxu1 %v2934_v17  ;;  %v2990_v34 = vor.u32 %v4098_v30, %v2989_v28  ;;  %v2917_v37 = vld [vmem:[%s6723_s1 + $0xc0] sm:$0xf]  ;;  %v2854_v44 = vor.u32 %v4064_v36, %v2853_v35 }
  0x14   : > { %674 = vmatpush.bf16.msra.mxu2 %v2998_v21  ;;  %v3054_v38 = vor.u32 %v4114_v32, %v3053_v31  ;;  %v4080_v39 = vld [vmem:[%s6723_s1 + $0xc4] sm:$0xf0]  ;;  %v2981_v40 = vld [vmem:[%s6723_s1 + $0x140] sm:$0xf]  ;;  %v2845_v47 = vld [vmem:[%s6723_s1 + $0x30] sm:$0xf] }
  0x15   : > { %688 = vmatpush.bf16.msra.mxu3 %v3062_v25  ;;  %v4096_v41 = vld [vmem:[%s6723_s1 + $0x144] sm:$0xf0]  ;;  %v3045_v42 = vld [vmem:[%s6723_s1 + $0x1c0] sm:$0xf]  ;;  %v2918_v45 = vor.u32 %v4080_v39, %v2917_v37  ;;  %v4062_v48 = vld [vmem:[%s6723_s1 + $0x34] sm:$0xf0] }
  0x16   : > { %v4112_v43 = vld [vmem:[%s6723_s1 + $0x1c4] sm:$0xf0]  ;;  %647 = vmatpush.bf16.msra.mxu0 %v2862_v29  ;;  %v2982_v46 = vor.u32 %v4096_v41, %v2981_v40  ;;  %v2909_v49 = vld [vmem:[%s6723_s1 + $0xb0] sm:$0xf]  ;;  %v4078_v51 = vld [vmem:[%s6723_s1 + $0xb4] sm:$0xf0]  ;;  %v2846_v56 = vor.u32 %v4062_v48, %v2845_v47 }
  0x17   : > { %661 = vmatpush.bf16.msra.mxu1 %v2926_v33  ;;  %v3046_v50 = vor.u32 %v4112_v43, %v3045_v42  ;;  %v2973_v52 = vld [vmem:[%s6723_s1 + $0x130] sm:$0xf]  ;;  %v4094_v53 = vld [vmem:[%s6723_s1 + $0x134] sm:$0xf0]  ;;  %v2910_v57 = vor.u32 %v4078_v51, %v2909_v49  ;;  %v2837_v59 = vld [vmem:[%s6723_s1 + $0x20] sm:$0xf] }
  0x18   : > { %675 = vmatpush.bf16.msra.mxu2 %v2990_v34  ;;  %v3037_v54 = vld [vmem:[%s6723_s1 + $0x1b0] sm:$0xf]  ;;  %v4110_v55 = vld [vmem:[%s6723_s1 + $0x1b4] sm:$0xf0]  ;;  %v2974_v58 = vor.u32 %v4094_v53, %v2973_v52  ;;  %v4060_v60 = vld [vmem:[%s6723_s1 + $0x24] sm:$0xf0] }
  0x19   : > { %689 = vmatpush.bf16.msra.mxu3 %v3054_v38  ;;  %v2901_v61 = vld [vmem:[%s6723_s1 + $0xa0] sm:$0xf]  ;;  %v3038_v62 = vor.u32 %v4110_v55, %v3037_v54  ;;  %v4076_v63 = vld [vmem:[%s6723_s1 + $0xa4] sm:$0xf0]  ;;  %v2838_v4 = vor.u32 %v4060_v60, %v2837_v59  ;;  %v2829_v7 = vld [vmem:[%s6723_s1 + $0x10] sm:$0xf] }
  0x1a   : > { %648 = vmatpush.bf16.msra.mxu0 %v2854_v44  ;;  %v2965_v0 = vld [vmem:[%s6723_s1 + $0x120] sm:$0xf]  ;;  %v4092_v1 = vld [vmem:[%s6723_s1 + $0x124] sm:$0xf0]  ;;  %v2902_v5 = vor.u32 %v4076_v63, %v2901_v61  ;;  %v4058_v8 = vld [vmem:[%s6723_s1 + $0x14] sm:$0xf0] }
  0x1b   : > { %662 = vmatpush.bf16.msra.mxu1 %v2918_v45  ;;  %v3029_v2 = vld [vmem:[%s6723_s1 + $0x1a0] sm:$0xf]  ;;  %v4108_v3 = vld [vmem:[%s6723_s1 + $0x1a4] sm:$0xf0]  ;;  %v2966_v6 = vor.u32 %v4092_v1, %v2965_v0  ;;  %v2893_v9 = vld [vmem:[%s6723_s1 + $0x90] sm:$0xf]  ;;  %v2830_v16 = vor.u32 %v4058_v8, %v2829_v7 }
  0x1c   : > { %676 = vmatpush.bf16.msra.mxu2 %v2982_v46  ;;  %v3030_v10 = vor.u32 %v4108_v3, %v3029_v2  ;;  %v4074_v11 = vld [vmem:[%s6723_s1 + $0x94] sm:$0xf0]  ;;  %v2957_v12 = vld [vmem:[%s6723_s1 + $0x110] sm:$0xf]  ;;  %v2821_v17 = vld [vmem:[%s6723_s1] sm:$0xf] }
  0x1d   : > { %690 = vmatpush.bf16.msra.mxu3 %v3046_v50  ;;  %v4090_v13 = vld [vmem:[%s6723_s1 + $0x114] sm:$0xf0]  ;;  %v3021_v14 = vld [vmem:[%s6723_s1 + $0x190] sm:$0xf]  ;;  %v4056_v18 = vld [vmem:[%s6723_s1 + $0x4] sm:$0xf0]  ;;  %v2894_v19 = vor.u32 %v4074_v11, %v2893_v9 }
  0x1e   : > { %649 = vmatpush.bf16.msra.mxu0 %v2846_v56  ;;  %v4106_v15 = vld [vmem:[%s6723_s1 + $0x194] sm:$0xf0]  ;;  %v2958_v20 = vor.u32 %v4090_v13, %v2957_v12  ;;  %v2885_v21 = vld [vmem:[%s6723_s1 + $0x80] sm:$0xf]  ;;  %v4072_v22 = vld [vmem:[%s6723_s1 + $0x84] sm:$0xf0]  ;;  %v2822_v31 = vor.u32 %v4056_v18, %v2821_v17 }
  0x1f   : > { %663 = vmatpush.bf16.msra.mxu1 %v2910_v57  ;;  %v2949_v23 = vld [vmem:[%s6723_s1 + $0x100] sm:$0xf]  ;;  %v3022_v24 = vor.u32 %v4106_v15, %v3021_v14  ;;  %v4088_v25 = vld [vmem:[%s6723_s1 + $0x104] sm:$0xf0]  ;;  %v4069_v28 = vld [vmem:[%s6723_s1 + $0x74] sm:$0xf]  ;;  %v2886_v35 = vor.u32 %v4072_v22, %v2885_v21 }
  0x20   : > { %677 = vmatpush.bf16.msra.mxu2 %v2974_v58  ;;  %v3013_v26 = vld [vmem:[%s6723_s1 + $0x180] sm:$0xf]  ;;  %v4104_v27 = vld [vmem:[%s6723_s1 + $0x184] sm:$0xf0]  ;;  %v2879_v29 = vld [vmem:[%s6723_s1 + $0x78] sm:$0xf0]  ;;  %v2950_v36 = vor.u32 %v4088_v25, %v2949_v23 }
  0x21   : > { %691 = vmatpush.bf16.msra.mxu3 %v3038_v62  ;;  %v4085_v30 = vld [vmem:[%s6723_s1 + $0xf4] sm:$0xf]  ;;  %v2943_v32 = vld [vmem:[%s6723_s1 + $0xf8] sm:$0xf0]  ;;  %v3014_v39 = vor.u32 %v4104_v27, %v3013_v26  ;;  %v2882_v40 = vor.u32 %v4069_v28, %v2879_v29  ;;  %v4067_v43 = vld [vmem:[%s6723_s1 + $0x64] sm:$0xf] }
  0x22   : > { %650 = vmatpush.bf16.msra.mxu0 %v2838_v4  ;;  %v4101_v33 = vld [vmem:[%s6723_s1 + $0x174] sm:$0xf]  ;;  %v3007_v34 = vld [vmem:[%s6723_s1 + $0x178] sm:$0xf0]  ;;  %v2946_v41 = vor.u32 %v4085_v30, %v2943_v32  ;;  %v2871_v44 = vld [vmem:[%s6723_s1 + $0x68] sm:$0xf0] }
  0x23   : > { %664 = vmatpush.bf16.msra.mxu1 %v2902_v5  ;;  %v4117_v37 = vld [vmem:[%s6723_s1 + $0x1f4] sm:$0xf]  ;;  %v3071_v38 = vld [vmem:[%s6723_s1 + $0x1f8] sm:$0xf0]  ;;  %v3010_v42 = vor.u32 %v4101_v33, %v3007_v34  ;;  %v4083_v45 = vld [vmem:[%s6723_s1 + $0xe4] sm:$0xf]  ;;  %v2874_v52 = vor.u32 %v4067_v43, %v2871_v44 }
  0x24   : > { %678 = vmatpush.bf16.msra.mxu2 %v2966_v6  ;;  %v3074_v46 = vor.u32 %v4117_v37, %v3071_v38  ;;  %v2935_v47 = vld [vmem:[%s6723_s1 + $0xe8] sm:$0xf0]  ;;  %v4099_v48 = vld [vmem:[%s6723_s1 + $0x164] sm:$0xf]  ;;  %v4065_v53 = vld [vmem:[%s6723_s1 + $0x54] sm:$0xf] }
  0x25   : > { %692 = vmatpush.bf16.msra.mxu3 %v3030_v10  ;;  %v2999_v49 = vld [vmem:[%s6723_s1 + $0x168] sm:$0xf0]  ;;  %v4115_v50 = vld [vmem:[%s6723_s1 + $0x1e4] sm:$0xf]  ;;  %v2938_v54 = vor.u32 %v4083_v45, %v2935_v47  ;;  %v2863_v56 = vld [vmem:[%s6723_s1 + $0x58] sm:$0xf0] }
  0x26   : > { %651 = vmatpush.bf16.msra.mxu0 %v2830_v16  ;;  %v3063_v51 = vld [vmem:[%s6723_s1 + $0x1e8] sm:$0xf0]  ;;  %v3002_v55 = vor.u32 %v4099_v48, %v2999_v49  ;;  %v4081_v57 = vld [vmem:[%s6723_s1 + $0xd4] sm:$0xf]  ;;  %v2927_v58 = vld [vmem:[%s6723_s1 + $0xd8] sm:$0xf0]  ;;  %v2866_v2 = vor.u32 %v4065_v53, %v2863_v56 }
  0x27   : > { %665 = vmatpush.bf16.msra.mxu1 %v2894_v19  ;;  %v3066_v59 = vor.u32 %v4115_v50, %v3063_v51  ;;  %v4097_v60 = vld [vmem:[%s6723_s1 + $0x154] sm:$0xf]  ;;  %v2991_v61 = vld [vmem:[%s6723_s1 + $0x158] sm:$0xf0]  ;;  %v4063_v0 = vld [vmem:[%s6723_s1 + $0x44] sm:$0xf]  ;;  %v2930_v6 = vor.u32 %v4081_v57, %v2927_v58 }
  0x28   : > { %679 = vmatpush.bf16.msra.mxu2 %v2958_v20  ;;  %v4113_v62 = vld [vmem:[%s6723_s1 + $0x1d4] sm:$0xf]  ;;  %v3055_v63 = vld [vmem:[%s6723_s1 + $0x1d8] sm:$0xf0]  ;;  %v2855_v1 = vld [vmem:[%s6723_s1 + $0x48] sm:$0xf0]  ;;  %v2994_v7 = vor.u32 %v4097_v60, %v2991_v61 }
  0x29   : > { %693 = vmatpush.bf16.msra.mxu3 %v3022_v24  ;;  %v4079_v3 = vld [vmem:[%s6723_s1 + $0xc4] sm:$0xf]  ;;  %v2919_v4 = vld [vmem:[%s6723_s1 + $0xc8] sm:$0xf0]  ;;  %p170_p3 = scmp.lt.s32.totalorder %s4354_s13, 1  ;;  %v3058_v11 = vor.u32 %v4113_v62, %v3055_v63  ;;  %v2858_v22 = vor.u32 %v4063_v0, %v2855_v1  ;;  %vm215_vm0 = vcmask 1041408  }
  0x2a   : > { %652 = vmatpush.bf16.msra.mxu0 %v2822_v31  ;;  %v4095_v5 = vld [vmem:[%s6723_s1 + $0x144] sm:$0xf]  ;;  %v2983_v8 = vld [vmem:[%s6723_s1 + $0x148] sm:$0xf0]  ;;  %v4061_v12 = vld [vmem:[%s6723_s1 + $0x34] sm:$0xf]  ;;  %v2922_v25 = vor.u32 %v4079_v3, %v2919_v4 }
  0x2b   : > { %666 = vmatpush.bf16.msra.mxu1 %v2886_v35  ;;  %v4111_v9 = vld [vmem:[%s6723_s1 + $0x1c4] sm:$0xf]  ;;  %v3047_v10 = vld [vmem:[%s6723_s1 + $0x1c8] sm:$0xf0]  ;;  %v2847_v13 = vld [vmem:[%s6723_s1 + $0x38] sm:$0xf0]  ;;  %v2986_v26 = vor.u32 %v4095_v5, %v2983_v8 }
  0x2c   : > { %680 = vmatpush.bf16.msra.mxu2 %v2950_v36  ;;  %v4656_v14 = vld [vmem:[%s6723_s1 + $0xb4] sm:$0xf]  ;;  %v4661_v15 = vld [vmem:[%s6723_s1 + $0xb8] sm:$0xf0]  ;;  %s4666_s14 = scalar_select %p170_p3, %s4354_s13, 1  ;;  %v3050_v30 = vor.u32 %v4111_v9, %v3047_v10  ;;  %vm219_vm1 = vcmask 1045508   ;;  %v2850_v32 = vor.u32 %v4061_v12, %v2847_v13 }
  0x2d   : > { %694 = vmatpush.bf16.msra.mxu3 %v3014_v39  ;;  %v4093_v16 = vld [vmem:[%s6723_s1 + $0x134] sm:$0xf]  ;;  %v2975_v17 = vld [vmem:[%s6723_s1 + $0x138] sm:$0xf0]  ;;  %v4687_v20 = vld [vmem:[%s6723_s1 + $0x24] sm:$0xf]  ;;  %v2914_v33 = vor.u32 %v4656_v14, %v4661_v15 }
  0x2e   : > { %701 = vmatpush.bf16.msrb.mxu0 %v2882_v40  ;;  %v4677_v18 = vld [vmem:[%s6723_s1 + $0x1b4] sm:$0xf]  ;;  %v4682_v19 = vld [vmem:[%s6723_s1 + $0x1b8] sm:$0xf0]  ;;  %v4692_v21 = vld [vmem:[%s6723_s1 + $0x28] sm:$0xf0]  ;;  %v2978_v37 = vor.u32 %v4093_v16, %v2975_v17 }
  0x2f   : > { %715 = vmatpush.bf16.msrb.mxu1 %v2946_v41  ;;  %v4697_v23 = vld [vmem:[%s6723_s1 + $0xa4] sm:$0xf]  ;;  %v4702_v24 = vld [vmem:[%s6723_s1 + $0xa8] sm:$0xf0]  ;;  %s4311_s4 = smul.u32 80, %s4666_s14  ;;  %vm223_vm2 = vcmask 1043456   ;;  %v3042_v38 = vor.u32 %v4677_v18, %v4682_v19  ;;  %v2842_v39 = vor.u32 %v4687_v20, %v4692_v21 }
  0x30   : > { %729 = vmatpush.bf16.msrb.mxu2 %v3010_v42  ;;  %v4708_v27 = vld [vmem:[%s6723_s1 + $0x124] sm:$0xf]  ;;  %v4713_v28 = vld [vmem:[%s6723_s1 + $0x128] sm:$0xf0]  ;;  %v2906_v40 = vor.u32 %v4697_v23, %v4702_v24  ;;  %v4057_v1 = vld [vmem:[%s6723_s1 + $0x14] sm:$0xf] }
  0x31   : > { %743 = vmatpush.bf16.msrb.mxu3 %v3074_v46  ;;  %v4718_v29 = vld [vmem:[%s6723_s1 + $0x1a4] sm:$0xf]  ;;  %v4723_v31 = vld [vmem:[%s6723_s1 + $0x1a8] sm:$0xf0]  ;;  %s4728_s18 = scalar_lea.vmem %s6722_s0, %s4311_s4  ;;  %v2970_v44 = vor.u32 %v4708_v27, %v4713_v28  ;;  %v4073_v3 = vld [vmem:[%s6723_s1 + $0x94] sm:$0xf] }
  0x32   : > { %702 = vmatpush.bf16.msrb.mxu0 %v2874_v52  ;;  %v187_v34 = vld [vmem:[%s4728_s18] sm:$0x33]  ;;  %v188_v35 = vld [vmem:[%s4728_s18 + $0x8] sm:$0x33]  ;;  %v189_v36 = vld [vmem:[%s4728_s18 + $0x10] sm:$0x33]  ;;  %v3034_v45 = vor.u32 %v4718_v29, %v4723_v31 }
  0x33   : > { %716 = vmatpush.bf16.msrb.mxu1 %v2938_v54  ;;  %v190_v41 = vld [vmem:[%s4728_s18 + $0x18] sm:$0x33]  ;;  %v191_v42 = vld [vmem:[%s4728_s18 + $0x20] sm:$0x33]  ;;  %v192_v43 = vld [vmem:[%s4728_s18 + $0x28] sm:$0x33] }
  0x34   : > { %730 = vmatpush.bf16.msrb.mxu2 %v3002_v55  ;;  %v193_v46 = vld [vmem:[%s4728_s18 + $0x30] sm:$0x33]  ;;  %v194_v47 = vld [vmem:[%s4728_s18 + $0x38] sm:$0x33]  ;;  %v203_v48 = vrot.slane %v187_v34, 2  ;;  %v204_v49 = vrot.slane %v188_v35, 4 }
  0x35   : > { %744 = vmatpush.bf16.msrb.mxu3 %v3066_v59  ;;  %v205_v50 = vrot.slane %v188_v35, 6  ;;  %v206_v51 = vrot.slane %v189_v36, 2  ;;  %v207_v52 = vrot.slane %v190_v41, 4  ;;  %v208_v53 = vrot.slane %v190_v41, 6  ;;  %v2895_v8 = vld [vmem:[%s6723_s1 + $0x98] sm:$0xf0] }
  0x36   : > { %703 = vmatpush.bf16.msrb.mxu0 %v2866_v2  ;;  %v209_v54 = vrot.slane %v191_v42, 2  ;;  %v210_v55 = vrot.slane %v192_v43, 4  ;;  %v211_v56 = vrot.slane %v192_v43, 6  ;;  %v212_v57 = vrot.slane %v193_v46, 2  ;;  %v2831_v2 = vld [vmem:[%s6723_s1 + $0x18] sm:$0xf0] }
  0x37   : > { %717 = vmatpush.bf16.msrb.mxu1 %v2930_v6  ;;  %v213_v58 = vrot.slane %v194_v47, 4  ;;  %v214_v59 = vrot.slane %v194_v47, 6  ;;  %v218_v60 = vsel %vm215_vm0, %v187_v34, %v203_v48  ;;  %v222_v61 = vsel %vm219_vm1, %v204_v49, %v205_v50  ;;  %v4089_v9 = vld [vmem:[%s6723_s1 + $0x114] sm:$0xf]  ;;  %v2959_v10 = vld [vmem:[%s6723_s1 + $0x118] sm:$0xf0] }
  0x38   : > { %731 = vmatpush.bf16.msrb.mxu2 %v2994_v7  ;;  %v224_v62 = vsel %vm223_vm2, %v218_v60, %v222_v61  ;;  %v227_v63 = vsel %vm215_vm0, %v189_v36, %v206_v51  ;;  %v230_v0 = vsel %vm219_vm1, %v207_v52, %v208_v53  ;;  %v234_v5 = vsel %vm215_vm0, %v191_v42, %v209_v54  ;;  %v4105_v13 = vld [vmem:[%s6723_s1 + $0x194] sm:$0xf]  ;;  %v3023_v14 = vld [vmem:[%s6723_s1 + $0x198] sm:$0xf0]  ;;  %v4055_v17 = vld [vmem:[%s6723_s1 + $0x4] sm:$0xf] }
  0x39   : > { %745 = vmatpush.bf16.msrb.mxu3 %v3058_v11  ;;  %v231_v4 = vsel %vm223_vm2, %v227_v63, %v230_v0  ;;  %v237_v6 = vsel %vm219_vm1, %v210_v55, %v211_v56  ;;  %v241_v7 = vsel %vm215_vm0, %v193_v46, %v212_v57  ;;  %v244_v12 = vsel %vm219_vm1, %v213_v58, %v214_v59  ;;  %v2823_v18 = vld [vmem:[%s6723_s1 + $0x8] sm:$0xf0]  ;;  %v4071_v21 = vld [vmem:[%s6723_s1 + $0x84] sm:$0xf]  ;;  %v3197_v29 = vld [vmem:[%s6723_s1 + $0x270] sm:$0xf] }
  0x3a   : > { %704 = vmatpush.bf16.msrb.mxu0 %v2858_v22  ;;  %v238_v11 = vsel %vm223_vm2, %v234_v5, %v237_v6  ;;  %310 = vst [vmem:[#allocation1] ss:$4 sm:$0xff] %v224_v62  ;;  %v245_v15 = vsel %vm223_vm2, %v241_v7, %v244_v12  ;;  %v2834_v16 = vor.u32 %v4057_v1, %v2831_v2  ;;  %v2887_v22 = vld [vmem:[%s6723_s1 + $0x88] sm:$0xf0]  ;;  %v4087_v24 = vld [vmem:[%s6723_s1 + $0x104] sm:$0xf] }
  0x3b   : > { %718 = vmatpush.bf16.msrb.mxu1 %v2922_v25  ;;  %312 = vst [vmem:[#allocation1 + $0x1] ss:$4 sm:$0xff] %v231_v4  ;;  %v2898_v19 = vor.u32 %v4073_v3, %v2895_v8  ;;  %v2962_v20 = vor.u32 %v4089_v9, %v2959_v10  ;;  %v3026_v23 = vor.u32 %v4105_v13, %v3023_v14  ;;  %v2951_v25 = vld [vmem:[%s6723_s1 + $0x108] sm:$0xf0]  ;;  %v4103_v27 = vld [vmem:[%s6723_s1 + $0x184] sm:$0xf] }
  0x3c   : > { %732 = vmatpush.bf16.msrb.mxu2 %v2986_v26  ;;  %314 = vst [vmem:[#allocation1 + $0x2] ss:$4 sm:$0xff] %v238_v11  ;;  %v2826_v26 = vor.u32 %v4055_v17, %v2823_v18  ;;  %v3015_v28 = vld [vmem:[%s6723_s1 + $0x188] sm:$0xf0]  ;;  %v2954_v31 = vor.u32 %v4087_v24, %v2951_v25  ;;  %v4150_v34 = vld [vmem:[%s6723_s1 + $0x2f4] sm:$0xf0] }
  0x3d   : > { %746 = vmatpush.bf16.msrb.mxu3 %v3050_v30  ;;  %316 = vst [vmem:[#allocation1 + $0x3] ss:$4 sm:$0xff] %v245_v15  ;;  %v2890_v30 = vor.u32 %v4071_v21, %v2887_v22  ;;  %v3325_v35 = vld [vmem:[%s6723_s1 + $0x370] sm:$0xf]  ;;  %v4166_v36 = vld [vmem:[%s6723_s1 + $0x374] sm:$0xf0]  ;;  %v3018_v41 = vor.u32 %v4103_v27, %v3015_v28 }
  0x3e   : > { %705 = vmatpush.bf16.msrb.mxu0 %v2850_v32  ;;  %v4134_v32 = vld [vmem:[%s6723_s1 + $0x274] sm:$0xf0]  ;;  %v3253_v43 = vld [vmem:[%s6723_s1 + $0x2e0] sm:$0xf]  ;;  %v4164_v46 = vld [vmem:[%s6723_s1 + $0x364] sm:$0xf0]  ;;  %v3326_v50 = vor.u32 %v4166_v36, %v3325_v35 }
  0x3f   : > { %719 = vmatpush.bf16.msrb.mxu1 %v2914_v33  ;;  %v3261_v33 = vld [vmem:[%s6723_s1 + $0x2f0] sm:$0xf]  ;;  %v3198_v42 = vor.u32 %v4134_v32, %v3197_v29  ;;  %v3381_v51 = vld [vmem:[%s6723_s1 + $0x3e0] sm:$0xf]  ;;  %v4180_v55 = vld [vmem:[%s6723_s1 + $0x3e4] sm:$0xf0] }
  0x40   : > { %733 = vmatpush.bf16.msrb.mxu2 %v2978_v37  ;;  %v3389_v37 = vld [vmem:[%s6723_s1 + $0x3f0] sm:$0xf]  ;;  %v3262_v49 = vor.u32 %v4150_v34, %v3261_v33  ;;  %v4878_v57 = vld [vmem:[%s6723_s1 + $0x254] sm:$0xf0]  ;;  %v3382_v3 = vor.u32 %v4180_v55, %v3381_v51  ;;  %v4913_v4 = vld [vmem:[%s6723_s1 + $0x240] sm:$0xf] }
  0x41   : > { %747 = vmatpush.bf16.msrb.mxu3 %v3042_v38  ;;  %v4182_v38 = vld [vmem:[%s6723_s1 + $0x3f4] sm:$0xf0]  ;;  %v4873_v56 = vld [vmem:[%s6723_s1 + $0x250] sm:$0xf]  ;;  %v4918_v5 = vld [vmem:[%s6723_s1 + $0x244] sm:$0xf0] }
  0x42   : > { %706 = vmatpush.bf16.msrb.mxu0 %v2842_v39  ;;  %v3189_v39 = vld [vmem:[%s6723_s1 + $0x260] sm:$0xf]  ;;  %v3390_v54 = vor.u32 %v4182_v38, %v3389_v37  ;;  %v4883_v59 = vld [vmem:[%s6723_s1 + $0x2d0] sm:$0xf]  ;;  %v4888_v60 = vld [vmem:[%s6723_s1 + $0x2d4] sm:$0xf0]  ;;  %v3182_v18 = vor.u32 %v4878_v57, %v4873_v56 }
  0x43   : > { %720 = vmatpush.bf16.msrb.mxu1 %v2906_v40  ;;  %v4132_v40 = vld [vmem:[%s6723_s1 + $0x264] sm:$0xf0]  ;;  %v4893_v61 = vld [vmem:[%s6723_s1 + $0x350] sm:$0xf]  ;;  %v4898_v0 = vld [vmem:[%s6723_s1 + $0x354] sm:$0xf0]  ;;  %v3246_v25 = vor.u32 %v4888_v60, %v4883_v59 }
  0x44   : > { %734 = vmatpush.bf16.msrb.mxu2 %v2970_v44  ;;  %v4148_v44 = vld [vmem:[%s6723_s1 + $0x2e4] sm:$0xf0]  ;;  %v4852_v47 = vld.sshfl [vmem:[#allocation1 + $0x10] sm:$0xff pattern:$0x73625140]  ;;  %v3190_v58 = vor.u32 %v4132_v40, %v3189_v39  ;;  %vm796_vm3 = vcmask 1043458  }
  0x45   : > { %748 = vmatpush.bf16.msrb.mxu3 %v3034_v45  ;;  %v3317_v45 = vld [vmem:[%s6723_s1 + $0x360] sm:$0xf]  ;;  %v4854_v48 = vld.sshfl [vmem:[#allocation1 + $0x18] sm:$0xff pattern:$0x73625140]  ;;  %681 = vmatmul.bf16.vlgmr.msra.gmra.mxu2 %v4852_v47  ;;  %v3254_v62 = vor.u32 %v4148_v44, %v3253_v43  ;;  %v3174_v44 = vor.u32 %v4918_v5, %v4913_v4  ;;  %vm798_vm4 = vcmask 1045504  }
  0x46   : > { %707 = vmatpush.bf16.msrb.mxu0 %v2834_v16  ;;  %695 = vmatmul.bf16.vlgmr.msra.gmra.mxu3 %v4854_v48  ;;  %v4861_v52 = vld.sshfl [vmem:[#allocation1] sm:$0xff pattern:$0x73625140]  ;;  %v4863_v53 = vld.sshfl [vmem:[#allocation1 + $0x8] sm:$0xff pattern:$0x73625140]  ;;  %v3318_v63 = vor.u32 %v4164_v46, %v3317_v45 }
  0x47   : > { %721 = vmatpush.bf16.msrb.mxu1 %v2898_v19  ;;  %653 = vmatmul.bf16.vlgmr.msra.gmra.mxu0 %v4861_v52  ;;  %v4903_v1 = vld [vmem:[%s6723_s1 + $0x3d0] sm:$0xf]  ;;  %v4908_v2 = vld [vmem:[%s6723_s1 + $0x3d4] sm:$0xf0]  ;;  %v4923_v6 = vld [vmem:[%s6723_s1 + $0x2c0] sm:$0xf] }
  0x48   : > { %735 = vmatpush.bf16.msrb.mxu2 %v2962_v20  ;;  %667 = vmatmul.bf16.vlgmr.msra.gmra.mxu1 %v4863_v53  ;;  %v4928_v7 = vld [vmem:[%s6723_s1 + $0x2c4] sm:$0xf0]  ;;  %v4933_v8 = vld [vmem:[%s6723_s1 + $0x340] sm:$0xf]  ;;  %v4953_v12 = vld [vmem:[%s6723_s1 + $0x230] sm:$0xf]  ;;  %v3374_v35 = vor.u32 %v4908_v2, %v4903_v1 }
  0x49   : > { %749 = vmatpush.bf16.msrb.mxu3 %v3026_v23  ;;  %v4938_v9 = vld [vmem:[%s6723_s1 + $0x344] sm:$0xf0]  ;;  %v4943_v10 = vld [vmem:[%s6723_s1 + $0x3c0] sm:$0xf]  ;;  %v4958_v13 = vld [vmem:[%s6723_s1 + $0x234] sm:$0xf0]  ;;  %v3238_v45 = vor.u32 %v4928_v7, %v4923_v6 }
  0x4a   : > { %708 = vmatpush.bf16.msrb.mxu0 %v2826_v26  ;;  %v4948_v11 = vld [vmem:[%s6723_s1 + $0x3c4] sm:$0xf0]  ;;  %v4963_v14 = vld [vmem:[%s6723_s1 + $0x2b0] sm:$0xf]  ;;  %v4968_v15 = vld [vmem:[%s6723_s1 + $0x2b4] sm:$0xf0]  ;;  %v3310_v26 = vor.u32 %v4898_v0, %v4893_v61  ;;  %v3302_v46 = vor.u32 %v4938_v9, %v4933_v8  ;;  %v3166_v55 = vor.u32 %v4958_v13, %v4953_v12 }
  0x4b   : > { %722 = vmatpush.bf16.msrb.mxu1 %v2890_v30  ;;  %v4973_v16 = vld [vmem:[%s6723_s1 + $0x330] sm:$0xf]  ;;  %v4978_v17 = vld [vmem:[%s6723_s1 + $0x334] sm:$0xf0]  ;;  %v4995_v21 = vld [vmem:[%s6723_s1 + $0x220] sm:$0xf]  ;;  %v3230_v56 = vor.u32 %v4968_v15, %v4963_v14 }
  0x4c   : > { %736 = vmatpush.bf16.msrb.mxu2 %v2954_v31  ;;  %v4985_v19 = vld [vmem:[%s6723_s1 + $0x3b0] sm:$0xf]  ;;  %v4990_v20 = vld [vmem:[%s6723_s1 + $0x3b4] sm:$0xf0]  ;;  %v5000_v22 = vld [vmem:[%s6723_s1 + $0x224] sm:$0xf0]  ;;  %v3294_v57 = vor.u32 %v4978_v17, %v4973_v16 }
  0x4d   : > { %750 = vmatpush.bf16.msrb.mxu3 %v3018_v41  ;;  %v5005_v23 = vld [vmem:[%s6723_s1 + $0x2a0] sm:$0xf]  ;;  %v5010_v24 = vld [vmem:[%s6723_s1 + $0x2a4] sm:$0xf0]  ;;  %v5039_v31 = vld [vmem:[%s6723_s1 + $0x210] sm:$0xf]  ;;  %v3358_v61 = vor.u32 %v4990_v20, %v4985_v19 }
  0x4e   : > { %1303 = vmatpush.bf16.msra.mxu0 %v3198_v42  ;;  %v5019_v27 = vld [vmem:[%s6723_s1 + $0x320] sm:$0xf]  ;;  %v5024_v28 = vld [vmem:[%s6723_s1 + $0x324] sm:$0xf0]  ;;  %v5044_v32 = vld [vmem:[%s6723_s1 + $0x214] sm:$0xf0] }
  0x4f   : > { %1317 = vmatpush.bf16.msra.mxu1 %v3262_v49  ;;  %v5029_v29 = vld [vmem:[%s6723_s1 + $0x3a0] sm:$0xf]  ;;  %v5034_v30 = vld [vmem:[%s6723_s1 + $0x3a4] sm:$0xf0]  ;;  %v5049_v33 = vld [vmem:[%s6723_s1 + $0x290] sm:$0xf] }
  0x50   : > { %1331 = vmatpush.bf16.msra.mxu2 %v3326_v50  ;;  %v5054_v34 = vld [vmem:[%s6723_s1 + $0x294] sm:$0xf0]  ;;  %v5061_v36 = vld [vmem:[%s6723_s1 + $0x310] sm:$0xf]  ;;  %v5081_v40 = vld [vmem:[%s6723_s1 + $0x200] sm:$0xf] }
  0x51   : > { %1345 = vmatpush.bf16.msra.mxu3 %v3390_v54  ;;  %v5066_v37 = vld [vmem:[%s6723_s1 + $0x314] sm:$0xf0]  ;;  %v5071_v38 = vld [vmem:[%s6723_s1 + $0x390] sm:$0xf]  ;;  %v5086_v41 = vld [vmem:[%s6723_s1 + $0x204] sm:$0xf0]  ;;  %v3366_v54 = vor.u32 %v4948_v11, %v4943_v10 }
  0x52   : > { %1304 = vmatpush.bf16.msra.mxu0 %v3190_v58  ;;  %v5076_v39 = vld [vmem:[%s6723_s1 + $0x394] sm:$0xf0]  ;;  %v5091_v42 = vld [vmem:[%s6723_s1 + $0x280] sm:$0xf]  ;;  %v5096_v43 = vld [vmem:[%s6723_s1 + $0x284] sm:$0xf0] }
  0x53   : > { %1318 = vmatpush.bf16.msra.mxu1 %v3254_v62  ;;  %v5107_v49 = vld [vmem:[%s6723_s1 + $0x300] sm:$0xf]  ;;  %v5112_v50 = vld [vmem:[%s6723_s1 + $0x304] sm:$0xf0]  ;;  %v5135_v59 = vld [vmem:[%s6723_s1 + $0x274] sm:$0xf]  ;;  %v3158_v62 = vor.u32 %v5000_v22, %v4995_v21 }
  0x54   : > { %1332 = vmatpush.bf16.msra.mxu2 %v3318_v63  ;;  %v5117_v51 = vld [vmem:[%s6723_s1 + $0x380] sm:$0xf]  ;;  %v5130_v58 = vld [vmem:[%s6723_s1 + $0x384] sm:$0xf0]  ;;  %v5140_v60 = vld [vmem:[%s6723_s1 + $0x278] sm:$0xf0] }
  0x55   : > { %1346 = vmatpush.bf16.msra.mxu3 %v3382_v3  ;;  %v5151_v0 = vld [vmem:[%s6723_s1 + $0x2f4] sm:$0xf]  ;;  %v5156_v1 = vld [vmem:[%s6723_s1 + $0x2f8] sm:$0xf0]  ;;  %v761_v16 = vld [vmem:[%s4728_s18] sm:$0x77]  ;;  %737 = vmatmul.bf16.vlgmr.msrb.gmra.mxu2 %v4852_v47 }
  0x56   : > { %1305 = vmatpush.bf16.msra.mxu0 %v3182_v18  ;;  %v5161_v2 = vld [vmem:[%s6723_s1 + $0x374] sm:$0xf]  ;;  %v5174_v7 = vld [vmem:[%s6723_s1 + $0x378] sm:$0xf0]  ;;  %v762_v17 = vld [vmem:[%s4728_s18 + $0x8] sm:$0x77]  ;;  %751 = vmatmul.bf16.vlgmr.msrb.gmra.mxu3 %v4854_v48 }
  0x57   : > { %1319 = vmatpush.bf16.msra.mxu1 %v3246_v25  ;;  %v5179_v8 = vld [vmem:[%s6723_s1 + $0x3f4] sm:$0xf]  ;;  %v5184_v9 = vld [vmem:[%s6723_s1 + $0x3f8] sm:$0xf0]  ;;  %v765_v13 = vld [vmem:[%s4728_s18 + $0x20] sm:$0x77]  ;;  %709 = vmatmul.bf16.vlgmr.msrb.gmra.mxu0 %v4861_v52 }
  0x58   : > { %1333 = vmatpush.bf16.msra.mxu2 %v3310_v26  ;;  %v763_v18 = vld [vmem:[%s4728_s18 + $0x10] sm:$0x77]  ;;  %v766_v12 = vld [vmem:[%s4728_s18 + $0x28] sm:$0x77]  ;;  %v768_v10 = vld [vmem:[%s4728_s18 + $0x38] sm:$0x77]  ;;  %723 = vmatmul.bf16.vlgmr.msrb.gmra.mxu1 %v4863_v53 }
  0x59   : > { %1347 = vmatpush.bf16.msra.mxu3 %v3374_v35  ;;  %v764_v35 = vld [vmem:[%s4728_s18 + $0x18] sm:$0x77]  ;;  %v767_v11 = vld [vmem:[%s4728_s18 + $0x30] sm:$0x77]  ;;  %v777_v20 = vrot.slane %v761_v16, 2  ;;  %v778_v6 = vrot.slane %v762_v17, 4 }
  0x5a   : > { %1306 = vmatpush.bf16.msra.mxu0 %v3174_v44  ;;  %v779_v25 = vrot.slane %v762_v17, 6  ;;  %v780_v26 = vrot.slane %v763_v18, 2  ;;  %v781_v5 = vrot.slane %v764_v35, 4  ;;  %v782_v4 = vrot.slane %v764_v35, 6  ;;  %s2814_s30 = sshll.u32 %s4354_s13, 1  ;;  %s4054_s7 = sshll.u32 %s4666_s14, 2 }
  0x5b   : > { %1320 = vmatpush.bf16.msra.mxu1 %v3238_v45  ;;  %v783_v45 = vrot.slane %v765_v13, 2  ;;  %v785_v44 = vrot.slane %v766_v12, 6  ;;  %v786_v3 = vrot.slane %v767_v11, 2  ;;  %v787_v19 = vrot.slane %v768_v10, 4  ;;  %p176_p4 = scmp.lt.s32.totalorder %s2814_s30, 3  ;;  %s186_s10 = scalar_lea.vmem %s6725_s3, %s4054_s7 }
  0x5c   : > { %1334 = vmatpush.bf16.msra.mxu2 %v3302_v46  ;;  %v784_v46 = vrot.slane %v766_v12, 4  ;;  %v788_v63 = vrot.slane %v768_v10, 6  ;;  %v794_v47 = vsel %vm219_vm1, %v778_v6, %v779_v25  ;;  %vm800_vm5 = vcmask 1045506  }
  0x5d   : > { %1348 = vmatpush.bf16.msra.mxu3 %v3366_v54  ;;  %v791_v54 = vsel %vm215_vm0, %v761_v16, %v777_v20  ;;  %v797_v52 = vsel %vm796_vm3, %v761_v16, %v777_v20  ;;  %v799_v53 = vsel %vm798_vm4, %v779_v25, %v778_v6  ;;  %v809_v10 = vsel %vm219_vm1, %v781_v5, %v782_v4  ;;  %s6777_s30 = smov (!%p176_p4, %s2814_s30), 3 }
  0x5e   : > { %1307 = vmatpush.bf16.msra.mxu0 %v3166_v55  ;;  %v795_v48 = vsel %vm223_vm2, %v791_v54, %v794_v47  ;;  %v806_v55 = vsel %vm215_vm0, %v763_v18, %v780_v26  ;;  %v801_v12 = vsel %vm800_vm5, %v797_v52, %v799_v53  ;;  %v811_v15 = vsel %vm796_vm3, %v763_v18, %v780_v26  ;;  %s4053_s13 = sshll.u32 %s6777_s30, 3 }
  0x5f   : > { %1321 = vmatpush.bf16.msra.mxu1 %v3230_v56  ;;  %v810_v14 = vsel %vm223_vm2, %v806_v55, %v809_v10  ;;  %v812_v56 = vsel %vm798_vm4, %v782_v4, %v781_v5  ;;  %v818_v6 = vsel %vm215_vm0, %v765_v13, %v783_v45  ;;  %v821_v16 = vsel %vm219_vm1, %v784_v46, %v785_v44  ;;  %s180_s6 = scalar_lea.vmem %s6724_s2, %s4053_s13 }
  0x60   : > { %1335 = vmatpush.bf16.msra.mxu2 %v3294_v57  ;;  %v803_v57 = vrot.slane %v801_v12, 2  ;;  %v6730_v17 = vor.u32 %v5010_v24, %v5005_v23  ;;  %v6731_v18 = vor.u32 %v5024_v28, %v5019_v27  ;;  %v822_v5 = vsel %vm223_vm2, %v818_v6, %v821_v16 }
  0x61   : > { %1349 = vmatpush.bf16.msra.mxu3 %v3358_v61  ;;  %v813_v61 = vsel %vm800_vm5, %v811_v15, %v812_v56  ;;  %v823_v21 = vsel %vm796_vm3, %v765_v13, %v783_v45  ;;  %v824_v22 = vsel %vm798_vm4, %v785_v44, %v784_v46  ;;  %v830_v23 = vsel %vm215_vm0, %v767_v11, %v786_v3  ;;  %v3319_v15 = vld [vmem:[%s6723_s1 + $0x368] sm:$0xf0]  ;;  %v4179_v56 = vld [vmem:[%s6723_s1 + $0x3e4] sm:$0xf] }
  0x62   : > { %1308 = vmatpush.bf16.msra.mxu0 %v3158_v62  ;;  %v815_v4 = vrot.slane %v813_v61, 2  ;;  %v6732_v62 = vor.u32 %v5034_v30, %v5029_v29  ;;  %v825_v20 = vsel %vm800_vm5, %v823_v21, %v824_v22  ;;  %v833_v24 = vsel %vm219_vm1, %v787_v19, %v788_v63 }
  0x63   : > { %1322 = vmatpush.bf16.msra.mxu1 %v6730_v17  ;;  %v835_v27 = vsel %vm796_vm3, %v767_v11, %v786_v3  ;;  %v827_v28 = vrot.slane %v825_v20, 2  ;;  %v5255_v25 = vsel %vm223_vm2, %v830_v23, %v833_v24  ;;  %v836_v13 = vsel %vm798_vm4, %v788_v63, %v787_v19 }
  0x64   : > { %1336 = vmatpush.bf16.msra.mxu2 %v6731_v18  ;;  %vm840_vm6 = vsmask.f32 1280  ;;  %v6733_v26 = vor.u32 %v5044_v32, %v5039_v31  ;;  %v837_v29 = vsel %vm800_vm5, %v835_v27, %v836_v13  ;;  %vm841_vm7 = vsmask.f32 3336  ;;  %v5271_v31 = vld [vmem:[%s6723_s1 + $0x264] sm:$0xf] }
  0x65   : > { %1350 = vmatpush.bf16.msra.mxu3 %v6732_v62  ;;  %vm843_vm8 = vsmask.f32 5392  ;;  %vm845_vm9 = vsmask.f32 7448  ;;  %v6734_v30 = vor.u32 %v5054_v34, %v5049_v33  ;;  %v6735_v3 = vor.u32 %v5066_v37, %v5061_v36  ;;  %vm842_vm10 = vmor %vm840_vm6, %vm841_vm7  ;;  %v3191_v36 = vld [vmem:[%s6723_s1 + $0x268] sm:$0xf0] }
  0x66   : > { %1309 = vmatpush.bf16.msra.mxu0 %v6733_v26  ;;  %v839_v11 = vrot.slane %v837_v29, 2  ;;  %v847_v63 = vshrl.u32 %v795_v48, 16  ;;  %v850_v19 = vshll.u32 %v795_v48, 16  ;;  %v856_v35 = vshll.u32 %v803_v57, 16  ;;  %vm5280_vm11 = vmor %vm842_vm10, %vm843_vm8  ;;  %v4129_v18 = vld [vmem:[%s6723_s1 + $0x254] sm:$0xf] }
  0x67   : > { %1323 = vmatpush.bf16.msra.mxu1 %v6734_v30  ;;  %v6736_v32 = vor.u32 %v5076_v39, %v5071_v38  ;;  %v860_v33 = vshrl.u32 %v810_v14, 16  ;;  %v863_v34 = vshll.u32 %v810_v14, 16  ;;  %v869_v44 = vshll.u32 %v815_v4, 16  ;;  %v4147_v38 = vld [vmem:[%s6723_s1 + $0x2e4] sm:$0xf]  ;;  %vm5327_vm12 = vmor %vm5280_vm11, %vm845_vm9 }
  0x68   : > { %1337 = vmatpush.bf16.msra.mxu2 %v6735_v3  ;;  %v873_v45 = vshrl.u32 %v822_v5, 16  ;;  %v849_v46 = vrot.slane %v847_v63, 6  ;;  %v852_v54 = vrot.slane %v850_v19, 7  ;;  %v858_v47 = vrot.slane %v856_v35, 7  ;;  %v3255_v39 = vld [vmem:[%s6723_s1 + $0x2e8] sm:$0xf0] }
  0x69   : > { %1351 = vmatpush.bf16.msra.mxu3 %v6736_v32  ;;  %v876_v48 = vshll.u32 %v822_v5, 16  ;;  %v6739_v52 = vor.u32 %v5086_v41, %v5081_v40  ;;  %v862_v53 = vrot.slane %v860_v33, 6  ;;  %v865_v55 = vrot.slane %v863_v34, 7  ;;  %v4163_v14 = vld [vmem:[%s6723_s1 + $0x364] sm:$0xf] }
  0x6a   : > { %v871_v10 = vrot.slane %v869_v44, 7  ;;  %v875_v12 = vrot.slane %v873_v45, 6  ;;  %v3383_v40 = vld [vmem:[%s6723_s1 + $0x3e8] sm:$0xf0]  ;;  %v6740_v41 = vor.u32 %v5096_v43, %v5091_v42  ;;  %v6741_v57 = vor.u32 %v5112_v50, %v5107_v49  ;;  %v3183_v4 = vld [vmem:[%s6723_s1 + $0x258] sm:$0xf0] }
  0x6b   : > { %1310 = vmatpush.bf16.msra.mxu0 %v6739_v52  ;;  %v853_v61 = vor.u32 %v852_v54, %v849_v46  ;;  %v878_v6 = vrot.slane %v876_v48, 7  ;;  %v882_v16 = vshll.u32 %v827_v28, 16  ;;  %v886_v17 = vshrl.u32 %v5255_v25, 16  ;;  %v3311_v28 = vld [vmem:[%s6723_s1 + $0x358] sm:$0xf0] }
  0x6c   : > { %1324 = vmatpush.bf16.msra.mxu1 %v6740_v41  ;;  %1338 = vmatpush.bf16.msra.mxu2 %v6741_v57  ;;  %v6742_v42 = vor.u32 %v5130_v58, %v5117_v51  ;;  %v6743_v43 = vor.u32 %v5135_v59, %v5140_v60  ;;  %v866_v50 = vor.u32 %v865_v55, %v862_v53  ;;  %v889_v5 = vshll.u32 %v5255_v25, 16  ;;  %v4145_v51 = vld [vmem:[%s6723_s1 + $0x2d4] sm:$0xf]  ;;  %v3247_v58 = vld [vmem:[%s6723_s1 + $0x2d8] sm:$0xf0] }
  0x6d   : > { %v895_v21 = vshll.u32 %v839_v11, 16  ;;  %v3194_v22 = vor.u32 %v5271_v31, %v3191_v36  ;;  %v4161_v59 = vld [vmem:[%s6723_s1 + $0x354] sm:$0xf]  ;;  %v6746_v60 = vor.u32 %v5151_v0, %v5156_v1  ;;  %v6747_v62 = vor.u32 %v5161_v2, %v5174_v7  ;;  %v3375_v2 = vld [vmem:[%s6723_s1 + $0x3d8] sm:$0xf0] }
  0x6e   : > { %1352 = vmatpush.bf16.msra.mxu3 %v6742_v42  ;;  %v854_v20 = vrot.slane %v853_v61, 2  ;;  %v879_v23 = vor.u32 %v878_v6, %v875_v12  ;;  %v884_v24 = vrot.slane %v882_v16, 7  ;;  %v888_v27 = vrot.slane %v886_v17, 6  ;;  %v4177_v1 = vld [vmem:[%s6723_s1 + $0x3d4] sm:$0xf] }
  0x6f   : > { %1359 = vmatpush.bf16.msrb.mxu0 %v6743_v43  ;;  %v6748_v25 = vor.u32 %v5179_v8, %v5184_v9  ;;  %v867_v13 = vrot.slane %v866_v50, 2  ;;  %v891_v26 = vrot.slane %v889_v5, 7  ;;  %v3258_v0 = vor.u32 %v4147_v38, %v3255_v39  ;;  %v4127_v8 = vld [vmem:[%s6723_s1 + $0x244] sm:$0xf]  ;;  %v3175_v9 = vld [vmem:[%s6723_s1 + $0x248] sm:$0xf0] }
  0x70   : > { %1373 = vmatpush.bf16.msrb.mxu1 %v6746_v60  ;;  %1387 = vmatpush.bf16.msrb.mxu2 %v6747_v62  ;;  %v859_v7 = vsel %vm5327_vm12, %v854_v20, %v858_v47  ;;  %v880_v29 = vrot.slane %v879_v23, 2  ;;  %v3322_v30 = vor.u32 %v4163_v14, %v3319_v15  ;;  %v3386_v3 = vor.u32 %v4179_v56, %v3383_v40  ;;  %v4143_v31 = vld [vmem:[%s6723_s1 + $0x2c4] sm:$0xf]  ;;  %v3239_v44 = vld [vmem:[%s6723_s1 + $0x2c8] sm:$0xf0] }
  0x71   : > { %v872_v11 = vsel %vm5327_vm12, %v867_v13, %v871_v10  ;;  %v892_v63 = vor.u32 %v891_v26, %v888_v27  ;;  %v897_v19 = vrot.slane %v895_v21, 7  ;;  %965 = vst [vmem:[#allocation1] ss:$4 sm:$0xff] %v859_v7  ;;  %v3186_v35 = vor.u32 %v4129_v18, %v3183_v4  ;;  %v4159_v45 = vld [vmem:[%s6723_s1 + $0x344] sm:$0xf] }
  0x72   : > { %1401 = vmatpush.bf16.msrb.mxu3 %v6748_v25  ;;  %v885_v32 = vsel %vm5327_vm12, %v880_v29, %v884_v24  ;;  %968 = vst [vmem:[#allocation1 + $0x1] ss:$4 sm:$0xff] %v872_v11  ;;  %v3250_v33 = vor.u32 %v4145_v51, %v3247_v58  ;;  %v3314_v34 = vor.u32 %v4161_v59, %v3311_v28  ;;  %v3303_v46 = vld [vmem:[%s6723_s1 + $0x348] sm:$0xf0]  ;;  %v4175_v54 = vld [vmem:[%s6723_s1 + $0x3c4] sm:$0xf] }
  0x73   : > { %1360 = vmatpush.bf16.msrb.mxu0 %v3194_v22  ;;  %v893_v36 = vrot.slane %v892_v63, 2  ;;  %971 = vst [vmem:[#allocation1 + $0x2] ss:$4 sm:$0xff] %v885_v32  ;;  %v3378_v37 = vor.u32 %v4177_v1, %v3375_v2  ;;  %v3367_v47 = vld [vmem:[%s6723_s1 + $0x3c8] sm:$0xf0]  ;;  %v3178_v38 = vor.u32 %v4127_v8, %v3175_v9  ;;  %v3242_v39 = vor.u32 %v4143_v31, %v3239_v44 }
  0x74   : > { %1374 = vmatpush.bf16.msrb.mxu1 %v3258_v0  ;;  %1388 = vmatpush.bf16.msrb.mxu2 %v3322_v30  ;;  %v3306_v52 = vor.u32 %v4159_v45, %v3303_v46  ;;  %v4125_v53 = vld [vmem:[%s6723_s1 + $0x234] sm:$0xf]  ;;  %v3167_v55 = vld [vmem:[%s6723_s1 + $0x238] sm:$0xf0]  ;;  %v3370_v10 = vor.u32 %v4175_v54, %v3367_v47  ;;  %v4123_v61 = vld [vmem:[%s6723_s1 + $0x224] sm:$0xf] }
  0x75   : > { %v898_v48 = vsel %vm5327_vm12, %v893_v36, %v897_v19  ;;  %v4141_v12 = vld [vmem:[%s6723_s1 + $0x2b4] sm:$0xf]  ;;  %v3231_v14 = vld [vmem:[%s6723_s1 + $0x2b8] sm:$0xf0]  ;;  %v3170_v15 = vor.u32 %v4125_v53, %v3167_v55  ;;  %v3159_v6 = vld [vmem:[%s6723_s1 + $0x228] sm:$0xf0] }
  0x76   : > { %1402 = vmatpush.bf16.msrb.mxu3 %v3386_v3  ;;  %974 = vst [vmem:[#allocation1 + $0x3] ss:$4 sm:$0xff] %v898_v48  ;;  %v4157_v56 = vld [vmem:[%s6723_s1 + $0x334] sm:$0xf]  ;;  %v3295_v40 = vld [vmem:[%s6723_s1 + $0x338] sm:$0xf0]  ;;  %v3234_v42 = vor.u32 %v4141_v12, %v3231_v14  ;;  %v3162_v60 = vor.u32 %v4123_v61, %v3159_v6 }
  0x77   : > { %1361 = vmatpush.bf16.msrb.mxu0 %v3186_v35  ;;  %v4173_v41 = vld [vmem:[%s6723_s1 + $0x3b4] sm:$0xf]  ;;  %v3359_v57 = vld [vmem:[%s6723_s1 + $0x3b8] sm:$0xf0]  ;;  %v4139_v16 = vld [vmem:[%s6723_s1 + $0x2a4] sm:$0xf]  ;;  %v3298_v43 = vor.u32 %v4157_v56, %v3295_v40 }
  0x78   : > { %1375 = vmatpush.bf16.msrb.mxu1 %v3250_v33  ;;  %1389 = vmatpush.bf16.msrb.mxu2 %v3314_v34  ;;  %v3223_v17 = vld [vmem:[%s6723_s1 + $0x2a8] sm:$0xf0]  ;;  %v4155_v18 = vld [vmem:[%s6723_s1 + $0x324] sm:$0xf]  ;;  %v4121_v21 = vld [vmem:[%s6723_s1 + $0x214] sm:$0xf]  ;;  %v3362_v59 = vor.u32 %v4173_v41, %v3359_v57 }
  0x79   : > { %v3287_v4 = vld [vmem:[%s6723_s1 + $0x328] sm:$0xf0]  ;;  %v4171_v50 = vld [vmem:[%s6723_s1 + $0x3a4] sm:$0xf]  ;;  %v3151_v22 = vld [vmem:[%s6723_s1 + $0x218] sm:$0xf0]  ;;  %v3226_v23 = vor.u32 %v4139_v16, %v3223_v17 }
  0x7a   : > { %1403 = vmatpush.bf16.msrb.mxu3 %v3378_v37  ;;  %v3351_v5 = vld [vmem:[%s6723_s1 + $0x3a8] sm:$0xf0]  ;;  %v3290_v24 = vor.u32 %v4155_v18, %v3287_v4  ;;  %v4137_v27 = vld [vmem:[%s6723_s1 + $0x294] sm:$0xf]  ;;  %v3215_v28 = vld [vmem:[%s6723_s1 + $0x298] sm:$0xf0]  ;;  %v3154_v13 = vor.u32 %v4121_v21, %v3151_v22 }
  0x7b   : > { %1362 = vmatpush.bf16.msrb.mxu0 %v3178_v38  ;;  %v3354_v25 = vor.u32 %v4171_v50, %v3351_v5  ;;  %v4153_v26 = vld [vmem:[%s6723_s1 + $0x314] sm:$0xf]  ;;  %v3279_v0 = vld [vmem:[%s6723_s1 + $0x318] sm:$0xf0]  ;;  %v4119_v7 = vld [vmem:[%s6723_s1 + $0x204] sm:$0xf]  ;;  %v3218_v8 = vor.u32 %v4137_v27, %v3215_v28 }
  0x7c   : > { %1376 = vmatpush.bf16.msrb.mxu1 %v3242_v39  ;;  %1390 = vmatpush.bf16.msrb.mxu2 %v3306_v52  ;;  %v4169_v1 = vld [vmem:[%s6723_s1 + $0x394] sm:$0xf]  ;;  %v3343_v2 = vld [vmem:[%s6723_s1 + $0x398] sm:$0xf0]  ;;  %v3143_v29 = vld [vmem:[%s6723_s1 + $0x208] sm:$0xf0]  ;;  %v3282_v9 = vor.u32 %v4153_v26, %v3279_v0 }
  0x7d   : > { %v5446_v51 = vld.sshfl [vmem:[#allocation1 + $0x10] sm:$0xff pattern:$0x73625140]  ;;  %v5448_v58 = vld.sshfl [vmem:[#allocation1 + $0x18] sm:$0xff pattern:$0x73625140]  ;;  %v3346_v35 = vor.u32 %v4169_v1, %v3343_v2  ;;  %v3146_v31 = vor.u32 %v4119_v7, %v3143_v29 }
  0x7e   : > { %1404 = vmatpush.bf16.msrb.mxu3 %v3370_v10  ;;  %1339 = vmatmul.bf16.vlgmr.msra.gmra.mxu2 %v5446_v51  ;;  %v5452_v62 = vld.sshfl [vmem:[#allocation1] sm:$0xff pattern:$0x73625140]  ;;  %v5454_v20 = vld.sshfl [vmem:[#allocation1 + $0x8] sm:$0xff pattern:$0x73625140] }
  0x7f   : > { %1363 = vmatpush.bf16.msrb.mxu0 %v3170_v15  ;;  %1353 = vmatmul.bf16.vlgmr.msra.gmra.mxu3 %v5448_v58  ;;  %v3525_v30 = vld [vmem:[%s6723_s1 + $0x470] sm:$0xf]  ;;  %v4198_v3 = vld [vmem:[%s6723_s1 + $0x474] sm:$0xf0]  ;;  %v4135_v11 = vld [vmem:[%s6723_s1 + $0x284] sm:$0xf] }
  0x80   : > { %1311 = vmatmul.bf16.vlgmr.msra.gmra.mxu0 %v5452_v62  ;;  %1325 = vmatmul.bf16.vlgmr.msra.gmra.mxu1 %v5454_v20  ;;  %v3207_v63 = vld [vmem:[%s6723_s1 + $0x288] sm:$0xf0]  ;;  %v4151_v19 = vld [vmem:[%s6723_s1 + $0x304] sm:$0xf]  ;;  %v3526_v44 = vor.u32 %v4198_v3, %v3525_v30  ;;  %v3589_v45 = vld [vmem:[%s6723_s1 + $0x4f0] sm:$0xf] }
  0x81   : > { %1377 = vmatpush.bf16.msrb.mxu1 %v3234_v42  ;;  %1391 = vmatpush.bf16.msrb.mxu2 %v3298_v43  ;;  %v3271_v32 = vld [vmem:[%s6723_s1 + $0x308] sm:$0xf0]  ;;  %v4167_v33 = vld [vmem:[%s6723_s1 + $0x384] sm:$0xf]  ;;  %v4214_v36 = vld [vmem:[%s6723_s1 + $0x4f4] sm:$0xf0]  ;;  %v3210_v48 = vor.u32 %v4135_v11, %v3207_v63 }
  0x82   : > { %1405 = vmatpush.bf16.msrb.mxu3 %v3362_v59  ;;  %v3335_v34 = vld [vmem:[%s6723_s1 + $0x388] sm:$0xf0]  ;;  %v3653_v37 = vld [vmem:[%s6723_s1 + $0x570] sm:$0xf]  ;;  %v4230_v46 = vld [vmem:[%s6723_s1 + $0x574] sm:$0xf0]  ;;  %v3274_v38 = vor.u32 %v4151_v19, %v3271_v32  ;;  %v3590_v55 = vor.u32 %v4214_v36, %v3589_v45 }
  0x83   : > { %1364 = vmatpush.bf16.msrb.mxu0 %v3162_v60  ;;  %v3717_v54 = vld [vmem:[%s6723_s1 + $0x5f0] sm:$0xf]  ;;  %v4246_v47 = vld [vmem:[%s6723_s1 + $0x5f4] sm:$0xf0]  ;;  %v3517_v39 = vld [vmem:[%s6723_s1 + $0x460] sm:$0xf]  ;;  %v3338_v53 = vor.u32 %v4167_v33, %v3335_v34  ;;  %v3654_v10 = vor.u32 %v4230_v46, %v3653_v37 }
  0x84   : > { %v4196_v52 = vld [vmem:[%s6723_s1 + $0x464] sm:$0xf0]  ;;  %v3718_v12 = vor.u32 %v4246_v47, %v3717_v54  ;;  %v3581_v14 = vld [vmem:[%s6723_s1 + $0x4e0] sm:$0xf]  ;;  %v3509_v6 = vld [vmem:[%s6723_s1 + $0x450] sm:$0xf] }
  0x85   : > { %1378 = vmatpush.bf16.msrb.mxu1 %v3226_v23  ;;  %1392 = vmatpush.bf16.msrb.mxu2 %v3290_v24  ;;  %v4212_v15 = vld [vmem:[%s6723_s1 + $0x4e4] sm:$0xf0]  ;;  %v3645_v56 = vld [vmem:[%s6723_s1 + $0x560] sm:$0xf]  ;;  %v3518_v40 = vor.u32 %v4196_v52, %v3517_v39  ;;  %v4194_v16 = vld [vmem:[%s6723_s1 + $0x454] sm:$0xf0] }
  0x86   : > { %1406 = vmatpush.bf16.msrb.mxu3 %v3354_v25  ;;  %v4228_v41 = vld [vmem:[%s6723_s1 + $0x564] sm:$0xf0]  ;;  %v3709_v57 = vld [vmem:[%s6723_s1 + $0x5e0] sm:$0xf]  ;;  %v3582_v17 = vor.u32 %v4212_v15, %v3581_v14  ;;  %v3573_v18 = vld [vmem:[%s6723_s1 + $0x4d0] sm:$0xf]  ;;  %v3510_v22 = vor.u32 %v4194_v16, %v3509_v6 }
  0x87   : > { %1365 = vmatpush.bf16.msrb.mxu0 %v3154_v13  ;;  %v4244_v61 = vld [vmem:[%s6723_s1 + $0x5e4] sm:$0xf0]  ;;  %v4210_v4 = vld [vmem:[%s6723_s1 + $0x4d4] sm:$0xf0]  ;;  %v3646_v42 = vor.u32 %v4228_v41, %v3645_v56  ;;  %v3637_v50 = vld [vmem:[%s6723_s1 + $0x550] sm:$0xf] }
  0x88   : > { %v3710_v43 = vor.u32 %v4244_v61, %v3709_v57  ;;  %v4226_v5 = vld [vmem:[%s6723_s1 + $0x554] sm:$0xf0]  ;;  %v3701_v21 = vld [vmem:[%s6723_s1 + $0x5d0] sm:$0xf]  ;;  %v3501_v60 = vld [vmem:[%s6723_s1 + $0x440] sm:$0xf] }
  0x89   : > { %1379 = vmatpush.bf16.msrb.mxu1 %v3218_v8  ;;  %1393 = vmatpush.bf16.msrb.mxu2 %v3282_v9  ;;  %v4242_v59 = vld [vmem:[%s6723_s1 + $0x5d4] sm:$0xf0]  ;;  %v4192_v23 = vld [vmem:[%s6723_s1 + $0x444] sm:$0xf0]  ;;  %v3629_v27 = vld [vmem:[%s6723_s1 + $0x540] sm:$0xf]  ;;  %v3638_v1 = vor.u32 %v4226_v5, %v3637_v50 }
  0x8a   : > { %1407 = vmatpush.bf16.msrb.mxu3 %v3346_v35  ;;  %v4208_v24 = vld [vmem:[%s6723_s1 + $0x4c4] sm:$0xf0]  ;;  %v3493_v13 = vld [vmem:[%s6723_s1 + $0x430] sm:$0xf]  ;;  %v4190_v26 = vld [vmem:[%s6723_s1 + $0x434] sm:$0xf0]  ;;  %v3702_v2 = vor.u32 %v4242_v59, %v3701_v21  ;;  %v3502_v3 = vor.u32 %v4192_v23, %v3501_v60 }
  0x8b   : > { %1366 = vmatpush.bf16.msrb.mxu0 %v3146_v31  ;;  %v4224_v28 = vld [vmem:[%s6723_s1 + $0x544] sm:$0xf0]  ;;  %v5608_v0 = vld [vmem:[%s6723_s1 + $0x4b0] sm:$0xf]  ;;  %v5613_v7 = vld [vmem:[%s6723_s1 + $0x4b4] sm:$0xf0] }
  0x8c   : > { %v4240_v25 = vld [vmem:[%s6723_s1 + $0x5c4] sm:$0xf0]  ;;  %v5618_v29 = vld [vmem:[%s6723_s1 + $0x530] sm:$0xf]  ;;  %v5623_v30 = vld [vmem:[%s6723_s1 + $0x534] sm:$0xf0]  ;;  %v3630_v31 = vor.u32 %v4224_v28, %v3629_v27  ;;  %v3558_v45 = vor.u32 %v5613_v7, %v5608_v0 }
  0x8d   : > { %1380 = vmatpush.bf16.msrb.mxu1 %v3210_v48  ;;  %1394 = vmatpush.bf16.msrb.mxu2 %v3274_v38  ;;  %v5629_v8 = vld [vmem:[%s6723_s1 + $0x5b0] sm:$0xf]  ;;  %v5634_v9 = vld [vmem:[%s6723_s1 + $0x5b4] sm:$0xf0]  ;;  %v5639_v11 = vld [vmem:[%s6723_s1 + $0x420] sm:$0xf]  ;;  %v3622_v54 = vor.u32 %v5623_v30, %v5618_v29 }
  0x8e   : > { %1408 = vmatpush.bf16.msrb.mxu3 %v3338_v53  ;;  %v5649_v63 = vld [vmem:[%s6723_s1 + $0x4a0] sm:$0xf]  ;;  %v5654_v19 = vld [vmem:[%s6723_s1 + $0x4a4] sm:$0xf0]  ;;  %v3395_v32 = vld [vmem:[%s4728_s18 + $0x10] sm:$0x33]  ;;  %v3686_v47 = vor.u32 %v5634_v9, %v5629_v8 }
  0x8f   : > { %1884 = vmatpush.bf16.msra.mxu0 %v3526_v44  ;;  %v3396_v33 = vld [vmem:[%s4728_s18 + $0x18] sm:$0x33]  ;;  %v3494_v44 = vor.u32 %v4190_v26, %v3493_v13  ;;  %v3397_v36 = vld [vmem:[%s4728_s18 + $0x20] sm:$0x33]  ;;  %v3398_v37 = vld [vmem:[%s4728_s18 + $0x28] sm:$0x33]  ;;  %v3550_v38 = vor.u32 %v5654_v19, %v5649_v63 }
  0x90   : > { %1395 = vmatmul.bf16.vlgmr.msrb.gmra.mxu2 %v5446_v51  ;;  %1367 = vmatmul.bf16.vlgmr.msrb.gmra.mxu0 %v5452_v62  ;;  %v3565_v51 = vld [vmem:[%s6723_s1 + $0x4c0] sm:$0xf]  ;;  %v3399_v46 = vld [vmem:[%s4728_s18 + $0x30] sm:$0x33]  ;;  %v3400_v39 = vld [vmem:[%s4728_s18 + $0x38] sm:$0x33] }
  0x91   : > { %1898 = vmatpush.bf16.msra.mxu1 %v3590_v55  ;;  %1912 = vmatpush.bf16.msra.mxu2 %v3654_v10  ;;  %v3693_v62 = vld [vmem:[%s6723_s1 + $0x5c0] sm:$0xf]  ;;  %v3566_v35 = vor.u32 %v4208_v24, %v3565_v51  ;;  %v3402_v53 = vld [vmem:[%s4728_s18 + $0x48] sm:$0x33]  ;;  %v1444_v55 = vrot.slane %v3395_v32, 2  ;;  %v1445_v10 = vrot.slane %v3396_v33, 4 }
  0x92   : > { %1926 = vmatpush.bf16.msra.mxu3 %v3718_v12  ;;  %1381 = vmatmul.bf16.vlgmr.msrb.gmra.mxu1 %v5454_v20  ;;  %v5644_v20 = vld [vmem:[%s6723_s1 + $0x424] sm:$0xf0]  ;;  %v3694_v34 = vor.u32 %v4240_v25, %v3693_v62  ;;  %v3401_v52 = vld [vmem:[%s4728_s18 + $0x40] sm:$0x33]  ;;  %v1446_v12 = vrot.slane %v3396_v33, 6  ;;  %v1447_v14 = vrot.slane %v3397_v36, 2 }
  0x93   : > { %1885 = vmatpush.bf16.msra.mxu0 %v3518_v40  ;;  %1409 = vmatmul.bf16.vlgmr.msrb.gmra.mxu3 %v5448_v58  ;;  %v3574_v58 = vor.u32 %v4210_v4, %v3573_v18  ;;  %v3486_v48 = vor.u32 %v5644_v20, %v5639_v11  ;;  %v1448_v15 = vrot.slane %v3398_v37, 4  ;;  %v1449_v56 = vrot.slane %v3398_v37, 6  ;;  %v3613_v57 = vld [vmem:[%s6723_s1 + $0x520] sm:$0xf]  ;;  %v4220_v18 = vld [vmem:[%s6723_s1 + $0x524] sm:$0xf0] }
  0x94   : > { %v1450_v40 = vrot.slane %v3399_v46, 2  ;;  %v1451_v41 = vrot.slane %v3400_v39, 4  ;;  %v1452_v61 = vrot.slane %v3400_v39, 6  ;;  %v1453_v6 = vrot.slane %v3401_v52, 2  ;;  %v3677_v4 = vld [vmem:[%s6723_s1 + $0x5a0] sm:$0xf] }
  0x95   : > { %1899 = vmatpush.bf16.msra.mxu1 %v3582_v17  ;;  %1913 = vmatpush.bf16.msra.mxu2 %v3646_v42  ;;  %v1454_v16 = vrot.slane %v3402_v53, 4  ;;  %v1455_v17 = vrot.slane %v3402_v53, 6  ;;  %v4236_v42 = vld [vmem:[%s6723_s1 + $0x5a4] sm:$0xf0]  ;;  %v1461_v50 = vsel %vm219_vm1, %v1445_v10, %v1446_v12  ;;  %v1465_v5 = vsel %vm215_vm0, %v3397_v36, %v1447_v14  ;;  %v4186_v59 = vld [vmem:[%s6723_s1 + $0x414] sm:$0xf0] }
  0x96   : > { %1927 = vmatpush.bf16.msra.mxu3 %v3710_v43  ;;  %v1458_v43 = vsel %vm215_vm0, %v3395_v32, %v1444_v55  ;;  %v1468_v21 = vsel %vm219_vm1, %v1448_v15, %v1449_v56  ;;  %v3541_v60 = vld [vmem:[%s6723_s1 + $0x490] sm:$0xf]  ;;  %v1472_v24 = vsel %vm215_vm0, %v3399_v46, %v1450_v40  ;;  %v1475_v27 = vsel %vm219_vm1, %v1451_v41, %v1452_v61  ;;  %v4202_v28 = vld [vmem:[%s6723_s1 + $0x494] sm:$0xf0]  ;;  %v4184_v8 = vld [vmem:[%s6723_s1 + $0x404] sm:$0xf0] }
  0x97   : > { %1886 = vmatpush.bf16.msra.mxu0 %v3510_v22  ;;  %v3477_v22 = vld [vmem:[%s6723_s1 + $0x410] sm:$0xf]  ;;  %v1462_v23 = vsel %vm223_vm2, %v1458_v43, %v1461_v50  ;;  %v1469_v51 = vsel %vm223_vm2, %v1465_v5, %v1468_v21  ;;  %v1476_v62 = vsel %vm223_vm2, %v1472_v24, %v1475_v27  ;;  %v1479_v25 = vsel %vm215_vm0, %v3401_v52, %v1453_v6  ;;  %v4234_v30 = vld [vmem:[%s6723_s1 + $0x594] sm:$0xf0]  ;;  %v3533_v9 = vld [vmem:[%s6723_s1 + $0x480] sm:$0xf] }
  0x98   : > { %v1482_v13 = vsel %vm219_vm1, %v1454_v16, %v1455_v17  ;;  %1549 = vst [vmem:[#allocation1] ss:$4 sm:$0xff] %v1462_v23  ;;  %v3614_v26 = vor.u32 %v4220_v18, %v3613_v57  ;;  %v3678_v0 = vor.u32 %v4236_v42, %v3677_v4  ;;  %v3478_v29 = vor.u32 %v4186_v59, %v3477_v22  ;;  %v4200_v20 = vld [vmem:[%s6723_s1 + $0x484] sm:$0xf0]  ;;  %v4197_v63 = vld [vmem:[%s6723_s1 + $0x474] sm:$0xf] }
  0x99   : > { %1900 = vmatpush.bf16.msra.mxu1 %v3574_v58  ;;  %1914 = vmatpush.bf16.msra.mxu2 %v3638_v1  ;;  %v3605_v58 = vld [vmem:[%s6723_s1 + $0x510] sm:$0xf]  ;;  %v4218_v1 = vld [vmem:[%s6723_s1 + $0x514] sm:$0xf0]  ;;  %v1483_v7 = vsel %vm223_vm2, %v1479_v25, %v1482_v13  ;;  %1551 = vst [vmem:[#allocation1 + $0x1] ss:$4 sm:$0xff] %v1469_v51  ;;  %v3542_v11 = vor.u32 %v4202_v28, %v3541_v60 }
  0x9a   : > { %1928 = vmatpush.bf16.msra.mxu3 %v3702_v2  ;;  %v3669_v2 = vld [vmem:[%s6723_s1 + $0x590] sm:$0xf]  ;;  %1553 = vst [vmem:[#allocation1 + $0x2] ss:$4 sm:$0xff] %v1476_v62  ;;  %v3527_v19 = vld [vmem:[%s6723_s1 + $0x478] sm:$0xf0] }
  0x9b   : > { %1887 = vmatpush.bf16.msra.mxu0 %v3502_v3  ;;  %v3469_v3 = vld [vmem:[%s6723_s1 + $0x400] sm:$0xf]  ;;  %1555 = vst [vmem:[#allocation1 + $0x3] ss:$4 sm:$0xff] %v1483_v7  ;;  %v4216_v33 = vld [vmem:[%s6723_s1 + $0x504] sm:$0xf0]  ;;  %v3530_v46 = vor.u32 %v4197_v63, %v3527_v19 }
  0x9c   : > { %v3597_v32 = vld [vmem:[%s6723_s1 + $0x500] sm:$0xf]  ;;  %v4213_v36 = vld [vmem:[%s6723_s1 + $0x4f4] sm:$0xf]  ;;  %v3591_v37 = vld [vmem:[%s6723_s1 + $0x4f8] sm:$0xf0] }
  0x9d   : > { %1901 = vmatpush.bf16.msra.mxu1 %v3566_v35  ;;  %1915 = vmatpush.bf16.msra.mxu2 %v3630_v31  ;;  %v3606_v35 = vor.u32 %v4218_v1, %v3605_v58  ;;  %v3670_v31 = vor.u32 %v4234_v30, %v3669_v2  ;;  %v3719_v39 = vld [vmem:[%s6723_s1 + $0x5f8] sm:$0xf0]  ;;  %v4195_v52 = vld [vmem:[%s6723_s1 + $0x464] sm:$0xf]  ;;  %v3519_v53 = vld [vmem:[%s6723_s1 + $0x468] sm:$0xf0]  ;;  %v3598_v55 = vor.u32 %v4216_v33, %v3597_v32 }
  0x9e   : > { %1929 = vmatpush.bf16.msra.mxu3 %v3694_v34  ;;  %v3661_v34 = vld [vmem:[%s6723_s1 + $0x580] sm:$0xf]  ;;  %v3594_v12 = vor.u32 %v4213_v36, %v3591_v37  ;;  %v4211_v15 = vld [vmem:[%s6723_s1 + $0x4e4] sm:$0xf]  ;;  %v3583_v56 = vld [vmem:[%s6723_s1 + $0x4e8] sm:$0xf0]  ;;  %v3522_v41 = vor.u32 %v4195_v52, %v3519_v53 }
  0x9f   : > { %1888 = vmatpush.bf16.msra.mxu0 %v3494_v44  ;;  %v3470_v44 = vor.u32 %v4184_v8, %v3469_v3  ;;  %v4227_v57 = vld [vmem:[%s6723_s1 + $0x564] sm:$0xf]  ;;  %v3647_v61 = vld [vmem:[%s6723_s1 + $0x568] sm:$0xf0]  ;;  %v4193_v17 = vld [vmem:[%s6723_s1 + $0x454] sm:$0xf]  ;;  %v3586_v5 = vor.u32 %v4211_v15, %v3583_v56 }
  0xa0   : > { %v4243_v6 = vld [vmem:[%s6723_s1 + $0x5e4] sm:$0xf]  ;;  %v3711_v16 = vld [vmem:[%s6723_s1 + $0x5e8] sm:$0xf0]  ;;  %v3511_v18 = vld [vmem:[%s6723_s1 + $0x458] sm:$0xf0]  ;;  %v3650_v21 = vor.u32 %v4227_v57, %v3647_v61 }
  0xa1   : > { %1902 = vmatpush.bf16.msra.mxu1 %v3558_v45  ;;  %1916 = vmatpush.bf16.msra.mxu2 %v3622_v54  ;;  %v4232_v45 = vld [vmem:[%s6723_s1 + $0x584] sm:$0xf0]  ;;  %v4229_v54 = vld [vmem:[%s6723_s1 + $0x574] sm:$0xf]  ;;  %v3575_v50 = vld [vmem:[%s6723_s1 + $0x4d8] sm:$0xf0]  ;;  %v3714_v60 = vor.u32 %v4243_v6, %v3711_v16  ;;  %v3514_v23 = vor.u32 %v4193_v17, %v3511_v18 }
  0xa2   : > { %1930 = vmatpush.bf16.msra.mxu3 %v3686_v47  ;;  %v3655_v47 = vld [vmem:[%s6723_s1 + $0x578] sm:$0xf0]  ;;  %v3662_v10 = vor.u32 %v4232_v45, %v3661_v34  ;;  %v5800_v4 = vld.sshfl [vmem:[#allocation1 + $0x10] sm:$0xff pattern:$0x73625140]  ;;  %vm2708_vm13 = vcmask 1040384  }
  0xa3   : > { %1889 = vmatpush.bf16.msra.mxu0 %v3486_v48  ;;  %v4245_v48 = vld [vmem:[%s6723_s1 + $0x5f4] sm:$0xf]  ;;  %v3658_v14 = vor.u32 %v4229_v54, %v3655_v47  ;;  %v5802_v42 = vld.sshfl [vmem:[#allocation1 + $0x18] sm:$0xff pattern:$0x73625140] }
  0xa4   : > { %v3722_v40 = vor.u32 %v4245_v48, %v3719_v39  ;;  %v4209_v43 = vld [vmem:[%s6723_s1 + $0x4d4] sm:$0xf]  ;;  %v5810_v22 = vld.sshfl [vmem:[#allocation1] sm:$0xff pattern:$0x73625140] }
  0xa5   : > { %1903 = vmatpush.bf16.msra.mxu1 %v3550_v38  ;;  %1917 = vmatpush.bf16.msra.mxu2 %v3614_v26  ;;  %v3534_v38 = vor.u32 %v4200_v20, %v3533_v9  ;;  %v5812_v59 = vld.sshfl [vmem:[#allocation1 + $0x8] sm:$0xff pattern:$0x73625140]  ;;  %v4225_v51 = vld [vmem:[%s6723_s1 + $0x554] sm:$0xf]  ;;  %v3578_v25 = vor.u32 %v4209_v43, %v3575_v50 }
  0xa6   : > { %1931 = vmatpush.bf16.msra.mxu3 %v3678_v0  ;;  %v3639_v24 = vld [vmem:[%s6723_s1 + $0x558] sm:$0xf0]  ;;  %v4241_v27 = vld [vmem:[%s6723_s1 + $0x5d4] sm:$0xf]  ;;  %v4191_v58 = vld [vmem:[%s6723_s1 + $0x444] sm:$0xf] }
  0xa7   : > { %1890 = vmatpush.bf16.msra.mxu0 %v3478_v29  ;;  %v3703_v28 = vld [vmem:[%s6723_s1 + $0x5d8] sm:$0xf0]  ;;  %v3503_v62 = vld [vmem:[%s6723_s1 + $0x448] sm:$0xf0]  ;;  %v3642_v13 = vor.u32 %v4225_v51, %v3639_v24  ;;  %v4207_v26 = vld [vmem:[%s6723_s1 + $0x4c4] sm:$0xf] }
  0xa8   : > { %v3567_v0 = vld [vmem:[%s6723_s1 + $0x4c8] sm:$0xf0]  ;;  %v3706_v1 = vor.u32 %v4241_v27, %v3703_v28  ;;  %v3506_v2 = vor.u32 %v4191_v58, %v3503_v62  ;;  %v4223_v7 = vld [vmem:[%s6723_s1 + $0x544] sm:$0xf]  ;;  %v4189_v8 = vld [vmem:[%s6723_s1 + $0x434] sm:$0xf] }
  0xa9   : > { %1904 = vmatpush.bf16.msra.mxu1 %v3542_v11  ;;  %1918 = vmatpush.bf16.msra.mxu2 %v3606_v35  ;;  %v3631_v29 = vld [vmem:[%s6723_s1 + $0x548] sm:$0xf0]  ;;  %v4239_v30 = vld [vmem:[%s6723_s1 + $0x5c4] sm:$0xf]  ;;  %v3495_v9 = vld [vmem:[%s6723_s1 + $0x438] sm:$0xf0]  ;;  %v3570_v11 = vor.u32 %v4207_v26, %v3567_v0 }
  0xaa   : > { %1932 = vmatpush.bf16.msra.mxu3 %v3670_v31  ;;  %v3695_v3 = vld [vmem:[%s6723_s1 + $0x5c8] sm:$0xf0]  ;;  %v3634_v20 = vor.u32 %v4223_v7, %v3631_v29  ;;  %v4205_v63 = vld [vmem:[%s6723_s1 + $0x4b4] sm:$0xf]  ;;  %v3559_v19 = vld [vmem:[%s6723_s1 + $0x4b8] sm:$0xf0]  ;;  %v3498_v31 = vor.u32 %v4189_v8, %v3495_v9 }
  0xab   : > { %1891 = vmatpush.bf16.msra.mxu0 %v3470_v44  ;;  %v3698_v35 = vor.u32 %v4239_v30, %v3695_v3  ;;  %v4221_v32 = vld [vmem:[%s6723_s1 + $0x534] sm:$0xf]  ;;  %v3623_v33 = vld [vmem:[%s6723_s1 + $0x538] sm:$0xf0]  ;;  %v4187_v45 = vld [vmem:[%s6723_s1 + $0x424] sm:$0xf]  ;;  %v3562_v37 = vor.u32 %v4205_v63, %v3559_v19 }
  0xac   : > { %v4237_v34 = vld [vmem:[%s6723_s1 + $0x5b4] sm:$0xf]  ;;  %v3687_v44 = vld [vmem:[%s6723_s1 + $0x5b8] sm:$0xf0]  ;;  %v3487_v36 = vld [vmem:[%s6723_s1 + $0x428] sm:$0xf0] }
  0xad   : > { %1905 = vmatpush.bf16.msra.mxu1 %v3534_v38  ;;  %1919 = vmatpush.bf16.msra.mxu2 %v3598_v55  ;;  %v4203_v54 = vld [vmem:[%s6723_s1 + $0x4a4] sm:$0xf]  ;;  %v3551_v47 = vld [vmem:[%s6723_s1 + $0x4a8] sm:$0xf0]  ;;  %v3690_v48 = vor.u32 %v4237_v34, %v3687_v44  ;;  %v3490_v38 = vor.u32 %v4187_v45, %v3487_v36  ;;  %v5916_v15 = vld [vmem:[%s6723_s1 + $0x498] sm:$0xf0] }
  0xae   : > { %1933 = vmatpush.bf16.msra.mxu3 %v3662_v10  ;;  %1892 = vmatmul.bf16.vlgmr.msra.gmra.mxu0 %v5810_v22  ;;  %v4219_v39 = vld [vmem:[%s6723_s1 + $0x524] sm:$0xf]  ;;  %v3615_v52 = vld [vmem:[%s6723_s1 + $0x528] sm:$0xf0]  ;;  %v4185_v10 = vld [vmem:[%s6723_s1 + $0x414] sm:$0xf]  ;;  %v3554_v56 = vor.u32 %v4203_v54, %v3551_v47 }
  0xaf   : > { %1940 = vmatpush.bf16.msrb.mxu0 %v3530_v46  ;;  %v3626_v46 = vor.u32 %v4221_v32, %v3623_v33  ;;  %v4235_v53 = vld [vmem:[%s6723_s1 + $0x5a4] sm:$0xf]  ;;  %v3679_v55 = vld [vmem:[%s6723_s1 + $0x5a8] sm:$0xf0]  ;;  %v5926_v57 = vld [vmem:[%s6723_s1 + $0x518] sm:$0xf0] }
  0xb0   : > { %1920 = vmatmul.bf16.vlgmr.msra.gmra.mxu2 %v5800_v4  ;;  %1906 = vmatmul.bf16.vlgmr.msra.gmra.mxu1 %v5812_v59  ;;  %v5931_v61 = vld [vmem:[%s6723_s1 + $0x594] sm:$0xf]  ;;  %v3682_v6 = vor.u32 %v4235_v53, %v3679_v55  ;;  %v5936_v17 = vld [vmem:[%s6723_s1 + $0x598] sm:$0xf0]  ;;  %v5941_v18 = vld [vmem:[%s6723_s1 + $0x404] sm:$0xf] }
  0xb1   : > { %1954 = vmatpush.bf16.msrb.mxu1 %v3594_v12  ;;  %1968 = vmatpush.bf16.msrb.mxu2 %v3658_v14  ;;  %v3479_v12 = vld [vmem:[%s6723_s1 + $0x418] sm:$0xf0]  ;;  %v5911_v14 = vld [vmem:[%s6723_s1 + $0x494] sm:$0xf]  ;;  %v5946_v43 = vld [vmem:[%s6723_s1 + $0x408] sm:$0xf0]  ;;  %v3674_v9 = vor.u32 %v5931_v61, %v5936_v17 }
  0xb2   : > { %1982 = vmatpush.bf16.msrb.mxu3 %v3722_v40  ;;  %v3618_v40 = vor.u32 %v4219_v39, %v3615_v52  ;;  %v3482_v16 = vor.u32 %v4185_v10, %v3479_v12  ;;  %v5951_v50 = vld [vmem:[%s6723_s1 + $0x484] sm:$0xf]  ;;  %v5976_v51 = vld [vmem:[%s6723_s1 + $0x588] sm:$0xf0]  ;;  %v5981_v24 = vld [vmem:[%s6723_s1 + $0x670] sm:$0xf]  ;;  %v3546_v0 = vor.u32 %v5911_v14, %v5916_v15 }
  0xb3   : > { %1941 = vmatpush.bf16.msrb.mxu0 %v3522_v41  ;;  %1934 = vmatmul.bf16.vlgmr.msra.gmra.mxu3 %v5802_v42  ;;  %v5921_v41 = vld [vmem:[%s6723_s1 + $0x514] sm:$0xf]  ;;  %v5986_v27 = vld [vmem:[%s6723_s1 + $0x674] sm:$0xf0]  ;;  %v5991_v28 = vld [vmem:[%s6723_s1 + $0x6f0] sm:$0xf] }
  0xb4   : > { %v5996_v58 = vld [vmem:[%s6723_s1 + $0x6f4] sm:$0xf0]  ;;  %v6001_v62 = vld [vmem:[%s6723_s1 + $0x770] sm:$0xf]  ;;  %v6030_v7 = vld [vmem:[%s6723_s1 + $0x664] sm:$0xf0]  ;;  %v3854_v44 = vor.u32 %v5986_v27, %v5981_v24 }
  0xb5   : > { %1955 = vmatpush.bf16.msrb.mxu1 %v3586_v5  ;;  %1969 = vmatpush.bf16.msrb.mxu2 %v3650_v21  ;;  %v5956_v5 = vld [vmem:[%s6723_s1 + $0x488] sm:$0xf0]  ;;  %v5961_v21 = vld [vmem:[%s6723_s1 + $0x504] sm:$0xf]  ;;  %v6016_v26 = vld [vmem:[%s6723_s1 + $0x7f4] sm:$0xf0] }
  0xb6   : > { %1983 = vmatpush.bf16.msrb.mxu3 %v3714_v60  ;;  %v5966_v60 = vld [vmem:[%s6723_s1 + $0x508] sm:$0xf0]  ;;  %v6035_v29 = vld [vmem:[%s6723_s1 + $0x6e0] sm:$0xf]  ;;  %v6040_v30 = vld [vmem:[%s6723_s1 + $0x6e4] sm:$0xf0]  ;;  %v3538_v39 = vor.u32 %v5951_v50, %v5956_v5 }
  0xb7   : > { %1942 = vmatpush.bf16.msrb.mxu0 %v3514_v23  ;;  %v5971_v23 = vld [vmem:[%s6723_s1 + $0x584] sm:$0xf]  ;;  %v6045_v3 = vld [vmem:[%s6723_s1 + $0x760] sm:$0xf]  ;;  %v6050_v8 = vld [vmem:[%s6723_s1 + $0x764] sm:$0xf0]  ;;  %v3602_v52 = vor.u32 %v5961_v21, %v5966_v60  ;;  %v3910_v5 = vor.u32 %v6040_v30, %v6035_v29 }
  0xb8   : > { %v6064_v63 = vld [vmem:[%s6723_s1 + $0x7e4] sm:$0xf0]  ;;  %v6069_v19 = vld [vmem:[%s6723_s1 + $0x650] sm:$0xf]  ;;  %v6084_v32 = vld [vmem:[%s6723_s1 + $0x6d4] sm:$0xf0]  ;;  %v3666_v53 = vor.u32 %v5971_v23, %v5976_v51 }
  0xb9   : > { %1956 = vmatpush.bf16.msrb.mxu1 %v3578_v25  ;;  %1970 = vmatpush.bf16.msrb.mxu2 %v3642_v13  ;;  %v6006_v25 = vld [vmem:[%s6723_s1 + $0x774] sm:$0xf0]  ;;  %v6011_v13 = vld [vmem:[%s6723_s1 + $0x7f0] sm:$0xf]  ;;  %v6121_v54 = vld [vmem:[%s6723_s1 + $0x6c0] sm:$0xf] }
  0xba   : > { %1984 = vmatpush.bf16.msrb.mxu3 %v3706_v1  ;;  %v3610_v1 = vor.u32 %v5921_v41, %v5926_v57  ;;  %v6089_v33 = vld [vmem:[%s6723_s1 + $0x750] sm:$0xf]  ;;  %v6094_v34 = vld [vmem:[%s6723_s1 + $0x754] sm:$0xf0]  ;;  %v6126_v47 = vld [vmem:[%s6723_s1 + $0x6c4] sm:$0xf0]  ;;  %v3982_v41 = vor.u32 %v6006_v25, %v6001_v62  ;;  %v4046_v57 = vor.u32 %v6016_v26, %v6011_v13 }
  0xbb   : > { %1943 = vmatpush.bf16.msrb.mxu0 %v3506_v2  ;;  %v6025_v2 = vld [vmem:[%s6723_s1 + $0x660] sm:$0xf]  ;;  %v6101_v45 = vld [vmem:[%s6723_s1 + $0x7d0] sm:$0xf]  ;;  %v6106_v36 = vld [vmem:[%s6723_s1 + $0x7d4] sm:$0xf0] }
  0xbc   : > { %v6147_v55 = vld [vmem:[%s6723_s1 + $0x7c0] sm:$0xf]  ;;  %v6152_v10 = vld [vmem:[%s6723_s1 + $0x7c4] sm:$0xf0]  ;;  %v6157_v12 = vld [vmem:[%s6723_s1 + $0x630] sm:$0xf]  ;;  %v3846_v50 = vor.u32 %v6030_v7, %v6025_v2 }
  0xbd   : > { %1957 = vmatpush.bf16.msrb.mxu1 %v3570_v11  ;;  %1971 = vmatpush.bf16.msrb.mxu2 %v3634_v20  ;;  %v3474_v11 = vor.u32 %v5941_v18, %v5946_v43  ;;  %v6059_v20 = vld [vmem:[%s6723_s1 + $0x7e0] sm:$0xf]  ;;  %v6162_v14 = vld [vmem:[%s6723_s1 + $0x634] sm:$0xf0]  ;;  %v6167_v15 = vld [vmem:[%s6723_s1 + $0x6b0] sm:$0xf] }
  0xbe   : > { %1985 = vmatpush.bf16.msrb.mxu3 %v3698_v35  ;;  %v6074_v35 = vld [vmem:[%s6723_s1 + $0x654] sm:$0xf0]  ;;  %v6183_v61 = vld [vmem:[%s6723_s1 + $0x730] sm:$0xf]  ;;  %v6203_v18 = vld [vmem:[%s6723_s1 + $0x620] sm:$0xf]  ;;  %v4038_v24 = vor.u32 %v6064_v63, %v6059_v20 }
  0xbf   : > { %1944 = vmatpush.bf16.msrb.mxu0 %v3498_v31  ;;  %v6079_v31 = vld [vmem:[%s6723_s1 + $0x6d0] sm:$0xf]  ;;  %v6198_v17 = vld [vmem:[%s6723_s1 + $0x7b4] sm:$0xf0]  ;;  %v6208_v43 = vld [vmem:[%s6723_s1 + $0x624] sm:$0xf0] }
  0xc0   : > { %v6219_v60 = vld [vmem:[%s6723_s1 + $0x6a0] sm:$0xf]  ;;  %v6224_v23 = vld [vmem:[%s6723_s1 + $0x6a4] sm:$0xf0]  ;;  %v6265_v7 = vld [vmem:[%s6723_s1 + $0x610] sm:$0xf] }
  0xc1   : > { %1958 = vmatpush.bf16.msrb.mxu1 %v3562_v37  ;;  %1972 = vmatpush.bf16.msrb.mxu2 %v3626_v46  ;;  %v6111_v37 = vld [vmem:[%s6723_s1 + $0x640] sm:$0xf]  ;;  %v6116_v46 = vld [vmem:[%s6723_s1 + $0x644] sm:$0xf0]  ;;  %6749 = vst [vmem:[#allocation3_spill] sm:$0xff] %v6265_v7  ;;  %v6753_v7 = vor.u32 %v6050_v8, %v6045_v3 }
  0xc2   : > { %1986 = vmatpush.bf16.msrb.mxu3 %v3690_v48  ;;  %v6131_v48 = vld [vmem:[%s6723_s1 + $0x740] sm:$0xf]  ;;  %v6242_v62 = vld [vmem:[%s6723_s1 + $0x724] sm:$0xf0]  ;;  %v6270_v29 = vld [vmem:[%s6723_s1 + $0x614] sm:$0xf0] }
  0xc3   : > { %1945 = vmatpush.bf16.msrb.mxu0 %v3490_v38  ;;  %v6136_v38 = vld [vmem:[%s6723_s1 + $0x744] sm:$0xf0]  ;;  %v6229_v51 = vld [vmem:[%s6723_s1 + $0x720] sm:$0xf]  ;;  %6750 = vst [vmem:[#allocation4_spill] sm:$0xff] %v6270_v29 }
  0xc4   : > { %v6247_v25 = vld [vmem:[%s6723_s1 + $0x7a0] sm:$0xf]  ;;  %v6252_v13 = vld [vmem:[%s6723_s1 + $0x7a4] sm:$0xf0]  ;;  %v6275_v30 = vld [vmem:[%s6723_s1 + $0x690] sm:$0xf] }
  0xc5   : > { %1959 = vmatpush.bf16.msrb.mxu1 %v3554_v56  ;;  %1973 = vmatpush.bf16.msrb.mxu2 %v3618_v40  ;;  %v6172_v56 = vld [vmem:[%s6723_s1 + $0x6b4] sm:$0xf0]  ;;  %v3918_v40 = vor.u32 %v5996_v58, %v5991_v28  ;;  %6751 = vst [vmem:[#allocation5_spill] sm:$0xff] %v6275_v30  ;;  %v3726_v20 = vld [vmem:[%s4728_s18 + $0x28] sm:$0x77]  ;;  %v668_v28 = vpop.f32.mrf.mxu1 }
  0xc6   : > { %1987 = vmatpush.bf16.msrb.mxu3 %v3682_v6  ;;  %v6188_v6 = vld [vmem:[%s6723_s1 + $0x734] sm:$0xf0]  ;;  %v2029_v21 = vrot.slane %v3726_v20, 6 }
  0xc7   : > { %1946 = vmatpush.bf16.msrb.mxu0 %v3482_v16  ;;  %v6193_v16 = vld [vmem:[%s6723_s1 + $0x7b0] sm:$0xf]  ;;  %v6286_v63 = vld [vmem:[%s6723_s1 + $0x694] sm:$0xf0] }
  0xc8   : > { %6752 = vst [vmem:[#allocation6_spill] sm:$0xff] %v6286_v63  ;;  %v3724_v2 = vld [vmem:[%s4728_s18 + $0x18] sm:$0x77] }
  0xc9   : > { %1960 = vmatpush.bf16.msrb.mxu1 %v3546_v0  ;;  %1974 = vmatpush.bf16.msrb.mxu2 %v3610_v1  ;;  %v3725_v1 = vld [vmem:[%s4728_s18 + $0x20] sm:$0x77]  ;;  %v3728_v0 = vld [vmem:[%s4728_s18 + $0x38] sm:$0x77]  ;;  %v2026_v27 = vrot.slane %v3724_v2, 6 }
  0xca   : > { %1988 = vmatpush.bf16.msrb.mxu3 %v3674_v9  ;;  %v6303_v9 = vld [vmem:[%s6723_s1 + $0x714] sm:$0xf0]  ;;  %v2031_v63 = vrot.slane %v3728_v0, 4 }
  0xcb   : > { %1947 = vmatpush.bf16.msrb.mxu0 %v3474_v11  ;;  %v654_v11 = vpop.f32.mrf.mxu0 }
  0xcc   : > { %v669_v26 = vadd.f32 %v668_v28, %v654_v11 }
  0xcd   : > { %1961 = vmatpush.bf16.msrb.mxu1 %v3538_v39  ;;  %1975 = vmatpush.bf16.msrb.mxu2 %v3602_v52  ;;  %v3723_v39 = vld [vmem:[%s4728_s18 + $0x10] sm:$0x77] }
  0xce   : > { %1989 = vmatpush.bf16.msrb.mxu3 %v3666_v53  ;;  %v3727_v52 = vld [vmem:[%s4728_s18 + $0x30] sm:$0x77]  ;;  %v6323_v53 = vld [vmem:[%s4728_s18 + $0x48] sm:$0x77]  ;;  %v2024_v58 = vrot.slane %v3723_v39, 2  ;;  %1948 = vmatmul.bf16.vlgmr.msrb.gmra.mxu0 %v5810_v22 }
  0xcf   : > { %2540 = vmatpush.bf16.msra.mxu0 %v3854_v44  ;;  %v6291_v44 = vld [vmem:[%s6723_s1 + $0x710] sm:$0xf]  ;;  %v2030_v30 = vrot.slane %v3727_v52, 2  ;;  %v2034_v22 = vrot.slane %v6323_v53, 4  ;;  %v2035_v28 = vrot.slane %v6323_v53, 6 }
  0xd0   : > { %1976 = vmatmul.bf16.vlgmr.msrb.gmra.mxu2 %v5800_v4  ;;  %v2027_v4 = vrot.slane %v3725_v1, 2  ;;  %1962 = vmatmul.bf16.vlgmr.msrb.gmra.mxu1 %v5812_v59  ;;  %v2043_v3 = vsel %vm796_vm3, %v3723_v39, %v2024_v58 }
  0xd1   : > { %2554 = vmatpush.bf16.msra.mxu1 %v3918_v40  ;;  %2568 = vmatpush.bf16.msra.mxu2 %v3982_v41  ;;  %v2025_v40 = vrot.slane %v3724_v2, 4  ;;  %v3934_v41 = vor.u32 %v6303_v9, %v6291_v44  ;;  %v2038_v2 = vsel %vm215_vm0, %v3723_v39, %v2024_v58  ;;  %v4291_v9 = vld [vmem:[%s6723_s1 + $0x764] sm:$0xf] }
  0xd2   : > { %2582 = vmatpush.bf16.msra.mxu3 %v4046_v57  ;;  %v3729_v57 = vld [vmem:[%s4728_s18 + $0x40] sm:$0x77]  ;;  %v2055_v58 = vsel %vm796_vm3, %v3725_v1, %v2027_v4 }
  0xd3   : > { %2541 = vmatpush.bf16.msra.mxu0 %v3846_v50  ;;  %1990 = vmatmul.bf16.vlgmr.msrb.gmra.mxu3 %v5802_v42  ;;  %v2028_v50 = vrot.slane %v3726_v20, 4  ;;  %v2032_v42 = vrot.slane %v3728_v0, 6  ;;  %v2033_v29 = vrot.slane %v3729_v57, 2  ;;  %v2041_v11 = vsel %vm219_vm1, %v2025_v40, %v2026_v27  ;;  %v682_v20 = vpop.f32.mrf.mxu2 }
  0xd4   : > { %v2044_v8 = vsel %vm798_vm4, %v2026_v27, %v2025_v40  ;;  %v683_v39 = vadd.f32 %v682_v20, %v669_v26  ;;  %v6756_v40 = vor.u32 %v6094_v34, %v6089_v33  ;;  %v2067_v26 = vsel %vm796_vm3, %v3727_v52, %v2030_v30 }
  0xd5   : > { %2555 = vmatpush.bf16.msra.mxu1 %v3910_v5  ;;  %2569 = vmatpush.bf16.msra.mxu2 %v6753_v7  ;;  %v6754_v5 = vor.u32 %v6074_v35, %v6069_v19  ;;  %v2045_v0 = vsel %vm800_vm5, %v2043_v3, %v2044_v8  ;;  %v2050_v7 = vsel %vm215_vm0, %v3725_v1, %v2027_v4  ;;  %v696_v35 = vpop.f32.mrf.mxu3 }
  0xd6   : > { %2583 = vmatpush.bf16.msra.mxu3 %v4038_v24  ;;  %v2042_v24 = vsel %vm223_vm2, %v2038_v2, %v2041_v11  ;;  %v2053_v59 = vsel %vm219_vm1, %v2028_v50, %v2029_v21  ;;  %v6755_v19 = vor.u32 %v6084_v32, %v6079_v31  ;;  %v2047_v53 = vrot.slane %v2045_v0, 2 }
  0xd7   : > { %2542 = vmatpush.bf16.msra.mxu0 %v6754_v5  ;;  %v2054_v5 = vsel %vm223_vm2, %v2050_v7, %v2053_v59  ;;  %v2056_v27 = vsel %vm798_vm4, %v2029_v21, %v2028_v50  ;;  %v6757_v2 = vor.u32 %v6106_v36, %v6101_v45  ;;  %v2062_v32 = vsel %vm215_vm0, %v3727_v52, %v2030_v30  ;;  %v656_v45 = vpop.f32.mrf.mxu0  ;;  %v670_v36 = vpop.f32.mrf.mxu1 }
  0xd8   : > { %v2057_v31 = vsel %vm800_vm5, %v2055_v58, %v2056_v27  ;;  %v2084_v11 = vshrl.u32 %v2042_v24, 16  ;;  %v6758_v3 = vor.u32 %v6116_v46, %v6111_v37  ;;  %v2065_v21 = vsel %vm219_vm1, %v2031_v63, %v2032_v42 }
  0xd9   : > { %2556 = vmatpush.bf16.msra.mxu1 %v6755_v19  ;;  %2570 = vmatpush.bf16.msra.mxu2 %v6756_v40  ;;  %v2059_v1 = vrot.slane %v2057_v31, 2  ;;  %v2068_v33 = vsel %vm798_vm4, %v2032_v42, %v2031_v63  ;;  %v6366_v34 = vadd.f32 %v696_v35, %v683_v39  ;;  %v2066_v4 = vsel %vm223_vm2, %v2062_v32, %v2065_v21 }
  0xda   : > { %2584 = vmatpush.bf16.msra.mxu3 %v6757_v2  ;;  %v2069_v50 = vsel %vm800_vm5, %v2067_v26, %v2068_v33  ;;  %v2074_v8 = vsel %vm215_vm0, %v3729_v57, %v2033_v29  ;;  %v6759_v37 = vor.u32 %v6126_v47, %v6121_v54  ;;  %v671_v46 = vadd.f32 %v670_v36, %v656_v45  ;;  %v6424_v26 = vld [vmem:[%s6723_s1 + $0x680] sm:$0xf]  ;;  %v6439_v33 = vld [vmem:[%s6723_s1 + $0x704] sm:$0xf0]  ;;  %v4261_v45 = vld [vmem:[%s6723_s1 + $0x674] sm:$0xf] }
  0xdb   : > { %2543 = vmatpush.bf16.msra.mxu0 %v6758_v3  ;;  %v2071_v0 = vrot.slane %v2069_v50, 2  ;;  %v2077_v30 = vsel %vm219_vm1, %v2034_v22, %v2035_v28  ;;  %v2079_v63 = vsel %vm796_vm3, %v3729_v57, %v2033_v29  ;;  %v6760_v52 = vor.u32 %v6136_v38, %v6131_v48  ;;  %v684_v58 = vpop.f32.mrf.mxu2 }
  0xdc   : > { %v6761_v42 = vor.u32 %v6152_v10, %v6147_v55  ;;  %v6383_v7 = vsel %vm223_vm2, %v2074_v8, %v2077_v30  ;;  %v2080_v54 = vsel %vm798_vm4, %v2035_v28, %v2034_v22  ;;  %v2086_v47 = vrot.slane %v2084_v11, 6  ;;  %v3855_v30 = vld [vmem:[%s6723_s1 + $0x678] sm:$0xf0] }
  0xdd   : > { %2557 = vmatpush.bf16.msra.mxu1 %v6759_v37  ;;  %2571 = vmatpush.bf16.msra.mxu2 %v6760_v52  ;;  %v2087_v59 = vshll.u32 %v2042_v24, 16  ;;  %v6762_v20 = vor.u32 %v6162_v14, %v6157_v12  ;;  %v2081_v29 = vsel %vm800_vm5, %v2079_v63, %v2080_v54  ;;  %v2093_v57 = vshll.u32 %v2047_v53, 16  ;;  %v698_v22 = vpop.f32.mrf.mxu3  ;;  %v6396_v12 = vld [vmem:[%s6723_s1 + $0x790] sm:$0xf] }
  0xde   : > { %2585 = vmatpush.bf16.msra.mxu3 %v6761_v42  ;;  %v2097_v48 = vshrl.u32 %v2054_v5, 16  ;;  %v2100_v38 = vshll.u32 %v2054_v5, 16  ;;  %v2083_v19 = vrot.slane %v2081_v29, 2  ;;  %v2106_v55 = vshll.u32 %v2059_v1, 16  ;;  %v6771_v29 = vld [vmem:[#allocation3_spill] sm:$0xff] }
  0xdf   : > { %2544 = vmatpush.bf16.msra.mxu0 %v6762_v20  ;;  %v2089_v35 = vrot.slane %v2087_v59, 7  ;;  %v2110_v10 = vshrl.u32 %v2066_v4, 16  ;;  %v6763_v27 = vor.u32 %v6172_v56, %v6167_v15  ;;  %v2095_v14 = vrot.slane %v2093_v57, 7  ;;  %v4298_v15 = vld [vmem:[%s6723_s1 + $0x794] sm:$0xf0]  ;;  %v710_v21 = vpop.f32.mrf.mxu0  ;;  %v724_v37 = vpop.f32.mrf.mxu1 }
  0xe0   : > { %v2099_v28 = vrot.slane %v2097_v48, 6  ;;  %v2102_v24 = vrot.slane %v2100_v38, 7  ;;  %v2113_v53 = vshll.u32 %v2066_v4, 16  ;;  %v685_v5 = vadd.f32 %v684_v58, %v671_v46  ;;  %v6410_v56 = vld [vmem:[%s6723_s1 + $0x600] sm:$0xf] }
  0xe1   : > { %2558 = vmatpush.bf16.msra.mxu1 %v6763_v27  ;;  %v6764_v39 = vor.u32 %v6188_v6, %v6183_v61  ;;  %v6765_v40 = vor.u32 %v6198_v17, %v6193_v16  ;;  %v2090_v2 = vor.u32 %v2089_v35, %v2086_v47  ;;  %v2108_v31 = vrot.slane %v2106_v55, 7  ;;  %v4248_v6 = vld [vmem:[%s6723_s1 + $0x604] sm:$0xf0]  ;;  %v6451_v46 = vld [vmem:[%s6723_s1 + $0x780] sm:$0xf] }
  0xe2   : > { %v2112_v32 = vrot.slane %v2110_v10, 6  ;;  %v6766_v61 = vor.u32 %v6208_v43, %v6203_v18  ;;  %v2103_v16 = vor.u32 %v2102_v24, %v2099_v28  ;;  %v2115_v17 = vrot.slane %v2113_v53, 7  ;;  %v6429_v18 = vld [vmem:[%s6723_s1 + $0x684] sm:$0xf0]  ;;  %v6434_v43 = vld [vmem:[%s6723_s1 + $0x700] sm:$0xf] }
  0xe3   : > { %2572 = vmatpush.bf16.msra.mxu2 %v6764_v39  ;;  %2586 = vmatpush.bf16.msra.mxu3 %v6765_v40  ;;  %v2119_v11 = vshll.u32 %v2071_v0, 16  ;;  %v2123_v3 = vshrl.u32 %v6383_v7, 16  ;;  %v6419_v1 = vadd.f32 %v698_v22, %v685_v5  ;;  %v2091_v36 = vrot.slane %v2090_v2, 2  ;;  %v4296_v0 = vld [vmem:[%s6723_s1 + $0x784] sm:$0xf0]  ;;  %v6773_v22 = vld [vmem:[#allocation6_spill] sm:$0xff]  ;;  %v738_v5 = vpop.f32.mrf.mxu2 }
  0xe4   : > { %2545 = vmatpush.bf16.msra.mxu0 %v6766_v61  ;;  %v2126_v4 = vshll.u32 %v6383_v7, 16  ;;  %v2132_v50 = vshll.u32 %v2083_v19, 16  ;;  %v6767_v8 = vor.u32 %v6224_v23, %v6219_v60  ;;  %v2104_v63 = vrot.slane %v2103_v16, 2  ;;  %v4277_v59 = vld [vmem:[%s6723_s1 + $0x6f4] sm:$0xf] }
  0xe5   : > { %v2116_v52 = vor.u32 %v2115_v17, %v2112_v32  ;;  %v2121_v42 = vrot.slane %v2119_v11, 7  ;;  %v2125_v7 = vrot.slane %v2123_v3, 6  ;;  %v6768_v60 = vor.u32 %v6242_v62, %v6229_v51  ;;  %v3919_v20 = vld [vmem:[%s6723_s1 + $0x6f8] sm:$0xf0]  ;;  %v4293_v51 = vld [vmem:[%s6723_s1 + $0x774] sm:$0xf]  ;;  %v752_v32 = vpop.f32.mrf.mxu3 }
  0xe6   : > { %2559 = vmatpush.bf16.msra.mxu1 %v6767_v8  ;;  %v6769_v23 = vor.u32 %v6252_v13, %v6247_v25  ;;  %v3998_v54 = vor.u32 %v4298_v15, %v6396_v12  ;;  %v725_v47 = vadd.f32 %v724_v37, %v710_v21  ;;  %v2096_v62 = vsel %vm5327_vm12, %v2091_v36, %v2095_v14  ;;  %v6770_v13 = vld [vmem:[#allocation4_spill] sm:$0xff]  ;;  %v3983_v38 = vld [vmem:[%s6723_s1 + $0x778] sm:$0xf0]  ;;  %v4259_v40 = vld [vmem:[%s6723_s1 + $0x664] sm:$0xf] }
  0xe7   : > { %2573 = vmatpush.bf16.msra.mxu2 %v6768_v60  ;;  %v2128_v25 = vrot.slane %v2126_v4, 7  ;;  %v6772_v57 = vor.u32 %v6770_v13, %v6771_v29  ;;  %v3798_v48 = vor.u32 %v4248_v6, %v6410_v56  ;;  %v2109_v19 = vsel %vm5327_vm12, %v2104_v63, %v2108_v31  ;;  %2202 = vst [vmem:[#allocation1] ss:$4 sm:$0xff] %v2096_v62  ;;  %v4309_v10 = vld [vmem:[%s6723_s1 + $0x7f4] sm:$0xf]  ;;  %v6774_v12 = vld [vmem:[#allocation5_spill] sm:$0xff]  ;;  %v726_v49 = vpop.f32.mrf.mxu1 }
  0xe8   : > { %2587 = vmatpush.bf16.msra.mxu3 %v6769_v23  ;;  %v2117_v35 = vrot.slane %v2116_v52, 2  ;;  %v3858_v55 = vor.u32 %v4261_v45, %v3855_v30  ;;  %v2134_v27 = vrot.slane %v2132_v50, 7  ;;  %2205 = vst [vmem:[#allocation1 + $0x1] ss:$4 sm:$0xff] %v2109_v19  ;;  %v6775_v14 = vor.u32 %v6773_v22, %v6774_v12  ;;  %v4047_v53 = vld [vmem:[%s6723_s1 + $0x7f8] sm:$0xf0] }
  0xe9   : > { %2546 = vmatpush.bf16.msra.mxu0 %v6772_v57  ;;  %v2129_v58 = vor.u32 %v2128_v25, %v2125_v7  ;;  %v3862_v28 = vor.u32 %v6429_v18, %v6424_v26  ;;  %v3926_v24 = vor.u32 %v6439_v33, %v6434_v43  ;;  %v3847_v15 = vld [vmem:[%s6723_s1 + $0x668] sm:$0xf0]  ;;  %v3990_v56 = vor.u32 %v4296_v0, %v6451_v46  ;;  %v4275_v16 = vld [vmem:[%s6723_s1 + $0x6e4] sm:$0xf]  ;;  %v712_v43 = vpop.f32.mrf.mxu0  ;;  %v4257_v33 = vld [vmem:[%s6723_s1 + $0x654] sm:$0xf] }
  0xea   : > { %2560 = vmatpush.bf16.msra.mxu1 %v6775_v14  ;;  %v2122_v39 = vsel %vm5327_vm12, %v2117_v35, %v2121_v42  ;;  %v739_v2 = vadd.f32 %v738_v5, %v725_v47  ;;  %v3922_v61 = vor.u32 %v4277_v59, %v3919_v20  ;;  %v3986_v6 = vor.u32 %v4293_v51, %v3983_v38  ;;  %v3911_v17 = vld [vmem:[%s6723_s1 + $0x6e8] sm:$0xf0]  ;;  %v4307_v26 = vld [vmem:[%s6723_s1 + $0x7e4] sm:$0xf]  ;;  %v3839_v45 = vld [vmem:[%s6723_s1 + $0x658] sm:$0xf0] }
  0xeb   : > { %2574 = vmatpush.bf16.msra.mxu2 %v3934_v41  ;;  %v2130_v31 = vrot.slane %v2129_v58, 2  ;;  %2208 = vst [vmem:[#allocation1 + $0x2] ss:$4 sm:$0xff] %v2122_v39  ;;  %v4050_v44 = vor.u32 %v4309_v10, %v4047_v53  ;;  %v3850_v3 = vor.u32 %v4259_v40, %v3847_v15  ;;  %v3975_v21 = vld [vmem:[%s6723_s1 + $0x768] sm:$0xf0]  ;;  %v727_v36 = vadd.f32 %v726_v49, %v712_v43  ;;  %v740_v7 = vpop.f32.mrf.mxu2 }
  0xec   : > { %2588 = vmatpush.bf16.msra.mxu3 %v3998_v54  ;;  %v6522_v11 = vadd.f32 %v752_v32, %v739_v2  ;;  %v4039_v18 = vld [vmem:[%s6723_s1 + $0x7e8] sm:$0xf0]  ;;  %v3914_v4 = vor.u32 %v4275_v16, %v3911_v17  ;;  %v3978_v50 = vor.u32 %v4291_v9, %v3975_v21  ;;  %v4273_v8 = vld [vmem:[%s6723_s1 + $0x6d4] sm:$0xf]  ;;  %v3903_v37 = vld [vmem:[%s6723_s1 + $0x6d8] sm:$0xf0]  ;;  %v3842_v0 = vor.u32 %v4257_v33, %v3839_v45 }
  0xed   : > { %2547 = vmatpush.bf16.msra.mxu0 %v3798_v48  ;;  %v2135_v41 = vsel %vm5327_vm12, %v2130_v31, %v2134_v27  ;;  %v4042_v46 = vor.u32 %v4307_v26, %v4039_v18  ;;  %v4289_v30 = vld [vmem:[%s6723_s1 + $0x754] sm:$0xf]  ;;  %v3967_v63 = vld [vmem:[%s6723_s1 + $0x758] sm:$0xf0]  ;;  %v4255_v60 = vld [vmem:[%s6723_s1 + $0x644] sm:$0xf]  ;;  %v741_v54 = vadd.f32 %v740_v7, %v727_v36  ;;  %v3906_v62 = vor.u32 %v4273_v8, %v3903_v37  ;;  %v754_v13 = vpop.f32.mrf.mxu3 }
  0xee   : > { %2561 = vmatpush.bf16.msra.mxu1 %v3862_v28  ;;  %2211 = vst [vmem:[#allocation1 + $0x3] ss:$4 sm:$0xff] %v2135_v41  ;;  %v4305_v52 = vld [vmem:[%s6723_s1 + $0x7d4] sm:$0xf]  ;;  %v4031_v42 = vld [vmem:[%s6723_s1 + $0x7d8] sm:$0xf0]  ;;  %v3970_v25 = vor.u32 %v4289_v30, %v3967_v63 }
  0xef   : > { %2575 = vmatpush.bf16.msra.mxu2 %v3926_v24  ;;  %v3831_v23 = vld [vmem:[%s6723_s1 + $0x648] sm:$0xf0]  ;;  %v4271_v47 = vld [vmem:[%s6723_s1 + $0x6c4] sm:$0xf]  ;;  %v4253_v48 = vld [vmem:[%s6723_s1 + $0x634] sm:$0xf]  ;;  %v6591_v10 = vadd.f32 %v754_v13, %v741_v54 }
  0xf0   : > { %2589 = vmatpush.bf16.msra.mxu3 %v3990_v56  ;;  %v3895_v59 = vld [vmem:[%s6723_s1 + $0x6c8] sm:$0xf0]  ;;  %v4287_v20 = vld [vmem:[%s6723_s1 + $0x744] sm:$0xf]  ;;  %v3823_v38 = vld [vmem:[%s6723_s1 + $0x638] sm:$0xf0]  ;;  %v3834_v58 = vor.u32 %v4255_v60, %v3831_v23 }
  0xf1   : > { %2596 = vmatpush.bf16.msrb.mxu0 %v3858_v55  ;;  %v3959_v51 = vld [vmem:[%s6723_s1 + $0x748] sm:$0xf0]  ;;  %v4303_v29 = vld [vmem:[%s6723_s1 + $0x7c4] sm:$0xf]  ;;  %v4034_v55 = vor.u32 %v4305_v52, %v4031_v42  ;;  %v3898_v12 = vor.u32 %v4271_v47, %v3895_v59  ;;  %v4269_v28 = vld [vmem:[%s6723_s1 + $0x6b4] sm:$0xf]  ;;  %v3826_v5 = vor.u32 %v4253_v48, %v3823_v38 }
  0xf2   : > { %2610 = vmatpush.bf16.msrb.mxu1 %v3922_v61  ;;  %v4023_v57 = vld [vmem:[%s6723_s1 + $0x7c8] sm:$0xf0]  ;;  %v3962_v14 = vor.u32 %v4287_v20, %v3959_v51  ;;  %v3887_v24 = vld [vmem:[%s6723_s1 + $0x6b8] sm:$0xf0]  ;;  %v4285_v39 = vld [vmem:[%s6723_s1 + $0x734] sm:$0xf] }
  0xf3   : > { %2624 = vmatpush.bf16.msrb.mxu2 %v3986_v6  ;;  %v4026_v53 = vor.u32 %v4303_v29, %v4023_v57  ;;  %v3951_v40 = vld [vmem:[%s6723_s1 + $0x738] sm:$0xf0]  ;;  %v4301_v15 = vld [vmem:[%s6723_s1 + $0x7b4] sm:$0xf]  ;;  %v4251_v2 = vld [vmem:[%s6723_s1 + $0x624] sm:$0xf]  ;;  %v3890_v32 = vor.u32 %v4269_v28, %v3887_v24 }
  0xf4   : > { %2638 = vmatpush.bf16.msrb.mxu3 %v4050_v44  ;;  %v4015_v56 = vld [vmem:[%s6723_s1 + $0x7b8] sm:$0xf0]  ;;  %v3815_v31 = vld [vmem:[%s6723_s1 + $0x628] sm:$0xf0]  ;;  %v3954_v61 = vor.u32 %v4285_v39, %v3951_v40  ;;  %v4267_v6 = vld [vmem:[%s6723_s1 + $0x6a4] sm:$0xf] }
  0xf5   : > { %2597 = vmatpush.bf16.msrb.mxu0 %v3850_v3  ;;  %v6587_v19 = vld.sshfl [vmem:[#allocation1 + $0x10] sm:$0xff pattern:$0x73625140]  ;;  %v6589_v35 = vld.sshfl [vmem:[#allocation1 + $0x18] sm:$0xff pattern:$0x73625140]  ;;  %v4018_v17 = vor.u32 %v4301_v15, %v4015_v56  ;;  %v3818_v9 = vor.u32 %v4251_v2, %v3815_v31 }
  0xf6   : > { %2611 = vmatpush.bf16.msrb.mxu1 %v3914_v4  ;;  %2576 = vmatmul.bf16.vlgmr.msra.gmra.mxu2 %v6587_v19  ;;  %v6595_v27 = vld.sshfl [vmem:[#allocation1] sm:$0xff pattern:$0x73625140]  ;;  %v6597_v22 = vld.sshfl [vmem:[#allocation1 + $0x8] sm:$0xff pattern:$0x73625140] }
  0xf7   : > { %2625 = vmatpush.bf16.msrb.mxu2 %v3978_v50  ;;  %2590 = vmatmul.bf16.vlgmr.msra.gmra.mxu3 %v6589_v35  ;;  %v3879_v16 = vld [vmem:[%s6723_s1 + $0x6a8] sm:$0xf0]  ;;  %v4283_v44 = vld [vmem:[%s6723_s1 + $0x724] sm:$0xf]  ;;  %v4249_v26 = vld [vmem:[%s6723_s1 + $0x614] sm:$0xf] }
  0xf8   : > { %2639 = vmatpush.bf16.msrb.mxu3 %v4042_v46  ;;  %2548 = vmatmul.bf16.vlgmr.msra.gmra.mxu0 %v6595_v27  ;;  %v3943_v41 = vld [vmem:[%s6723_s1 + $0x728] sm:$0xf0]  ;;  %v4299_v3 = vld [vmem:[%s6723_s1 + $0x7a4] sm:$0xf]  ;;  %v3807_v18 = vld [vmem:[%s6723_s1 + $0x618] sm:$0xf0]  ;;  %v3882_v43 = vor.u32 %v4267_v6, %v3879_v16 }
  0xf9   : > { %2598 = vmatpush.bf16.msrb.mxu0 %v3842_v0  ;;  %2562 = vmatmul.bf16.vlgmr.msra.gmra.mxu1 %v6597_v22  ;;  %v4007_v21 = vld [vmem:[%s6723_s1 + $0x7a8] sm:$0xf0]  ;;  %v3946_v49 = vor.u32 %v4283_v44, %v3943_v41  ;;  %v4265_v33 = vld [vmem:[%s6723_s1 + $0x694] sm:$0xf]  ;;  %v3871_v45 = vld [vmem:[%s6723_s1 + $0x698] sm:$0xf0]  ;;  %v3810_v4 = vor.u32 %v4249_v26, %v3807_v18 }
  0xfa   : > { %2612 = vmatpush.bf16.msrb.mxu1 %v3906_v62  ;;  %v4010_v36 = vor.u32 %v4299_v3, %v4007_v21  ;;  %v4281_v50 = vld [vmem:[%s6723_s1 + $0x714] sm:$0xf]  ;;  %v3935_v8 = vld [vmem:[%s6723_s1 + $0x718] sm:$0xf0]  ;;  %v4247_v0 = vld [vmem:[%s6723_s1 + $0x604] sm:$0xf]  ;;  %v3874_v63 = vor.u32 %v4265_v33, %v3871_v45 }
  0xfb   : > { %2626 = vmatpush.bf16.msrb.mxu2 %v3970_v25  ;;  %v4297_v37 = vld [vmem:[%s6723_s1 + $0x794] sm:$0xf]  ;;  %v3999_v46 = vld [vmem:[%s6723_s1 + $0x798] sm:$0xf0]  ;;  %v3799_v30 = vld [vmem:[%s6723_s1 + $0x608] sm:$0xf0]  ;;  %v3938_v52 = vor.u32 %v4281_v50, %v3935_v8 }
  0xfc   : > { %2640 = vmatpush.bf16.msrb.mxu3 %v4034_v55  ;;  %v4263_v42 = vld [vmem:[%s6723_s1 + $0x684] sm:$0xf]  ;;  %v4002_v7 = vor.u32 %v4297_v37, %v3999_v46  ;;  %v3802_v60 = vor.u32 %v4247_v0, %v3799_v30  ;;  %v3863_v23 = vld [vmem:[%s6723_s1 + $0x688] sm:$0xf0] }
  0xfd   : > { %2599 = vmatpush.bf16.msrb.mxu0 %v3834_v58  ;;  %v4279_v54 = vld [vmem:[%s6723_s1 + $0x704] sm:$0xf]  ;;  %v3927_v47 = vld [vmem:[%s6723_s1 + $0x708] sm:$0xf0]  ;;  %v1312_v59 = vpop.f32.mrf.mxu0  ;;  %v1326_v20 = vpop.f32.mrf.mxu1  ;;  %v3866_v13 = vor.u32 %v4263_v42, %v3863_v23 }
  0xfe   : > { %2613 = vmatpush.bf16.msrb.mxu1 %v3898_v12  ;;  %v4295_v51 = vld [vmem:[%s6723_s1 + $0x784] sm:$0xf]  ;;  %v3991_v62 = vld [vmem:[%s6723_s1 + $0x788] sm:$0xf0]  ;;  %v1327_v25 = vadd.f32 %v1326_v20, %v1312_v59  ;;  %v3930_v29 = vor.u32 %v4279_v54, %v3927_v47 }
  0xff   : > { %2627 = vmatpush.bf16.msrb.mxu2 %v3962_v14  ;;  %v3994_v57 = vor.u32 %v4295_v51, %v3991_v62 }
 0x100   : > { %2641 = vmatpush.bf16.msrb.mxu3 %v4026_v53 }
 0x101   : > { %2600 = vmatpush.bf16.msrb.mxu0 %v3826_v5  ;;  %v1340_v48 = vpop.f32.mrf.mxu2 }
 0x102   : > { %2614 = vmatpush.bf16.msrb.mxu1 %v3890_v32  ;;  %v1354_v38 = vpop.f32.mrf.mxu3  ;;  %v1341_v55 = vadd.f32 %v1340_v48, %v1327_v25 }
 0x103   : > { %2628 = vmatpush.bf16.msrb.mxu2 %v3954_v61 }
 0x104   : > { %2642 = vmatpush.bf16.msrb.mxu3 %v4018_v17  ;;  %v1355_v58 = vadd.f32 %v1354_v38, %v1341_v55 }
 0x105   : > { %2601 = vmatpush.bf16.msrb.mxu0 %v3818_v9  ;;  %v1314_v12 = vpop.f32.mrf.mxu0  ;;  %v1328_v14 = vpop.f32.mrf.mxu1 }
 0x106   : > { %2615 = vmatpush.bf16.msrb.mxu1 %v3882_v43  ;;  %v1329_v28 = vadd.f32 %v1328_v14, %v1314_v12  ;;  %v1419_v24 = vadd.f32 %v1355_v58, %v6366_v34 }
 0x107   : > { %2629 = vmatpush.bf16.msrb.mxu2 %v3946_v49 }
 0x108   : > { %2643 = vmatpush.bf16.msrb.mxu3 %v4010_v36 }
 0x109   : > { %2602 = vmatpush.bf16.msrb.mxu0 %v3810_v4  ;;  %v1342_v53 = vpop.f32.mrf.mxu2 }
 0x10a   : > { %2616 = vmatpush.bf16.msrb.mxu1 %v3874_v63  ;;  %v1356_v5 = vpop.f32.mrf.mxu3  ;;  %v1343_v39 = vadd.f32 %v1342_v53, %v1329_v28 }
 0x10b   : > { %2630 = vmatpush.bf16.msrb.mxu2 %v3938_v52 }
 0x10c   : > { %2644 = vmatpush.bf16.msrb.mxu3 %v4002_v7  ;;  %v1357_v40 = vadd.f32 %v1356_v5, %v1343_v39 }
 0x10d   : > { %2603 = vmatpush.bf16.msrb.mxu0 %v3802_v60  ;;  %v1368_v56 = vpop.f32.mrf.mxu0 }
 0x10e   : > { %2617 = vmatpush.bf16.msrb.mxu1 %v3866_v13  ;;  %v1421_v15 = vadd.f32 %v1357_v40, %v6419_v1 }
 0x10f   : > { %2631 = vmatpush.bf16.msrb.mxu2 %v3930_v29 }
 0x110   : > { %2645 = vmatpush.bf16.msrb.mxu3 %v3994_v57  ;;  %2604 = vmatmul.bf16.vlgmr.msrb.gmra.mxu0 %v6595_v27  ;;  %v1382_v27 = vpop.f32.mrf.mxu1 }
 0x111   : > { %2618 = vmatmul.bf16.vlgmr.msrb.gmra.mxu1 %v6597_v22  ;;  %v1383_v57 = vadd.f32 %v1382_v27, %v1368_v56 }
 0x112   : > { %2632 = vmatmul.bf16.vlgmr.msrb.gmra.mxu2 %v6587_v19 }
 0x113   : > { %2646 = vmatmul.bf16.vlgmr.msrb.gmra.mxu3 %v6589_v35  ;;  %v1396_v2 = vpop.f32.mrf.mxu2 }
 0x114   : > { %v1397_v28 = vadd.f32 %v1396_v2, %v1383_v57 }
 0x115   : > { %v1370_v32 = vpop.f32.mrf.mxu0 }
 0x116   : > { %v1410_v31 = vpop.f32.mrf.mxu3 }
 0x118   : > { %v1384_v61 = vpop.f32.mrf.mxu1 }
 0x11b   : > { %v6697_v6 = vpop.f32.mrf.mxu2 }
 0x11e   : > { %v6699_v22 = vpop.f32.mrf.mxu3 }
 0x12b   : > { %v1893_v19 = vpop.f32.mrf.mxu0 }
 0x12d   : > { %v1907_v34 = vpop.f32.mrf.mxu1 }
 0x12e   : > { %v1908_v4 = vadd.f32 %v1907_v34, %v1893_v19  ;;  %v1411_v34 = vadd.f32 %v1410_v31, %v1397_v28 }
 0x130   : > { %v1420_v2 = vadd.f32 %v1411_v34, %v6522_v11 }
 0x133   : > { %v1921_v16 = vpop.f32.mrf.mxu2  ;;  %v1895_v17 = vpop.f32.mrf.mxu0 }
 0x134   : > { %v1922_v0 = vadd.f32 %v1921_v16, %v1908_v4  ;;  %v1385_v16 = vadd.f32 %v1384_v61, %v1370_v32 }
 0x135   : > { %v1909_v9 = vpop.f32.mrf.mxu1 }
 0x136   : > { %v1935_v35 = vpop.f32.mrf.mxu3  ;;  %v1910_v50 = vadd.f32 %v1909_v9, %v1895_v17 }
 0x137   : > { %v1936_v7 = vadd.f32 %v1935_v35, %v1922_v0 }
 0x139   : > { %v2000_v20 = vadd.f32 %v1936_v7, %v1419_v24 }
 0x13b   : > { %v1923_v44 = vpop.f32.mrf.mxu2 }
 0x13c   : > { %v1924_v30 = vadd.f32 %v1923_v44, %v1910_v50 }
 0x13e   : > { %v1937_v41 = vpop.f32.mrf.mxu3 }
 0x13f   : > { %v1938_v23 = vadd.f32 %v1937_v41, %v1924_v30 }
 0x141   : > { %v2002_v62 = vadd.f32 %v1938_v23, %v1421_v15 }
 0x14b   : > { %v1949_v3 = vpop.f32.mrf.mxu0 }
 0x14d   : > { %v1963_v1 = vpop.f32.mrf.mxu1 }
 0x14e   : > { %v1964_v58 = vadd.f32 %v1963_v1, %v1949_v3  ;;  %v1399_v1 = vadd.f32 %v6697_v6, %v1385_v16 }
 0x153   : > { %v1977_v21 = vpop.f32.mrf.mxu2  ;;  %v1951_v18 = vpop.f32.mrf.mxu0 }
 0x154   : > { %v1978_v19 = vadd.f32 %v1977_v21, %v1964_v58 }
 0x155   : > { %v1965_v43 = vpop.f32.mrf.mxu1 }
 0x156   : > { %v1991_v26 = vpop.f32.mrf.mxu3  ;;  %v1966_v9 = vadd.f32 %v1965_v43, %v1951_v18  ;;  %v1413_v43 = vadd.f32 %v6699_v22, %v1399_v1 }
 0x157   : > { %v1992_v17 = vadd.f32 %v1991_v26, %v1978_v19 }
 0x158   : > { %v1422_v0 = vadd.f32 %v1413_v43, %v6591_v10 }
 0x159   : > { %v2001_v4 = vadd.f32 %v1992_v17, %v1420_v2 }
 0x15b   : > { %v1979_v49 = vpop.f32.mrf.mxu2 }
 0x15c   : > { %v1980_v50 = vadd.f32 %v1979_v49, %v1966_v9 }
 0x15e   : > { %v6701_v33 = vpop.f32.mrf.mxu3 }
 0x15f   : > { %v1994_v11 = vadd.f32 %v6701_v33, %v1980_v50 }
 0x175   : > { %v2549_v45 = vpop.f32.mrf.mxu0 }
 0x176   : > { %v2563_v36 = vpop.f32.mrf.mxu1 }
 0x177   : > { %v2564_v8 = vadd.f32 %v2563_v36, %v2549_v45 }
 0x179   : > { %v2577_v37 = vpop.f32.mrf.mxu2 }
 0x17a   : > { %v2591_v46 = vpop.f32.mrf.mxu3  ;;  %v2578_v63 = vadd.f32 %v2577_v37, %v2564_v8 }
 0x17c   : > { %v2592_v54 = vadd.f32 %v2591_v46, %v2578_v63 }
 0x17d   : > { %v2551_v52 = vpop.f32.mrf.mxu0 }
 0x17e   : > { %v2565_v42 = vpop.f32.mrf.mxu1  ;;  %v2656_v25 = vadd.f32 %v2592_v54, %v2000_v20 }
 0x17f   : > { %v2566_v60 = vadd.f32 %v2565_v42, %v2551_v52  ;;  %v2003_v52 = vadd.f32 %v1994_v11, %v1422_v0 }
 0x180   : > { %v2688_v48 = vmul.f32 %v2656_v25, %v2656_v25 }
 0x181   : > { %v2579_v47 = vpop.f32.mrf.mxu2 }
 0x182   : > { %v2593_v59 = vpop.f32.mrf.mxu3  ;;  %v2580_v51 = vadd.f32 %v2579_v47, %v2566_v60 }
 0x184   : > { %v2594_v13 = vadd.f32 %v2593_v59, %v2580_v51 }
 0x186   : > { %v2658_v29 = vadd.f32 %v2594_v13, %v2002_v62 }
 0x188   : > { %v2672_v38 = vadd.f32 %v2658_v29, %v2656_v25  ;;  %v2690_v55 = vmul.f32 %v2658_v29, %v2658_v29 }
 0x18a   : > { %v2673_v12 = vrot.slane %v2672_v38, 4  ;;  %v2692_v14 = vadd.f32 %v2690_v55, %v2688_v48 }
 0x18c   : > { %v2674_v53 = vadd.f32 %v2673_v12, %v2672_v38  ;;  %v2693_v5 = vrot.slane %v2692_v14, 4 }
 0x18d   : > { %v2605_v39 = vpop.f32.mrf.mxu0 }
 0x18e   : > { %v2619_v40 = vpop.f32.mrf.mxu1  ;;  %v2675_v24 = vrot.slane %v2674_v53, 2  ;;  %v2694_v15 = vadd.f32 %v2693_v5, %v2692_v14 }
 0x18f   : > { %v2620_v35 = vadd.f32 %v2619_v40, %v2605_v39 }
 0x190   : > { %v2676_v56 = vadd.f32 %v2675_v24, %v2674_v53  ;;  %v2695_v27 = vrot.slane %v2694_v15, 2 }
 0x192   : > { %v2677_v44 = vrot.slane %v2676_v56, 1  ;;  %v2696_v41 = vadd.f32 %v2695_v27, %v2694_v15 }
 0x194   : > { %v2697_v36 = vrot.slane %v2696_v41, 1  ;;  %v2678_v32 = vadd.f32 %v2677_v44, %v2676_v56 }
 0x195   : > { %v2633_v3 = vpop.f32.mrf.mxu2  ;;  %v2607_v26 = vpop.f32.mrf.mxu0 }
 0x196   : > { %v2634_v45 = vadd.f32 %v2633_v3, %v2620_v35  ;;  %v2647_v21 = vpop.f32.mrf.mxu3  ;;  %v2698_v61 = vadd.f32 %v2697_v36, %v2696_v41  ;;  %v2621_v18 = vpop.f32.mrf.mxu1 }
 0x197   : > { %v2622_v49 = vadd.f32 %v2621_v18, %v2607_v26 }
 0x198   : > { %v2648_v31 = vadd.f32 %v2647_v21, %v2634_v45  ;;  %v2709_v37 = vsel %vm2708_vm13, %v2678_v32, %v2698_v61 }
 0x19a   : > { %v2657_v8 = vadd.f32 %v2648_v31, %v2001_v4 }
 0x19c   : > { %v2668_v6 = vpack.c.bf16 %v2657_v8, %v2656_v25  ;;  %v2689_v7 = vmul.f32 %v2657_v8, %v2657_v8 }
 0x19d   : > { %v2635_v46 = vpop.f32.mrf.mxu2 }
 0x19e   : > { %2670 = vst [vmem:[%s180_s6] sm:$0xff] %v2668_v6  ;;  %v2636_v30 = vadd.f32 %v2635_v46, %v2622_v49  ;;  %v2649_v63 = vpop.f32.mrf.mxu3 }
 0x1a0   : > { %v2650_v42 = vadd.f32 %v2649_v63, %v2636_v30 }
 0x1a2   : > { %v2659_v22 = vadd.f32 %v2650_v42, %v2003_v52 }
 0x1a4   : > { %v2669_v60 = vpack.c.bf16 %v2659_v22, %v2658_v29  ;;  %v2679_v23 = vadd.f32 %v2659_v22, %v2657_v8  ;;  %v2691_v54 = vmul.f32 %v2659_v22, %v2659_v22 }
 0x1a6   : > { %2671 = vst [vmem:[%s180_s6 + $0x8] sm:$0xff] %v2669_v60  ;;  %v2680_v47 = vrot.slane %v2679_v23, 4  ;;  %v2699_v59 = vadd.f32 %v2691_v54, %v2689_v7 }
 0x1a8   : > { %v2681_v33 = vadd.f32 %v2680_v47, %v2679_v23  ;;  %v2700_v20 = vrot.slane %v2699_v59, 4 }
 0x1aa   : > { %v2682_v51 = vrot.slane %v2681_v33, 2  ;;  %v2701_v62 = vadd.f32 %v2700_v20, %v2699_v59 }
 0x1ac   : > { %v2683_v25 = vadd.f32 %v2682_v51, %v2681_v33  ;;  %v2702_v10 = vrot.slane %v2701_v62, 2 }
 0x1ae   : > { %v2684_v13 = vrot.slane %v2683_v25, 1  ;;  %v2703_v57 = vadd.f32 %v2702_v10, %v2701_v62 }
 0x1b0   : > { %v2704_v48 = vrot.slane %v2703_v57, 1  ;;  %v2685_v38 = vadd.f32 %v2684_v13, %v2683_v25 }
 0x1b2   : > { %v2705_v55 = vadd.f32 %v2704_v48, %v2703_v57 }
 0x1b4   : > { %v2710_v58 = vsel %vm2708_vm13, %v2685_v38, %v2705_v55 }
 0x1b5   : > { %v2713_v29 = vrot.slane %v2710_v58, 6 }
 0x1b7   : > { %v2714_v12 = vsel %vm215_vm0, %v2709_v37, %v2713_v29 }
 0x1b8   : > { %2716 = vst [vmem:[%s186_s10] sm:$0xf] %v2714_v12 }
 0x1b9 PF: > { %s14_s12 = sadd.s32 1, %s4326_s12  }
 0x1ba   : > { %p11_p5 = scmp.ge.s32.totalorder %s14_s12, 4  }
 0x1bc   :  { %13 = sbr.rel (!%p11_p5) target bundleno = 1 (0x1), region = 86 }

</bundles_post_ra>
